<compile_context>
chip_gen: v7x
topology: tpu7x:2x2x1
jax: 0.10.0
libtpu: 0.0.40
codegen_flags: <defaults>
</compile_context>

<pallas_src>
import jax
import jax.numpy as jnp
import numpy as np
from jax.experimental import pallas as pl
from jax.experimental.pallas import tpu as pltpu


FILTER = 256
NUM_X_FREQ = 6
NUM_D_FREQ = 3
DX = 6 * NUM_X_FREQ + 3   # 39
DD = 6 * NUM_D_FREQ + 3   # 21
PAD_K = 128               # lane-aligned K for the x / d matmuls
W10S_N = 384              # 256 (layer10) + 1 (sigma head) padded to lane multiple


def _relu(v):
    return jnp.maximum(v, 0.0)


def nerf_kernel(
    x_ref, d_ref,
    wx, b1, w2, b2, w3, b3, w4, b4, w5, b5,
    w6a, b6, w7, b7, w8, b8,
    w10s, b10s, w11a, w11b, b11, w12, b12,
    out_ref,
):
    F = FILTER
    xb = x_ref[...]                       # (tm, 128) bf16, zero-padded cols
    db = d_ref[...]                       # (tm, 128) bf16, zero-padded cols

    def mm(h, w_ref):
        return jnp.dot(h, w_ref[...], preferred_element_type=jnp.float32)

    def lin_relu(h, w_ref, b_ref):
        return _relu(mm(h, w_ref) + b_ref[...]).astype(jnp.bfloat16)

    # Fused layer-1 / layer-6 skip: wx = [w1 | w6b] (K zero-padded to 128).
    y = mm(xb, wx)                        # (tm, 512) f32
    h = _relu(y[:, :F] + b1[...]).astype(jnp.bfloat16)
    skip6 = y[:, F:2 * F]                 # x @ w6b contribution, kept f32

    h = lin_relu(h, w2, b2)
    h = lin_relu(h, w3, b3)
    h = lin_relu(h, w4, b4)
    h = lin_relu(h, w5, b5)
    # linear6(cat([h, x], dim=1)) == h @ w6a + x @ w6b + b6
    h = _relu(mm(h, w6a) + skip6 + b6[...]).astype(jnp.bfloat16)
    h = lin_relu(h, w7, b7)
    h = lin_relu(h, w8, b8)

    # Fused layer-10 + sigma head: w10s = [w10 | w9 | 0-pad] (256, 384).
    y = mm(h, w10s) + b10s[...]           # (tm, 384) f32
    sigma = y[:, F:F + 1]                 # linear9(h8)  (no activation)
    h = y[:, :F].astype(jnp.bfloat16)     # linear10(h8) (no activation, matches reference)

    # linear11(cat([h, d], dim=1)) == h @ w11a + d @ w11b + b11
    h = _relu(mm(h, w11a) + mm(db, w11b) + b11[...]).astype(jnp.bfloat16)
    rgb = jax.nn.sigmoid(mm(h, w12) + b12[...])

    # One lane-packed output tile: cols 0..2 = rgb, col 3 = sigma.
    out_ref[:, 0:3] = rgb.astype(out_ref.dtype)
    out_ref[:, 3:4] = sigma.astype(out_ref.dtype)


def make_params(key, filter_size=FILTER):
    """nn.Linear-style init (uniform(-1/sqrt(fan_in), 1/sqrt(fan_in))).

    Weights stored transposed vs PyTorch: (in_features, out_features).
    Biases stored as (1, out_features).  Layers 6 / 11 use the fan_in of the
    full concatenated input, as PyTorch would.
    """
    F = filter_size
    specs = [
        # (w_name, b_name_or_None, rows, cols, pytorch_fan_in)
        ("w1", "b1", DX, F, DX),
        ("w2", "b2", F, F, F),
        ("w3", "b3", F, F, F),
        ("w4", "b4", F, F, F),
        ("w5", "b5", F, F, F),
        ("w6a", "b6", F, F, F + DX),
        ("w6b", None, DX, F, F + DX),
        ("w7", "b7", F, F, F),
        ("w8", "b8", F, F, F),
        ("w9", "b9", F, 1, F),
        ("w10", "b10", F, F, F),
        ("w11a", "b11", F, 128, F + DD),
        ("w11b", None, DD, 128, F + DD),
        ("w12", "b12", 128, 3, 128),
    ]
    params = {}
    keys = jax.random.split(key, 2 * len(specs))
    for i, (wn, bn, rows, cols, fan_in) in enumerate(specs):
        bound = 1.0 / np.sqrt(fan_in)
        params[wn] = jax.random.uniform(
            keys[2 * i], (rows, cols), jnp.float32, -bound, bound)
        if bn is not None:
            params[bn] = jax.random.uniform(
                keys[2 * i + 1], (1, cols), jnp.float32, -bound, bound)
    return params


def prepare_weights(p):
    """Host-side fusion / zero-padding / bf16 casting of the parameter dict."""
    bf16 = jnp.bfloat16

    def pad_rows(w, rows):
        return jnp.pad(w, ((0, rows - w.shape[0]), (0, 0)))

    # [w1 | w6b], K zero-padded 39 -> 128 so the x matmul is lane-dense.
    wx = jnp.concatenate(
        [pad_rows(p["w1"], PAD_K), pad_rows(p["w6b"], PAD_K)], axis=1
    ).astype(bf16)                                             # (128, 512)

    # [w10 | w9] padded to 384 columns: layer-10 + sigma head in one MXU pass.
    w10s = jnp.concatenate([p["w10"], p["w9"]], axis=1)        # (256, 257)
    w10s = jnp.pad(w10s, ((0, 0), (0, W10S_N - w10s.shape[1]))).astype(bf16)
    b10s = jnp.concatenate([p["b10"], p["b9"]], axis=1)
    b10s = jnp.pad(b10s, ((0, 0), (0, W10S_N - b10s.shape[1]))).astype(jnp.float32)

    w11b = pad_rows(p["w11b"], PAD_K).astype(bf16)             # (128, 128)

    f32 = lambda a: a.astype(jnp.float32)
    return [
        wx, f32(p["b1"]),
        p["w2"].astype(bf16), f32(p["b2"]),
        p["w3"].astype(bf16), f32(p["b3"]),
        p["w4"].astype(bf16), f32(p["b4"]),
        p["w5"].astype(bf16), f32(p["b5"]),
        p["w6a"].astype(bf16), f32(p["b6"]),
        p["w7"].astype(bf16), f32(p["b7"]),
        p["w8"].astype(bf16), f32(p["b8"]),
        w10s, b10s,
        p["w11a"].astype(bf16), w11b, f32(p["b11"]),
        p["w12"].astype(bf16), f32(p["b12"]),
    ]


def nerf_forward(x, d, params, *, tile_m=512):
    N = x.shape[0]
    pad_n = (-N) % tile_m
    n_pad = N + pad_n

    # Lane-dense bf16 inputs; zero padding is exact (padded weight rows are 0).
    x_p = jnp.pad(x, ((0, pad_n), (0, PAD_K - x.shape[1]))).astype(jnp.bfloat16)
    d_p = jnp.pad(d, ((0, pad_n), (0, PAD_K - d.shape[1]))).astype(jnp.bfloat16)

    ordered = prepare_weights(params)

    row_spec = pl.BlockSpec((tile_m, PAD_K), lambda i: (i, 0))
    full_spec = lambda arr: pl.BlockSpec(arr.shape, lambda i: (0, 0))

    in_specs = [row_spec, row_spec] + [full_spec(a) for a in ordered]
    out_specs = pl.BlockSpec((tile_m, 4), lambda i: (i, 0))

    out = pl.pallas_call(
        nerf_kernel,
        out_shape=jax.ShapeDtypeStruct((n_pad, 4), jnp.float32),
        grid_spec=pltpu.PrefetchScalarGridSpec(
            num_scalar_prefetch=0,
            grid=(n_pad // tile_m,),
            in_specs=in_specs,
            out_specs=out_specs,
        ),
        compiler_params=pltpu.CompilerParams(
            dimension_semantics=("parallel",)),
    )(x_p, d_p, *ordered)

    rgb = out[:N, 0:3]
    sigma = out[:N, 3:4]
    return rgb, sigma


def nerf_forward_ref(x, d, p):
    """Pure-JAX reference of the PyTorch forward with matched matmul precision
    (bf16 operands, f32 accumulation) for tolerance checking."""
    bf16 = jnp.bfloat16

    def mm(a, w):
        return jnp.dot(a.astype(bf16), w.astype(bf16),
                       preferred_element_type=jnp.float32)

    relu = jax.nn.relu
    h = relu(mm(x, p["w1"]) + p["b1"]).astype(bf16)
    h = relu(mm(h, p["w2"]) + p["b2"]).astype(bf16)
    h = relu(mm(h, p["w3"]) + p["b3"]).astype(bf16)
    h = relu(mm(h, p["w4"]) + p["b4"]).astype(bf16)
    h = relu(mm(h, p["w5"]) + p["b5"]).astype(bf16)
    h = relu(mm(h, p["w6a"]) + mm(x, p["w6b"]) + p["b6"]).astype(bf16)
    h = relu(mm(h, p["w7"]) + p["b7"]).astype(bf16)
    h = relu(mm(h, p["w8"]) + p["b8"]).astype(bf16)
    sigma = mm(h, p["w9"]) + p["b9"]
    h = (mm(h, p["w10"]) + p["b10"]).astype(bf16)      # no activation
    h = relu(mm(h, p["w11a"]) + mm(d, p["w11b"]) + p["b11"]).astype(bf16)
    rgb = jax.nn.sigmoid(mm(h, p["w12"]) + p["b12"])
    return rgb, sigma


if __name__ == "__main__":
    key = jax.random.PRNGKey(0)
    kp, kx, kd = jax.random.split(key, 3)

    N = 1024   # sample points; grid = N // tile_m = 2 (even -> both v7x TCs busy)
    params = make_params(kp)
    x = jax.random.normal(kx, (N, DX), jnp.float32)
    d = jax.random.normal(kd, (N, DD), jnp.float32)

    rgb, sigma = nerf_forward(x, d, params, tile_m=512)
    rgb = jax.block_until_ready(rgb)
    sigma = jax.block_until_ready(sigma)

    rgb_ref, sigma_ref = nerf_forward_ref(x, d, params)
    np.testing.assert_allclose(np.asarray(rgb), np.asarray(rgb_ref),
                               rtol=2e-2, atol=2e-2)
    np.testing.assert_allclose(np.asarray(sigma), np.asarray(sigma_ref),
                               rtol=2e-2, atol=2e-2)

    print("KERNEL_OK")
</pallas_src>

<mosaic_0001>
module attributes {stable_mosaic.version = 11 : i64} {
  func.func @nerf_kernel(%arg0: i32, %arg1: memref<512x128xbf16, #tpu.memory_space<vmem>>, %arg2: memref<512x128xbf16, #tpu.memory_space<vmem>>, %arg3: memref<128x512xbf16, #tpu.memory_space<vmem>>, %arg4: memref<1x256xf32, #tpu.memory_space<vmem>>, %arg5: memref<256x256xbf16, #tpu.memory_space<vmem>>, %arg6: memref<1x256xf32, #tpu.memory_space<vmem>>, %arg7: memref<256x256xbf16, #tpu.memory_space<vmem>>, %arg8: memref<1x256xf32, #tpu.memory_space<vmem>>, %arg9: memref<256x256xbf16, #tpu.memory_space<vmem>>, %arg10: memref<1x256xf32, #tpu.memory_space<vmem>>, %arg11: memref<256x256xbf16, #tpu.memory_space<vmem>>, %arg12: memref<1x256xf32, #tpu.memory_space<vmem>>, %arg13: memref<256x256xbf16, #tpu.memory_space<vmem>>, %arg14: memref<1x256xf32, #tpu.memory_space<vmem>>, %arg15: memref<256x256xbf16, #tpu.memory_space<vmem>>, %arg16: memref<1x256xf32, #tpu.memory_space<vmem>>, %arg17: memref<256x256xbf16, #tpu.memory_space<vmem>>, %arg18: memref<1x256xf32, #tpu.memory_space<vmem>>, %arg19: memref<256x384xbf16, #tpu.memory_space<vmem>>, %arg20: memref<1x384xf32, #tpu.memory_space<vmem>>, %arg21: memref<256x128xbf16, #tpu.memory_space<vmem>>, %arg22: memref<128x128xbf16, #tpu.memory_space<vmem>>, %arg23: memref<1x128xf32, #tpu.memory_space<vmem>>, %arg24: memref<128x3xbf16, #tpu.memory_space<vmem>>, %arg25: memref<1x3xf32, #tpu.memory_space<vmem>>, %arg26: memref<512x4xf32, #tpu.memory_space<vmem>>) attributes {dimension_semantics = [#tpu.dimension_semantics<parallel>], iteration_bounds = array<i64: 2>, scalar_prefetch = 0 : i64, scratch_operands = 0 : i64, tpu.core_type = #tpu.core_type<tc>, window_params = [{transform_indices = @transform_0, window_bounds = array<i64: 512, 128>}, {transform_indices = @transform_1, window_bounds = array<i64: 512, 128>}, {pipeline_mode = #tpu.pipeline_mode<synchronous>, transform_indices = @transform_2, window_bounds = array<i64: 128, 512>}, {pipeline_mode = #tpu.pipeline_mode<synchronous>, transform_indices = @transform_3, window_bounds = array<i64: 1, 256>}, {pipeline_mode = #tpu.pipeline_mode<synchronous>, transform_indices = @transform_4, window_bounds = array<i64: 256, 256>}, {pipeline_mode = #tpu.pipeline_mode<synchronous>, transform_indices = @transform_5, window_bounds = array<i64: 1, 256>}, {pipeline_mode = #tpu.pipeline_mode<synchronous>, transform_indices = @transform_6, window_bounds = array<i64: 256, 256>}, {pipeline_mode = #tpu.pipeline_mode<synchronous>, transform_indices = @transform_7, window_bounds = array<i64: 1, 256>}, {pipeline_mode = #tpu.pipeline_mode<synchronous>, transform_indices = @transform_8, window_bounds = array<i64: 256, 256>}, {pipeline_mode = #tpu.pipeline_mode<synchronous>, transform_indices = @transform_9, window_bounds = array<i64: 1, 256>}, {pipeline_mode = #tpu.pipeline_mode<synchronous>, transform_indices = @transform_10, window_bounds = array<i64: 256, 256>}, {pipeline_mode = #tpu.pipeline_mode<synchronous>, transform_indices = @transform_11, window_bounds = array<i64: 1, 256>}, {pipeline_mode = #tpu.pipeline_mode<synchronous>, transform_indices = @transform_12, window_bounds = array<i64: 256, 256>}, {pipeline_mode = #tpu.pipeline_mode<synchronous>, transform_indices = @transform_13, window_bounds = array<i64: 1, 256>}, {pipeline_mode = #tpu.pipeline_mode<synchronous>, transform_indices = @transform_14, window_bounds = array<i64: 256, 256>}, {pipeline_mode = #tpu.pipeline_mode<synchronous>, transform_indices = @transform_15, window_bounds = array<i64: 1, 256>}, {pipeline_mode = #tpu.pipeline_mode<synchronous>, transform_indices = @transform_16, window_bounds = array<i64: 256, 256>}, {pipeline_mode = #tpu.pipeline_mode<synchronous>, transform_indices = @transform_17, window_bounds = array<i64: 1, 256>}, {pipeline_mode = #tpu.pipeline_mode<synchronous>, transform_indices = @transform_18, window_bounds = array<i64: 256, 384>}, {pipeline_mode = #tpu.pipeline_mode<synchronous>, transform_indices = @transform_19, window_bounds = array<i64: 1, 384>}, {pipeline_mode = #tpu.pipeline_mode<synchronous>, transform_indices = @transform_20, window_bounds = array<i64: 256, 128>}, {pipeline_mode = #tpu.pipeline_mode<synchronous>, transform_indices = @transform_21, window_bounds = array<i64: 128, 128>}, {pipeline_mode = #tpu.pipeline_mode<synchronous>, transform_indices = @transform_22, window_bounds = array<i64: 1, 128>}, {pipeline_mode = #tpu.pipeline_mode<synchronous>, transform_indices = @transform_23, window_bounds = array<i64: 128, 3>}, {pipeline_mode = #tpu.pipeline_mode<synchronous>, transform_indices = @transform_24, window_bounds = array<i64: 1, 3>}, {transform_indices = @transform_25, window_bounds = array<i64: 512, 4>}]} {
    %c0 = arith.constant 0 : index
    %c0_0 = arith.constant 0 : index
    %0 = vector.load %arg1[%c0, %c0_0] : memref<512x128xbf16, #tpu.memory_space<vmem>>, vector<512x128xbf16>
    %c0_1 = arith.constant 0 : index
    %c0_2 = arith.constant 0 : index
    %1 = vector.load %arg2[%c0_1, %c0_2] : memref<512x128xbf16, #tpu.memory_space<vmem>>, vector<512x128xbf16>
    %c0_3 = arith.constant 0 : index
    %c0_4 = arith.constant 0 : index
    %2 = vector.load %arg3[%c0_3, %c0_4] : memref<128x512xbf16, #tpu.memory_space<vmem>>, vector<128x512xbf16>
    %cst = arith.constant dense<0.000000e+00> : vector<512x512xf32>
    %3 = tpu.matmul %0, %2, %cst {dimension_numbers = #tpu.dot_dimension_numbers<[1], [0], [0], [1], [0, 0, 1, 1], [], []>} : vector<512x128xbf16>, vector<128x512xbf16>, vector<512x512xf32> -> vector<512x512xf32>
    %4 = vector.extract_strided_slice %3 {offsets = [0, 0], sizes = [512, 256], strides = [1, 1]} : vector<512x512xf32> to vector<512x256xf32>
    %c0_5 = arith.constant 0 : index
    %c0_6 = arith.constant 0 : index
    %5 = vector.load %arg4[%c0_5, %c0_6] : memref<1x256xf32, #tpu.memory_space<vmem>>, vector<1x256xf32>
    %6 = vector.broadcast %5 : vector<1x256xf32> to vector<512x256xf32>
    %7 = arith.addf %4, %6 : vector<512x256xf32>
    %cst_7 = arith.constant 0.000000e+00 : f32
    %8 = vector.broadcast %cst_7 : f32 to vector<512x256xf32>
    %9 = arith.maximumf %7, %8 : vector<512x256xf32>
    %10 = arith.truncf %9 : vector<512x256xf32> to vector<512x256xbf16>
    %11 = vector.extract_strided_slice %3 {offsets = [0, 256], sizes = [512, 256], strides = [1, 1]} : vector<512x512xf32> to vector<512x256xf32>
    %c0_8 = arith.constant 0 : index
    %c0_9 = arith.constant 0 : index
    %12 = vector.load %arg5[%c0_8, %c0_9] : memref<256x256xbf16, #tpu.memory_space<vmem>>, vector<256x256xbf16>
    %cst_10 = arith.constant dense<0.000000e+00> : vector<512x256xf32>
    %13 = tpu.matmul %10, %12, %cst_10 {dimension_numbers = #tpu.dot_dimension_numbers<[1], [0], [0], [1], [0, 0, 1, 1], [], []>} : vector<512x256xbf16>, vector<256x256xbf16>, vector<512x256xf32> -> vector<512x256xf32>
    %c0_11 = arith.constant 0 : index
    %c0_12 = arith.constant 0 : index
    %14 = vector.load %arg6[%c0_11, %c0_12] : memref<1x256xf32, #tpu.memory_space<vmem>>, vector<1x256xf32>
    %15 = vector.broadcast %14 : vector<1x256xf32> to vector<512x256xf32>
    %16 = arith.addf %13, %15 : vector<512x256xf32>
    %cst_13 = arith.constant 0.000000e+00 : f32
    %17 = vector.broadcast %cst_13 : f32 to vector<512x256xf32>
    %18 = arith.maximumf %16, %17 : vector<512x256xf32>
    %19 = arith.truncf %18 : vector<512x256xf32> to vector<512x256xbf16>
    %c0_14 = arith.constant 0 : index
    %c0_15 = arith.constant 0 : index
    %20 = vector.load %arg7[%c0_14, %c0_15] : memref<256x256xbf16, #tpu.memory_space<vmem>>, vector<256x256xbf16>
    %cst_16 = arith.constant dense<0.000000e+00> : vector<512x256xf32>
    %21 = tpu.matmul %19, %20, %cst_16 {dimension_numbers = #tpu.dot_dimension_numbers<[1], [0], [0], [1], [0, 0, 1, 1], [], []>} : vector<512x256xbf16>, vector<256x256xbf16>, vector<512x256xf32> -> vector<512x256xf32>
    %c0_17 = arith.constant 0 : index
    %c0_18 = arith.constant 0 : index
    %22 = vector.load %arg8[%c0_17, %c0_18] : memref<1x256xf32, #tpu.memory_space<vmem>>, vector<1x256xf32>
    %23 = vector.broadcast %22 : vector<1x256xf32> to vector<512x256xf32>
    %24 = arith.addf %21, %23 : vector<512x256xf32>
    %cst_19 = arith.constant 0.000000e+00 : f32
    %25 = vector.broadcast %cst_19 : f32 to vector<512x256xf32>
    %26 = arith.maximumf %24, %25 : vector<512x256xf32>
    %27 = arith.truncf %26 : vector<512x256xf32> to vector<512x256xbf16>
    %c0_20 = arith.constant 0 : index
    %c0_21 = arith.constant 0 : index
    %28 = vector.load %arg9[%c0_20, %c0_21] : memref<256x256xbf16, #tpu.memory_space<vmem>>, vector<256x256xbf16>
    %cst_22 = arith.constant dense<0.000000e+00> : vector<512x256xf32>
    %29 = tpu.matmul %27, %28, %cst_22 {dimension_numbers = #tpu.dot_dimension_numbers<[1], [0], [0], [1], [0, 0, 1, 1], [], []>} : vector<512x256xbf16>, vector<256x256xbf16>, vector<512x256xf32> -> vector<512x256xf32>
    %c0_23 = arith.constant 0 : index
    %c0_24 = arith.constant 0 : index
    %30 = vector.load %arg10[%c0_23, %c0_24] : memref<1x256xf32, #tpu.memory_space<vmem>>, vector<1x256xf32>
    %31 = vector.broadcast %30 : vector<1x256xf32> to vector<512x256xf32>
    %32 = arith.addf %29, %31 : vector<512x256xf32>
    %cst_25 = arith.constant 0.000000e+00 : f32
    %33 = vector.broadcast %cst_25 : f32 to vector<512x256xf32>
    %34 = arith.maximumf %32, %33 : vector<512x256xf32>
    %35 = arith.truncf %34 : vector<512x256xf32> to vector<512x256xbf16>
    %c0_26 = arith.constant 0 : index
    %c0_27 = arith.constant 0 : index
    %36 = vector.load %arg11[%c0_26, %c0_27] : memref<256x256xbf16, #tpu.memory_space<vmem>>, vector<256x256xbf16>
    %cst_28 = arith.constant dense<0.000000e+00> : vector<512x256xf32>
    %37 = tpu.matmul %35, %36, %cst_28 {dimension_numbers = #tpu.dot_dimension_numbers<[1], [0], [0], [1], [0, 0, 1, 1], [], []>} : vector<512x256xbf16>, vector<256x256xbf16>, vector<512x256xf32> -> vector<512x256xf32>
    %c0_29 = arith.constant 0 : index
    %c0_30 = arith.constant 0 : index
    %38 = vector.load %arg12[%c0_29, %c0_30] : memref<1x256xf32, #tpu.memory_space<vmem>>, vector<1x256xf32>
    %39 = vector.broadcast %38 : vector<1x256xf32> to vector<512x256xf32>
    %40 = arith.addf %37, %39 : vector<512x256xf32>
    %cst_31 = arith.constant 0.000000e+00 : f32
    %41 = vector.broadcast %cst_31 : f32 to vector<512x256xf32>
    %42 = arith.maximumf %40, %41 : vector<512x256xf32>
    %43 = arith.truncf %42 : vector<512x256xf32> to vector<512x256xbf16>
    %c0_32 = arith.constant 0 : index
    %c0_33 = arith.constant 0 : index
    %44 = vector.load %arg13[%c0_32, %c0_33] : memref<256x256xbf16, #tpu.memory_space<vmem>>, vector<256x256xbf16>
    %cst_34 = arith.constant dense<0.000000e+00> : vector<512x256xf32>
    %45 = tpu.matmul %43, %44, %cst_34 {dimension_numbers = #tpu.dot_dimension_numbers<[1], [0], [0], [1], [0, 0, 1, 1], [], []>} : vector<512x256xbf16>, vector<256x256xbf16>, vector<512x256xf32> -> vector<512x256xf32>
    %46 = arith.addf %45, %11 : vector<512x256xf32>
    %c0_35 = arith.constant 0 : index
    %c0_36 = arith.constant 0 : index
    %47 = vector.load %arg14[%c0_35, %c0_36] : memref<1x256xf32, #tpu.memory_space<vmem>>, vector<1x256xf32>
    %48 = vector.broadcast %47 : vector<1x256xf32> to vector<512x256xf32>
    %49 = arith.addf %46, %48 : vector<512x256xf32>
    %cst_37 = arith.constant 0.000000e+00 : f32
    %50 = vector.broadcast %cst_37 : f32 to vector<512x256xf32>
    %51 = arith.maximumf %49, %50 : vector<512x256xf32>
    %52 = arith.truncf %51 : vector<512x256xf32> to vector<512x256xbf16>
    %c0_38 = arith.constant 0 : index
    %c0_39 = arith.constant 0 : index
    %53 = vector.load %arg15[%c0_38, %c0_39] : memref<256x256xbf16, #tpu.memory_space<vmem>>, vector<256x256xbf16>
    %cst_40 = arith.constant dense<0.000000e+00> : vector<512x256xf32>
    %54 = tpu.matmul %52, %53, %cst_40 {dimension_numbers = #tpu.dot_dimension_numbers<[1], [0], [0], [1], [0, 0, 1, 1], [], []>} : vector<512x256xbf16>, vector<256x256xbf16>, vector<512x256xf32> -> vector<512x256xf32>
    %c0_41 = arith.constant 0 : index
    %c0_42 = arith.constant 0 : index
    %55 = vector.load %arg16[%c0_41, %c0_42] : memref<1x256xf32, #tpu.memory_space<vmem>>, vector<1x256xf32>
    %56 = vector.broadcast %55 : vector<1x256xf32> to vector<512x256xf32>
    %57 = arith.addf %54, %56 : vector<512x256xf32>
    %cst_43 = arith.constant 0.000000e+00 : f32
    %58 = vector.broadcast %cst_43 : f32 to vector<512x256xf32>
    %59 = arith.maximumf %57, %58 : vector<512x256xf32>
    %60 = arith.truncf %59 : vector<512x256xf32> to vector<512x256xbf16>
    %c0_44 = arith.constant 0 : index
    %c0_45 = arith.constant 0 : index
    %61 = vector.load %arg17[%c0_44, %c0_45] : memref<256x256xbf16, #tpu.memory_space<vmem>>, vector<256x256xbf16>
    %cst_46 = arith.constant dense<0.000000e+00> : vector<512x256xf32>
    %62 = tpu.matmul %60, %61, %cst_46 {dimension_numbers = #tpu.dot_dimension_numbers<[1], [0], [0], [1], [0, 0, 1, 1], [], []>} : vector<512x256xbf16>, vector<256x256xbf16>, vector<512x256xf32> -> vector<512x256xf32>
    %c0_47 = arith.constant 0 : index
    %c0_48 = arith.constant 0 : index
    %63 = vector.load %arg18[%c0_47, %c0_48] : memref<1x256xf32, #tpu.memory_space<vmem>>, vector<1x256xf32>
    %64 = vector.broadcast %63 : vector<1x256xf32> to vector<512x256xf32>
    %65 = arith.addf %62, %64 : vector<512x256xf32>
    %cst_49 = arith.constant 0.000000e+00 : f32
    %66 = vector.broadcast %cst_49 : f32 to vector<512x256xf32>
    %67 = arith.maximumf %65, %66 : vector<512x256xf32>
    %68 = arith.truncf %67 : vector<512x256xf32> to vector<512x256xbf16>
    %c0_50 = arith.constant 0 : index
    %c0_51 = arith.constant 0 : index
    %69 = vector.load %arg19[%c0_50, %c0_51] : memref<256x384xbf16, #tpu.memory_space<vmem>>, vector<256x384xbf16>
    %cst_52 = arith.constant dense<0.000000e+00> : vector<512x384xf32>
    %70 = tpu.matmul %68, %69, %cst_52 {dimension_numbers = #tpu.dot_dimension_numbers<[1], [0], [0], [1], [0, 0, 1, 1], [], []>} : vector<512x256xbf16>, vector<256x384xbf16>, vector<512x384xf32> -> vector<512x384xf32>
    %c0_53 = arith.constant 0 : index
    %c0_54 = arith.constant 0 : index
    %71 = vector.load %arg20[%c0_53, %c0_54] : memref<1x384xf32, #tpu.memory_space<vmem>>, vector<1x384xf32>
    %72 = vector.broadcast %71 : vector<1x384xf32> to vector<512x384xf32>
    %73 = arith.addf %70, %72 : vector<512x384xf32>
    %74 = vector.extract_strided_slice %73 {offsets = [0, 256], sizes = [512, 1], strides = [1, 1]} : vector<512x384xf32> to vector<512x1xf32>
    %75 = vector.extract_strided_slice %73 {offsets = [0, 0], sizes = [512, 256], strides = [1, 1]} : vector<512x384xf32> to vector<512x256xf32>
    %76 = arith.truncf %75 : vector<512x256xf32> to vector<512x256xbf16>
    %c0_55 = arith.constant 0 : index
    %c0_56 = arith.constant 0 : index
    %77 = vector.load %arg21[%c0_55, %c0_56] : memref<256x128xbf16, #tpu.memory_space<vmem>>, vector<256x128xbf16>
    %cst_57 = arith.constant dense<0.000000e+00> : vector<512x128xf32>
    %78 = tpu.matmul %76, %77, %cst_57 {dimension_numbers = #tpu.dot_dimension_numbers<[1], [0], [0], [1], [0, 0, 1, 1], [], []>} : vector<512x256xbf16>, vector<256x128xbf16>, vector<512x128xf32> -> vector<512x128xf32>
    %c0_58 = arith.constant 0 : index
    %c0_59 = arith.constant 0 : index
    %79 = vector.load %arg22[%c0_58, %c0_59] : memref<128x128xbf16, #tpu.memory_space<vmem>>, vector<128x128xbf16>
    %cst_60 = arith.constant dense<0.000000e+00> : vector<512x128xf32>
    %80 = tpu.matmul %1, %79, %cst_60 {dimension_numbers = #tpu.dot_dimension_numbers<[1], [0], [0], [1], [0, 0, 1, 1], [], []>} : vector<512x128xbf16>, vector<128x128xbf16>, vector<512x128xf32> -> vector<512x128xf32>
    %81 = arith.addf %78, %80 : vector<512x128xf32>
    %c0_61 = arith.constant 0 : index
    %c0_62 = arith.constant 0 : index
    %82 = vector.load %arg23[%c0_61, %c0_62] : memref<1x128xf32, #tpu.memory_space<vmem>>, vector<1x128xf32>
    %83 = vector.broadcast %82 : vector<1x128xf32> to vector<512x128xf32>
    %84 = arith.addf %81, %83 : vector<512x128xf32>
    %cst_63 = arith.constant 0.000000e+00 : f32
    %85 = vector.broadcast %cst_63 : f32 to vector<512x128xf32>
    %86 = arith.maximumf %84, %85 : vector<512x128xf32>
    %87 = arith.truncf %86 : vector<512x128xf32> to vector<512x128xbf16>
    %c0_64 = arith.constant 0 : index
    %c0_65 = arith.constant 0 : index
    %88 = vector.load %arg24[%c0_64, %c0_65] : memref<128x3xbf16, #tpu.memory_space<vmem>>, vector<128x3xbf16>
    %cst_66 = arith.constant dense<0.000000e+00> : vector<512x3xf32>
    %89 = tpu.matmul %87, %88, %cst_66 {dimension_numbers = #tpu.dot_dimension_numbers<[1], [0], [0], [1], [0, 0, 1, 1], [], []>} : vector<512x128xbf16>, vector<128x3xbf16>, vector<512x3xf32> -> vector<512x3xf32>
    %c0_67 = arith.constant 0 : index
    %c0_68 = arith.constant 0 : index
    %90 = vector.load %arg25[%c0_67, %c0_68] : memref<1x3xf32, #tpu.memory_space<vmem>>, vector<1x3xf32>
    %91 = vector.broadcast %90 : vector<1x3xf32> to vector<512x3xf32>
    %92 = arith.addf %89, %91 : vector<512x3xf32>
    %93 = arith.negf %92 : vector<512x3xf32>
    %94 = math.exp %93 : vector<512x3xf32>
    %cst_69 = arith.constant 1.000000e+00 : f32
    %95 = vector.broadcast %cst_69 : f32 to vector<512x3xf32>
    %96 = arith.addf %95, %94 : vector<512x3xf32>
    %97 = arith.divf %95, %96 : vector<512x3xf32>
    %c0_70 = arith.constant 0 : index
    %c0_71 = arith.constant 0 : index
    %98 = vector.load %arg26[%c0_70, %c0_71] : memref<512x4xf32, #tpu.memory_space<vmem>>, vector<512x3xf32>
    tpu.vector_store %arg26[%c0_70, %c0_71], %97 {strides = array<i32>} : memref<512x4xf32, #tpu.memory_space<vmem>>, vector<512x3xf32>,
    %c0_72 = arith.constant 0 : index
    %c3 = arith.constant 3 : index
    %99 = vector.load %arg26[%c0_72, %c3] : memref<512x4xf32, #tpu.memory_space<vmem>>, vector<512x1xf32>
    tpu.vector_store %arg26[%c0_72, %c3], %74 {strides = array<i32>} : memref<512x4xf32, #tpu.memory_space<vmem>>, vector<512x1xf32>,
    return
  }
  func.func @transform_0(%arg0: i32) -> (i32, i32) {
    %c0_i32 = arith.constant 0 : i32
    %c0_i32_0 = arith.constant 0 : i32
    return %arg0, %c0_i32 : i32, i32
  }
  func.func @transform_1(%arg0: i32) -> (i32, i32) {
    %c0_i32 = arith.constant 0 : i32
    %c0_i32_0 = arith.constant 0 : i32
    return %arg0, %c0_i32 : i32, i32
  }
  func.func @transform_2(%arg0: i32) -> (i32, i32) {
    %c0_i32 = arith.constant 0 : i32
    %c0_i32_0 = arith.constant 0 : i32
    %c0_i32_1 = arith.constant 0 : i32
    return %c0_i32, %c0_i32_0 : i32, i32
  }
  func.func @transform_3(%arg0: i32) -> (i32, i32) {
    %c0_i32 = arith.constant 0 : i32
    %c0_i32_0 = arith.constant 0 : i32
    %c0_i32_1 = arith.constant 0 : i32
    return %c0_i32, %c0_i32_0 : i32, i32
  }
  func.func @transform_4(%arg0: i32) -> (i32, i32) {
    %c0_i32 = arith.constant 0 : i32
    %c0_i32_0 = arith.constant 0 : i32
    %c0_i32_1 = arith.constant 0 : i32
    return %c0_i32, %c0_i32_0 : i32, i32
  }
  func.func @transform_5(%arg0: i32) -> (i32, i32) {
    %c0_i32 = arith.constant 0 : i32
    %c0_i32_0 = arith.constant 0 : i32
    %c0_i32_1 = arith.constant 0 : i32
    return %c0_i32, %c0_i32_0 : i32, i32
  }
  func.func @transform_6(%arg0: i32) -> (i32, i32) {
    %c0_i32 = arith.constant 0 : i32
    %c0_i32_0 = arith.constant 0 : i32
    %c0_i32_1 = arith.constant 0 : i32
    return %c0_i32, %c0_i32_0 : i32, i32
  }
  func.func @transform_7(%arg0: i32) -> (i32, i32) {
    %c0_i32 = arith.constant 0 : i32
    %c0_i32_0 = arith.constant 0 : i32
    %c0_i32_1 = arith.constant 0 : i32
    return %c0_i32, %c0_i32_0 : i32, i32
  }
  func.func @transform_8(%arg0: i32) -> (i32, i32) {
    %c0_i32 = arith.constant 0 : i32
    %c0_i32_0 = arith.constant 0 : i32
    %c0_i32_1 = arith.constant 0 : i32
    return %c0_i32, %c0_i32_0 : i32, i32
  }
  func.func @transform_9(%arg0: i32) -> (i32, i32) {
    %c0_i32 = arith.constant 0 : i32
    %c0_i32_0 = arith.constant 0 : i32
    %c0_i32_1 = arith.constant 0 : i32
    return %c0_i32, %c0_i32_0 : i32, i32
  }
  func.func @transform_10(%arg0: i32) -> (i32, i32) {
    %c0_i32 = arith.constant 0 : i32
    %c0_i32_0 = arith.constant 0 : i32
    %c0_i32_1 = arith.constant 0 : i32
    return %c0_i32, %c0_i32_0 : i32, i32
  }
  func.func @transform_11(%arg0: i32) -> (i32, i32) {
    %c0_i32 = arith.constant 0 : i32
    %c0_i32_0 = arith.constant 0 : i32
    %c0_i32_1 = arith.constant 0 : i32
    return %c0_i32, %c0_i32_0 : i32, i32
  }
  func.func @transform_12(%arg0: i32) -> (i32, i32) {
    %c0_i32 = arith.constant 0 : i32
    %c0_i32_0 = arith.constant 0 : i32
    %c0_i32_1 = arith.constant 0 : i32
    return %c0_i32, %c0_i32_0 : i32, i32
  }
  func.func @transform_13(%arg0: i32) -> (i32, i32) {
    %c0_i32 = arith.constant 0 : i32
    %c0_i32_0 = arith.constant 0 : i32
    %c0_i32_1 = arith.constant 0 : i32
    return %c0_i32, %c0_i32_0 : i32, i32
  }
  func.func @transform_14(%arg0: i32) -> (i32, i32) {
    %c0_i32 = arith.constant 0 : i32
    %c0_i32_0 = arith.constant 0 : i32
    %c0_i32_1 = arith.constant 0 : i32
    return %c0_i32, %c0_i32_0 : i32, i32
  }
  func.func @transform_15(%arg0: i32) -> (i32, i32) {
    %c0_i32 = arith.constant 0 : i32
    %c0_i32_0 = arith.constant 0 : i32
    %c0_i32_1 = arith.constant 0 : i32
    return %c0_i32, %c0_i32_0 : i32, i32
  }
  func.func @transform_16(%arg0: i32) -> (i32, i32) {
    %c0_i32 = arith.constant 0 : i32
    %c0_i32_0 = arith.constant 0 : i32
    %c0_i32_1 = arith.constant 0 : i32
    return %c0_i32, %c0_i32_0 : i32, i32
  }
  func.func @transform_17(%arg0: i32) -> (i32, i32) {
    %c0_i32 = arith.constant 0 : i32
    %c0_i32_0 = arith.constant 0 : i32
    %c0_i32_1 = arith.constant 0 : i32
    return %c0_i32, %c0_i32_0 : i32, i32
  }
  func.func @transform_18(%arg0: i32) -> (i32, i32) {
    %c0_i32 = arith.constant 0 : i32
    %c0_i32_0 = arith.constant 0 : i32
    %c0_i32_1 = arith.constant 0 : i32
    return %c0_i32, %c0_i32_0 : i32, i32
  }
  func.func @transform_19(%arg0: i32) -> (i32, i32) {
    %c0_i32 = arith.constant 0 : i32
    %c0_i32_0 = arith.constant 0 : i32
    %c0_i32_1 = arith.constant 0 : i32
    return %c0_i32, %c0_i32_0 : i32, i32
  }
  func.func @transform_20(%arg0: i32) -> (i32, i32) {
    %c0_i32 = arith.constant 0 : i32
    %c0_i32_0 = arith.constant 0 : i32
    %c0_i32_1 = arith.constant 0 : i32
    return %c0_i32, %c0_i32_0 : i32, i32
  }
  func.func @transform_21(%arg0: i32) -> (i32, i32) {
    %c0_i32 = arith.constant 0 : i32
    %c0_i32_0 = arith.constant 0 : i32
    %c0_i32_1 = arith.constant 0 : i32
    return %c0_i32, %c0_i32_0 : i32, i32
  }
  func.func @transform_22(%arg0: i32) -> (i32, i32) {
    %c0_i32 = arith.constant 0 : i32
    %c0_i32_0 = arith.constant 0 : i32
    %c0_i32_1 = arith.constant 0 : i32
    return %c0_i32, %c0_i32_0 : i32, i32
  }
  func.func @transform_23(%arg0: i32) -> (i32, i32) {
    %c0_i32 = arith.constant 0 : i32
    %c0_i32_0 = arith.constant 0 : i32
    %c0_i32_1 = arith.constant 0 : i32
    return %c0_i32, %c0_i32_0 : i32, i32
  }
  func.func @transform_24(%arg0: i32) -> (i32, i32) {
    %c0_i32 = arith.constant 0 : i32
    %c0_i32_0 = arith.constant 0 : i32
    %c0_i32_1 = arith.constant 0 : i32
    return %c0_i32, %c0_i32_0 : i32, i32
  }
  func.func @transform_25(%arg0: i32) -> (i32, i32) {
    %c0_i32 = arith.constant 0 : i32
    %c0_i32_0 = arith.constant 0 : i32
    return %arg0, %c0_i32 : i32, i32
  }
}

</mosaic_0001>

<bundles_post_ra>
// kernel: tpu_custom_call.1
= control target key start
LH: loop header
LB: loop body
LE: loop exit
PB: predicated region body
PF: predicated region fallthrough
CT: control target
= control target key end

     0   :  { %s18126_s0 = inlined_call_operand.hbm [shape: bf16[1024,128], index: 0, kind: input, shape index: {}]   ;;  %s18127_s1 = inlined_call_operand.hbm [shape: bf16[1024,128], index: 1, kind: input, shape index: {}]   ;;  %s18128_s2 = inlined_call_operand.hbm [shape: bf16[128,512], index: 2, kind: input, shape index: {}]   ;;  %s18129_s3 = inlined_call_operand.vmem [shape: f32[1,256], index: 3, kind: input, shape index: {}]   ;;  %s18130_s4 = inlined_call_operand.hbm [shape: bf16[256,256], index: 4, kind: input, shape index: {}]   ;;  %s18131_s5 = inlined_call_operand.vmem [shape: f32[1,256], index: 5, kind: input, shape index: {}]   ;;  %s18132_s6 = inlined_call_operand.hbm [shape: bf16[256,256], index: 6, kind: input, shape index: {}]   ;;  %s18133_s7 = inlined_call_operand.vmem [shape: f32[1,256], index: 7, kind: input, shape index: {}]   ;;  %s18134_s8 = inlined_call_operand.hbm [shape: bf16[256,256], index: 8, kind: input, shape index: {}]   ;;  %s18135_s9 = inlined_call_operand.vmem [shape: f32[1,256], index: 9, kind: input, shape index: {}]   ;;  %s18136_s10 = inlined_call_operand.hbm [shape: bf16[256,256], index: 10, kind: input, shape index: {}]   ;;  %s18137_s11 = inlined_call_operand.vmem [shape: f32[1,256], index: 11, kind: input, shape index: {}]   ;;  %s18138_s12 = inlined_call_operand.hbm [shape: bf16[256,256], index: 12, kind: input, shape index: {}]   ;;  %s18139_s13 = inlined_call_operand.hbm [shape: f32[1,256], index: 13, kind: input, shape index: {}]   ;;  %s18140_s14 = inlined_call_operand.hbm [shape: bf16[256,256], index: 14, kind: input, shape index: {}]   ;;  %s18141_s15 = inlined_call_operand.hbm [shape: f32[1,256], index: 15, kind: input, shape index: {}]   ;;  %s18142_s16 = inlined_call_operand.hbm [shape: bf16[256,256], index: 16, kind: input, shape index: {}]   ;;  %s18143_s17 = inlined_call_operand.hbm [shape: f32[1,256], index: 17, kind: input, shape index: {}]   ;;  %s18144_s18 = inlined_call_operand.hbm [shape: bf16[256,384], index: 18, kind: input, shape index: {}]   ;;  %s18145_s19 = inlined_call_operand.vmem [shape: f32[1,384], index: 19, kind: input, shape index: {}]   ;;  %s18146_s20 = inlined_call_operand.vmem [shape: bf16[256,128], index: 20, kind: input, shape index: {}]   ;;  %s18147_s21 = inlined_call_operand.hbm [shape: bf16[128,128], index: 21, kind: input, shape index: {}]   ;;  %s18148_s22 = inlined_call_operand.vmem [shape: f32[1,128], index: 22, kind: input, shape index: {}]   ;;  %s18149_s23 = inlined_call_operand.vmem [shape: bf16[128,3], index: 23, kind: input, shape index: {}]   ;;  %s18150_s24 = inlined_call_operand.vmem [shape: f32[1,3], index: 24, kind: input, shape index: {}]   ;;  %s18151_s25 = inlined_call_operand.vmem [shape: f32[1024,4], index: 25, kind: output, shape index: {}]  }
   0x1   :  { %18222 = sst [smem:[#allocation79_spill]] %s18126_s0 }
   0x2   :  { %18223 = sst [smem:[#allocation80_spill]] %s18127_s1 }
   0x3   :  { %18224 = sst [smem:[#allocation81_spill]] %s18128_s2 }
   0x4   :  { %18225 = sst [smem:[#allocation82_spill]] %s18129_s3 }
   0x5   :  { %18226 = sst [smem:[#allocation83_spill]] %s18130_s4 }
   0x6   :  { %18227 = sst [smem:[#allocation84_spill]] %s18131_s5 }
   0x7   :  { %18228 = sst [smem:[#allocation85_spill]] %s18132_s6 }
   0x8   :  { %18229 = sst [smem:[#allocation86_spill]] %s18133_s7 }
   0x9   :  { %18230 = sst [smem:[#allocation87_spill]] %s18134_s8 }
   0xa   :  { %18231 = sst [smem:[#allocation88_spill]] %s18135_s9 }
   0xb   :  { %18232 = sst [smem:[#allocation89_spill]] %s18136_s10 }
   0xc   :  { %18233 = sst [smem:[#allocation90_spill]] %s18137_s11 }
   0xd   :  { %18234 = sst [smem:[#allocation91_spill]] %s18138_s12 }
   0xe   :  { %18235 = sst [smem:[#allocation92_spill]] %s18140_s14 }
   0xf   :  { %18236 = sst [smem:[#allocation93_spill]] %s18145_s19 }
  0x10   :  { %18237 = sst [smem:[#allocation94_spill]] %s18146_s20 }
  0x11   :  { %18238 = sst [smem:[#allocation95_spill]] %s18148_s22 }
  0x12   :  { %18239 = sst [smem:[#allocation96_spill]] %s18149_s23 }
  0x13   :  { %18240 = sst [smem:[#allocation97_spill]] %s18150_s24 }
  0x14   :  { %18241 = sst [smem:[#allocation98_spill]] %s18151_s25 }
  0x15   :  { %30 = vsyncpa [#allocation3], 0 }
  0x16   :  { %32 = vsyncpa [#allocation3 + $0x1], 0 }
  0x17   :  { %33 = vsyncpa [#allocation5], 0 }
  0x18   :  { %35 = vsyncpa [#allocation5 + $0x1], 0 }
  0x19   :  { %36 = vsyncpa [#allocation8], 0 }
  0x1a   :  { %37 = vsyncpa [#allocation11], 0 }
  0x1b   :  { %38 = vsyncpa [#allocation14], 0 }
  0x1c   :  { %39 = vsyncpa [#allocation17], 0 }
  0x1d   :  { %40 = vsyncpa [#allocation20], 0 }
  0x1e   :  { %41 = vsyncpa [#allocation23], 0  ;;  %s13959_s29 = smov 0   ;;  %s13961_s2 = smov 0  }
  0x1f   :  { %s13963_s6 = smov 0   ;;  %s13965_s30 = smov 0  }
  0x20 LB: > { %s13804_s7 = smov [#allocation6]   ;;  %s13980_s26 = sadd.s32 4294967295, %s13802_s30   ;;  %s13802_s30 = sphi %s13965_s30, %s18496_s30   ;;  %s13798_s6 = sphi %s13963_s6, %s18495_s6   ;;  %s13794_s2 = sphi %s13961_s2, %s18494_s2   ;;  %s13790_s29 = sphi %s13959_s29, %s18493_s29  }
  0x21   : > { %s625_s3 = sshll.u32 %s13804_s7, 4  ;;  %18242 = sst [smem:[#allocation34_spill]] %s13980_s26  ;;  %s13985_s3 = int_to_ptr.vmem [resolvable:$true] %s625_s3 }
  0x22   : > { %p11449_p0 = scmp.ge.s32.totalorder %s13802_s30, 1  ;;  %p18164_p1 = scmp.eq.s32.totalorder %s13980_s26, 0 }
  0x23   : > { %p613_p2 = scmp.lt.s32.totalorder %s13802_s30, 3  ;;  %s13805_s8 = smov [#allocation7]  }
  0x24   : > { %s641_s27 = sshll.u32 %s13805_s8, 4  ;;  %s13806_s28 = smov [#allocation10]   ;;  %s13999_s27 = int_to_ptr.vmem [resolvable:$true] %s641_s27 }
  0x25   : > { %p13987_p3 = pnand %p11449_p0, %p613_p2  ;;  %s14001_s9 = sshll.u32 %s13806_s28, 4  ;;  %s674_s9 = int_to_ptr.vmem [resolvable:$true] %s14001_s9 }
  0x26   : > { %s18246_s7 = sld [smem:[#allocation81_spill]] }
  0x27   : > { %s18243_s1 = scalar_select %p13987_p3, 1, 0 }
  0x28   : > { %p12382_p4 = pneg %p13987_p3 }
  0x29   : > { %18244 = sst [smem:[#allocation35_spill]] %s18243_s1 }
  0x2a   : > { %p13995_p5 = pnand %p12382_p4, %p18164_p1 }
  0x2c   : > { %s13312_s25 = scalar_lea.hbm %s18246_s7, 4096  ;;  %p14011_p7 = pneg %p13995_p5 }
  0x2d   : > { %p13313_p6 = scmp.ne.s32.totalorder %s18246_s7, %s13312_s25  ;;  %p13319_p10 = scmp.lt.u32.totalorder %s13312_s25, %s18246_s7 }
  0x2f   : > { %p13315_p8 = pnand %p14011_p7, %p13313_p6 }
  0x31   : > { %p13316_p9 = pneg %p13315_p8 }
  0x33   : > { %p13321_p11 = pnand %p13319_p10, %p13316_p9 }
  0x35   : > { %13324 = shalt.err (!%p13321_p11)
}
  0x36   : > { %s13325_s22 = scalar_lea.vmem %s13985_s3, 4096  ;;  %p13333_p2 = scmp.lt.s32.totalorder %s13985_s3, %s13985_s3 }
  0x37   : > { %p13326_p12 = scmp.ne.s32.totalorder %s13985_s3, %s13325_s22  ;;  %p13334_p4 = scmp.lt.s32.totalorder %s13325_s22, %s13325_s22 }
  0x39   : > { %p13328_p13 = pnand %p13326_p12, %p14011_p7  ;;  %p13335_p6 = por %p13334_p4, %p13333_p2 }
  0x3b   : > { %p13329_p0 = pneg %p13328_p13 }
  0x3d   : > { %p13336_p8 = pnand %p13335_p6, %p13329_p0 }
  0x3f   : > { %13339 = shalt.err (!%p13336_p8)
}
  0x40   : > { %s13807_s24 = smov 256   ;;  %s13808_s23 = smov 16  }
  0x41   : > { %12385 = dma.hbm_to_vmem [thread:$0]  (!%p13995_p5), %s18246_s7, 4096, %s13985_s3, [#allocation5], %s13807_s24, %s13807_s24, %s13808_s23  }
  0x42   : > { %s18248_s20 = sld [smem:[#allocation83_spill]] }
  0x48   : > { %s13340_s19 = scalar_lea.hbm %s18248_s20, 4096 }
  0x49   : > { %p13341_p9 = scmp.ne.s32.totalorder %s18248_s20, %s13340_s19  ;;  %p13347_p12 = scmp.lt.u32.totalorder %s13340_s19, %s18248_s20 }
  0x4b   : > { %p13343_p10 = pnand %p13341_p9, %p14011_p7 }
  0x4d   : > { %p13344_p11 = pneg %p13343_p10 }
  0x4f   : > { %p13349_p13 = pnand %p13347_p12, %p13344_p11 }
  0x51   : > { %13352 = shalt.err (!%p13349_p13)
}
  0x52   : > { %s13353_s3 = scalar_lea.vmem %s13999_s27, 4096  ;;  %p13361_p6 = scmp.lt.s32.totalorder %s13999_s27, %s13999_s27 }
  0x53   : > { %p13354_p0 = scmp.ne.s32.totalorder %s13999_s27, %s13353_s3  ;;  %p13362_p8 = scmp.lt.s32.totalorder %s13353_s3, %s13353_s3 }
  0x55   : > { %p13356_p2 = pnand %p13354_p0, %p14011_p7  ;;  %p13363_p9 = por %p13362_p8, %p13361_p6 }
  0x57   : > { %p13357_p4 = pneg %p13356_p2 }
  0x59   : > { %p13364_p10 = pnand %p13363_p9, %p13357_p4 }
  0x5b   : > { %13367 = shalt.err (!%p13364_p10)
}
  0x5c   : > { %s18168_s11 = smov 128   ;;  %s18170_s19 = smov 8  }
  0x5d   : > { %12388 = dma.hbm_to_vmem [thread:$0]  (!%p13995_p5), %s18248_s20, 4096, %s13999_s27, [#allocation8], %s18168_s11, %s18168_s11, %s18170_s19  }
  0x5e   : > { %s18249_s25 = sld [smem:[#allocation87_spill]] }
  0x64   : > { %s13368_s5 = scalar_lea.hbm %s18249_s25, 4096 }
  0x65   : > { %p13369_p11 = scmp.ne.s32.totalorder %s18249_s25, %s13368_s5  ;;  %p13375_p0 = scmp.lt.u32.totalorder %s13368_s5, %s18249_s25 }
  0x67   : > { %p13371_p12 = pnand %p13369_p11, %p14011_p7 }
  0x69   : > { %p13372_p13 = pneg %p13371_p12 }
  0x6b   : > { %p13377_p2 = pnand %p13375_p0, %p13372_p13 }
  0x6d   : > { %13380 = shalt.err (!%p13377_p2)
}
  0x6e   : > { %s13381_s26 = scalar_lea.vmem %s674_s9, 4096  ;;  %p13389_p9 = scmp.lt.s32.totalorder %s674_s9, %s674_s9 }
  0x6f   : > { %p13382_p4 = scmp.ne.s32.totalorder %s674_s9, %s13381_s26  ;;  %p13390_p10 = scmp.lt.s32.totalorder %s13381_s26, %s13381_s26 }
  0x71   : > { %p13384_p6 = pnand %p13382_p4, %p14011_p7  ;;  %p13391_p1 = por %p13390_p10, %p13389_p9 }
  0x73   : > { %p13385_p8 = pneg %p13384_p6 }
  0x75   : > { %p13392_p3 = pnand %p13391_p1, %p13385_p8 }
  0x77   : > { %13395 = shalt.err (!%p13392_p3)
}
  0x78   : > { %12394 = dma.hbm_to_vmem [thread:$0]  (!%p13995_p5), %s18249_s25, 4096, %s674_s9, [#allocation11], %s18168_s11, %s18168_s11, %s18170_s19  }
  0x79   : > { %s13811_s24 = smov [#allocation13]   ;;  %s13812_s5 = smov [#allocation16]  }
  0x7a   : > { %s705_s23 = sshll.u32 %s13811_s24, 4  ;;  %s729_s0 = sshll.u32 %s13812_s5, 4  ;;  %s706_s23 = int_to_ptr.vmem [resolvable:$true] %s705_s23  ;;  %s730_s0 = int_to_ptr.vmem [resolvable:$true] %s729_s0 }
  0x7b   : > { %s18250_s12 = sld [smem:[#allocation91_spill]] }
  0x81   : > { %s13396_s3 = scalar_lea.hbm %s18250_s12, 4096 }
  0x82   : > { %p13397_p1 = scmp.ne.s32.totalorder %s18250_s12, %s13396_s3  ;;  %p13403_p12 = scmp.lt.u32.totalorder %s13396_s3, %s18250_s12 }
  0x84   : > { %p13399_p3 = pnand %p13397_p1, %p14011_p7 }
  0x86   : > { %p13400_p11 = pneg %p13399_p3 }
  0x88   : > { %p13405_p13 = pnand %p13403_p12, %p13400_p11 }
  0x8a   : > { %13408 = shalt.err (!%p13405_p13)
}
  0x8b   : > { %s13409_s9 = scalar_lea.vmem %s706_s23, 4096  ;;  %p13417_p6 = scmp.lt.s32.totalorder %s706_s23, %s706_s23 }
  0x8c   : > { %p13410_p0 = scmp.ne.s32.totalorder %s706_s23, %s13409_s9  ;;  %p13418_p8 = scmp.lt.s32.totalorder %s13409_s9, %s13409_s9 }
  0x8e   : > { %p13412_p2 = pnand %p13410_p0, %p14011_p7  ;;  %p13419_p9 = por %p13418_p8, %p13417_p6 }
  0x90   : > { %p13413_p4 = pneg %p13412_p2 }
  0x92   : > { %p13420_p10 = pnand %p13419_p9, %p13413_p4 }
  0x94   : > { %13423 = shalt.err (!%p13420_p10)
}
  0x95   : > { %12400 = dma.hbm_to_vmem [thread:$0]  (!%p13995_p5), %s18250_s12, 4096, %s706_s23, [#allocation14], %s18168_s11, %s18168_s11, %s18170_s19  }
  0x96   : > { %s18251_s14 = sld [smem:[#allocation92_spill]] }
  0x9c   : > { %s13424_s5 = scalar_lea.hbm %s18251_s14, 4096 }
  0x9d   : > { %p13425_p1 = scmp.ne.s32.totalorder %s18251_s14, %s13424_s5  ;;  %p13431_p12 = scmp.lt.u32.totalorder %s13424_s5, %s18251_s14 }
  0x9f   : > { %p13427_p3 = pnand %p13425_p1, %p14011_p7 }
  0xa1   : > { %p13428_p11 = pneg %p13427_p3 }
  0xa3   : > { %p13433_p13 = pnand %p13431_p12, %p13428_p11 }
  0xa5   : > { %13436 = shalt.err (!%p13433_p13)
}
  0xa6   : > { %s13437_s27 = scalar_lea.vmem %s730_s0, 4096  ;;  %p13445_p6 = scmp.lt.s32.totalorder %s730_s0, %s730_s0 }
  0xa7   : > { %p13438_p0 = scmp.ne.s32.totalorder %s730_s0, %s13437_s27  ;;  %p13446_p8 = scmp.lt.s32.totalorder %s13437_s27, %s13437_s27 }
  0xa9   : > { %p13440_p2 = pnand %p13438_p0, %p14011_p7  ;;  %p13447_p9 = por %p13446_p8, %p13445_p6 }
  0xab   : > { %p13441_p4 = pneg %p13440_p2 }
  0xad   : > { %p13448_p10 = pnand %p13447_p9, %p13441_p4 }
  0xaf   : > { %13451 = shalt.err (!%p13448_p10)
}
  0xb0   : > { %12406 = dma.hbm_to_vmem [thread:$0]  (!%p13995_p5), %s18251_s14, 4096, %s730_s0, [#allocation17], %s18168_s11, %s18168_s11, %s18170_s19  }
  0xb1   : > { %s13813_s20 = smov [#allocation19]   ;;  %s13814_s1 = smov [#allocation22]  }
  0xb2   : > { %s753_s7 = sshll.u32 %s13813_s20, 4  ;;  %s777_s24 = sshll.u32 %s13814_s1, 4  ;;  %s754_s7 = int_to_ptr.vmem [resolvable:$true] %s753_s7  ;;  %s778_s24 = int_to_ptr.vmem [resolvable:$true] %s777_s24 }
  0xb3   : > { %s13452_s22 = scalar_lea.hbm %s18142_s16, 4096 }
  0xb4   : > { %p13453_p1 = scmp.ne.s32.totalorder %s18142_s16, %s13452_s22  ;;  %p13459_p12 = scmp.lt.u32.totalorder %s13452_s22, %s18142_s16 }
  0xb6   : > { %p13455_p3 = pnand %p13453_p1, %p14011_p7 }
  0xb8   : > { %p13456_p11 = pneg %p13455_p3 }
  0xba   : > { %p13461_p13 = pnand %p13459_p12, %p13456_p11 }
  0xbc   : > { %13464 = shalt.err (!%p13461_p13)
}
  0xbd   : > { %s13465_s0 = scalar_lea.vmem %s754_s7, 4096  ;;  %p13473_p6 = scmp.lt.s32.totalorder %s754_s7, %s754_s7 }
  0xbe   : > { %p13466_p0 = scmp.ne.s32.totalorder %s754_s7, %s13465_s0  ;;  %p13474_p8 = scmp.lt.s32.totalorder %s13465_s0, %s13465_s0 }
  0xc0   : > { %p13468_p2 = pnand %p13466_p0, %p14011_p7  ;;  %p13475_p9 = por %p13474_p8, %p13473_p6 }
  0xc2   : > { %p13469_p4 = pneg %p13468_p2 }
  0xc4   : > { %p13476_p10 = pnand %p13475_p9, %p13469_p4 }
  0xc6   : > { %13479 = shalt.err (!%p13476_p10)
}
  0xc7   : > { %12412 = dma.hbm_to_vmem [thread:$0]  (!%p13995_p5), %s18142_s16, 4096, %s754_s7, [#allocation20], %s18168_s11, %s18168_s11, %s18170_s19  }
  0xc8   : > { %s13480_s28 = scalar_lea.hbm %s18144_s18, 6144 }
  0xc9   : > { %p13481_p1 = scmp.ne.s32.totalorder %s18144_s18, %s13480_s28  ;;  %p13487_p12 = scmp.lt.u32.totalorder %s13480_s28, %s18144_s18 }
  0xcb   : > { %p13483_p3 = pnand %p13481_p1, %p14011_p7 }
  0xcd   : > { %p13484_p11 = pneg %p13483_p3 }
  0xcf   : > { %p13489_p13 = pnand %p13487_p12, %p13484_p11 }
  0xd1   : > { %13492 = shalt.err (!%p13489_p13)
}
  0xd2   : > { %s13493_s23 = scalar_lea.vmem %s778_s24, 6144  ;;  %p13501_p6 = scmp.lt.s32.totalorder %s778_s24, %s778_s24 }
  0xd3   : > { %p13494_p0 = scmp.ne.s32.totalorder %s778_s24, %s13493_s23  ;;  %p13502_p8 = scmp.lt.s32.totalorder %s13493_s23, %s13493_s23 }
  0xd5   : > { %p13496_p2 = pnand %p13494_p0, %p14011_p7  ;;  %p13503_p9 = por %p13502_p8, %p13501_p6 }
  0xd7   : > { %p13497_p4 = pneg %p13496_p2 }
  0xd9   : > { %p13504_p10 = pnand %p13503_p9, %p13497_p4 }
  0xdb   : > { %13507 = shalt.err (!%p13504_p10)
}
  0xdc   : > { %s13815_s7 = smov 192   ;;  %s13816_s0 = smov 12  }
  0xdd   : > { %12418 = dma.hbm_to_vmem [thread:$0]  (!%p13995_p5), %s18144_s18, 6144, %s778_s24, [#allocation23], %s13815_s7, %s13815_s7, %s13816_s0  }
  0xde   : > { %s13817_s1 = smov [#allocation9]   ;;  %s13818_s28 = smov [#allocation12]  }
  0xdf   : > { %s657_s5 = sshll.u32 %s13817_s1, 4  ;;  %s689_s22 = sshll.u32 %s13818_s28, 4  ;;  %s658_s5 = int_to_ptr.vmem [resolvable:$true] %s657_s5  ;;  %s690_s22 = int_to_ptr.vmem [resolvable:$true] %s689_s22 }
  0xe0   : > { %s18252_s27 = sld [smem:[#allocation85_spill]] }
  0xe6   : > { %s13508_s23 = scalar_lea.hbm %s18252_s27, 4096 }
  0xe7   : > { %p13509_p1 = scmp.ne.s32.totalorder %s18252_s27, %s13508_s23  ;;  %p13515_p12 = scmp.lt.u32.totalorder %s13508_s23, %s18252_s27 }
  0xe9   : > { %p13511_p3 = pnand %p13509_p1, %p14011_p7 }
  0xeb   : > { %p13512_p11 = pneg %p13511_p3 }
  0xed   : > { %p13517_p13 = pnand %p13515_p12, %p13512_p11 }
  0xef   : > { %13520 = shalt.err (!%p13517_p13)
}
  0xf0   : > { %s13521_s24 = scalar_lea.vmem %s658_s5, 4096  ;;  %p13529_p6 = scmp.lt.s32.totalorder %s658_s5, %s658_s5 }
  0xf1   : > { %p13522_p0 = scmp.ne.s32.totalorder %s658_s5, %s13521_s24  ;;  %p13530_p8 = scmp.lt.s32.totalorder %s13521_s24, %s13521_s24 }
  0xf3   : > { %p13524_p2 = pnand %p13522_p0, %p14011_p7  ;;  %p13531_p9 = por %p13530_p8, %p13529_p6 }
  0xf5   : > { %p13525_p4 = pneg %p13524_p2 }
  0xf7   : > { %p13532_p10 = pnand %p13531_p9, %p13525_p4 }
  0xf9   : > { %13535 = shalt.err (!%p13532_p10)
}
  0xfa   : > { %s18253_s11 = smov 8   ;;  %s18254_s19 = smov 128  }
  0xfb   : > { %12391 = dma.hbm_to_vmem [thread:$0]  (!%p13995_p5), %s18252_s27, 4096, %s658_s5, [#allocation8], %s18254_s19, %s18254_s19, %s18253_s11  }
  0xfc   : > { %s18255_s10 = sld [smem:[#allocation89_spill]] }
 0x102   : > { %s13536_s9 = scalar_lea.hbm %s18255_s10, 4096 }
 0x103   : > { %p13537_p1 = scmp.ne.s32.totalorder %s18255_s10, %s13536_s9  ;;  %p13543_p12 = scmp.lt.u32.totalorder %s13536_s9, %s18255_s10 }
 0x105   : > { %p13539_p3 = pnand %p13537_p1, %p14011_p7 }
 0x107   : > { %p13540_p11 = pneg %p13539_p3 }
 0x109   : > { %p13545_p13 = pnand %p13543_p12, %p13540_p11 }
 0x10b   : > { %13548 = shalt.err (!%p13545_p13)
}
 0x10c   : > { %s13549_s26 = scalar_lea.vmem %s690_s22, 4096  ;;  %p13557_p6 = scmp.lt.s32.totalorder %s690_s22, %s690_s22 }
 0x10d   : > { %p13550_p0 = scmp.ne.s32.totalorder %s690_s22, %s13549_s26  ;;  %p13558_p8 = scmp.lt.s32.totalorder %s13549_s26, %s13549_s26 }
 0x10f   : > { %p13552_p2 = pnand %p13550_p0, %p14011_p7  ;;  %p13559_p9 = por %p13558_p8, %p13557_p6 }
 0x111   : > { %p13553_p4 = pneg %p13552_p2 }
 0x113   : > { %p13560_p10 = pnand %p13559_p9, %p13553_p4 }
 0x115   : > { %13563 = shalt.err (!%p13560_p10)
}
 0x116   : > { %12397 = dma.hbm_to_vmem [thread:$0]  (!%p13995_p5), %s18255_s10, 4096, %s690_s22, [#allocation11], %s18254_s19, %s18254_s19, %s18253_s11  }
 0x117   : > { %s13819_s24 = smov [#allocation15]   ;;  %s13820_s14 = smov [#allocation18]  }
 0x118   : > { %s719_s12 = sshll.u32 %s13819_s24, 4  ;;  %s743_s7 = sshll.u32 %s13820_s14, 4  ;;  %s720_s12 = int_to_ptr.vmem [resolvable:$true] %s719_s12  ;;  %s744_s7 = int_to_ptr.vmem [resolvable:$true] %s743_s7 }
 0x119   : > { %s13564_s20 = scalar_lea.hbm %s18139_s13, 32 }
 0x11a   : > { %p13565_p1 = scmp.ne.s32.totalorder %s18139_s13, %s13564_s20  ;;  %p13571_p12 = scmp.lt.u32.totalorder %s13564_s20, %s18139_s13 }
 0x11c   : > { %p13567_p3 = pnand %p13565_p1, %p14011_p7 }
 0x11e   : > { %p13568_p11 = pneg %p13567_p3 }
 0x120   : > { %p13573_p13 = pnand %p13571_p12, %p13568_p11 }
 0x122   : > { %13576 = shalt.err (!%p13573_p13)
}
 0x123   : > { %s13577_s22 = scalar_lea.vmem %s720_s12, 32  ;;  %p13585_p6 = scmp.lt.s32.totalorder %s720_s12, %s720_s12 }
 0x124   : > { %p13578_p0 = scmp.ne.s32.totalorder %s720_s12, %s13577_s22  ;;  %p13586_p8 = scmp.lt.s32.totalorder %s13577_s22, %s13577_s22 }
 0x126   : > { %p13580_p2 = pnand %p13578_p0, %p14011_p7  ;;  %p13587_p9 = por %p13586_p8, %p13585_p6 }
 0x128   : > { %p13581_p4 = pneg %p13580_p2 }
 0x12a   : > { %p13588_p10 = pnand %p13587_p9, %p13581_p4 }
 0x12c   : > { %13591 = shalt.err (!%p13588_p10)
}
 0x12d   : > { %12403 = dma.hbm_to_vmem [thread:$0]  (!%p13995_p5), %s18139_s13, 32, %s720_s12, [#allocation14]  }
 0x12e   : > { %s13592_s24 = scalar_lea.hbm %s18141_s15, 32 }
 0x12f   : > { %p13593_p1 = scmp.ne.s32.totalorder %s18141_s15, %s13592_s24  ;;  %p13599_p12 = scmp.lt.u32.totalorder %s13592_s24, %s18141_s15 }
 0x131   : > { %p13595_p3 = pnand %p13593_p1, %p14011_p7 }
 0x133   : > { %p13596_p11 = pneg %p13595_p3 }
 0x135   : > { %p13601_p13 = pnand %p13599_p12, %p13596_p11 }
 0x137   : > { %13604 = shalt.err (!%p13601_p13)
}
 0x138   : > { %s13605_s1 = scalar_lea.vmem %s744_s7, 32  ;;  %p13613_p6 = scmp.lt.s32.totalorder %s744_s7, %s744_s7 }
 0x139   : > { %p13606_p0 = scmp.ne.s32.totalorder %s744_s7, %s13605_s1  ;;  %p13614_p8 = scmp.lt.s32.totalorder %s13605_s1, %s13605_s1 }
 0x13b   : > { %p13608_p2 = pnand %p13606_p0, %p14011_p7  ;;  %p13615_p9 = por %p13614_p8, %p13613_p6 }
 0x13d   : > { %p13609_p4 = pneg %p13608_p2 }
 0x13f   : > { %p13616_p10 = pnand %p13615_p9, %p13609_p4 }
 0x141   : > { %13619 = shalt.err (!%p13616_p10)
}
 0x142   : > { %12409 = dma.hbm_to_vmem [thread:$0]  (!%p13995_p5), %s18141_s15, 32, %s744_s7, [#allocation17]  }
 0x143   : > { %s13821_s3 = smov [#allocation21]   ;;  %s13822_s22 = smov [#allocation24]  }
 0x144   : > { %s767_s26 = sshll.u32 %s13821_s3, 4  ;;  %s796_s11 = sshll.u32 %s13822_s22, 4  ;;  %s768_s26 = int_to_ptr.vmem [resolvable:$true] %s767_s26  ;;  %s797_s11 = int_to_ptr.vmem [resolvable:$true] %s796_s11 }
 0x145   : > { %s13620_s23 = scalar_lea.hbm %s18143_s17, 32 }
 0x146   : > { %p13621_p1 = scmp.ne.s32.totalorder %s18143_s17, %s13620_s23  ;;  %p13627_p12 = scmp.lt.u32.totalorder %s13620_s23, %s18143_s17 }
 0x148   : > { %p13623_p3 = pnand %p13621_p1, %p14011_p7 }
 0x14a   : > { %p13624_p11 = pneg %p13623_p3 }
 0x14c   : > { %p13629_p13 = pnand %p13627_p12, %p13624_p11 }
 0x14e   : > { %13632 = shalt.err (!%p13629_p13)
}
 0x14f   : > { %s13633_s7 = scalar_lea.vmem %s768_s26, 32  ;;  %p13641_p6 = scmp.lt.s32.totalorder %s768_s26, %s768_s26 }
 0x150   : > { %p13634_p0 = scmp.ne.s32.totalorder %s768_s26, %s13633_s7  ;;  %p13642_p8 = scmp.lt.s32.totalorder %s13633_s7, %s13633_s7 }
 0x152   : > { %p13636_p2 = pnand %p13634_p0, %p14011_p7  ;;  %p13643_p9 = por %p13642_p8, %p13641_p6 }
 0x154   : > { %p13637_p4 = pneg %p13636_p2 }
 0x156   : > { %p13644_p10 = pnand %p13643_p9, %p13637_p4 }
 0x158   : > { %13647 = shalt.err (!%p13644_p10)
}
 0x159   : > { %12415 = dma.hbm_to_vmem [thread:$0]  (!%p13995_p5), %s18143_s17, 32, %s768_s26, [#allocation20]  }
 0x15a   : > { %s13648_s3 = scalar_lea.hbm %s18147_s21, 1024 }
 0x15b   : > { %p13649_p1 = scmp.ne.s32.totalorder %s18147_s21, %s13648_s3  ;;  %p13655_p12 = scmp.lt.u32.totalorder %s13648_s3, %s18147_s21 }
 0x15d   : > { %p13651_p3 = pnand %p13649_p1, %p14011_p7 }
 0x15f   : > { %p13652_p11 = pneg %p13651_p3 }
 0x161   : > { %p13657_p13 = pnand %p13655_p12, %p13652_p11 }
 0x163   : > { %13660 = shalt.err (!%p13657_p13)
}
 0x164   : > { %s13661_s24 = scalar_lea.vmem %s797_s11, 1024  ;;  %p13669_p6 = scmp.lt.s32.totalorder %s797_s11, %s797_s11 }
 0x165   : > { %p13662_p0 = scmp.ne.s32.totalorder %s797_s11, %s13661_s24  ;;  %p13670_p8 = scmp.lt.s32.totalorder %s13661_s24, %s13661_s24 }
 0x167   : > { %p13664_p2 = pnand %p13662_p0, %p14011_p7  ;;  %p13671_p9 = por %p13670_p8, %p13669_p6 }
 0x169   : > { %p13665_p4 = pneg %p13664_p2 }
 0x16b   : > { %p13672_p10 = pnand %p13671_p9, %p13665_p4 }
 0x16d   : > { %13675 = shalt.err (!%p13672_p10)
}
 0x16e   : > { %s18172_s26 = smov 64   ;;  %s18256_s14 = sld [smem:[#allocation34_spill]] }
 0x16f   : > { %s18174_s8 = smov 4   ;;  %s14279_s7 = sadd.s32 1, %s13802_s30  }
 0x170   : > { %12421 = dma.hbm_to_vmem [thread:$0]  (!%p13995_p5), %s18147_s21, 1024, %s797_s11, [#allocation23], %s18172_s26, %s18172_s26, %s18174_s8  }
 0x171   : > { %s51_s20 = ssub.s32 %s13802_s30, %s14279_s7  ;;  %s54_s1 = sadd.s32 1, %s13798_s6 }
 0x172   : > { %p52_p7 = scmp.eq.s32.totalorder %s51_s20, 0  ;;  %p61_p1 = scmp.ne.s32.totalorder %s13798_s6, %s13794_s2 }
 0x173   : > { %p62_p3 = scmp.eq.s32.totalorder %s13802_s30, 0  ;;  %p67_p11 = scmp.ne.s32.totalorder %s13794_s2, %s13790_s29 }
 0x174   : > { %s14290_s12 = scalar_select %p52_p7, %s13798_s6, %s54_s1  }
 0x175   : > { %p63_p12 = por %p62_p3, %p61_p1  ;;  %p18257_p13 = scmp.eq.s32.totalorder %s18256_s14, 0 }
 0x176   : > { %p12442_p2 = scmp.lt.s32.totalorder %s13802_s30, 2  ;;  %s819_s28 = sand.u32 1, %s13798_s6  }
 0x177   : > { %p14294_p0 = por %p18257_p13, %p67_p11  ;;  %s11464_s11 = sshll.u32 %s819_s28, 8 }
 0x178   : > { %s11956_s3 = sshll.u32 %s13802_s30, 12  ;;  %s18259_s5 = sld [smem:[#allocation79_spill]] }
 0x179   : > { %s823_s29 = scalar_lea.vmem [#allocation2], %s11464_s11  ;;  %p14308_p5 = pnand %p12442_p2, %p63_p12 }
 0x17a   : > { %s830_s24 = sshll.u32 %s823_s29, 4  ;;  %s18261_s20 = sld [smem:[#allocation80_spill]]  ;;  %s14306_s24 = int_to_ptr.vmem [resolvable:$true] %s830_s24 }
 0x17b   : > { %s844_s22 = scalar_lea.vmem [#allocation4], %s11464_s11  ;;  %s14319_s26 = scalar_lea.sflag [#allocation3], %s819_s28 }
 0x17c   : > { %s14317_s19 = sshll.u32 %s844_s22, 4  ;;  %p13678_p6 = pneg %p14308_p5  ;;  %s14351_s19 = int_to_ptr.vmem [resolvable:$true] %s14317_s19 }
 0x17e   : > { %s14304_s23 = scalar_lea.hbm %s18259_s5, %s11956_s3  ;;  %s13681_s0 = scalar_lea.hbm %s18259_s5, 8192 }
 0x17f   : > { %s13676_s29 = scalar_lea.hbm %s14304_s23, 4096  ;;  %p13682_p10 = scmp.lt.u32.totalorder %s14304_s23, %s18259_s5 }
 0x180   : > { %s14315_s1 = scalar_lea.hbm %s18261_s20, %s11956_s3  ;;  %p13677_p4 = scmp.ne.s32.totalorder %s14304_s23, %s13676_s29 }
 0x181   : > { %p13683_p7 = scmp.lt.u32.totalorder %s13681_s0, %s13676_s29  ;;  %p13685_p3 = scmp.lt.u32.totalorder %s13676_s29, %s14304_s23 }
 0x182   : > { %p13679_p8 = pnand %p13678_p6, %p13677_p4 }
 0x183   : > { %p13684_p1 = por %p13683_p7, %p13682_p10 }
 0x184   : > { %p13680_p9 = pneg %p13679_p8 }
 0x185   : > { %p13686_p11 = por %p13685_p3, %p13684_p1 }
 0x187   : > { %p13687_p12 = pnand %p13686_p11, %p13680_p9 }
 0x189   : > { %13690 = shalt.err (!%p13687_p12)
}
 0x18a   : > { %s13691_s28 = scalar_lea.vmem %s14306_s24, 4096  ;;  %s13825_s10 = smov [#allocation2]  }
 0x18b   : > { %p13692_p13 = scmp.ne.s32.totalorder %s14306_s24, %s13691_s28  ;;  %s13696_s8 = sshll.u32 %s13825_s10, 4  ;;  %s13697_s8 = int_to_ptr.vmem [resolvable:$false] %s13696_s8 }
 0x18c   : > { %s13698_s11 = scalar_lea.vmem %s13697_s8, 8192  ;;  %p13699_p8 = scmp.lt.s32.totalorder %s14306_s24, %s13697_s8 }
 0x18d   : > { %p13694_p2 = pnand %p13692_p13, %p13678_p6  ;;  %p13700_p10 = scmp.lt.s32.totalorder %s13698_s11, %s13691_s28 }
 0x18f   : > { %p13695_p4 = pneg %p13694_p2  ;;  %p13701_p7 = por %p13700_p10, %p13699_p8 }
 0x191   : > { %p13702_p1 = pnand %p13701_p7, %p13695_p4 }
 0x193   : > { %13705 = shalt.err (!%p13702_p1)
}
 0x194   : > { %s18262_s22 = smov 4   ;;  %s18263_s29 = smov 64  }
 0x195   : > { %12425 = dma.hbm_to_vmem [thread:$0]  (!%p14308_p5), %s14304_s23, 4096, %s14306_s24, %s14319_s26, %s18263_s29, %s18263_s29, %s18262_s22  }
 0x196   : > { %s840_s0 = sand.u32 1, %s13802_s30   ;;  %s13706_s3 = scalar_lea.hbm %s14315_s1, 4096 }
 0x197   : > { %s14354_s9 = scalar_lea.sflag [#allocation5], %s840_s0  ;;  %p13707_p9 = scmp.ne.s32.totalorder %s14315_s1, %s13706_s3 }
 0x198   : > { %s13711_s8 = scalar_lea.hbm %s18261_s20, 8192  ;;  %p13712_p12 = scmp.lt.u32.totalorder %s14315_s1, %s18261_s20 }
 0x199   : > { %p13709_p3 = pnand %p13707_p9, %p13678_p6  ;;  %p13713_p13 = scmp.lt.u32.totalorder %s13711_s8, %s13706_s3 }
 0x19a   : > { %p13715_p4 = scmp.lt.u32.totalorder %s13706_s3, %s14315_s1 }
 0x19b   : > { %p13710_p11 = pneg %p13709_p3  ;;  %p13714_p2 = por %p13713_p13, %p13712_p12 }
 0x19d   : > { %p13716_p8 = por %p13715_p4, %p13714_p2 }
 0x19f   : > { %p13717_p10 = pnand %p13716_p8, %p13710_p11 }
 0x1a1   : > { %13720 = shalt.err (!%p13717_p10)
}
 0x1a2   : > { %s13721_s30 = scalar_lea.vmem %s14351_s19, 4096  ;;  %s13826_s26 = smov [#allocation4]  }
 0x1a3   : > { %p13722_p7 = scmp.ne.s32.totalorder %s14351_s19, %s13721_s30  ;;  %s13726_s23 = sshll.u32 %s13826_s26, 4  ;;  %s13727_s23 = int_to_ptr.vmem [resolvable:$false] %s13726_s23 }
 0x1a4   : > { %s13728_s5 = scalar_lea.vmem %s13727_s23, 8192  ;;  %p13729_p3 = scmp.lt.s32.totalorder %s14351_s19, %s13727_s23 }
 0x1a5   : > { %p13724_p1 = pnand %p13722_p7, %p13678_p6  ;;  %p13730_p12 = scmp.lt.s32.totalorder %s13728_s5, %s13721_s30 }
 0x1a7   : > { %p13725_p9 = pneg %p13724_p1  ;;  %p13731_p13 = por %p13730_p12, %p13729_p3 }
 0x1a9   : > { %p13732_p2 = pnand %p13731_p13, %p13725_p9 }
 0x1ab   : > { %13735 = shalt.err (!%p13732_p2)
}
 0x1ac   : > { %12428 = dma.hbm_to_vmem [thread:$0]  (!%p14308_p5), %s14315_s1, 4096, %s14351_s19, %s14354_s9, %s18263_s29, %s18263_s29, %s18262_s22  }
 0x1ad   : > { %s18264_s24 = sld [smem:[#allocation35_spill]] }
 0x1b3   : > { %p18265_p6 = scmp.ne.s32.totalorder %s18264_s24, 0 }
 0x1b5   : > { %863 = sbr.rel (%p18265_p6) target bundleno = 3494 (0xda6), region = 120 }
 0x1bc   : > { %s865_s0 = sand.u32 1, %s13794_s2  }
 0x1bd   : > { %s11471_s3 = sshll.u32 %s865_s0, 8  ;;  %s866_s28 = scalar_lea.sflag [#allocation3], %s865_s0 }
 0x1be   : > { %s14386_s10 = scalar_lea.vmem [#allocation2], %s11471_s3 }
 0x1bf   : > { %13753 = dma.done.wait (%p14294_p0), %s866_s28, 4096  }
 0x1c0   : > { %13755 = vsyncadd (%p14294_p0), %s866_s28, 4294963200  ;;  %s18266_s14 = sld [smem:[#allocation34_spill]]  ;;  %s14393_s1 = scalar_lea.vmem [#allocation4], %s11471_s3 }
 0x1c6   : > { %s874_s8 = sand.u32 1, %s18266_s14  }
 0x1c7   : > { %s875_s11 = scalar_lea.sflag [#allocation5], %s874_s8 }
 0x1c8   : > { %13757 = dma.done.wait (%p14294_p0), %s875_s11, 4096  }
 0x1c9   : > { %13759 = vsyncadd (%p14294_p0), %s875_s11, 4294963200  ;;  %p18267_p5 = scmp.eq.s32.totalorder %s18266_s14, 0 }
 0x1cb   : > { %13761 = dma.done.wait (%p18267_p5), [#allocation5], 4096   ;;  %p18268_p11 = pmov %p18267_p5 }
 0x1cc   : > { %p18269_p4 = pmov %p18267_p5 }
 0x1cd   : > { %13763 = vsyncadd (%p18268_p11), [#allocation5], 4294963200 }
 0x1ce   : > { %13765 = dma.done.wait (%p18269_p4), [#allocation8], 8192   ;;  %p18270_p8 = pmov %p18269_p4 }
 0x1cf   : > { %p18271_p10 = pmov %p18269_p4 }
 0x1d0   : > { %13767 = vsyncadd (%p18270_p8), [#allocation8], 4294959104 }
 0x1d1   : > { %13769 = dma.done.wait (%p18271_p10), [#allocation11], 8192   ;;  %p18272_p7 = pmov %p18269_p4 }
 0x1d2   : > { %p18273_p0 = pmov %p18269_p4 }
 0x1d3   : > { %13771 = vsyncadd (%p18272_p7), [#allocation11], 4294959104 }
 0x1d4   : > { %13773 = dma.done.wait (%p18273_p0), [#allocation14], 4128   ;;  %p18274_p1 = pmov %p18273_p0 }
 0x1d5   : > { %p18275_p9 = pmov %p18273_p0 }
 0x1d6   : > { %13775 = vsyncadd (%p18274_p1), [#allocation14], 4294963168 }
 0x1d7   : > { %13777 = dma.done.wait (%p18275_p9), [#allocation17], 4128   ;;  %p18276_p3 = pmov %p18273_p0 }
 0x1d8   : > { %p18277_p12 = pmov %p18273_p0 }
 0x1d9   : > { %13779 = vsyncadd (%p18276_p3), [#allocation17], 4294963168 }
 0x1da   : > { %13781 = dma.done.wait (%p18277_p12), [#allocation20], 4128   ;;  %p18278_p13 = pmov %p18273_p0 }
 0x1db   : > { %p18279_p2 = pmov %p18273_p0 }
 0x1dc   : > { %13783 = vsyncadd (%p18278_p13), [#allocation20], 4294963168 }
 0x1dd   : > { %13785 = dma.done.wait (%p18279_p2), [#allocation23], 7168   ;;  %p18280_p6 = pmov %p18273_p0 }
 0x1de   : > { %v18177_v0 = vmov 0   ;;  %v12511_v1 = vld [vmem:[#allocation6 + $0x4] ss:$16 sps:$4 sm:$0xff]   ;;  %v12513_v2 = vld [vmem:[#allocation6] ss:$16 sps:$4 sm:$0xff]   ;;  %v14435_v23 = vld [vmem:[%s14386_s10 + $0x8] sm:$0xff]  }
 0x1df   : > { %13787 = vsyncadd (%p18280_p6), [#allocation23], 4294960128  ;;  %1555 = vmatprep.mubr.bf16.mxu0 %v18177_v0  ;;  %1908 = vmatprep.mubr.bf16.mxu1 %v18177_v0  ;;  %v12514_v3 = vld [vmem:[#allocation6 + $0x24] ss:$16 sps:$4 sm:$0xff]   ;;  %v12516_v4 = vld [vmem:[#allocation6 + $0x20] ss:$16 sps:$4 sm:$0xff]  }
 0x1e0   : > { %1523 = vmatprep.subr.bf16.mxu0 %v12511_v1  ;;  %v12517_v5 = vld [vmem:[#allocation6 + $0x44] ss:$16 sps:$4 sm:$0xff]   ;;  %v12519_v6 = vld [vmem:[#allocation6 + $0x40] ss:$16 sps:$4 sm:$0xff]   ;;  %v14445_v33 = vld [vmem:[%s14386_s10 + $0x18] sm:$0xff]   ;;  %s18281_s22 = sld [smem:[#allocation82_spill]] }
 0x1e1   : > { %1524 = vmatpush1.bf16.msra.mxu0 %v12513_v2  ;;  %v12520_v7 = vld [vmem:[#allocation6 + $0x64] ss:$16 sps:$4 sm:$0xff]   ;;  %v12522_v8 = vld [vmem:[#allocation6 + $0x60] ss:$16 sps:$4 sm:$0xff]   ;;  %v14455_v43 = vld [vmem:[%s14386_s10 + $0x28] sm:$0xff]   ;;  %s18282_s30 = sld [smem:[#allocation84_spill]] }
 0x1e2   : > { %1525 = vmatprep.subr.bf16.mxu0 %v12514_v3  ;;  %v12523_v9 = vld [vmem:[#allocation6 + $0x84] ss:$16 sps:$4 sm:$0xff]   ;;  %v12525_v10 = vld [vmem:[#allocation6 + $0x80] ss:$16 sps:$4 sm:$0xff]   ;;  %v14465_v48 = vld [vmem:[%s14386_s10 + $0x38] sm:$0xff]   ;;  %s18283_s5 = sld [smem:[#allocation86_spill]] }
 0x1e3   : > { %v12526_v11 = vld [vmem:[#allocation6 + $0xa4] ss:$16 sps:$4 sm:$0xff]   ;;  %v12528_v12 = vld [vmem:[#allocation6 + $0xa0] ss:$16 sps:$4 sm:$0xff]   ;;  %v12595_v49 = vld [vmem:[#allocation6 + $0xc] ss:$16 sps:$4 sm:$0xff]  }
 0x1e4   : > { %v12529_v13 = vld [vmem:[#allocation6 + $0xc4] ss:$16 sps:$4 sm:$0xff]   ;;  %v12531_v14 = vld [vmem:[#allocation6 + $0xc0] ss:$16 sps:$4 sm:$0xff]   ;;  %v12597_v50 = vld [vmem:[#allocation6 + $0x8] ss:$16 sps:$4 sm:$0xff]   ;;  %1876 = vmatprep.subr.bf16.mxu1 %v12595_v49 }
 0x1e5   : > { %1526 = vmatpush1.bf16.msra.mxu0 %v12516_v4  ;;  %v12532_v15 = vld [vmem:[#allocation6 + $0xe4] ss:$16 sps:$4 sm:$0xff]   ;;  %v12534_v16 = vld [vmem:[#allocation6 + $0xe0] ss:$16 sps:$4 sm:$0xff]   ;;  %1877 = vmatpush1.bf16.msra.mxu1 %v12597_v50  ;;  %v12602_v54 = vld [vmem:[#allocation6 + $0x2c] ss:$16 sps:$4 sm:$0xff]  }
 0x1e6   : > { %1527 = vmatprep.subr.bf16.mxu0 %v12517_v5  ;;  %v12538_v17 = vld [vmem:[#allocation7 + $0x4] ss:$8 sps:$4 sm:$0xff]   ;;  %v12536_v19 = vld [vmem:[#allocation7] ss:$8 sps:$4 sm:$0xff]   ;;  %v12543_v20 = vld [vmem:[#allocation7 + $0x14] ss:$8 sps:$4 sm:$0xff]   ;;  %1878 = vmatprep.subr.bf16.mxu1 %v12602_v54 }
 0x1e7   : > { %v14430_v18 = vld [vmem:[%s14386_s10] sm:$0xff]   ;;  %v12541_v21 = vld [vmem:[#allocation7 + $0x10] ss:$8 sps:$4 sm:$0xff]   ;;  %v12553_v25 = vld [vmem:[#allocation7 + $0x34] ss:$8 sps:$4 sm:$0xff]   ;;  %s18284_s3 = sld [smem:[#allocation88_spill]] }
 0x1e8   : > { %v12548_v22 = vld [vmem:[#allocation7 + $0x24] ss:$8 sps:$4 sm:$0xff]   ;;  %v12546_v24 = vld [vmem:[#allocation7 + $0x20] ss:$8 sps:$4 sm:$0xff]   ;;  %v12551_v26 = vld [vmem:[#allocation7 + $0x30] ss:$8 sps:$4 sm:$0xff]  }
 0x1e9   : > { %1528 = vmatpush1.bf16.msra.mxu0 %v12519_v6  ;;  %v12558_v27 = vld [vmem:[#allocation7 + $0x44] ss:$8 sps:$4 sm:$0xff]   ;;  %v14440_v28 = vld [vmem:[%s14386_s10 + $0x10] sm:$0xff]   ;;  %v12556_v29 = vld [vmem:[#allocation7 + $0x40] ss:$8 sps:$4 sm:$0xff]   ;;  %s18285_s8 = sld [smem:[#allocation90_spill]] }
 0x1ea   : > { %1529 = vmatprep.subr.bf16.mxu0 %v12520_v7  ;;  %v12563_v30 = vld [vmem:[#allocation7 + $0x54] ss:$8 sps:$4 sm:$0xff]   ;;  %v12561_v31 = vld [vmem:[#allocation7 + $0x50] ss:$8 sps:$4 sm:$0xff]   ;;  %v12568_v32 = vld [vmem:[#allocation7 + $0x64] ss:$8 sps:$4 sm:$0xff]  }
 0x1eb   : > { %v12566_v34 = vld [vmem:[#allocation7 + $0x60] ss:$8 sps:$4 sm:$0xff]   ;;  %v12573_v35 = vld [vmem:[#allocation7 + $0x74] ss:$8 sps:$4 sm:$0xff]   ;;  %v12571_v36 = vld [vmem:[#allocation7 + $0x70] ss:$8 sps:$4 sm:$0xff]  }
 0x1ec   : > { %v12578_v37 = vld [vmem:[#allocation7 + $0x84] ss:$8 sps:$4 sm:$0xff]   ;;  %v12576_v39 = vld [vmem:[#allocation7 + $0x80] ss:$8 sps:$4 sm:$0xff]   ;;  %v12583_v40 = vld [vmem:[#allocation7 + $0x94] ss:$8 sps:$4 sm:$0xff]  }
 0x1ed   : > { %1530 = vmatpush1.bf16.msra.mxu0 %v12522_v8  ;;  %v14450_v38 = vld [vmem:[%s14386_s10 + $0x20] sm:$0xff]   ;;  %v12581_v41 = vld [vmem:[#allocation7 + $0x90] ss:$8 sps:$4 sm:$0xff]   ;;  %v12593_v47 = vld [vmem:[#allocation7 + $0xb4] ss:$8 sps:$4 sm:$0xff]   ;;  %s18286_s19 = sld [smem:[#allocation93_spill]] }
 0x1ee   : > { %1531 = vmatprep.subr.bf16.mxu0 %v12523_v9  ;;  %v12588_v42 = vld [vmem:[#allocation7 + $0xa4] ss:$8 sps:$4 sm:$0xff]   ;;  %v12586_v44 = vld [vmem:[#allocation7 + $0xa0] ss:$8 sps:$4 sm:$0xff]   ;;  %v14460_v45 = vld [vmem:[%s14386_s10 + $0x30] sm:$0xff]   ;;  %s18448_s28 = sld [smem:[#allocation95_spill]] }
 0x1ef   : > { %v12591_v46 = vld [vmem:[#allocation7 + $0xb0] ss:$8 sps:$4 sm:$0xff]   ;;  %v14470_v51 = vld [vmem:[%s14386_s10 + $0x40] sm:$0xff]   ;;  %v12605_v56 = vld [vmem:[#allocation6 + $0x4c] ss:$16 sps:$4 sm:$0xff]   ;;  %s18487_s11 = sld [smem:[#allocation97_spill]] }
 0x1f0   : > { %v12599_v52 = vld [vmem:[#allocation7 + $0xc0] ss:$8 sps:$4 sm:$0xff]   ;;  %v12601_v53 = vld [vmem:[#allocation7 + $0xc4] ss:$8 sps:$4 sm:$0xff]   ;;  %v14480_v63 = vld [vmem:[%s14386_s10 + $0x50] sm:$0xff]   ;;  %s11486_s4 = sshll.u32 %s18266_s14, 6 }
 0x1f1   : > { %1532 = vmatpush1.bf16.msra.mxu0 %v12525_v10  ;;  %v12604_v55 = vld [vmem:[#allocation6 + $0x28] ss:$16 sps:$4 sm:$0xff]   ;;  %v12609_v59 = vld [vmem:[#allocation6 + $0x6c] ss:$16 sps:$4 sm:$0xff]   ;;  %v14490_v10 = vld [vmem:[%s14386_s10 + $0x60] sm:$0xff]   ;;  %p17773_p5 = scmp.lt.s32.totalorder %s11486_s4, 127 }
 0x1f2   : > { %1533 = vmatprep.subr.bf16.mxu0 %v12526_v11  ;;  %v14475_v57 = vld [vmem:[%s14386_s10 + $0x48] sm:$0xff]   ;;  %1879 = vmatpush1.bf16.msra.mxu1 %v12604_v55  ;;  %v12616_v1 = vld [vmem:[#allocation7 + $0xd0] ss:$8 sps:$4 sm:$0xff]   ;;  %v12618_v2 = vld [vmem:[#allocation7 + $0xd4] ss:$8 sps:$4 sm:$0xff]   ;;  %vm10848_vm0 = vcmask 23552  }
 0x1f3   : > { %v12607_v58 = vld [vmem:[#allocation6 + $0x48] ss:$16 sps:$4 sm:$0xff]   ;;  %1880 = vmatprep.subr.bf16.mxu1 %v12605_v56  ;;  %v12612_v61 = vld [vmem:[#allocation6 + $0x8c] ss:$16 sps:$4 sm:$0xff]   ;;  %s18498_s4 = smov (!%p17773_p5, %s11486_s4), 127  ;;  %vm11169_vm1 = vcmask 31768  }
 0x1f4   : > { %v12611_v60 = vld [vmem:[#allocation6 + $0x68] ss:$16 sps:$4 sm:$0xff]   ;;  %v12619_v3 = vld [vmem:[#allocation6 + $0xac] ss:$16 sps:$4 sm:$0xff]   ;;  %s11487_s14 = sshll.u32 %s18498_s4, 3 }
 0x1f5   : > { %1534 = vmatpush1.bf16.msra.mxu0 %v12528_v12  ;;  %v12614_v62 = vld [vmem:[#allocation6 + $0x88] ss:$16 sps:$4 sm:$0xff]   ;;  %v12622_v6 = vld [vmem:[#allocation6 + $0xcc] ss:$16 sps:$4 sm:$0xff]  }
 0x1f6   : > { %1535 = vmatprep.subr.bf16.mxu0 %v12529_v13  ;;  %1881 = vmatpush1.bf16.msra.mxu1 %v12607_v58  ;;  %v12621_v4 = vld [vmem:[#allocation6 + $0xa8] ss:$16 sps:$4 sm:$0xff]   ;;  %v12626_v8 = vld [vmem:[#allocation6 + $0xec] ss:$16 sps:$4 sm:$0xff]  }
 0x1f7   : > { %1882 = vmatprep.subr.bf16.mxu1 %v12609_v59  ;;  %v14485_v5 = vld [vmem:[%s14386_s10 + $0x58] sm:$0xff]   ;;  %v12629_v11 = vld [vmem:[#allocation9] ss:$8 sps:$4 sm:$0xff]   ;;  %v12631_v12 = vld [vmem:[#allocation9 + $0x4] ss:$8 sps:$4 sm:$0xff]  }
 0x1f8   : > { %v12624_v7 = vld [vmem:[#allocation6 + $0xc8] ss:$16 sps:$4 sm:$0xff]  }
 0x1f9   : > { %1536 = vmatpush1.bf16.msra.mxu0 %v12531_v14  ;;  %v12628_v9 = vld [vmem:[#allocation6 + $0xe8] ss:$16 sps:$4 sm:$0xff]  }
 0x1fa   : > { %1537 = vmatprep.subr.bf16.mxu0 %v12532_v15  ;;  %1883 = vmatpush1.bf16.msra.mxu1 %v12611_v60  ;;  %v12633_v13 = vld [vmem:[#allocation7 + $0xe0] ss:$8 sps:$4 sm:$0xff]   ;;  %v12635_v15 = vld [vmem:[#allocation7 + $0xe4] ss:$8 sps:$4 sm:$0xff]   ;;  %v12660_v50 = vld [vmem:[#allocation9 + $0x70] ss:$8 sps:$4 sm:$0xff]  }
 0x1fb   : > { %1884 = vmatprep.subr.bf16.mxu1 %v12612_v61  ;;  %v14497_v14 = vld [vmem:[%s14386_s10 + $0x68] sm:$0xff]   ;;  %v14613_v55 = vld [vmem:[%s14386_s10 + $0xd8] sm:$0xff]  }
 0x1fd   : > { %1538 = vmatpush1.bf16.msra.mxu0 %v12534_v16  ;;  %v14504_v16 = vld [vmem:[%s14386_s10 + $0x70] sm:$0xff]  }
 0x1fe   : > { %2765 = vmatprep.subr.bf16.mxu0 %v12538_v17  ;;  %1885 = vmatpush1.bf16.msra.mxu1 %v12614_v62  ;;  %v12637_v17 = vld [vmem:[#allocation9 + $0x10] ss:$8 sps:$4 sm:$0xff]  }
 0x1ff   : > { %1886 = vmatprep.subr.bf16.mxu1 %v12619_v3 }
 0x200   : > { %1556 = vmatmul.mubr.bf16.vlgmr.msra.gmra.mrb[0].mxu0 %v14430_v18 }
 0x201   : > { %2766 = vmatpush1.bf16.msra.mxu0 %v12536_v19  ;;  %1565 = vmatprep.mubr.bf16.mxu0 %v18177_v0  ;;  %v12641_v19 = vld [vmem:[#allocation7 + $0xf0] ss:$8 sps:$4 sm:$0xff]  }
 0x202   : > { %2767 = vmatprep.subr.bf16.mxu0 %v12543_v20  ;;  %1887 = vmatpush1.bf16.msra.mxu1 %v12621_v4  ;;  %v14511_v20 = vld [vmem:[%s14386_s10 + $0x78] sm:$0xff]  }
 0x203   : > { %1888 = vmatprep.subr.bf16.mxu1 %v12622_v6 }
 0x205   : > { %2768 = vmatpush1.bf16.msra.mxu0 %v12541_v21  ;;  %v12643_v21 = vld [vmem:[#allocation7 + $0xf4] ss:$8 sps:$4 sm:$0xff]  }
 0x206   : > { %2769 = vmatprep.subr.bf16.mxu0 %v12548_v22  ;;  %1889 = vmatpush1.bf16.msra.mxu1 %v12624_v7  ;;  %v14518_v22 = vld [vmem:[%s14386_s10 + $0x80] sm:$0xff]  }
 0x207   : > { %1890 = vmatprep.subr.bf16.mxu1 %v12626_v8  ;;  %v14628_v7 = vld [vmem:[%s14386_s10 + $0xe0] sm:$0xff]  }
 0x208   : > { %1566 = vmatmul.mubr.bf16.gmra.mrb[4].mxu0 %v14435_v23 }
 0x209   : > { %1575 = vmatprep.mubr.bf16.mxu0 %v18177_v0  ;;  %2770 = vmatpush1.bf16.msra.mxu0 %v12546_v24  ;;  %v12647_v24 = vld [vmem:[#allocation9 + $0x24] ss:$8 sps:$4 sm:$0xff]  }
 0x20a   : > { %2771 = vmatprep.subr.bf16.mxu0 %v12553_v25  ;;  %1891 = vmatpush1.bf16.msra.mxu1 %v12628_v9  ;;  %v14525_v25 = vld [vmem:[%s14386_s10 + $0x88] sm:$0xff]  }
 0x20b   : > { %3514 = vmatprep.subr.bf16.mxu1 %v12631_v12 }
 0x20d   : > { %2772 = vmatpush1.bf16.msra.mxu0 %v12551_v26  ;;  %1909 = vmatmul.mubr.bf16.vlgmr.msra.gmra.mrb[0].mxu1 %v14430_v18  ;;  %v12639_v18 = vld [vmem:[#allocation9 + $0x14] ss:$8 sps:$4 sm:$0xff]  }
 0x20e   : > { %2773 = vmatprep.subr.bf16.mxu0 %v12558_v27  ;;  %1918 = vmatprep.mubr.bf16.mxu1 %v18177_v0  ;;  %v14532_v26 = vld [vmem:[%s14386_s10 + $0x90] sm:$0xff]  }
 0x20f   : > { %3515 = vmatpush1.bf16.msra.mxu1 %v12629_v11  ;;  %v12648_v27 = vld [vmem:[#allocation9 + $0x30] ss:$8 sps:$4 sm:$0xff]  }
 0x210   : > { %1576 = vmatmul.mubr.bf16.gmra.mrb[8].mxu0 %v14440_v28  ;;  %3516 = vmatprep.subr.bf16.mxu1 %v12639_v18  ;;  %v12665_v18 = vld [vmem:[#allocation9 + $0x84] ss:$8 sps:$4 sm:$0xff]  }
 0x211   : > { %1585 = vmatprep.mubr.bf16.mxu0 %v18177_v0  ;;  %2774 = vmatpush1.bf16.msra.mxu0 %v12556_v29  ;;  %v14539_v29 = vld [vmem:[%s14386_s10 + $0x98] sm:$0xff]  }
 0x212   : > { %2775 = vmatprep.subr.bf16.mxu0 %v12563_v30  ;;  %v14546_v30 = vld [vmem:[%s14386_s10 + $0xa0] sm:$0xff]  }
 0x213   : > { %3517 = vmatpush1.bf16.msra.mxu1 %v12637_v17  ;;  %v12663_v17 = vld [vmem:[#allocation9 + $0x80] ss:$8 sps:$4 sm:$0xff]  }
 0x214   : > { %3518 = vmatprep.subr.bf16.mxu1 %v12647_v24  ;;  %v14643_v24 = vld [vmem:[%s14386_s10 + $0xe8] sm:$0xff]  }
 0x215   : > { %2776 = vmatpush1.bf16.msra.mxu0 %v12561_v31  ;;  %1919 = vmatmul.mubr.bf16.gmra.mrb[4].mxu1 %v14435_v23  ;;  %v12645_v23 = vld [vmem:[#allocation9 + $0x20] ss:$8 sps:$4 sm:$0xff]  }
 0x216   : > { %2777 = vmatprep.subr.bf16.mxu0 %v12568_v32  ;;  %1928 = vmatprep.mubr.bf16.mxu1 %v18177_v0  ;;  %v12651_v31 = vld [vmem:[#allocation9 + $0x40] ss:$8 sps:$4 sm:$0xff]   ;;  %v12653_v32 = vld [vmem:[#allocation9 + $0x44] ss:$8 sps:$4 sm:$0xff]  }
 0x217   : > { %3519 = vmatpush1.bf16.msra.mxu1 %v12645_v23 }
 0x218   : > { %1586 = vmatmul.mubr.bf16.gmra.mrb[12].mxu0 %v14445_v33 }
 0x219   : > { %1595 = vmatprep.mubr.bf16.mxu0 %v18177_v0  ;;  %2778 = vmatpush1.bf16.msra.mxu0 %v12566_v34  ;;  %v14560_v34 = vld [vmem:[%s14386_s10 + $0xb0] sm:$0xff]  }
 0x21a   : > { %2779 = vmatprep.subr.bf16.mxu0 %v12573_v35  ;;  %v12654_v35 = vld [vmem:[#allocation9 + $0x50] ss:$8 sps:$4 sm:$0xff]  }
 0x21d   : > { %2780 = vmatpush1.bf16.msra.mxu0 %v12571_v36  ;;  %1929 = vmatmul.mubr.bf16.gmra.mrb[8].mxu1 %v14440_v28  ;;  %v12650_v28 = vld [vmem:[#allocation9 + $0x34] ss:$8 sps:$4 sm:$0xff]  }
 0x21e   : > { %2781 = vmatprep.subr.bf16.mxu0 %v12578_v37  ;;  %1938 = vmatprep.mubr.bf16.mxu1 %v18177_v0  ;;  %v12656_v36 = vld [vmem:[#allocation9 + $0x54] ss:$8 sps:$4 sm:$0xff]  }
 0x21f   : > { %3520 = vmatprep.subr.bf16.mxu1 %v12650_v28  ;;  %v14567_v37 = vld [vmem:[%s14386_s10 + $0xb8] sm:$0xff]  }
 0x220   : > { %1596 = vmatmul.mubr.bf16.gmra.mrb[16].mxu0 %v14450_v38  ;;  %3521 = vmatpush1.bf16.msra.mxu1 %v12648_v27 }
 0x221   : > { %1605 = vmatprep.mubr.bf16.mxu0 %v18177_v0  ;;  %2782 = vmatpush1.bf16.msra.mxu0 %v12576_v39  ;;  %v12657_v39 = vld [vmem:[#allocation9 + $0x60] ss:$8 sps:$4 sm:$0xff]  }
 0x222   : > { %2783 = vmatprep.subr.bf16.mxu0 %v12583_v40  ;;  %3522 = vmatprep.subr.bf16.mxu1 %v12653_v32  ;;  %v12659_v40 = vld [vmem:[#allocation9 + $0x64] ss:$8 sps:$4 sm:$0xff]  }
 0x224   : > { %3523 = vmatpush1.bf16.msra.mxu1 %v12651_v31 }
 0x225   : > { %2784 = vmatpush1.bf16.msra.mxu0 %v12581_v41  ;;  %1939 = vmatmul.mubr.bf16.gmra.mrb[12].mxu1 %v14445_v33  ;;  %v14553_v33 = vld [vmem:[%s14386_s10 + $0xa8] sm:$0xff]  }
 0x226   : > { %2785 = vmatprep.subr.bf16.mxu0 %v12588_v42  ;;  %1948 = vmatprep.mubr.bf16.mxu1 %v18177_v0  ;;  %v14581_v41 = vld [vmem:[%s14386_s10 + $0xc8] sm:$0xff]   ;;  %v2231_v42 = vlaneseq }
 0x227   : > { %3524 = vmatprep.subr.bf16.mxu1 %v12656_v36 }
 0x228   : > { %1606 = vmatmul.mubr.bf16.gmra.mrb[20].mxu0 %v14455_v43  ;;  %3525 = vmatpush1.bf16.msra.mxu1 %v12654_v35 }
 0x229   : > { %1615 = vmatprep.mubr.bf16.mxu0 %v18177_v0  ;;  %2786 = vmatpush1.bf16.msra.mxu0 %v12586_v44  ;;  %v14590_v44 = vld [vmem:[%s14386_s10 + $0xd0] sm:$0xff]  }
 0x22a   : > { %2787 = vmatprep.subr.bf16.mxu0 %v12593_v47  ;;  %3526 = vmatprep.subr.bf16.mxu1 %v12659_v40 }
 0x22c   : > { %3527 = vmatpush1.bf16.msra.mxu1 %v12657_v39 }
 0x22d   : > { %2788 = vmatpush1.bf16.msra.mxu0 %v12591_v46  ;;  %1949 = vmatmul.mubr.bf16.gmra.mrb[16].mxu1 %v14450_v38  ;;  %v14574_v38 = vld [vmem:[%s14386_s10 + $0xc0] sm:$0xff]  }
 0x22e   : > { %2789 = vmatprep.subr.bf16.mxu0 %v12601_v53  ;;  %1958 = vmatprep.mubr.bf16.mxu1 %v18177_v0  ;;  %v2229_v46 = vld [vmem:[%s18281_s22] sm:$0x3]  ;;  %s13828_s22 = smov 3  }
 0x230   : > { %1616 = vmatmul.mubr.bf16.gmra.mrb[24].mxu0 %v14460_v45 }
 0x231   : > { %1625 = vmatprep.mubr.bf16.mxu0 %v18177_v0  ;;  %2790 = vmatpush1.bf16.msra.mxu0 %v12599_v52 }
 0x232   : > { %2791 = vmatprep.subr.bf16.mxu0 %v12618_v2 }
 0x235   : > { %2792 = vmatpush1.bf16.msra.mxu0 %v12616_v1  ;;  %1959 = vmatmul.mubr.bf16.gmra.mrb[20].mxu1 %v14455_v43  ;;  %v14586_v43 = vshrl.u32 %v2231_v42, 7 }
 0x236   : > { %2793 = vmatprep.subr.bf16.mxu0 %v12635_v15  ;;  %1968 = vmatprep.mubr.bf16.mxu1 %v18177_v0 }
 0x237   : > { %v14599_v47 = vsub.s32 1, %v14586_v43 }
 0x238   : > { %1626 = vmatmul.mubr.bf16.gmra.mrb[28].mxu0 %v14465_v48 }
 0x239   : > { %1635 = vmatprep.mubr.bf16.mxu0 %v18177_v0  ;;  %2794 = vmatpush1.bf16.msra.mxu0 %v12633_v13  ;;  %v14608_v49 = vrot.slane %v2229_v46, %v14599_v47 }
 0x23a   : > { %2795 = vmatprep.subr.bf16.mxu0 %v12643_v21 }
 0x23d   : > { %2796 = vmatpush1.bf16.msra.mxu0 %v12641_v19  ;;  %1969 = vmatmul.mubr.bf16.gmra.mrb[24].mxu1 %v14460_v45  ;;  %v14593_v45 = vsub.s32 0, %v14586_v43 }
 0x23e   : > { %1978 = vmatprep.mubr.bf16.mxu1 %v18177_v0 }
 0x240   : > { %1636 = vmatmul.mubr.bf16.gmra.mrb[32].mxu0 %v14470_v51 }
 0x241   : > { %1645 = vmatprep.mubr.bf16.mxu0 %v18177_v0 }
 0x245   : > { %1979 = vmatmul.mubr.bf16.gmra.mrb[28].mxu1 %v14465_v48  ;;  %v14605_v48 = vrot.slane %v2229_v46, %v14593_v45 }
 0x246   : > { %1988 = vmatprep.mubr.bf16.mxu1 %v18177_v0 }
 0x248   : > { %1646 = vmatmul.mubr.bf16.gmra.mrb[36].mxu0 %v14475_v57 }
 0x249   : > { %1655 = vmatprep.mubr.bf16.mxu0 %v18177_v0 }
 0x24d   : > { %1989 = vmatmul.mubr.bf16.gmra.mrb[32].mxu1 %v14470_v51  ;;  %v12662_v51 = vld [vmem:[#allocation9 + $0x74] ss:$8 sps:$4 sm:$0xff]  }
 0x24e   : > { %1998 = vmatprep.mubr.bf16.mxu1 %v18177_v0  ;;  %3528 = vmatprep.subr.bf16.mxu1 %v12662_v51 }
 0x24f   : > { %3529 = vmatpush1.bf16.msra.mxu1 %v12660_v50 }
 0x250   : > { %1656 = vmatmul.mubr.bf16.gmra.mrb[40].mxu0 %v14480_v63  ;;  %3530 = vmatprep.subr.bf16.mxu1 %v12665_v18 }
 0x251   : > { %1665 = vmatprep.mubr.bf16.mxu0 %v18177_v0 }
 0x253   : > { %3531 = vmatpush1.bf16.msra.mxu1 %v12663_v17 }
 0x255   : > { %1999 = vmatmul.mubr.bf16.gmra.mrb[36].mxu1 %v14475_v57 }
 0x256   : > { %2008 = vmatprep.mubr.bf16.mxu1 %v18177_v0 }
 0x258   : > { %1666 = vmatmul.mubr.bf16.gmra.mrb[44].mxu0 %v14485_v5 }
 0x259   : > { %1675 = vmatprep.mubr.bf16.mxu0 %v18177_v0 }
 0x25d   : > { %2009 = vmatmul.mubr.bf16.gmra.mrb[40].mxu1 %v14480_v63 }
 0x25e   : > { %2018 = vmatprep.mubr.bf16.mxu1 %v18177_v0 }
 0x260   : > { %1676 = vmatmul.mubr.bf16.gmra.mrb[48].mxu0 %v14490_v10 }
 0x261   : > { %1685 = vmatprep.mubr.bf16.mxu0 %v18177_v0 }
 0x265   : > { %2019 = vmatmul.mubr.bf16.gmra.mrb[44].mxu1 %v14485_v5 }
 0x266   : > { %2028 = vmatprep.mubr.bf16.mxu1 %v18177_v0 }
 0x268   : > { %1686 = vmatmul.mubr.bf16.gmra.mrb[52].mxu0 %v14497_v14 }
 0x269   : > { %1695 = vmatprep.mubr.bf16.mxu0 %v18177_v0 }
 0x26d   : > { %2029 = vmatmul.mubr.bf16.gmra.mrb[48].mxu1 %v14490_v10 }
 0x26e   : > { %2038 = vmatprep.mubr.bf16.mxu1 %v18177_v0 }
 0x270   : > { %1696 = vmatmul.mubr.bf16.gmra.mrb[56].mxu0 %v14504_v16 }
 0x271   : > { %1705 = vmatprep.mubr.bf16.mxu0 %v18177_v0 }
 0x275   : > { %2039 = vmatmul.mubr.bf16.gmra.mrb[52].mxu1 %v14497_v14 }
 0x276   : > { %2048 = vmatprep.mubr.bf16.mxu1 %v18177_v0 }
 0x278   : > { %1706 = vmatmul.mubr.bf16.gmra.mrb[60].mxu0 %v14511_v20 }
 0x279   : > { %1715 = vmatprep.mubr.bf16.mxu0 %v18177_v0 }
 0x27d   : > { %2049 = vmatmul.mubr.bf16.gmra.mrb[56].mxu1 %v14504_v16 }
 0x27e   : > { %2058 = vmatprep.mubr.bf16.mxu1 %v18177_v0 }
 0x280   : > { %1716 = vmatmul.mubr.bf16.gmra.mrb[64].mxu0 %v14518_v22 }
 0x281   : > { %1725 = vmatprep.mubr.bf16.mxu0 %v18177_v0 }
 0x285   : > { %2059 = vmatmul.mubr.bf16.gmra.mrb[60].mxu1 %v14511_v20 }
 0x286   : > { %2068 = vmatprep.mubr.bf16.mxu1 %v18177_v0 }
 0x288   : > { %1726 = vmatmul.mubr.bf16.gmra.mrb[68].mxu0 %v14525_v25 }
 0x289   : > { %1735 = vmatprep.mubr.bf16.mxu0 %v18177_v0 }
 0x28d   : > { %2069 = vmatmul.mubr.bf16.gmra.mrb[64].mxu1 %v14518_v22 }
 0x28e   : > { %2078 = vmatprep.mubr.bf16.mxu1 %v18177_v0 }
 0x290   : > { %1736 = vmatmul.mubr.bf16.gmra.mrb[72].mxu0 %v14532_v26 }
 0x291   : > { %1745 = vmatprep.mubr.bf16.mxu0 %v18177_v0 }
 0x295   : > { %2079 = vmatmul.mubr.bf16.gmra.mrb[68].mxu1 %v14525_v25 }
 0x296   : > { %2088 = vmatprep.mubr.bf16.mxu1 %v18177_v0 }
 0x298   : > { %1746 = vmatmul.mubr.bf16.gmra.mrb[76].mxu0 %v14539_v29 }
 0x299   : > { %1755 = vmatprep.mubr.bf16.mxu0 %v18177_v0 }
 0x29d   : > { %2089 = vmatmul.mubr.bf16.gmra.mrb[72].mxu1 %v14532_v26 }
 0x29e   : > { %2098 = vmatprep.mubr.bf16.mxu1 %v18177_v0 }
 0x2a0   : > { %1756 = vmatmul.mubr.bf16.gmra.mrb[80].mxu0 %v14546_v30 }
 0x2a1   : > { %1765 = vmatprep.mubr.bf16.mxu0 %v18177_v0 }
 0x2a5   : > { %2099 = vmatmul.mubr.bf16.gmra.mrb[76].mxu1 %v14539_v29 }
 0x2a6   : > { %2108 = vmatprep.mubr.bf16.mxu1 %v18177_v0 }
 0x2a8   : > { %1766 = vmatmul.mubr.bf16.gmra.mrb[84].mxu0 %v14553_v33 }
 0x2a9   : > { %1775 = vmatprep.mubr.bf16.mxu0 %v18177_v0 }
 0x2ad   : > { %2109 = vmatmul.mubr.bf16.gmra.mrb[80].mxu1 %v14546_v30 }
 0x2ae   : > { %2118 = vmatprep.mubr.bf16.mxu1 %v18177_v0 }
 0x2b0   : > { %1776 = vmatmul.mubr.bf16.gmra.mrb[88].mxu0 %v14560_v34 }
 0x2b1   : > { %1785 = vmatprep.mubr.bf16.mxu0 %v18177_v0 }
 0x2b5   : > { %2119 = vmatmul.mubr.bf16.gmra.mrb[84].mxu1 %v14553_v33 }
 0x2b6   : > { %2128 = vmatprep.mubr.bf16.mxu1 %v18177_v0 }
 0x2b8   : > { %1786 = vmatmul.mubr.bf16.gmra.mrb[92].mxu0 %v14567_v37 }
 0x2b9   : > { %1795 = vmatprep.mubr.bf16.mxu0 %v18177_v0 }
 0x2bd   : > { %2129 = vmatmul.mubr.bf16.gmra.mrb[88].mxu1 %v14560_v34 }
 0x2be   : > { %2138 = vmatprep.mubr.bf16.mxu1 %v18177_v0 }
 0x2c0   : > { %1796 = vmatmul.mubr.bf16.gmra.mrb[96].mxu0 %v14574_v38 }
 0x2c1   : > { %1805 = vmatprep.mubr.bf16.mxu0 %v18177_v0 }
 0x2c5   : > { %2139 = vmatmul.mubr.bf16.gmra.mrb[92].mxu1 %v14567_v37 }
 0x2c6   : > { %2148 = vmatprep.mubr.bf16.mxu1 %v18177_v0 }
 0x2c8   : > { %1806 = vmatmul.mubr.bf16.gmra.mrb[100].mxu0 %v14581_v41 }
 0x2c9   : > { %1815 = vmatprep.mubr.bf16.mxu0 %v18177_v0 }
 0x2cd   : > { %2149 = vmatmul.mubr.bf16.gmra.mrb[96].mxu1 %v14574_v38 }
 0x2ce   : > { %2158 = vmatprep.mubr.bf16.mxu1 %v18177_v0 }
 0x2d0   : > { %1816 = vmatmul.mubr.bf16.gmra.mrb[104].mxu0 %v14590_v44 }
 0x2d1   : > { %1825 = vmatprep.mubr.bf16.mxu0 %v18177_v0 }
 0x2d3   : > { %v1557_v52 = vpop.f32.mrb[0].mxu0 }
 0x2d4   : > { %v2241_v53 = vadd.f32 %v14605_v48, %v1557_v52  ;;  %v1559_v54 = vpop.f32.mrb[1].mxu0 }
 0x2d5   : > { %v2242_v56 = vadd.f32 %v14608_v49, %v1559_v54  ;;  %v1561_v57 = vpop.f32.mrb[2].mxu0  ;;  %2159 = vmatmul.mubr.bf16.gmra.mrb[100].mxu1 %v14581_v41 }
 0x2d6   : > { %v2243_v58 = vadd.f32 %v14605_v48, %v1561_v57  ;;  %v1563_v59 = vpop.f32.mrb[3].mxu0  ;;  %v2369_v61 = vmax.f32 %v2241_v53, 0.0  ;;  %v14658_v53 = vld [vmem:[%s14386_s10 + $0xf0] sm:$0xff]   ;;  %2168 = vmatprep.mubr.bf16.mxu1 %v18177_v0 }
 0x2d7   : > { %v2244_v60 = vadd.f32 %v14608_v49, %v1563_v59  ;;  %v2370_v63 = vmax.f32 %v2242_v56, 0.0 }
 0x2d8   : > { %v2371_v62 = vmax.f32 %v2243_v58, 0.0  ;;  %1826 = vmatmul.mubr.bf16.gmra.mrb[108].mxu0 %v14613_v55 }
 0x2d9   : > { %v2372_v1 = vmax.f32 %v2244_v60, 0.0  ;;  %1835 = vmatprep.mubr.bf16.mxu0 %v18177_v0 }
 0x2da   : > { %v14622_v2 = vpack.c.bf16 %v2371_v62, %v2369_v61 }
 0x2db   : > { %v1567_v3 = vpop.f32.mrb[4].mxu0  ;;  %v14624_v4 = vpack.c.bf16 %v2372_v1, %v2370_v63  ;;  %v12666_v1 = vld [vmem:[#allocation9 + $0x90] ss:$8 sps:$4 sm:$0xff]  }
 0x2dc   : > { %v2245_v5 = vadd.f32 %v14605_v48, %v1567_v3  ;;  %v1569_v6 = vpop.f32.mrb[5].mxu0  ;;  %v12668_v3 = vld [vmem:[#allocation9 + $0x94] ss:$8 sps:$4 sm:$0xff]  }
 0x2dd   : > { %v2246_v8 = vadd.f32 %v14608_v49, %v1569_v6  ;;  %v1571_v9 = vpop.f32.mrb[6].mxu0  ;;  %3532 = vmatprep.subr.bf16.mxu1 %v12668_v3  ;;  %2169 = vmatmul.mubr.bf16.gmra.mrb[104].mxu1 %v14590_v44 }
 0x2de   : > { %v2247_v10 = vadd.f32 %v14605_v48, %v1571_v9  ;;  %v1573_v11 = vpop.f32.mrb[7].mxu0  ;;  %v2373_v13 = vmax.f32 %v2245_v5, 0.0  ;;  %3533 = vmatpush1.bf16.msra.mxu1 %v12666_v1  ;;  %2178 = vmatprep.mubr.bf16.mxu1 %v18177_v0 }
 0x2df   : > { %v2248_v12 = vadd.f32 %v14608_v49, %v1573_v11  ;;  %v2374_v15 = vmax.f32 %v2246_v8, 0.0 }
 0x2e0   : > { %v2375_v14 = vmax.f32 %v2247_v10, 0.0  ;;  %1836 = vmatmul.mubr.bf16.gmra.mrb[112].mxu0 %v14628_v7  ;;  %v14673_v10 = vld [vmem:[%s14386_s10 + $0xf8] sm:$0xff]  }
 0x2e1   : > { %v2376_v16 = vmax.f32 %v2248_v12, 0.0  ;;  %1845 = vmatprep.mubr.bf16.mxu0 %v18177_v0 }
 0x2e2   : > { %v14637_v19 = vpack.c.bf16 %v2375_v14, %v2373_v13 }
 0x2e3   : > { %v1577_v20 = vpop.f32.mrb[8].mxu0  ;;  %v14639_v21 = vpack.c.bf16 %v2376_v16, %v2374_v15 }
 0x2e4   : > { %v2249_v22 = vadd.f32 %v14605_v48, %v1577_v20  ;;  %v1579_v23 = vpop.f32.mrb[9].mxu0 }
 0x2e5   : > { %v2250_v27 = vadd.f32 %v14608_v49, %v1579_v23  ;;  %v1581_v28 = vpop.f32.mrb[10].mxu0  ;;  %2179 = vmatmul.mubr.bf16.gmra.mrb[108].mxu1 %v14613_v55 }
 0x2e6   : > { %v2251_v31 = vadd.f32 %v14605_v48, %v1581_v28  ;;  %v1583_v32 = vpop.f32.mrb[11].mxu0  ;;  %v2377_v36 = vmax.f32 %v2249_v22, 0.0  ;;  %2188 = vmatprep.mubr.bf16.mxu1 %v18177_v0 }
 0x2e7   : > { %v2252_v35 = vadd.f32 %v14608_v49, %v1583_v32  ;;  %v2378_v40 = vmax.f32 %v2250_v27, 0.0 }
 0x2e8   : > { %v2379_v39 = vmax.f32 %v2251_v31, 0.0  ;;  %1846 = vmatmul.mubr.bf16.gmra.mrb[116].mxu0 %v14643_v24 }
 0x2e9   : > { %v2380_v42 = vmax.f32 %v2252_v35, 0.0  ;;  %1855 = vmatprep.mubr.bf16.mxu0 %v18177_v0 }
 0x2ea   : > { %v14652_v46 = vpack.c.bf16 %v2379_v39, %v2377_v36 }
 0x2eb   : > { %v1587_v50 = vpop.f32.mrb[12].mxu0  ;;  %v14654_v51 = vpack.c.bf16 %v2380_v42, %v2378_v40 }
 0x2ec   : > { %v2253_v52 = vadd.f32 %v14605_v48, %v1587_v50  ;;  %v1589_v25 = vpop.f32.mrb[13].mxu0 }
 0x2ed   : > { %v2254_v54 = vadd.f32 %v14608_v49, %v1589_v25  ;;  %v1591_v56 = vpop.f32.mrb[14].mxu0  ;;  %v12671_v25 = vld [vmem:[#allocation9 + $0xa4] ss:$8 sps:$4 sm:$0xff]   ;;  %2189 = vmatmul.mubr.bf16.gmra.mrb[112].mxu1 %v14628_v7 }
 0x2ee   : > { %v2255_v57 = vadd.f32 %v14605_v48, %v1591_v56  ;;  %v1593_v58 = vpop.f32.mrb[15].mxu0  ;;  %v2381_v60 = vmax.f32 %v2253_v52, 0.0  ;;  %v12669_v52 = vld [vmem:[#allocation9 + $0xa0] ss:$8 sps:$4 sm:$0xff]   ;;  %3534 = vmatprep.subr.bf16.mxu1 %v12671_v25  ;;  %2198 = vmatprep.mubr.bf16.mxu1 %v18177_v0 }
 0x2ef   : > { %v2256_v59 = vadd.f32 %v14608_v49, %v1593_v58  ;;  %v2382_v62 = vmax.f32 %v2254_v54, 0.0  ;;  %3535 = vmatpush1.bf16.msra.mxu1 %v12669_v52 }
 0x2f0   : > { %v2383_v61 = vmax.f32 %v2255_v57, 0.0  ;;  %1856 = vmatmul.mubr.bf16.gmra.mrb[120].mxu0 %v14658_v53 }
 0x2f1   : > { %v2384_v63 = vmax.f32 %v2256_v59, 0.0  ;;  %1865 = vmatprep.mubr.bf16.mxu0 %v18177_v0 }
 0x2f2   : > { %v14667_v5 = vpack.c.bf16 %v2383_v61, %v2381_v60 }
 0x2f3   : > { %v1597_v6 = vpop.f32.mrb[16].mxu0  ;;  %v14669_v8 = vpack.c.bf16 %v2384_v63, %v2382_v62 }
 0x2f4   : > { %v2257_v26 = vadd.f32 %v14605_v48, %v1597_v6  ;;  %v1599_v9 = vpop.f32.mrb[17].mxu0 }
 0x2f5   : > { %v2258_v11 = vadd.f32 %v14608_v49, %v1599_v9  ;;  %v1601_v12 = vpop.f32.mrb[18].mxu0  ;;  %2199 = vmatmul.mubr.bf16.gmra.mrb[116].mxu1 %v14643_v24 }
 0x2f6   : > { %v2259_v13 = vadd.f32 %v14605_v48, %v1601_v12  ;;  %v1603_v14 = vpop.f32.mrb[19].mxu0  ;;  %v2385_v16 = vmax.f32 %v2257_v26, 0.0  ;;  %2208 = vmatprep.mubr.bf16.mxu1 %v18177_v0 }
 0x2f7   : > { %v2260_v15 = vadd.f32 %v14608_v49, %v1603_v14  ;;  %v2386_v18 = vmax.f32 %v2258_v11, 0.0 }
 0x2f8   : > { %v2387_v17 = vmax.f32 %v2259_v13, 0.0  ;;  %1866 = vmatmul.mubr.bf16.gmra.mrb[124].mxu0 %v14673_v10 }
 0x2f9   : > { %v2388_v20 = vmax.f32 %v2260_v15, 0.0  ;;  %2797 = vmatprep.mubr.bf16.mxu0 %v14624_v4 }
 0x2fa   : > { %v14682_v22 = vpack.c.bf16 %v2387_v17, %v2385_v16 }
 0x2fb   : > { %v1607_v23 = vpop.f32.mrb[20].mxu0  ;;  %v14684_v27 = vpack.c.bf16 %v2388_v20, %v2386_v18  ;;  %v12672_v20 = vld [vmem:[#allocation9 + $0xb0] ss:$8 sps:$4 sm:$0xff]  }
 0x2fc   : > { %v2261_v28 = vadd.f32 %v14605_v48, %v1607_v23  ;;  %v1609_v29 = vpop.f32.mrb[21].mxu0  ;;  %v12674_v23 = vld [vmem:[#allocation9 + $0xb4] ss:$8 sps:$4 sm:$0xff]  }
 0x2fd   : > { %v2262_v31 = vadd.f32 %v14608_v49, %v1609_v29  ;;  %v1611_v32 = vpop.f32.mrb[22].mxu0  ;;  %3536 = vmatprep.subr.bf16.mxu1 %v12674_v23  ;;  %2209 = vmatmul.mubr.bf16.gmra.mrb[120].mxu1 %v14658_v53 }
 0x2fe   : > { %v2263_v35 = vadd.f32 %v14605_v48, %v1611_v32  ;;  %v1613_v36 = vpop.f32.mrb[23].mxu0  ;;  %v2389_v4 = vmax.f32 %v2261_v28, 0.0  ;;  %3537 = vmatpush1.bf16.msra.mxu1 %v12672_v20  ;;  %2218 = vmatprep.mubr.bf16.mxu1 %v18177_v0 }
 0x2ff   : > { %v2264_v39 = vadd.f32 %v14608_v49, %v1613_v36  ;;  %v2390_v42 = vmax.f32 %v2262_v31, 0.0 }
 0x300   : > { %v2391_v40 = vmax.f32 %v2263_v35, 0.0  ;;  %2798 = vmatmul.mubr.bf16.vlgmr.msra.gmra.mrb[128].mxu0 %v14622_v2 }
 0x301   : > { %v2392_v50 = vmax.f32 %v2264_v39, 0.0  ;;  %2807 = vmatprep.mubr.bf16.mxu0 %v14639_v21 }
 0x302   : > { %v14694_v54 = vpack.c.bf16 %v2391_v40, %v2389_v4 }
 0x303   : > { %v1617_v56 = vpop.f32.mrb[24].mxu0  ;;  %v14696_v57 = vpack.c.bf16 %v2392_v50, %v2390_v42 }
 0x304   : > { %v2265_v30 = vadd.f32 %v14605_v48, %v1617_v56  ;;  %v1619_v58 = vpop.f32.mrb[25].mxu0 }
 0x305   : > { %v2266_v59 = vadd.f32 %v14608_v49, %v1619_v58  ;;  %v1621_v60 = vpop.f32.mrb[26].mxu0  ;;  %2219 = vmatmul.mubr.bf16.gmra.mrb[124].mxu1 %v14673_v10 }
 0x306   : > { %v2267_v2 = vadd.f32 %v14605_v48, %v1621_v60  ;;  %v1623_v61 = vpop.f32.mrb[27].mxu0  ;;  %v2393_v62 = vmax.f32 %v2265_v30, 0.0 }
 0x307   : > { %v2268_v21 = vadd.f32 %v14608_v49, %v1623_v61  ;;  %v2394_v1 = vmax.f32 %v2266_v59, 0.0 }
 0x308   : > { %v2395_v63 = vmax.f32 %v2267_v2, 0.0  ;;  %2808 = vmatmul.mubr.bf16.gmra.mrb[132].mxu0 %v14637_v19 }
 0x309   : > { %v2396_v3 = vmax.f32 %v2268_v21, 0.0  ;;  %2817 = vmatprep.mubr.bf16.mxu0 %v14654_v51 }
 0x30a   : > { %v14706_v6 = vpack.c.bf16 %v2395_v63, %v2393_v62  ;;  %v12675_v63 = vld [vmem:[#allocation9 + $0xc0] ss:$8 sps:$4 sm:$0xff]  }
 0x30b   : > { %v1627_v26 = vpop.f32.mrb[28].mxu0  ;;  %v14708_v9 = vpack.c.bf16 %v2396_v3, %v2394_v1  ;;  %v12677_v1 = vld [vmem:[#allocation9 + $0xc4] ss:$8 sps:$4 sm:$0xff]  }
 0x30c   : > { %v2269_v11 = vadd.f32 %v14605_v48, %v1627_v26  ;;  %v1629_v33 = vpop.f32.mrb[29].mxu0  ;;  %3538 = vmatprep.subr.bf16.mxu1 %v12677_v1 }
 0x30d   : > { %v2270_v12 = vadd.f32 %v14608_v49, %v1629_v33  ;;  %v1631_v13 = vpop.f32.mrb[30].mxu0  ;;  %3539 = vmatpush1.bf16.msra.mxu1 %v12675_v63 }
 0x30e   : > { %v2271_v14 = vadd.f32 %v14605_v48, %v1631_v13  ;;  %v1633_v15 = vpop.f32.mrb[31].mxu0  ;;  %v2397_v51 = vmax.f32 %v2269_v11, 0.0 }
 0x30f   : > { %v2272_v19 = vadd.f32 %v14608_v49, %v1633_v15  ;;  %v2398_v17 = vmax.f32 %v2270_v12, 0.0 }
 0x310   : > { %v2399_v16 = vmax.f32 %v2271_v14, 0.0  ;;  %2818 = vmatmul.mubr.bf16.gmra.mrb[136].mxu0 %v14652_v46 }
 0x311   : > { %v2400_v18 = vmax.f32 %v2272_v19, 0.0  ;;  %2827 = vmatprep.mubr.bf16.mxu0 %v14669_v8 }
 0x312   : > { %v14718_v28 = vpack.c.bf16 %v2399_v16, %v2397_v51 }
 0x313   : > { %v1637_v29 = vpop.f32.mrb[32].mxu0  ;;  %v14720_v31 = vpack.c.bf16 %v2400_v18, %v2398_v17 }
 0x314   : > { %v2273_v34 = vadd.f32 %v14605_v48, %v1637_v29  ;;  %v1639_v32 = vpop.f32.mrb[33].mxu0 }
 0x315   : > { %v2274_v35 = vadd.f32 %v14608_v49, %v1639_v32  ;;  %v1641_v36 = vpop.f32.mrb[34].mxu0 }
 0x316   : > { %v2275_v46 = vadd.f32 %v14605_v48, %v1641_v36  ;;  %v1643_v39 = vpop.f32.mrb[35].mxu0  ;;  %v2401_v4 = vmax.f32 %v2273_v34, 0.0 }
 0x317   : > { %v2276_v8 = vadd.f32 %v14608_v49, %v1643_v39  ;;  %v2402_v42 = vmax.f32 %v2274_v35, 0.0 }
 0x318   : > { %v2403_v40 = vmax.f32 %v2275_v46, 0.0  ;;  %2828 = vmatmul.mubr.bf16.gmra.mrb[140].mxu0 %v14667_v5 }
 0x319   : > { %v2404_v50 = vmax.f32 %v2276_v8, 0.0  ;;  %2837 = vmatprep.mubr.bf16.mxu0 %v14684_v27  ;;  %v12678_v8 = vld [vmem:[#allocation9 + $0xd0] ss:$8 sps:$4 sm:$0xff]  }
 0x31a   : > { %v14730_v52 = vpack.c.bf16 %v2403_v40, %v2401_v4  ;;  %v12680_v4 = vld [vmem:[#allocation9 + $0xd4] ss:$8 sps:$4 sm:$0xff]  }
 0x31b   : > { %v1647_v25 = vpop.f32.mrb[36].mxu0  ;;  %v14732_v56 = vpack.c.bf16 %v2404_v50, %v2402_v42  ;;  %3540 = vmatprep.subr.bf16.mxu1 %v12680_v4 }
 0x31c   : > { %v2277_v30 = vadd.f32 %v14605_v48, %v1647_v25  ;;  %v1649_v37 = vpop.f32.mrb[37].mxu0  ;;  %3541 = vmatpush1.bf16.msra.mxu1 %v12678_v8 }
 0x31d   : > { %v2278_v58 = vadd.f32 %v14608_v49, %v1649_v37  ;;  %v1651_v59 = vpop.f32.mrb[38].mxu0 }
 0x31e   : > { %v2279_v60 = vadd.f32 %v14605_v48, %v1651_v59  ;;  %v1653_v2 = vpop.f32.mrb[39].mxu0  ;;  %v2405_v27 = vmax.f32 %v2277_v30, 0.0 }
 0x31f   : > { %v2280_v5 = vadd.f32 %v14608_v49, %v1653_v2  ;;  %v2406_v21 = vmax.f32 %v2278_v58, 0.0 }
 0x320   : > { %v2407_v61 = vmax.f32 %v2279_v60, 0.0  ;;  %2838 = vmatmul.mubr.bf16.gmra.mrb[144].mxu0 %v14682_v22 }
 0x321   : > { %v2408_v62 = vmax.f32 %v2280_v5, 0.0  ;;  %2847 = vmatprep.mubr.bf16.mxu0 %v14696_v57 }
 0x322   : > { %v14742_v3 = vpack.c.bf16 %v2407_v61, %v2405_v27 }
 0x323   : > { %v1657_v26 = vpop.f32.mrb[40].mxu0  ;;  %v14744_v11 = vpack.c.bf16 %v2408_v62, %v2406_v21 }
 0x324   : > { %v2281_v38 = vadd.f32 %v14605_v48, %v1657_v26  ;;  %v1659_v33 = vpop.f32.mrb[41].mxu0 }
 0x325   : > { %v2282_v12 = vadd.f32 %v14608_v49, %v1659_v33  ;;  %v1661_v13 = vpop.f32.mrb[42].mxu0  ;;  %v12681_v33 = vld [vmem:[#allocation10] ss:$8 sps:$4 sm:$0xff]  }
 0x326   : > { %v2283_v22 = vadd.f32 %v14605_v48, %v1661_v13  ;;  %v1663_v14 = vpop.f32.mrb[43].mxu0  ;;  %v2409_v15 = vmax.f32 %v2281_v38, 0.0 }
 0x327   : > { %v2284_v57 = vadd.f32 %v14608_v49, %v1663_v14  ;;  %v2410_v51 = vmax.f32 %v2282_v12, 0.0 }
 0x328   : > { %v2411_v19 = vmax.f32 %v2283_v22, 0.0  ;;  %2848 = vmatmul.mubr.bf16.gmra.mrb[148].mxu0 %v14694_v54 }
 0x329   : > { %v2412_v16 = vmax.f32 %v2284_v57, 0.0  ;;  %2857 = vmatprep.mubr.bf16.mxu0 %v14708_v9  ;;  %v12684_v57 = vld [vmem:[#allocation9 + $0xe0] ss:$8 sps:$4 sm:$0xff]  }
 0x32a   : > { %v14754_v17 = vpack.c.bf16 %v2411_v19, %v2409_v15  ;;  %v12686_v15 = vld [vmem:[#allocation9 + $0xe4] ss:$8 sps:$4 sm:$0xff]  }
 0x32b   : > { %v1667_v18 = vpop.f32.mrb[44].mxu0  ;;  %v14756_v20 = vpack.c.bf16 %v2412_v16, %v2410_v51  ;;  %3542 = vmatprep.subr.bf16.mxu1 %v12686_v15 }
 0x32c   : > { %v2285_v23 = vadd.f32 %v14605_v48, %v1667_v18  ;;  %v1669_v41 = vpop.f32.mrb[45].mxu0  ;;  %3543 = vmatpush1.bf16.msra.mxu1 %v12684_v57 }
 0x32d   : > { %v2286_v29 = vadd.f32 %v14608_v49, %v1669_v41  ;;  %v1671_v34 = vpop.f32.mrb[46].mxu0 }
 0x32e   : > { %v2287_v32 = vadd.f32 %v14605_v48, %v1671_v34  ;;  %v1673_v35 = vpop.f32.mrb[47].mxu0  ;;  %v2413_v9 = vmax.f32 %v2285_v23, 0.0 }
 0x32f   : > { %v2288_v54 = vadd.f32 %v14608_v49, %v1673_v35  ;;  %v2414_v46 = vmax.f32 %v2286_v29, 0.0 }
 0x330   : > { %v2415_v36 = vmax.f32 %v2287_v32, 0.0  ;;  %2858 = vmatmul.mubr.bf16.gmra.mrb[152].mxu0 %v14706_v6 }
 0x331   : > { %v2416_v39 = vmax.f32 %v2288_v54, 0.0  ;;  %2867 = vmatprep.mubr.bf16.mxu0 %v14720_v31 }
 0x332   : > { %v14766_v40 = vpack.c.bf16 %v2415_v36, %v2413_v9 }
 0x333   : > { %v1677_v42 = vpop.f32.mrb[48].mxu0  ;;  %v14768_v50 = vpack.c.bf16 %v2416_v39, %v2414_v46 }
 0x334   : > { %v2289_v44 = vadd.f32 %v14605_v48, %v1677_v42  ;;  %v1679_v25 = vpop.f32.mrb[49].mxu0 }
 0x335   : > { %v2290_v30 = vadd.f32 %v14608_v49, %v1679_v25  ;;  %v1681_v37 = vpop.f32.mrb[50].mxu0  ;;  %v12687_v25 = vld [vmem:[#allocation10 + $0x10] ss:$8 sps:$4 sm:$0xff]  }
 0x336   : > { %v2291_v6 = vadd.f32 %v14605_v48, %v1681_v37  ;;  %v1683_v58 = vpop.f32.mrb[51].mxu0  ;;  %v2417_v59 = vmax.f32 %v2289_v44, 0.0 }
 0x337   : > { %v2292_v31 = vadd.f32 %v14608_v49, %v1683_v58  ;;  %v2418_v2 = vmax.f32 %v2290_v30, 0.0 }
 0x338   : > { %v2419_v60 = vmax.f32 %v2291_v6, 0.0  ;;  %2868 = vmatmul.mubr.bf16.gmra.mrb[156].mxu0 %v14718_v28 }
 0x339   : > { %v2420_v5 = vmax.f32 %v2292_v31, 0.0  ;;  %2877 = vmatprep.mubr.bf16.mxu0 %v14732_v56  ;;  %v12683_v56 = vld [vmem:[#allocation10 + $0x4] ss:$8 sps:$4 sm:$0xff]   ;;  %v12690_v31 = vld [vmem:[#allocation9 + $0xf0] ss:$8 sps:$4 sm:$0xff]  }
 0x33a   : > { %v14778_v27 = vpack.c.bf16 %v2419_v60, %v2417_v59  ;;  %4263 = vmatprep.subr.bf16.mxu0 %v12683_v56  ;;  %v12692_v59 = vld [vmem:[#allocation9 + $0xf4] ss:$8 sps:$4 sm:$0xff]  }
 0x33b   : > { %v1687_v61 = vpop.f32.mrb[52].mxu0  ;;  %v14780_v21 = vpack.c.bf16 %v2420_v5, %v2418_v2  ;;  %4264 = vmatpush1.bf16.msra.mxu0 %v12681_v33  ;;  %3544 = vmatprep.subr.bf16.mxu1 %v12692_v59  ;;  %v12698_v59 = vld [vmem:[#allocation10 + $0x34] ss:$8 sps:$4 sm:$0xff]  }
 0x33c   : > { %v2293_v62 = vadd.f32 %v14605_v48, %v1687_v61  ;;  %v1689_v55 = vpop.f32.mrb[53].mxu0  ;;  %3545 = vmatpush1.bf16.msra.mxu1 %v12690_v31  ;;  %v12696_v31 = vld [vmem:[#allocation10 + $0x30] ss:$8 sps:$4 sm:$0xff]  }
 0x33d   : > { %v2294_v63 = vadd.f32 %v14608_v49, %v1689_v55  ;;  %v1691_v1 = vpop.f32.mrb[54].mxu0 }
 0x33e   : > { %v2295_v26 = vadd.f32 %v14605_v48, %v1691_v1  ;;  %v1693_v38 = vpop.f32.mrb[55].mxu0  ;;  %v2421_v12 = vmax.f32 %v2293_v62, 0.0 }
 0x33f   : > { %v2296_v28 = vadd.f32 %v14608_v49, %v1693_v38  ;;  %v2422_v22 = vmax.f32 %v2294_v63, 0.0 }
 0x340   : > { %v2423_v13 = vmax.f32 %v2295_v26, 0.0  ;;  %2878 = vmatmul.mubr.bf16.gmra.mrb[160].mxu0 %v14730_v52 }
 0x341   : > { %v2424_v14 = vmax.f32 %v2296_v28, 0.0  ;;  %2887 = vmatprep.mubr.bf16.mxu0 %v14744_v11 }
 0x342   : > { %v14790_v19 = vpack.c.bf16 %v2423_v13, %v2421_v12 }
 0x343   : > { %v1697_v7 = vpop.f32.mrb[56].mxu0  ;;  %v14792_v51 = vpack.c.bf16 %v2424_v14, %v2422_v22 }
 0x344   : > { %v2297_v16 = vadd.f32 %v14605_v48, %v1697_v7  ;;  %v1699_v18 = vpop.f32.mrb[57].mxu0  ;;  %v12693_v7 = vld [vmem:[#allocation10 + $0x20] ss:$8 sps:$4 sm:$0xff]  }
 0x345   : > { %v2298_v52 = vadd.f32 %v14608_v49, %v1699_v18  ;;  %v1701_v23 = vpop.f32.mrb[58].mxu0 }
 0x346   : > { %v2299_v41 = vadd.f32 %v14605_v48, %v1701_v23  ;;  %v1703_v11 = vpop.f32.mrb[59].mxu0  ;;  %v2425_v34 = vmax.f32 %v2297_v16, 0.0  ;;  %v12695_v16 = vld [vmem:[#allocation10 + $0x24] ss:$8 sps:$4 sm:$0xff]  }
 0x347   : > { %v2300_v29 = vadd.f32 %v14608_v49, %v1703_v11  ;;  %v2426_v35 = vmax.f32 %v2298_v52, 0.0 }
 0x348   : > { %v2427_v32 = vmax.f32 %v2299_v41, 0.0  ;;  %2888 = vmatmul.mubr.bf16.gmra.mrb[164].mxu0 %v14742_v3 }
 0x349   : > { %v2428_v54 = vmax.f32 %v2300_v29, 0.0  ;;  %2897 = vmatprep.mubr.bf16.mxu0 %v14756_v20  ;;  %v12689_v20 = vld [vmem:[#allocation10 + $0x14] ss:$8 sps:$4 sm:$0xff]  }
 0x34a   : > { %v14802_v9 = vpack.c.bf16 %v2427_v32, %v2425_v34  ;;  %4265 = vmatprep.subr.bf16.mxu0 %v12689_v20 }
 0x34b   : > { %v1707_v36 = vpop.f32.mrb[60].mxu0  ;;  %v14804_v46 = vpack.c.bf16 %v2428_v54, %v2426_v35  ;;  %4266 = vmatpush1.bf16.msra.mxu0 %v12687_v25 }
 0x34c   : > { %v2301_v39 = vadd.f32 %v14605_v48, %v1707_v36  ;;  %v1709_v24 = vpop.f32.mrb[61].mxu0  ;;  %4267 = vmatprep.subr.bf16.mxu0 %v12695_v16 }
 0x34d   : > { %v2302_v8 = vadd.f32 %v14608_v49, %v1709_v24  ;;  %v1711_v4 = vpop.f32.mrb[62].mxu0 }
 0x34e   : > { %v2303_v42 = vadd.f32 %v14605_v48, %v1711_v4  ;;  %v1713_v44 = vpop.f32.mrb[63].mxu0  ;;  %v2429_v30 = vmax.f32 %v2301_v39, 0.0 }
 0x34f   : > { %v2304_v3 = vadd.f32 %v14608_v49, %v1713_v44  ;;  %v2430_v6 = vmax.f32 %v2302_v8, 0.0  ;;  %4268 = vmatpush1.bf16.msra.mxu0 %v12693_v7 }
 0x350   : > { %v2431_v37 = vmax.f32 %v2303_v42, 0.0  ;;  %2898 = vmatmul.mubr.bf16.gmra.mrb[168].mxu0 %v14754_v17  ;;  %4269 = vmatprep.subr.bf16.mxu0 %v12698_v59 }
 0x351   : > { %v2432_v58 = vmax.f32 %v2304_v3, 0.0  ;;  %2907 = vmatprep.mubr.bf16.mxu0 %v14768_v50 }
 0x352   : > { %v14814_v60 = vpack.c.bf16 %v2431_v37, %v2429_v30 }
 0x353   : > { %v1717_v53 = vpop.f32.mrb[64].mxu0  ;;  %v14816_v2 = vpack.c.bf16 %v2432_v58, %v2430_v6  ;;  %4270 = vmatpush1.bf16.msra.mxu0 %v12696_v31 }
 0x354   : > { %v2305_v5 = vadd.f32 %v14605_v48, %v1717_v53  ;;  %v1719_v61 = vpop.f32.mrb[65].mxu0 }
 0x355   : > { %v2306_v17 = vadd.f32 %v14608_v49, %v1719_v61  ;;  %v1721_v62 = vpop.f32.mrb[66].mxu0 }
 0x356   : > { %v2307_v55 = vadd.f32 %v14605_v48, %v1721_v62  ;;  %v1723_v50 = vpop.f32.mrb[67].mxu0  ;;  %v2433_v1 = vmax.f32 %v2305_v5, 0.0 }
 0x357   : > { %v2308_v63 = vadd.f32 %v14608_v49, %v1723_v50  ;;  %v2434_v38 = vmax.f32 %v2306_v17, 0.0 }
 0x358   : > { %v2435_v26 = vmax.f32 %v2307_v55, 0.0  ;;  %2908 = vmatmul.mubr.bf16.gmra.mrb[172].mxu0 %v14766_v40 }
 0x359   : > { %v2436_v28 = vmax.f32 %v2308_v63, 0.0  ;;  %2917 = vmatprep.mubr.bf16.mxu0 %v14780_v21 }
 0x35a   : > { %v14825_v33 = vpack.c.bf16 %v2435_v26, %v2433_v1 }
 0x35b   : > { %v1727_v56 = vpop.f32.mrb[68].mxu0  ;;  %v14827_v12 = vpack.c.bf16 %v2436_v28, %v2434_v38 }
 0x35c   : > { %v2309_v13 = vadd.f32 %v14605_v48, %v1727_v56  ;;  %v1729_v22 = vpop.f32.mrb[69].mxu0 }
 0x35d   : > { %v2310_v10 = vadd.f32 %v14608_v49, %v1729_v22  ;;  %v1731_v14 = vpop.f32.mrb[70].mxu0 }
 0x35e   : > { %v2311_v57 = vadd.f32 %v14605_v48, %v1731_v14  ;;  %v1733_v15 = vpop.f32.mrb[71].mxu0  ;;  %v2437_v18 = vmax.f32 %v2309_v13, 0.0 }
 0x35f   : > { %v2312_v40 = vadd.f32 %v14608_v49, %v1733_v15  ;;  %v2438_v52 = vmax.f32 %v2310_v10, 0.0 }
 0x360   : > { %v2439_v21 = vmax.f32 %v2311_v57, 0.0  ;;  %2918 = vmatmul.mubr.bf16.gmra.mrb[176].mxu0 %v14778_v27 }
 0x361   : > { %v2440_v23 = vmax.f32 %v2312_v40, 0.0  ;;  %2927 = vmatprep.mubr.bf16.mxu0 %v14792_v51 }
 0x362   : > { %v14835_v41 = vpack.c.bf16 %v2439_v21, %v2437_v18 }
 0x363   : > { %v1737_v11 = vpop.f32.mrb[72].mxu0  ;;  %v14837_v29 = vpack.c.bf16 %v2440_v23, %v2438_v52  ;;  %v12699_v52 = vld [vmem:[#allocation10 + $0x40] ss:$8 sps:$4 sm:$0xff]   ;;  %v12701_v23 = vld [vmem:[#allocation10 + $0x44] ss:$8 sps:$4 sm:$0xff]  }
 0x364   : > { %v2313_v34 = vadd.f32 %v14605_v48, %v1737_v11  ;;  %v1739_v32 = vpop.f32.mrb[73].mxu0  ;;  %4271 = vmatprep.subr.bf16.mxu0 %v12701_v23 }
 0x365   : > { %v2314_v35 = vadd.f32 %v14608_v49, %v1739_v32  ;;  %v1741_v54 = vpop.f32.mrb[74].mxu0  ;;  %4272 = vmatpush1.bf16.msra.mxu0 %v12699_v52 }
 0x366   : > { %v2315_v36 = vadd.f32 %v14605_v48, %v1741_v54  ;;  %v1743_v27 = vpop.f32.mrb[75].mxu0  ;;  %v2441_v24 = vmax.f32 %v2313_v34, 0.0 }
 0x367   : > { %v2316_v39 = vadd.f32 %v14608_v49, %v1743_v27  ;;  %v2442_v8 = vmax.f32 %v2314_v35, 0.0 }
 0x368   : > { %v2443_v51 = vmax.f32 %v2315_v36, 0.0  ;;  %2928 = vmatmul.mubr.bf16.gmra.mrb[180].mxu0 %v14790_v19 }
 0x369   : > { %v2444_v4 = vmax.f32 %v2316_v39, 0.0  ;;  %2937 = vmatprep.mubr.bf16.mxu0 %v14804_v46 }
 0x36a   : > { %v14845_v42 = vpack.c.bf16 %v2443_v51, %v2441_v24 }
 0x36b   : > { %v1747_v44 = vpop.f32.mrb[76].mxu0  ;;  %v14847_v3 = vpack.c.bf16 %v2444_v4, %v2442_v8 }
 0x36c   : > { %v2317_v25 = vadd.f32 %v14605_v48, %v1747_v44  ;;  %v1749_v20 = vpop.f32.mrb[77].mxu0 }
 0x36d   : > { %v2318_v30 = vadd.f32 %v14608_v49, %v1749_v20  ;;  %v1751_v37 = vpop.f32.mrb[78].mxu0 }
 0x36e   : > { %v2319_v6 = vadd.f32 %v14605_v48, %v1751_v37  ;;  %v1753_v58 = vpop.f32.mrb[79].mxu0  ;;  %v2445_v53 = vmax.f32 %v2317_v25, 0.0 }
 0x36f   : > { %v2320_v19 = vadd.f32 %v14608_v49, %v1753_v58  ;;  %v2446_v5 = vmax.f32 %v2318_v30, 0.0 }
 0x370   : > { %v2447_v46 = vmax.f32 %v2319_v6, 0.0  ;;  %2938 = vmatmul.mubr.bf16.gmra.mrb[184].mxu0 %v14802_v9 }
 0x371   : > { %v2448_v61 = vmax.f32 %v2320_v19, 0.0  ;;  %2947 = vmatprep.mubr.bf16.mxu0 %v14816_v2 }
 0x372   : > { %v14855_v17 = vpack.c.bf16 %v2447_v46, %v2445_v53 }
 0x373   : > { %v1757_v62 = vpop.f32.mrb[80].mxu0  ;;  %v14857_v55 = vpack.c.bf16 %v2448_v61, %v2446_v5  ;;  %v12702_v5 = vld [vmem:[#allocation10 + $0x50] ss:$8 sps:$4 sm:$0xff]   ;;  %v12704_v61 = vld [vmem:[#allocation10 + $0x54] ss:$8 sps:$4 sm:$0xff]  }
 0x374   : > { %v2321_v50 = vadd.f32 %v14605_v48, %v1757_v62  ;;  %v1759_v63 = vpop.f32.mrb[81].mxu0  ;;  %4273 = vmatprep.subr.bf16.mxu0 %v12704_v61 }
 0x375   : > { %v2322_v1 = vadd.f32 %v14608_v49, %v1759_v63  ;;  %v1761_v26 = vpop.f32.mrb[82].mxu0  ;;  %4274 = vmatpush1.bf16.msra.mxu0 %v12702_v5 }
 0x376   : > { %v2323_v38 = vadd.f32 %v14605_v48, %v1761_v26  ;;  %v1763_v9 = vpop.f32.mrb[83].mxu0  ;;  %v2449_v56 = vmax.f32 %v2321_v50, 0.0 }
 0x377   : > { %v2324_v28 = vadd.f32 %v14608_v49, %v1763_v9  ;;  %v2450_v13 = vmax.f32 %v2322_v1, 0.0 }
 0x378   : > { %v2451_v2 = vmax.f32 %v2323_v38, 0.0  ;;  %2948 = vmatmul.mubr.bf16.gmra.mrb[188].mxu0 %v14814_v60 }
 0x379   : > { %v2452_v22 = vmax.f32 %v2324_v28, 0.0  ;;  %2957 = vmatprep.mubr.bf16.mxu0 %v14827_v12 }
 0x37a   : > { %v14865_v10 = vpack.c.bf16 %v2451_v2, %v2449_v56 }
 0x37b   : > { %v1767_v14 = vpop.f32.mrb[84].mxu0  ;;  %v14867_v57 = vpack.c.bf16 %v2452_v22, %v2450_v13 }
 0x37c   : > { %v2325_v15 = vadd.f32 %v14605_v48, %v1767_v14  ;;  %v1769_v40 = vpop.f32.mrb[85].mxu0 }
 0x37d   : > { %v2326_v7 = vadd.f32 %v14608_v49, %v1769_v40  ;;  %v1771_v16 = vpop.f32.mrb[86].mxu0 }
 0x37e   : > { %v2327_v18 = vadd.f32 %v14605_v48, %v1771_v16  ;;  %v1773_v21 = vpop.f32.mrb[87].mxu0  ;;  %v2453_v11 = vmax.f32 %v2325_v15, 0.0 }
 0x37f   : > { %v2328_v60 = vadd.f32 %v14608_v49, %v1773_v21  ;;  %v2454_v34 = vmax.f32 %v2326_v7, 0.0 }
 0x380   : > { %v2455_v12 = vmax.f32 %v2327_v18, 0.0  ;;  %2958 = vmatmul.mubr.bf16.gmra.mrb[192].mxu0 %v14825_v33 }
 0x381   : > { %v2456_v32 = vmax.f32 %v2328_v60, 0.0  ;;  %2967 = vmatprep.mubr.bf16.mxu0 %v14837_v29 }
 0x382   : > { %v14875_v35 = vpack.c.bf16 %v2455_v12, %v2453_v11 }
 0x383   : > { %v1777_v54 = vpop.f32.mrb[88].mxu0  ;;  %v14877_v36 = vpack.c.bf16 %v2456_v32, %v2454_v34  ;;  %v12705_v34 = vld [vmem:[#allocation10 + $0x60] ss:$8 sps:$4 sm:$0xff]   ;;  %v12707_v32 = vld [vmem:[#allocation10 + $0x64] ss:$8 sps:$4 sm:$0xff]  }
 0x384   : > { %v2329_v27 = vadd.f32 %v14605_v48, %v1777_v54  ;;  %v1779_v39 = vpop.f32.mrb[89].mxu0  ;;  %4275 = vmatprep.subr.bf16.mxu0 %v12707_v32 }
 0x385   : > { %v2330_v24 = vadd.f32 %v14608_v49, %v1779_v39  ;;  %v1781_v51 = vpop.f32.mrb[90].mxu0  ;;  %4276 = vmatpush1.bf16.msra.mxu0 %v12705_v34 }
 0x386   : > { %v2331_v8 = vadd.f32 %v14605_v48, %v1781_v51  ;;  %v1783_v33 = vpop.f32.mrb[91].mxu0  ;;  %v2457_v44 = vmax.f32 %v2329_v27, 0.0 }
 0x387   : > { %v2332_v4 = vadd.f32 %v14608_v49, %v1783_v33  ;;  %v2458_v25 = vmax.f32 %v2330_v24, 0.0 }
 0x388   : > { %v2459_v29 = vmax.f32 %v2331_v8, 0.0  ;;  %2968 = vmatmul.mubr.bf16.gmra.mrb[196].mxu0 %v14835_v41 }
 0x389   : > { %v2460_v20 = vmax.f32 %v2332_v4, 0.0  ;;  %2977 = vmatprep.mubr.bf16.mxu0 %v14847_v3 }
 0x38a   : > { %v14885_v30 = vpack.c.bf16 %v2459_v29, %v2457_v44 }
 0x38b   : > { %v1787_v37 = vpop.f32.mrb[92].mxu0  ;;  %v14887_v6 = vpack.c.bf16 %v2460_v20, %v2458_v25 }
 0x38c   : > { %v2333_v58 = vadd.f32 %v14605_v48, %v1787_v37  ;;  %v1789_v19 = vpop.f32.mrb[93].mxu0 }
 0x38d   : > { %v2334_v31 = vadd.f32 %v14608_v49, %v1789_v19  ;;  %v1791_v59 = vpop.f32.mrb[94].mxu0 }
 0x38e   : > { %v2335_v53 = vadd.f32 %v14605_v48, %v1791_v59  ;;  %v1793_v46 = vpop.f32.mrb[95].mxu0  ;;  %v2461_v62 = vmax.f32 %v2333_v58, 0.0 }
 0x38f   : > { %v2336_v41 = vadd.f32 %v14608_v49, %v1793_v46  ;;  %v2462_v50 = vmax.f32 %v2334_v31, 0.0 }
 0x390   : > { %v2463_v3 = vmax.f32 %v2335_v53, 0.0  ;;  %2978 = vmatmul.mubr.bf16.gmra.mrb[200].mxu0 %v14845_v42 }
 0x391   : > { %v2464_v63 = vmax.f32 %v2336_v41, 0.0  ;;  %2987 = vmatprep.mubr.bf16.mxu0 %v14857_v55 }
 0x392   : > { %v14895_v1 = vpack.c.bf16 %v2463_v3, %v2461_v62 }
 0x393   : > { %v1797_v26 = vpop.f32.mrb[96].mxu0  ;;  %v14897_v38 = vpack.c.bf16 %v2464_v63, %v2462_v50  ;;  %v12708_v50 = vld [vmem:[#allocation10 + $0x70] ss:$8 sps:$4 sm:$0xff]   ;;  %v12710_v63 = vld [vmem:[#allocation10 + $0x74] ss:$8 sps:$4 sm:$0xff]  }
 0x394   : > { %v2337_v9 = vadd.f32 %v14605_v48, %v1797_v26  ;;  %v1799_v28 = vpop.f32.mrb[97].mxu0  ;;  %4277 = vmatprep.subr.bf16.mxu0 %v12710_v63 }
 0x395   : > { %v2338_v56 = vadd.f32 %v14608_v49, %v1799_v28  ;;  %v1801_v2 = vpop.f32.mrb[98].mxu0  ;;  %4278 = vmatpush1.bf16.msra.mxu0 %v12708_v50 }
 0x396   : > { %v2339_v13 = vadd.f32 %v14605_v48, %v1801_v2  ;;  %v1803_v42 = vpop.f32.mrb[99].mxu0  ;;  %v2465_v14 = vmax.f32 %v2337_v9, 0.0 }
 0x397   : > { %v2340_v22 = vadd.f32 %v14608_v49, %v1803_v42  ;;  %v2466_v15 = vmax.f32 %v2338_v56, 0.0 }
 0x398   : > { %v2467_v55 = vmax.f32 %v2339_v13, 0.0  ;;  %2988 = vmatmul.mubr.bf16.gmra.mrb[204].mxu0 %v14855_v17 }
 0x399   : > { %v2468_v40 = vmax.f32 %v2340_v22, 0.0  ;;  %2997 = vmatprep.mubr.bf16.mxu0 %v14867_v57 }
 0x39a   : > { %v14905_v7 = vpack.c.bf16 %v2467_v55, %v2465_v14 }
 0x39b   : > { %v1807_v16 = vpop.f32.mrb[100].mxu0  ;;  %v14907_v18 = vpack.c.bf16 %v2468_v40, %v2466_v15 }
 0x39c   : > { %v2341_v21 = vadd.f32 %v14605_v48, %v1807_v16  ;;  %v1809_v60 = vpop.f32.mrb[101].mxu0 }
 0x39d   : > { %v2342_v52 = vadd.f32 %v14608_v49, %v1809_v60  ;;  %v1811_v23 = vpop.f32.mrb[102].mxu0 }
 0x39e   : > { %v2343_v11 = vadd.f32 %v14605_v48, %v1811_v23  ;;  %v1813_v12 = vpop.f32.mrb[103].mxu0  ;;  %v2469_v54 = vmax.f32 %v2341_v21, 0.0 }
 0x39f   : > { %v2344_v17 = vadd.f32 %v14608_v49, %v1813_v12  ;;  %v2470_v27 = vmax.f32 %v2342_v52, 0.0 }
 0x3a0   : > { %v2471_v57 = vmax.f32 %v2343_v11, 0.0  ;;  %2998 = vmatmul.mubr.bf16.gmra.mrb[208].mxu0 %v14865_v10 }
 0x3a1   : > { %v2472_v39 = vmax.f32 %v2344_v17, 0.0  ;;  %3007 = vmatprep.mubr.bf16.mxu0 %v14877_v36 }
 0x3a2   : > { %v14915_v24 = vpack.c.bf16 %v2471_v57, %v2469_v54 }
 0x3a3   : > { %v1817_v51 = vpop.f32.mrb[104].mxu0  ;;  %v14917_v8 = vpack.c.bf16 %v2472_v39, %v2470_v27  ;;  %v12711_v27 = vld [vmem:[#allocation10 + $0x80] ss:$8 sps:$4 sm:$0xff]   ;;  %v12713_v39 = vld [vmem:[#allocation10 + $0x84] ss:$8 sps:$4 sm:$0xff]  }
 0x3a4   : > { %v2345_v33 = vadd.f32 %v14605_v48, %v1817_v51  ;;  %v1819_v4 = vpop.f32.mrb[105].mxu0  ;;  %4279 = vmatprep.subr.bf16.mxu0 %v12713_v39 }
 0x3a5   : > { %v2346_v44 = vadd.f32 %v14608_v49, %v1819_v4  ;;  %v1821_v29 = vpop.f32.mrb[106].mxu0  ;;  %4280 = vmatpush1.bf16.msra.mxu0 %v12711_v27 }
 0x3a6   : > { %v2347_v25 = vadd.f32 %v14605_v48, %v1821_v29  ;;  %v1823_v10 = vpop.f32.mrb[107].mxu0  ;;  %v2473_v37 = vmax.f32 %v2345_v33, 0.0 }
 0x3a7   : > { %v2348_v20 = vadd.f32 %v14608_v49, %v1823_v10  ;;  %v2474_v58 = vmax.f32 %v2346_v44, 0.0 }
 0x3a8   : > { %v2475_v36 = vmax.f32 %v2347_v25, 0.0  ;;  %3008 = vmatmul.mubr.bf16.gmra.mrb[212].mxu0 %v14875_v35 }
 0x3a9   : > { %v2476_v19 = vmax.f32 %v2348_v20, 0.0  ;;  %3017 = vmatprep.mubr.bf16.mxu0 %v14887_v6 }
 0x3aa   : > { %v14925_v31 = vpack.c.bf16 %v2475_v36, %v2473_v37 }
 0x3ab   : > { %v1827_v59 = vpop.f32.mrb[108].mxu0  ;;  %v14927_v53 = vpack.c.bf16 %v2476_v19, %v2474_v58 }
 0x3ac   : > { %v2349_v46 = vadd.f32 %v14605_v48, %v1827_v59  ;;  %v1829_v41 = vpop.f32.mrb[109].mxu0 }
 0x3ad   : > { %v2350_v5 = vadd.f32 %v14608_v49, %v1829_v41  ;;  %v1831_v61 = vpop.f32.mrb[110].mxu0 }
 0x3ae   : > { %v2351_v62 = vadd.f32 %v14605_v48, %v1831_v61  ;;  %v1833_v3 = vpop.f32.mrb[111].mxu0  ;;  %v2477_v26 = vmax.f32 %v2349_v46, 0.0 }
 0x3af   : > { %v2352_v35 = vadd.f32 %v14608_v49, %v1833_v3  ;;  %v2478_v9 = vmax.f32 %v2350_v5, 0.0 }
 0x3b0   : > { %v2479_v6 = vmax.f32 %v2351_v62, 0.0  ;;  %3018 = vmatmul.mubr.bf16.gmra.mrb[216].mxu0 %v14885_v30 }
 0x3b1   : > { %v2480_v28 = vmax.f32 %v2352_v35, 0.0  ;;  %3027 = vmatprep.mubr.bf16.mxu0 %v14897_v38 }
 0x3b2   : > { %v14935_v56 = vpack.c.bf16 %v2479_v6, %v2477_v26  ;;  %v2593_v26 = vld [vmem:[%s18282_s30] sm:$0x3]  ;;  %s18287_s30 = sld [smem:[#allocation94_spill]] }
 0x3b3   : > { %v1837_v2 = vpop.f32.mrb[112].mxu0  ;;  %v14937_v13 = vpack.c.bf16 %v2480_v28, %v2478_v9  ;;  %v12714_v9 = vld [vmem:[#allocation10 + $0x90] ss:$8 sps:$4 sm:$0xff]   ;;  %v12716_v28 = vld [vmem:[#allocation10 + $0x94] ss:$8 sps:$4 sm:$0xff]  }
 0x3b4   : > { %v2353_v42 = vadd.f32 %v14605_v48, %v1837_v2  ;;  %v1839_v22 = vpop.f32.mrb[113].mxu0  ;;  %4281 = vmatprep.subr.bf16.mxu0 %v12716_v28 }
 0x3b5   : > { %v2354_v14 = vadd.f32 %v14608_v49, %v1839_v22  ;;  %v1841_v55 = vpop.f32.mrb[114].mxu0  ;;  %v14978_v22 = vrot.slane %v2593_v26, %v14593_v45  ;;  %4282 = vmatpush1.bf16.msra.mxu0 %v12714_v9 }
 0x3b6   : > { %v2355_v15 = vadd.f32 %v14605_v48, %v1841_v55  ;;  %v1843_v30 = vpop.f32.mrb[115].mxu0  ;;  %v2481_v16 = vmax.f32 %v2353_v42, 0.0 }
 0x3b7   : > { %v2356_v40 = vadd.f32 %v14608_v49, %v1843_v30  ;;  %v2482_v21 = vmax.f32 %v2354_v14, 0.0 }
 0x3b8   : > { %v2483_v38 = vmax.f32 %v2355_v15, 0.0  ;;  %3028 = vmatmul.mubr.bf16.gmra.mrb[220].mxu0 %v14895_v1  ;;  %v14982_v15 = vrot.slane %v2593_v26, %v14599_v47  ;;  %s18288_s26 = smov %s18287_s30 }
 0x3b9   : > { %v2484_v60 = vmax.f32 %v2356_v40, 0.0  ;;  %3037 = vmatprep.mubr.bf16.mxu0 %v14907_v18 }
 0x3ba   : > { %v14945_v52 = vpack.c.bf16 %v2483_v38, %v2481_v16 }
 0x3bb   : > { %v1847_v23 = vpop.f32.mrb[116].mxu0  ;;  %v14947_v11 = vpack.c.bf16 %v2484_v60, %v2482_v21 }
 0x3bc   : > { %v2357_v12 = vadd.f32 %v14605_v48, %v1847_v23  ;;  %v1849_v17 = vpop.f32.mrb[117].mxu0 }
 0x3bd   : > { %v2358_v34 = vadd.f32 %v14608_v49, %v1849_v17  ;;  %v1851_v32 = vpop.f32.mrb[118].mxu0 }
 0x3be   : > { %v2359_v54 = vadd.f32 %v14605_v48, %v1851_v32  ;;  %v1853_v57 = vpop.f32.mrb[119].mxu0  ;;  %v2485_v51 = vmax.f32 %v2357_v12, 0.0 }
 0x3bf   : > { %v2360_v1 = vadd.f32 %v14608_v49, %v1853_v57  ;;  %v2486_v33 = vmax.f32 %v2358_v34, 0.0 }
 0x3c0   : > { %v2487_v18 = vmax.f32 %v2359_v54, 0.0  ;;  %3038 = vmatmul.mubr.bf16.gmra.mrb[224].mxu0 %v14905_v7 }
 0x3c1   : > { %v2488_v4 = vmax.f32 %v2360_v1, 0.0  ;;  %3047 = vmatprep.mubr.bf16.mxu0 %v14917_v8 }
 0x3c2   : > { %v14955_v44 = vpack.c.bf16 %v2487_v18, %v2485_v51 }
 0x3c3   : > { %v1857_v29 = vpop.f32.mrb[120].mxu0  ;;  %v14957_v25 = vpack.c.bf16 %v2488_v4, %v2486_v33  ;;  %v12717_v4 = vld [vmem:[#allocation10 + $0xa0] ss:$8 sps:$4 sm:$0xff]  }
 0x3c4   : > { %v2361_v10 = vadd.f32 %v14605_v48, %v1857_v29  ;;  %v1859_v20 = vpop.f32.mrb[121].mxu0  ;;  %v12719_v29 = vld [vmem:[#allocation10 + $0xa4] ss:$8 sps:$4 sm:$0xff]  }
 0x3c5   : > { %v2362_v37 = vadd.f32 %v14608_v49, %v1859_v20  ;;  %v1861_v36 = vpop.f32.mrb[122].mxu0  ;;  %4283 = vmatprep.subr.bf16.mxu0 %v12719_v29 }
 0x3c6   : > { %v2363_v58 = vadd.f32 %v14605_v48, %v1861_v36  ;;  %v1863_v7 = vpop.f32.mrb[123].mxu0  ;;  %v2489_v59 = vmax.f32 %v2361_v10, 0.0  ;;  %4284 = vmatpush1.bf16.msra.mxu0 %v12717_v4 }
 0x3c7   : > { %v2364_v19 = vadd.f32 %v14608_v49, %v1863_v7  ;;  %v2490_v46 = vmax.f32 %v2362_v37, 0.0 }
 0x3c8   : > { %v2491_v8 = vmax.f32 %v2363_v58, 0.0  ;;  %3048 = vmatmul.mubr.bf16.gmra.mrb[228].mxu0 %v14915_v24 }
 0x3c9   : > { %v2492_v41 = vmax.f32 %v2364_v19, 0.0  ;;  %3057 = vmatprep.mubr.bf16.mxu0 %v14927_v53 }
 0x3ca   : > { %v14965_v5 = vpack.c.bf16 %v2491_v8, %v2489_v59 }
 0x3cb   : > { %v1867_v61 = vpop.f32.mrb[124].mxu0  ;;  %v14967_v62 = vpack.c.bf16 %v2492_v41, %v2490_v46 }
 0x3cc   : > { %v2365_v3 = vadd.f32 %v14605_v48, %v1867_v61  ;;  %v1869_v35 = vpop.f32.mrb[125].mxu0 }
 0x3cd   : > { %v2366_v50 = vadd.f32 %v14608_v49, %v1869_v35  ;;  %v1871_v63 = vpop.f32.mrb[126].mxu0 }
 0x3ce   : > { %v2367_v24 = vadd.f32 %v14605_v48, %v1871_v63  ;;  %v1873_v6 = vpop.f32.mrb[127].mxu0  ;;  %v2493_v2 = vmax.f32 %v2365_v3, 0.0 }
 0x3cf   : > { %v2368_v53 = vadd.f32 %v14608_v49, %v1873_v6  ;;  %v2494_v14 = vmax.f32 %v2366_v50, 0.0 }
 0x3d0   : > { %v2495_v42 = vmax.f32 %v2367_v24, 0.0  ;;  %3058 = vmatmul.mubr.bf16.gmra.mrb[232].mxu0 %v14925_v31 }
 0x3d1   : > { %v2496_v55 = vmax.f32 %v2368_v53, 0.0  ;;  %3067 = vmatprep.mubr.bf16.mxu0 %v14937_v13 }
 0x3d2   : > { %v14984_v48 = vpack.c.bf16 %v2495_v42, %v2493_v2 }
 0x3d3   : > { %v2799_v49 = vpop.f32.mrb[128].mxu0  ;;  %v14986_v30 = vpack.c.bf16 %v2496_v55, %v2494_v14  ;;  %v12720_v14 = vld [vmem:[#allocation10 + $0xb0] ss:$8 sps:$4 sm:$0xff]   ;;  %v12722_v55 = vld [vmem:[#allocation10 + $0xb4] ss:$8 sps:$4 sm:$0xff]  }
 0x3d4   : > { %v2800_v40 = vadd.f32 %v2799_v49, %v14978_v22  ;;  %v2801_v31 = vpop.f32.mrb[129].mxu0  ;;  %4285 = vmatprep.subr.bf16.mxu0 %v12722_v55 }
 0x3d5   : > { %v2802_v16 = vadd.f32 %v2801_v31, %v14982_v15  ;;  %v2803_v38 = vpop.f32.mrb[130].mxu0  ;;  %4286 = vmatpush1.bf16.msra.mxu0 %v12720_v14 }
 0x3d6   : > { %v2804_v21 = vadd.f32 %v2803_v38, %v14978_v22  ;;  %v2805_v60 = vpop.f32.mrb[131].mxu0  ;;  %v3118_v23 = vmax.f32 %v2800_v40, 0.0 }
 0x3d7   : > { %v2806_v13 = vadd.f32 %v2805_v60, %v14982_v15  ;;  %v3119_v17 = vmax.f32 %v2802_v16, 0.0 }
 0x3d8   : > { %v3120_v12 = vmax.f32 %v2804_v21, 0.0  ;;  %3068 = vmatmul.mubr.bf16.gmra.mrb[236].mxu0 %v14935_v56 }
 0x3d9   : > { %v3121_v34 = vmax.f32 %v2806_v13, 0.0  ;;  %3077 = vmatprep.mubr.bf16.mxu0 %v14947_v11 }
 0x3da   : > { %v3246_v32 = vpack.c.bf16 %v3120_v12, %v3118_v23 }
 0x3db   : > { %v2809_v54 = vpop.f32.mrb[132].mxu0  ;;  %v3247_v57 = vpack.c.bf16 %v3121_v34, %v3119_v17 }
 0x3dc   : > { %v2810_v1 = vadd.f32 %v2809_v54, %v14978_v22  ;;  %v2811_v27 = vpop.f32.mrb[133].mxu0 }
 0x3dd   : > { %v2812_v39 = vadd.f32 %v2811_v27, %v14982_v15  ;;  %v2813_v51 = vpop.f32.mrb[134].mxu0  ;;  %3546 = vmatprep.mubr.bf16.mxu1 %v3247_v57 }
 0x3de   : > { %v2814_v18 = vadd.f32 %v2813_v51, %v14978_v22  ;;  %v2815_v33 = vpop.f32.mrb[135].mxu0  ;;  %3547 = vmatmul.mubr.bf16.vlgmr.msra.gmra.mrb[128].mxu1 %v3246_v32  ;;  %v3122_v10 = vmax.f32 %v2810_v1, 0.0 }
 0x3df   : > { %v2816_v56 = vadd.f32 %v2815_v33, %v14982_v15  ;;  %v3123_v20 = vmax.f32 %v2812_v39, 0.0 }
 0x3e0   : > { %v3124_v11 = vmax.f32 %v2814_v18, 0.0  ;;  %3078 = vmatmul.mubr.bf16.gmra.mrb[240].mxu0 %v14945_v52 }
 0x3e1   : > { %v3125_v37 = vmax.f32 %v2816_v56, 0.0  ;;  %3087 = vmatprep.mubr.bf16.mxu0 %v14957_v25 }
 0x3e2   : > { %v3248_v36 = vpack.c.bf16 %v3124_v11, %v3122_v10  ;;  %v12723_v11 = vld [vmem:[#allocation10 + $0xc0] ss:$8 sps:$4 sm:$0xff]  }
 0x3e3   : > { %v2819_v58 = vpop.f32.mrb[136].mxu0  ;;  %v3249_v7 = vpack.c.bf16 %v3125_v37, %v3123_v20 }
 0x3e4   : > { %v2820_v19 = vadd.f32 %v2819_v58, %v14978_v22  ;;  %v2821_v59 = vpop.f32.mrb[137].mxu0 }
 0x3e5   : > { %v2822_v8 = vadd.f32 %v2821_v59, %v14982_v15  ;;  %v2823_v46 = vpop.f32.mrb[138].mxu0  ;;  %3556 = vmatprep.mubr.bf16.mxu1 %v3249_v7 }
 0x3e6   : > { %v2824_v41 = vadd.f32 %v2823_v46, %v14978_v22  ;;  %v2825_v61 = vpop.f32.mrb[139].mxu0  ;;  %3557 = vmatmul.mubr.bf16.gmra.mrb[132].mxu1 %v3248_v36  ;;  %v3126_v3 = vmax.f32 %v2820_v19, 0.0 }
 0x3e7   : > { %v2826_v52 = vadd.f32 %v2825_v61, %v14982_v15  ;;  %v3127_v35 = vmax.f32 %v2822_v8, 0.0 }
 0x3e8   : > { %v3128_v25 = vmax.f32 %v2824_v41, 0.0  ;;  %3088 = vmatmul.mubr.bf16.gmra.mrb[244].mxu0 %v14955_v44 }
 0x3e9   : > { %v3129_v50 = vmax.f32 %v2826_v52, 0.0  ;;  %3097 = vmatprep.mubr.bf16.mxu0 %v14967_v62 }
 0x3ea   : > { %v3250_v63 = vpack.c.bf16 %v3128_v25, %v3126_v3 }
 0x3eb   : > { %v2829_v26 = vpop.f32.mrb[140].mxu0  ;;  %v3251_v24 = vpack.c.bf16 %v3129_v50, %v3127_v35 }
 0x3ec   : > { %v2830_v6 = vadd.f32 %v2829_v26, %v14978_v22  ;;  %v2831_v53 = vpop.f32.mrb[141].mxu0 }
 0x3ed   : > { %v2832_v9 = vadd.f32 %v2831_v53, %v14982_v15  ;;  %v2833_v28 = vpop.f32.mrb[142].mxu0  ;;  %3566 = vmatprep.mubr.bf16.mxu1 %v3251_v24 }
 0x3ee   : > { %v2834_v2 = vadd.f32 %v2833_v28, %v14978_v22  ;;  %v2835_v42 = vpop.f32.mrb[143].mxu0  ;;  %3567 = vmatmul.mubr.bf16.gmra.mrb[136].mxu1 %v3250_v63  ;;  %v3130_v49 = vmax.f32 %v2830_v6, 0.0 }
 0x3ef   : > { %v2836_v44 = vadd.f32 %v2835_v42, %v14982_v15  ;;  %v3131_v40 = vmax.f32 %v2832_v9, 0.0 }
 0x3f0   : > { %v3132_v62 = vmax.f32 %v2834_v2, 0.0  ;;  %3098 = vmatmul.mubr.bf16.gmra.mrb[248].mxu0 %v14965_v5 }
 0x3f1   : > { %v3133_v31 = vmax.f32 %v2836_v44, 0.0  ;;  %3107 = vmatprep.mubr.bf16.mxu0 %v14986_v30 }
 0x3f2   : > { %v3252_v16 = vpack.c.bf16 %v3132_v62, %v3130_v49  ;;  %v12726_v49 = vld [vmem:[#allocation10 + $0xd0] ss:$8 sps:$4 sm:$0xff]   ;;  %v12728_v62 = vld [vmem:[#allocation10 + $0xd4] ss:$8 sps:$4 sm:$0xff]  }
 0x3f3   : > { %v2839_v38 = vpop.f32.mrb[144].mxu0  ;;  %v3253_v21 = vpack.c.bf16 %v3133_v31, %v3131_v40 }
 0x3f4   : > { %v2840_v60 = vadd.f32 %v2839_v38, %v14978_v22  ;;  %v2841_v13 = vpop.f32.mrb[145].mxu0 }
 0x3f5   : > { %v2842_v23 = vadd.f32 %v2841_v13, %v14982_v15  ;;  %v2843_v12 = vpop.f32.mrb[146].mxu0  ;;  %3576 = vmatprep.mubr.bf16.mxu1 %v3253_v21 }
 0x3f6   : > { %v2844_v17 = vadd.f32 %v2843_v12, %v14978_v22  ;;  %v2845_v34 = vpop.f32.mrb[147].mxu0  ;;  %3577 = vmatmul.mubr.bf16.gmra.mrb[140].mxu1 %v3252_v16  ;;  %v3134_v32 = vmax.f32 %v2840_v60, 0.0 }
 0x3f7   : > { %v2846_v5 = vadd.f32 %v2845_v34, %v14982_v15  ;;  %v3135_v54 = vmax.f32 %v2842_v23, 0.0 }
 0x3f8   : > { %v3136_v30 = vmax.f32 %v2844_v17, 0.0  ;;  %3108 = vmatmul.mubr.bf16.gmra.mrb[252].mxu0 %v14984_v48  ;;  %v12725_v48 = vld [vmem:[#allocation10 + $0xc4] ss:$8 sps:$4 sm:$0xff]  }
 0x3f9   : > { %v3137_v57 = vmax.f32 %v2846_v5, 0.0  ;;  %4287 = vmatprep.subr.bf16.mxu0 %v12725_v48 }
 0x3fa   : > { %v3254_v1 = vpack.c.bf16 %v3136_v30, %v3134_v32  ;;  %4288 = vmatpush1.bf16.msra.mxu0 %v12723_v11 }
 0x3fb   : > { %v2849_v27 = vpop.f32.mrb[148].mxu0  ;;  %v3255_v39 = vpack.c.bf16 %v3137_v57, %v3135_v54  ;;  %4289 = vmatprep.subr.bf16.mxu0 %v12728_v62 }
 0x3fc   : > { %v2850_v51 = vadd.f32 %v2849_v27, %v14978_v22  ;;  %v2851_v18 = vpop.f32.mrb[149].mxu0 }
 0x3fd   : > { %v2852_v33 = vadd.f32 %v2851_v18, %v14982_v15  ;;  %v2853_v56 = vpop.f32.mrb[150].mxu0  ;;  %3586 = vmatprep.mubr.bf16.mxu1 %v3255_v39  ;;  %v12729_v39 = vld [vmem:[#allocation12] ss:$8 sps:$4 sm:$0xff]  }
 0x3fe   : > { %v2854_v4 = vadd.f32 %v2853_v56, %v14978_v22  ;;  %v2855_v29 = vpop.f32.mrb[151].mxu0  ;;  %3587 = vmatmul.mubr.bf16.gmra.mrb[144].mxu1 %v3254_v1  ;;  %v3138_v20 = vmax.f32 %v2850_v51, 0.0  ;;  %4290 = vmatpush1.bf16.msra.mxu0 %v12726_v49  ;;  %v12731_v51 = vld [vmem:[#allocation12 + $0x4] ss:$8 sps:$4 sm:$0xff]  }
 0x3ff   : > { %v2856_v10 = vadd.f32 %v2855_v29, %v14982_v15  ;;  %v3139_v36 = vmax.f32 %v2852_v33, 0.0  ;;  %5012 = vmatprep.subr.bf16.mxu1 %v12731_v51 }
 0x400   : > { %v3140_v37 = vmax.f32 %v2854_v4, 0.0  ;;  %5013 = vmatpush1.bf16.msra.mxu1 %v12729_v39 }
 0x401   : > { %v3141_v58 = vmax.f32 %v2856_v10, 0.0 }
 0x402   : > { %v3256_v7 = vpack.c.bf16 %v3140_v37, %v3138_v20 }
 0x403   : > { %v2859_v19 = vpop.f32.mrb[152].mxu0  ;;  %v3257_v59 = vpack.c.bf16 %v3141_v58, %v3139_v36  ;;  %v12732_v36 = vld [vmem:[#allocation10 + $0xe0] ss:$8 sps:$4 sm:$0xff]   ;;  %v12734_v58 = vld [vmem:[#allocation10 + $0xe4] ss:$8 sps:$4 sm:$0xff]  }
 0x404   : > { %v2860_v8 = vadd.f32 %v2859_v19, %v14978_v22  ;;  %v2861_v46 = vpop.f32.mrb[153].mxu0  ;;  %4291 = vmatprep.subr.bf16.mxu0 %v12734_v58  ;;  %v12741_v58 = vld [vmem:[#allocation12 + $0x20] ss:$8 sps:$4 sm:$0xff]  }
 0x405   : > { %v2862_v41 = vadd.f32 %v2861_v46, %v14982_v15  ;;  %v2863_v61 = vpop.f32.mrb[154].mxu0  ;;  %3596 = vmatprep.mubr.bf16.mxu1 %v3257_v59  ;;  %4292 = vmatpush1.bf16.msra.mxu0 %v12732_v36 }
 0x406   : > { %v2864_v52 = vadd.f32 %v2863_v61, %v14978_v22  ;;  %v2865_v3 = vpop.f32.mrb[155].mxu0  ;;  %3597 = vmatmul.mubr.bf16.gmra.mrb[148].mxu1 %v3256_v7  ;;  %v3142_v35 = vmax.f32 %v2860_v8, 0.0 }
 0x407   : > { %v2866_v25 = vadd.f32 %v2865_v3, %v14982_v15  ;;  %v3143_v63 = vmax.f32 %v2862_v41, 0.0 }
 0x408   : > { %v3144_v50 = vmax.f32 %v2864_v52, 0.0 }
 0x409   : > { %v3145_v26 = vmax.f32 %v2866_v25, 0.0 }
 0x40a   : > { %v3258_v24 = vpack.c.bf16 %v3144_v50, %v3142_v35 }
 0x40b   : > { %v2869_v6 = vpop.f32.mrb[156].mxu0  ;;  %v3259_v53 = vpack.c.bf16 %v3145_v26, %v3143_v63 }
 0x40c   : > { %v2870_v9 = vadd.f32 %v2869_v6, %v14978_v22  ;;  %v2871_v28 = vpop.f32.mrb[157].mxu0 }
 0x40d   : > { %v2872_v2 = vadd.f32 %v2871_v28, %v14982_v15  ;;  %v2873_v42 = vpop.f32.mrb[158].mxu0  ;;  %3606 = vmatprep.mubr.bf16.mxu1 %v3259_v53  ;;  %v12735_v28 = vld [vmem:[#allocation12 + $0x10] ss:$8 sps:$4 sm:$0xff]  }
 0x40e   : > { %v2874_v44 = vadd.f32 %v2873_v42, %v14978_v22  ;;  %v2875_v14 = vpop.f32.mrb[159].mxu0  ;;  %3607 = vmatmul.mubr.bf16.gmra.mrb[152].mxu1 %v3258_v24  ;;  %v3146_v40 = vmax.f32 %v2870_v9, 0.0 }
 0x40f   : > { %v2876_v55 = vadd.f32 %v2875_v14, %v14982_v15  ;;  %v3147_v16 = vmax.f32 %v2872_v2, 0.0  ;;  %v12737_v2 = vld [vmem:[#allocation12 + $0x14] ss:$8 sps:$4 sm:$0xff]  }
 0x410   : > { %v3148_v31 = vmax.f32 %v2874_v44, 0.0  ;;  %5014 = vmatprep.subr.bf16.mxu1 %v12737_v2 }
 0x411   : > { %v3149_v38 = vmax.f32 %v2876_v55, 0.0  ;;  %5015 = vmatpush1.bf16.msra.mxu1 %v12735_v28 }
 0x412   : > { %v3260_v21 = vpack.c.bf16 %v3148_v31, %v3146_v40 }
 0x413   : > { %v2879_v60 = vpop.f32.mrb[160].mxu0  ;;  %v3261_v13 = vpack.c.bf16 %v3149_v38, %v3147_v16 }
 0x414   : > { %v2880_v23 = vadd.f32 %v2879_v60, %v14978_v22  ;;  %v2881_v12 = vpop.f32.mrb[161].mxu0  ;;  %v12740_v60 = vld [vmem:[#allocation10 + $0xf4] ss:$8 sps:$4 sm:$0xff]  }
 0x415   : > { %v2882_v17 = vadd.f32 %v2881_v12, %v14982_v15  ;;  %v2883_v34 = vpop.f32.mrb[162].mxu0  ;;  %3616 = vmatprep.mubr.bf16.mxu1 %v3261_v13  ;;  %4293 = vmatprep.subr.bf16.mxu0 %v12740_v60 }
 0x416   : > { %v2884_v5 = vadd.f32 %v2883_v34, %v14978_v22  ;;  %v2885_v32 = vpop.f32.mrb[163].mxu0  ;;  %3617 = vmatmul.mubr.bf16.gmra.mrb[156].mxu1 %v3260_v21  ;;  %v3150_v54 = vmax.f32 %v2880_v23, 0.0  ;;  %v12738_v21 = vld [vmem:[#allocation10 + $0xf0] ss:$8 sps:$4 sm:$0xff]  }
 0x417   : > { %v2886_v30 = vadd.f32 %v2885_v32, %v14982_v15  ;;  %v3151_v1 = vmax.f32 %v2882_v17, 0.0  ;;  %4294 = vmatpush1.bf16.msra.mxu0 %v12738_v21  ;;  %v12746_v21 = vld [vmem:[#allocation12 + $0x34] ss:$8 sps:$4 sm:$0xff]  }
 0x418   : > { %v3152_v57 = vmax.f32 %v2884_v5, 0.0 }
 0x419   : > { %v3153_v27 = vmax.f32 %v2886_v30, 0.0 }
 0x41a   : > { %v3262_v18 = vpack.c.bf16 %v3152_v57, %v3150_v54 }
 0x41b   : > { %v2889_v33 = vpop.f32.mrb[164].mxu0  ;;  %v3263_v56 = vpack.c.bf16 %v3153_v27, %v3151_v1 }
 0x41c   : > { %v2890_v4 = vadd.f32 %v2889_v33, %v14978_v22  ;;  %v2891_v29 = vpop.f32.mrb[165].mxu0 }
 0x41d   : > { %v2892_v10 = vadd.f32 %v2891_v29, %v14982_v15  ;;  %v2893_v11 = vpop.f32.mrb[166].mxu0  ;;  %3626 = vmatprep.mubr.bf16.mxu1 %v3263_v56 }
 0x41e   : > { %v2894_v48 = vadd.f32 %v2893_v11, %v14978_v22  ;;  %v2895_v20 = vpop.f32.mrb[167].mxu0  ;;  %3627 = vmatmul.mubr.bf16.gmra.mrb[160].mxu1 %v3262_v18  ;;  %v3154_v7 = vmax.f32 %v2890_v4, 0.0 }
 0x41f   : > { %v2896_v37 = vadd.f32 %v2895_v20, %v14982_v15  ;;  %v3155_v59 = vmax.f32 %v2892_v10, 0.0 }
 0x420   : > { %v3156_v19 = vmax.f32 %v2894_v48, 0.0 }
 0x421   : > { %v3157_v8 = vmax.f32 %v2896_v37, 0.0 }
 0x422   : > { %v3264_v46 = vpack.c.bf16 %v3156_v19, %v3154_v7  ;;  %v12743_v7 = vld [vmem:[#allocation12 + $0x24] ss:$8 sps:$4 sm:$0xff]  }
 0x423   : > { %v2899_v41 = vpop.f32.mrb[168].mxu0  ;;  %v3265_v61 = vpack.c.bf16 %v3157_v8, %v3155_v59  ;;  %5016 = vmatprep.subr.bf16.mxu1 %v12743_v7 }
 0x424   : > { %v2900_v52 = vadd.f32 %v2899_v41, %v14978_v22  ;;  %v2901_v3 = vpop.f32.mrb[169].mxu0  ;;  %5017 = vmatpush1.bf16.msra.mxu1 %v12741_v58 }
 0x425   : > { %v2902_v25 = vadd.f32 %v2901_v3, %v14982_v15  ;;  %v2903_v35 = vpop.f32.mrb[170].mxu0  ;;  %3636 = vmatprep.mubr.bf16.mxu1 %v3265_v61  ;;  %5018 = vmatprep.subr.bf16.mxu1 %v12746_v21 }
 0x426   : > { %v2904_v50 = vadd.f32 %v2903_v35, %v14978_v22  ;;  %v2905_v63 = vpop.f32.mrb[171].mxu0  ;;  %3637 = vmatmul.mubr.bf16.gmra.mrb[164].mxu1 %v3264_v46  ;;  %v3158_v24 = vmax.f32 %v2900_v52, 0.0 }
 0x427   : > { %v2906_v26 = vadd.f32 %v2905_v63, %v14982_v15  ;;  %v3159_v53 = vmax.f32 %v2902_v25, 0.0 }
 0x428   : > { %v3160_v6 = vmax.f32 %v2904_v50, 0.0 }
 0x429   : > { %v3161_v9 = vmax.f32 %v2906_v26, 0.0 }
 0x42a   : > { %v3266_v42 = vpack.c.bf16 %v3160_v6, %v3158_v24 }
 0x42b   : > { %v2909_v44 = vpop.f32.mrb[172].mxu0  ;;  %v3267_v14 = vpack.c.bf16 %v3161_v9, %v3159_v53 }
 0x42c   : > { %v2910_v55 = vadd.f32 %v2909_v44, %v14978_v22  ;;  %v2911_v49 = vpop.f32.mrb[173].mxu0 }
 0x42d   : > { %v2912_v62 = vadd.f32 %v2911_v49, %v14982_v15  ;;  %v2913_v40 = vpop.f32.mrb[174].mxu0  ;;  %3646 = vmatprep.mubr.bf16.mxu1 %v3267_v14 }
 0x42e   : > { %v2914_v31 = vadd.f32 %v2913_v40, %v14978_v22  ;;  %v2915_v16 = vpop.f32.mrb[175].mxu0  ;;  %3647 = vmatmul.mubr.bf16.gmra.mrb[168].mxu1 %v3266_v42  ;;  %v3162_v13 = vmax.f32 %v2910_v55, 0.0 }
 0x42f   : > { %v2916_v38 = vadd.f32 %v2915_v16, %v14982_v15  ;;  %v3163_v12 = vmax.f32 %v2912_v62, 0.0 }
 0x430   : > { %v3164_v23 = vmax.f32 %v2914_v31, 0.0 }
 0x431   : > { %v3165_v17 = vmax.f32 %v2916_v38, 0.0  ;;  %v12744_v38 = vld [vmem:[#allocation12 + $0x30] ss:$8 sps:$4 sm:$0xff]  }
 0x432   : > { %v3268_v34 = vpack.c.bf16 %v3164_v23, %v3162_v13  ;;  %5019 = vmatpush1.bf16.msra.mxu1 %v12744_v38 }
 0x433   : > { %v2919_v5 = vpop.f32.mrb[176].mxu0  ;;  %v3269_v32 = vpack.c.bf16 %v3165_v17, %v3163_v12 }
 0x434   : > { %v2920_v30 = vadd.f32 %v2919_v5, %v14978_v22  ;;  %v2921_v54 = vpop.f32.mrb[177].mxu0 }
 0x435   : > { %v2922_v57 = vadd.f32 %v2921_v54, %v14982_v15  ;;  %v2923_v1 = vpop.f32.mrb[178].mxu0  ;;  %3656 = vmatprep.mubr.bf16.mxu1 %v3269_v32 }
 0x436   : > { %v2924_v27 = vadd.f32 %v2923_v1, %v14978_v22  ;;  %v2925_v39 = vpop.f32.mrb[179].mxu0  ;;  %3657 = vmatmul.mubr.bf16.gmra.mrb[172].mxu1 %v3268_v34  ;;  %v3166_v18 = vmax.f32 %v2920_v30, 0.0 }
 0x437   : > { %v2926_v51 = vadd.f32 %v2925_v39, %v14982_v15  ;;  %v3167_v56 = vmax.f32 %v2922_v57, 0.0 }
 0x438   : > { %v3168_v33 = vmax.f32 %v2924_v27, 0.0 }
 0x439   : > { %v3169_v4 = vmax.f32 %v2926_v51, 0.0 }
 0x43a   : > { %v3270_v29 = vpack.c.bf16 %v3168_v33, %v3166_v18 }
 0x43b   : > { %v2929_v10 = vpop.f32.mrb[180].mxu0  ;;  %v3271_v11 = vpack.c.bf16 %v3169_v4, %v3167_v56 }
 0x43c   : > { %v2930_v48 = vadd.f32 %v2929_v10, %v14978_v22  ;;  %v2931_v20 = vpop.f32.mrb[181].mxu0 }
 0x43d   : > { %v2932_v37 = vadd.f32 %v2931_v20, %v14982_v15  ;;  %v2933_v36 = vpop.f32.mrb[182].mxu0  ;;  %3666 = vmatprep.mubr.bf16.mxu1 %v3271_v11 }
 0x43e   : > { %v2934_v19 = vadd.f32 %v2933_v36, %v14978_v22  ;;  %v2935_v59 = vpop.f32.mrb[183].mxu0  ;;  %3667 = vmatmul.mubr.bf16.gmra.mrb[176].mxu1 %v3270_v29  ;;  %v3170_v46 = vmax.f32 %v2930_v48, 0.0 }
 0x43f   : > { %v2936_v8 = vadd.f32 %v2935_v59, %v14982_v15  ;;  %v3171_v61 = vmax.f32 %v2932_v37, 0.0  ;;  %v12749_v59 = vld [vmem:[#allocation12 + $0x44] ss:$8 sps:$4 sm:$0xff]  }
 0x440   : > { %v3172_v41 = vmax.f32 %v2934_v19, 0.0  ;;  %v12747_v19 = vld [vmem:[#allocation12 + $0x40] ss:$8 sps:$4 sm:$0xff]   ;;  %5020 = vmatprep.subr.bf16.mxu1 %v12749_v59 }
 0x441   : > { %v3173_v52 = vmax.f32 %v2936_v8, 0.0  ;;  %5021 = vmatpush1.bf16.msra.mxu1 %v12747_v19 }
 0x442   : > { %v3272_v3 = vpack.c.bf16 %v3172_v41, %v3170_v46 }
 0x443   : > { %v2939_v25 = vpop.f32.mrb[184].mxu0  ;;  %v3273_v35 = vpack.c.bf16 %v3173_v52, %v3171_v61 }
 0x444   : > { %v2940_v50 = vadd.f32 %v2939_v25, %v14978_v22  ;;  %v2941_v63 = vpop.f32.mrb[185].mxu0 }
 0x445   : > { %v2942_v26 = vadd.f32 %v2941_v63, %v14982_v15  ;;  %v2943_v24 = vpop.f32.mrb[186].mxu0  ;;  %3676 = vmatprep.mubr.bf16.mxu1 %v3273_v35 }
 0x446   : > { %v2944_v6 = vadd.f32 %v2943_v24, %v14978_v22  ;;  %v2945_v53 = vpop.f32.mrb[187].mxu0  ;;  %3677 = vmatmul.mubr.bf16.gmra.mrb[180].mxu1 %v3272_v3  ;;  %v3174_v28 = vmax.f32 %v2940_v50, 0.0 }
 0x447   : > { %v2946_v9 = vadd.f32 %v2945_v53, %v14982_v15  ;;  %v3175_v42 = vmax.f32 %v2942_v26, 0.0 }
 0x448   : > { %v3176_v2 = vmax.f32 %v2944_v6, 0.0 }
 0x449   : > { %v3177_v44 = vmax.f32 %v2946_v9, 0.0 }
 0x44a   : > { %v3274_v14 = vpack.c.bf16 %v3176_v2, %v3174_v28 }
 0x44b   : > { %v2949_v55 = vpop.f32.mrb[188].mxu0  ;;  %v3275_v49 = vpack.c.bf16 %v3177_v44, %v3175_v42 }
 0x44c   : > { %v2950_v62 = vadd.f32 %v2949_v55, %v14978_v22  ;;  %v2951_v40 = vpop.f32.mrb[189].mxu0 }
 0x44d   : > { %v2952_v31 = vadd.f32 %v2951_v40, %v14982_v15  ;;  %v2953_v16 = vpop.f32.mrb[190].mxu0  ;;  %3686 = vmatprep.mubr.bf16.mxu1 %v3275_v49 }
 0x44e   : > { %v2954_v60 = vadd.f32 %v2953_v16, %v14978_v22  ;;  %v2955_v13 = vpop.f32.mrb[191].mxu0  ;;  %3687 = vmatmul.mubr.bf16.gmra.mrb[184].mxu1 %v3274_v14  ;;  %v3178_v12 = vmax.f32 %v2950_v62, 0.0 }
 0x44f   : > { %v2956_v23 = vadd.f32 %v2955_v13, %v14982_v15  ;;  %v3179_v34 = vmax.f32 %v2952_v31, 0.0  ;;  %v12752_v13 = vld [vmem:[#allocation12 + $0x54] ss:$8 sps:$4 sm:$0xff]  }
 0x450   : > { %v3180_v17 = vmax.f32 %v2954_v60, 0.0  ;;  %v12750_v60 = vld [vmem:[#allocation12 + $0x50] ss:$8 sps:$4 sm:$0xff]   ;;  %5022 = vmatprep.subr.bf16.mxu1 %v12752_v13 }
 0x451   : > { %v3181_v5 = vmax.f32 %v2956_v23, 0.0  ;;  %5023 = vmatpush1.bf16.msra.mxu1 %v12750_v60 }
 0x452   : > { %v3276_v32 = vpack.c.bf16 %v3180_v17, %v3178_v12 }
 0x453   : > { %v2959_v30 = vpop.f32.mrb[192].mxu0  ;;  %v3277_v54 = vpack.c.bf16 %v3181_v5, %v3179_v34 }
 0x454   : > { %v2960_v57 = vadd.f32 %v2959_v30, %v14978_v22  ;;  %v2961_v1 = vpop.f32.mrb[193].mxu0 }
 0x455   : > { %v2962_v27 = vadd.f32 %v2961_v1, %v14982_v15  ;;  %v2963_v39 = vpop.f32.mrb[194].mxu0  ;;  %3696 = vmatprep.mubr.bf16.mxu1 %v3277_v54 }
 0x456   : > { %v2964_v51 = vadd.f32 %v2963_v39, %v14978_v22  ;;  %v2965_v18 = vpop.f32.mrb[195].mxu0  ;;  %3697 = vmatmul.mubr.bf16.gmra.mrb[188].mxu1 %v3276_v32  ;;  %v3182_v56 = vmax.f32 %v2960_v57, 0.0 }
 0x457   : > { %v2966_v33 = vadd.f32 %v2965_v18, %v14982_v15  ;;  %v3183_v29 = vmax.f32 %v2962_v27, 0.0 }
 0x458   : > { %v3184_v4 = vmax.f32 %v2964_v51, 0.0 }
 0x459   : > { %v3185_v10 = vmax.f32 %v2966_v33, 0.0 }
 0x45a   : > { %v3278_v11 = vpack.c.bf16 %v3184_v4, %v3182_v56 }
 0x45b   : > { %v2969_v48 = vpop.f32.mrb[196].mxu0  ;;  %v3279_v20 = vpack.c.bf16 %v3185_v10, %v3183_v29 }
 0x45c   : > { %v2970_v37 = vadd.f32 %v2969_v48, %v14978_v22  ;;  %v2971_v36 = vpop.f32.mrb[197].mxu0 }
 0x45d   : > { %v2972_v58 = vadd.f32 %v2971_v36, %v14982_v15  ;;  %v2973_v7 = vpop.f32.mrb[198].mxu0  ;;  %3706 = vmatprep.mubr.bf16.mxu1 %v3279_v20 }
 0x45e   : > { %v2974_v8 = vadd.f32 %v2973_v7, %v14978_v22  ;;  %v2975_v46 = vpop.f32.mrb[199].mxu0  ;;  %3707 = vmatmul.mubr.bf16.gmra.mrb[192].mxu1 %v3278_v11  ;;  %v3186_v61 = vmax.f32 %v2970_v37, 0.0 }
 0x45f   : > { %v2976_v41 = vadd.f32 %v2975_v46, %v14982_v15  ;;  %v3187_v3 = vmax.f32 %v2972_v58, 0.0  ;;  %v12755_v46 = vld [vmem:[#allocation12 + $0x64] ss:$8 sps:$4 sm:$0xff]  }
 0x460   : > { %v3188_v52 = vmax.f32 %v2974_v8, 0.0  ;;  %v12753_v8 = vld [vmem:[#allocation12 + $0x60] ss:$8 sps:$4 sm:$0xff]   ;;  %5024 = vmatprep.subr.bf16.mxu1 %v12755_v46 }
 0x461   : > { %v3189_v25 = vmax.f32 %v2976_v41, 0.0  ;;  %5025 = vmatpush1.bf16.msra.mxu1 %v12753_v8 }
 0x462   : > { %v3280_v35 = vpack.c.bf16 %v3188_v52, %v3186_v61 }
 0x463   : > { %v2979_v50 = vpop.f32.mrb[200].mxu0  ;;  %v3281_v63 = vpack.c.bf16 %v3189_v25, %v3187_v3 }
 0x464   : > { %v2980_v26 = vadd.f32 %v2979_v50, %v14978_v22  ;;  %v2981_v24 = vpop.f32.mrb[201].mxu0 }
 0x465   : > { %v2982_v6 = vadd.f32 %v2981_v24, %v14982_v15  ;;  %v2983_v53 = vpop.f32.mrb[202].mxu0  ;;  %3716 = vmatprep.mubr.bf16.mxu1 %v3281_v63 }
 0x466   : > { %v2984_v9 = vadd.f32 %v2983_v53, %v14978_v22  ;;  %v2985_v28 = vpop.f32.mrb[203].mxu0  ;;  %3717 = vmatmul.mubr.bf16.gmra.mrb[196].mxu1 %v3280_v35  ;;  %v3190_v42 = vmax.f32 %v2980_v26, 0.0 }
 0x467   : > { %v2986_v2 = vadd.f32 %v2985_v28, %v14982_v15  ;;  %v3191_v14 = vmax.f32 %v2982_v6, 0.0 }
 0x468   : > { %v3192_v44 = vmax.f32 %v2984_v9, 0.0 }
 0x469   : > { %v3193_v55 = vmax.f32 %v2986_v2, 0.0 }
 0x46a   : > { %v3282_v49 = vpack.c.bf16 %v3192_v44, %v3190_v42 }
 0x46b   : > { %v2989_v62 = vpop.f32.mrb[204].mxu0  ;;  %v3283_v40 = vpack.c.bf16 %v3193_v55, %v3191_v14 }
 0x46c   : > { %v2990_v31 = vadd.f32 %v2989_v62, %v14978_v22  ;;  %v2991_v16 = vpop.f32.mrb[205].mxu0 }
 0x46d   : > { %v2992_v38 = vadd.f32 %v2991_v16, %v14982_v15  ;;  %v2993_v21 = vpop.f32.mrb[206].mxu0  ;;  %3726 = vmatprep.mubr.bf16.mxu1 %v3283_v40 }
 0x46e   : > { %v2994_v23 = vadd.f32 %v2993_v21, %v14978_v22  ;;  %v2995_v12 = vpop.f32.mrb[207].mxu0  ;;  %3727 = vmatmul.mubr.bf16.gmra.mrb[200].mxu1 %v3282_v49  ;;  %v3194_v34 = vmax.f32 %v2990_v31, 0.0 }
 0x46f   : > { %v2996_v17 = vadd.f32 %v2995_v12, %v14982_v15  ;;  %v3195_v32 = vmax.f32 %v2992_v38, 0.0  ;;  %v12758_v12 = vld [vmem:[#allocation12 + $0x74] ss:$8 sps:$4 sm:$0xff]  }
 0x470   : > { %v3196_v5 = vmax.f32 %v2994_v23, 0.0  ;;  %v12756_v23 = vld [vmem:[#allocation12 + $0x70] ss:$8 sps:$4 sm:$0xff]   ;;  %5026 = vmatprep.subr.bf16.mxu1 %v12758_v12 }
 0x471   : > { %v3197_v30 = vmax.f32 %v2996_v17, 0.0  ;;  %5027 = vmatpush1.bf16.msra.mxu1 %v12756_v23 }
 0x472   : > { %v3284_v54 = vpack.c.bf16 %v3196_v5, %v3194_v34 }
 0x473   : > { %v2999_v57 = vpop.f32.mrb[208].mxu0  ;;  %v3285_v1 = vpack.c.bf16 %v3197_v30, %v3195_v32 }
 0x474   : > { %v3000_v27 = vadd.f32 %v2999_v57, %v14978_v22  ;;  %v3001_v39 = vpop.f32.mrb[209].mxu0 }
 0x475   : > { %v3002_v51 = vadd.f32 %v3001_v39, %v14982_v15  ;;  %v3003_v18 = vpop.f32.mrb[210].mxu0  ;;  %3736 = vmatprep.mubr.bf16.mxu1 %v3285_v1 }
 0x476   : > { %v3004_v33 = vadd.f32 %v3003_v18, %v14978_v22  ;;  %v3005_v56 = vpop.f32.mrb[211].mxu0  ;;  %3737 = vmatmul.mubr.bf16.gmra.mrb[204].mxu1 %v3284_v54  ;;  %v3198_v29 = vmax.f32 %v3000_v27, 0.0 }
 0x477   : > { %v3006_v4 = vadd.f32 %v3005_v56, %v14982_v15  ;;  %v3199_v11 = vmax.f32 %v3002_v51, 0.0 }
 0x478   : > { %v3200_v10 = vmax.f32 %v3004_v33, 0.0 }
 0x479   : > { %v3201_v48 = vmax.f32 %v3006_v4, 0.0 }
 0x47a   : > { %v3286_v20 = vpack.c.bf16 %v3200_v10, %v3198_v29 }
 0x47b   : > { %v3009_v37 = vpop.f32.mrb[212].mxu0  ;;  %v3287_v36 = vpack.c.bf16 %v3201_v48, %v3199_v11 }
 0x47c   : > { %v3010_v58 = vadd.f32 %v3009_v37, %v14978_v22  ;;  %v3011_v7 = vpop.f32.mrb[213].mxu0 }
 0x47d   : > { %v3012_v19 = vadd.f32 %v3011_v7, %v14982_v15  ;;  %v3013_v59 = vpop.f32.mrb[214].mxu0  ;;  %3746 = vmatprep.mubr.bf16.mxu1 %v3287_v36 }
 0x47e   : > { %v3014_v41 = vadd.f32 %v3013_v59, %v14978_v22  ;;  %v3015_v61 = vpop.f32.mrb[215].mxu0  ;;  %3747 = vmatmul.mubr.bf16.gmra.mrb[208].mxu1 %v3286_v20  ;;  %v3202_v3 = vmax.f32 %v3010_v58, 0.0 }
 0x47f   : > { %v3016_v52 = vadd.f32 %v3015_v61, %v14982_v15  ;;  %v3203_v35 = vmax.f32 %v3012_v19, 0.0  ;;  %v12761_v61 = vld [vmem:[#allocation12 + $0x84] ss:$8 sps:$4 sm:$0xff]  }
 0x480   : > { %v3204_v25 = vmax.f32 %v3014_v41, 0.0  ;;  %v12759_v41 = vld [vmem:[#allocation12 + $0x80] ss:$8 sps:$4 sm:$0xff]   ;;  %5028 = vmatprep.subr.bf16.mxu1 %v12761_v61 }
 0x481   : > { %v3205_v50 = vmax.f32 %v3016_v52, 0.0  ;;  %5029 = vmatpush1.bf16.msra.mxu1 %v12759_v41 }
 0x482   : > { %v3288_v63 = vpack.c.bf16 %v3204_v25, %v3202_v3 }
 0x483   : > { %v3019_v26 = vpop.f32.mrb[216].mxu0  ;;  %v3289_v24 = vpack.c.bf16 %v3205_v50, %v3203_v35 }
 0x484   : > { %v3020_v6 = vadd.f32 %v3019_v26, %v14978_v22  ;;  %v3021_v53 = vpop.f32.mrb[217].mxu0 }
 0x485   : > { %v3022_v9 = vadd.f32 %v3021_v53, %v14982_v15  ;;  %v3023_v28 = vpop.f32.mrb[218].mxu0  ;;  %3756 = vmatprep.mubr.bf16.mxu1 %v3289_v24 }
 0x486   : > { %v3024_v2 = vadd.f32 %v3023_v28, %v14978_v22  ;;  %v3025_v42 = vpop.f32.mrb[219].mxu0  ;;  %3757 = vmatmul.mubr.bf16.gmra.mrb[212].mxu1 %v3288_v63  ;;  %v3206_v14 = vmax.f32 %v3020_v6, 0.0 }
 0x487   : > { %v3026_v44 = vadd.f32 %v3025_v42, %v14982_v15  ;;  %v3207_v49 = vmax.f32 %v3022_v9, 0.0 }
 0x488   : > { %v3208_v55 = vmax.f32 %v3024_v2, 0.0 }
 0x489   : > { %v3209_v62 = vmax.f32 %v3026_v44, 0.0 }
 0x48a   : > { %v3290_v40 = vpack.c.bf16 %v3208_v55, %v3206_v14 }
 0x48b   : > { %v3029_v31 = vpop.f32.mrb[220].mxu0  ;;  %v3291_v16 = vpack.c.bf16 %v3209_v62, %v3207_v49 }
 0x48c   : > { %v3030_v38 = vadd.f32 %v3029_v31, %v14978_v22  ;;  %v3031_v21 = vpop.f32.mrb[221].mxu0 }
 0x48d   : > { %v3032_v60 = vadd.f32 %v3031_v21, %v14982_v15  ;;  %v3033_v13 = vpop.f32.mrb[222].mxu0  ;;  %3766 = vmatprep.mubr.bf16.mxu1 %v3291_v16 }
 0x48e   : > { %v3034_v17 = vadd.f32 %v3033_v13, %v14978_v22  ;;  %v3035_v34 = vpop.f32.mrb[223].mxu0  ;;  %3767 = vmatmul.mubr.bf16.gmra.mrb[216].mxu1 %v3290_v40  ;;  %v3210_v32 = vmax.f32 %v3030_v38, 0.0 }
 0x48f   : > { %v3036_v5 = vadd.f32 %v3035_v34, %v14982_v15  ;;  %v3211_v54 = vmax.f32 %v3032_v60, 0.0  ;;  %v3342_v60 = vld [vmem:[%s18283_s5] sm:$0x3]  ;;  %v12762_v34 = vld [vmem:[#allocation12 + $0x90] ss:$8 sps:$4 sm:$0xff]  }
 0x490   : > { %v3212_v30 = vmax.f32 %v3034_v17, 0.0 }
 0x491   : > { %v3213_v57 = vmax.f32 %v3036_v5, 0.0  ;;  %v12764_v5 = vld [vmem:[#allocation12 + $0x94] ss:$8 sps:$4 sm:$0xff]  }
 0x492   : > { %v3292_v1 = vpack.c.bf16 %v3212_v30, %v3210_v32  ;;  %5030 = vmatprep.subr.bf16.mxu1 %v12764_v5 }
 0x493   : > { %v3039_v27 = vpop.f32.mrb[224].mxu0  ;;  %v3293_v39 = vpack.c.bf16 %v3213_v57, %v3211_v54  ;;  %v15112_v54 = vrot.slane %v3342_v60, %v14593_v45  ;;  %5031 = vmatpush1.bf16.msra.mxu1 %v12762_v34 }
 0x494   : > { %v3040_v51 = vadd.f32 %v3039_v27, %v14978_v22  ;;  %v3041_v18 = vpop.f32.mrb[225].mxu0 }
 0x495   : > { %v3042_v33 = vadd.f32 %v3041_v18, %v14982_v15  ;;  %v3043_v56 = vpop.f32.mrb[226].mxu0  ;;  %3776 = vmatprep.mubr.bf16.mxu1 %v3293_v39 }
 0x496   : > { %v3044_v4 = vadd.f32 %v3043_v56, %v14978_v22  ;;  %v3045_v29 = vpop.f32.mrb[227].mxu0  ;;  %3777 = vmatmul.mubr.bf16.gmra.mrb[220].mxu1 %v3292_v1  ;;  %v3214_v11 = vmax.f32 %v3040_v51, 0.0  ;;  %v15116_v1 = vrot.slane %v3342_v60, %v14599_v47 }
 0x497   : > { %v3046_v10 = vadd.f32 %v3045_v29, %v14982_v15  ;;  %v3215_v20 = vmax.f32 %v3042_v33, 0.0 }
 0x498   : > { %v3216_v48 = vmax.f32 %v3044_v4, 0.0 }
 0x499   : > { %v3217_v37 = vmax.f32 %v3046_v10, 0.0 }
 0x49a   : > { %v3294_v36 = vpack.c.bf16 %v3216_v48, %v3214_v11 }
 0x49b   : > { %v3049_v58 = vpop.f32.mrb[228].mxu0  ;;  %v3295_v7 = vpack.c.bf16 %v3217_v37, %v3215_v20 }
 0x49c   : > { %v3050_v19 = vadd.f32 %v3049_v58, %v14978_v22  ;;  %v3051_v59 = vpop.f32.mrb[229].mxu0 }
 0x49d   : > { %v3052_v8 = vadd.f32 %v3051_v59, %v14982_v15  ;;  %v3053_v46 = vpop.f32.mrb[230].mxu0  ;;  %3786 = vmatprep.mubr.bf16.mxu1 %v3295_v7 }
 0x49e   : > { %v3054_v52 = vadd.f32 %v3053_v46, %v14978_v22  ;;  %v3055_v3 = vpop.f32.mrb[231].mxu0  ;;  %3787 = vmatmul.mubr.bf16.gmra.mrb[224].mxu1 %v3294_v36  ;;  %v3218_v35 = vmax.f32 %v3050_v19, 0.0 }
 0x49f   : > { %v3056_v25 = vadd.f32 %v3055_v3, %v14982_v15  ;;  %v3219_v63 = vmax.f32 %v3052_v8, 0.0 }
 0x4a0   : > { %v3220_v50 = vmax.f32 %v3054_v52, 0.0 }
 0x4a1   : > { %v3221_v26 = vmax.f32 %v3056_v25, 0.0 }
 0x4a2   : > { %v3296_v24 = vpack.c.bf16 %v3220_v50, %v3218_v35 }
 0x4a3   : > { %v3059_v6 = vpop.f32.mrb[232].mxu0  ;;  %v3297_v53 = vpack.c.bf16 %v3221_v26, %v3219_v63 }
 0x4a4   : > { %v3060_v9 = vadd.f32 %v3059_v6, %v14978_v22  ;;  %v3061_v28 = vpop.f32.mrb[233].mxu0 }
 0x4a5   : > { %v3062_v2 = vadd.f32 %v3061_v28, %v14982_v15  ;;  %v3063_v42 = vpop.f32.mrb[234].mxu0  ;;  %3796 = vmatprep.mubr.bf16.mxu1 %v3297_v53 }
 0x4a6   : > { %v3064_v44 = vadd.f32 %v3063_v42, %v14978_v22  ;;  %v3065_v14 = vpop.f32.mrb[235].mxu0  ;;  %3797 = vmatmul.mubr.bf16.gmra.mrb[228].mxu1 %v3296_v24  ;;  %v3222_v49 = vmax.f32 %v3060_v9, 0.0 }
 0x4a7   : > { %v3066_v55 = vadd.f32 %v3065_v14, %v14982_v15  ;;  %v3223_v40 = vmax.f32 %v3062_v2, 0.0 }
 0x4a8   : > { %v3224_v62 = vmax.f32 %v3064_v44, 0.0 }
 0x4a9   : > { %v3225_v31 = vmax.f32 %v3066_v55, 0.0 }
 0x4aa   : > { %v3298_v16 = vpack.c.bf16 %v3224_v62, %v3222_v49 }
 0x4ab   : > { %v3069_v38 = vpop.f32.mrb[236].mxu0  ;;  %v3299_v21 = vpack.c.bf16 %v3225_v31, %v3223_v40 }
 0x4ac   : > { %v3070_v13 = vadd.f32 %v3069_v38, %v14978_v22  ;;  %v3071_v23 = vpop.f32.mrb[237].mxu0 }
 0x4ad   : > { %v3072_v12 = vadd.f32 %v3071_v23, %v14982_v15  ;;  %v3073_v17 = vpop.f32.mrb[238].mxu0  ;;  %3806 = vmatprep.mubr.bf16.mxu1 %v3299_v21  ;;  %v12767_v23 = vld [vmem:[#allocation12 + $0xa4] ss:$8 sps:$4 sm:$0xff]  }
 0x4ae   : > { %v3074_v32 = vadd.f32 %v3073_v17, %v14978_v22  ;;  %v3075_v30 = vpop.f32.mrb[239].mxu0  ;;  %3807 = vmatmul.mubr.bf16.gmra.mrb[232].mxu1 %v3298_v16  ;;  %v3226_v27 = vmax.f32 %v3070_v13, 0.0  ;;  %v12765_v13 = vld [vmem:[#allocation12 + $0xa0] ss:$8 sps:$4 sm:$0xff]   ;;  %5032 = vmatprep.subr.bf16.mxu1 %v12767_v23 }
 0x4af   : > { %v3076_v57 = vadd.f32 %v3075_v30, %v14982_v15  ;;  %v3227_v51 = vmax.f32 %v3072_v12, 0.0  ;;  %5033 = vmatpush1.bf16.msra.mxu1 %v12765_v13 }
 0x4b0   : > { %v3228_v39 = vmax.f32 %v3074_v32, 0.0 }
 0x4b1   : > { %v3229_v18 = vmax.f32 %v3076_v57, 0.0  ;;  %v3548_v33 = vpop.f32.mrb[128].mxu1 }
 0x4b2   : > { %v3549_v56 = vadd.f32 %v3548_v33, %v15112_v54  ;;  %v3550_v4 = vpop.f32.mrb[129].mxu1  ;;  %v3300_v29 = vpack.c.bf16 %v3228_v39, %v3226_v27 }
 0x4b3   : > { %v3551_v10 = vadd.f32 %v3550_v4, %v15116_v1  ;;  %v3079_v11 = vpop.f32.mrb[240].mxu0  ;;  %v3552_v48 = vpop.f32.mrb[130].mxu1  ;;  %v3301_v20 = vpack.c.bf16 %v3229_v18, %v3227_v51 }
 0x4b4   : > { %v3080_v37 = vadd.f32 %v3079_v11, %v14978_v22  ;;  %v3553_v36 = vadd.f32 %v3552_v48, %v15112_v54  ;;  %v3081_v58 = vpop.f32.mrb[241].mxu0  ;;  %v3554_v7 = vpop.f32.mrb[131].mxu1  ;;  %v3867_v46 = vmax.f32 %v3549_v56, 0.0 }
 0x4b5   : > { %v3082_v19 = vadd.f32 %v3081_v58, %v14982_v15  ;;  %v3555_v59 = vadd.f32 %v3554_v7, %v15116_v1  ;;  %v3083_v8 = vpop.f32.mrb[242].mxu0  ;;  %3816 = vmatprep.mubr.bf16.mxu1 %v3301_v20  ;;  %v3868_v3 = vmax.f32 %v3551_v10, 0.0 }
 0x4b6   : > { %v3869_v41 = vmax.f32 %v3553_v36, 0.0  ;;  %v3084_v61 = vadd.f32 %v3083_v8, %v14978_v22  ;;  %v3085_v52 = vpop.f32.mrb[243].mxu0  ;;  %3817 = vmatmul.mubr.bf16.gmra.mrb[236].mxu1 %v3300_v29  ;;  %v3230_v50 = vmax.f32 %v3080_v37, 0.0 }
 0x4b7   : > { %v3870_v25 = vmax.f32 %v3555_v59, 0.0  ;;  %v3086_v35 = vadd.f32 %v3085_v52, %v14982_v15  ;;  %v3231_v24 = vmax.f32 %v3082_v19, 0.0 }
 0x4b8   : > { %v3995_v63 = vpack.c.bf16 %v3869_v41, %v3867_v46  ;;  %v3232_v26 = vmax.f32 %v3084_v61, 0.0 }
 0x4b9   : > { %v3233_v6 = vmax.f32 %v3086_v35, 0.0  ;;  %v3558_v53 = vpop.f32.mrb[132].mxu1  ;;  %v3996_v9 = vpack.c.bf16 %v3870_v25, %v3868_v3 }
 0x4ba   : > { %v3559_v28 = vadd.f32 %v3558_v53, %v15112_v54  ;;  %v3560_v2 = vpop.f32.mrb[133].mxu1  ;;  %v3302_v42 = vpack.c.bf16 %v3232_v26, %v3230_v50 }
 0x4bb   : > { %v3561_v44 = vadd.f32 %v3560_v2, %v15116_v1  ;;  %v3089_v14 = vpop.f32.mrb[244].mxu0  ;;  %v3562_v55 = vpop.f32.mrb[134].mxu1  ;;  %4295 = vmatprep.mubr.bf16.mxu0 %v3996_v9  ;;  %v3303_v49 = vpack.c.bf16 %v3233_v6, %v3231_v24 }
 0x4bc   : > { %v3090_v62 = vadd.f32 %v3089_v14, %v14978_v22  ;;  %v3563_v40 = vadd.f32 %v3562_v55, %v15112_v54  ;;  %v3091_v31 = vpop.f32.mrb[245].mxu0  ;;  %v3564_v16 = vpop.f32.mrb[135].mxu1  ;;  %4296 = vmatmul.mubr.bf16.vlgmr.msra.gmra.mrb[0].mxu0 %v3995_v63  ;;  %v3871_v12 = vmax.f32 %v3559_v28, 0.0 }
 0x4bd   : > { %v3092_v38 = vadd.f32 %v3091_v31, %v14982_v15  ;;  %v3565_v21 = vadd.f32 %v3564_v16, %v15116_v1  ;;  %v3093_v60 = vpop.f32.mrb[246].mxu0  ;;  %3826 = vmatprep.mubr.bf16.mxu1 %v3303_v49  ;;  %v3872_v32 = vmax.f32 %v3561_v44, 0.0 }
 0x4be   : > { %v3873_v17 = vmax.f32 %v3563_v40, 0.0  ;;  %v3094_v34 = vadd.f32 %v3093_v60, %v14978_v22  ;;  %v3095_v5 = vpop.f32.mrb[247].mxu0  ;;  %3827 = vmatmul.mubr.bf16.gmra.mrb[240].mxu1 %v3302_v42  ;;  %v3234_v27 = vmax.f32 %v3090_v62, 0.0 }
 0x4bf   : > { %v3874_v30 = vmax.f32 %v3565_v21, 0.0  ;;  %v3096_v57 = vadd.f32 %v3095_v5, %v14982_v15  ;;  %v3235_v18 = vmax.f32 %v3092_v38, 0.0 }
 0x4c0   : > { %v3997_v39 = vpack.c.bf16 %v3873_v17, %v3871_v12  ;;  %v3236_v51 = vmax.f32 %v3094_v34, 0.0  ;;  %v12768_v12 = vld [vmem:[#allocation12 + $0xb0] ss:$8 sps:$4 sm:$0xff]   ;;  %v12770_v17 = vld [vmem:[#allocation12 + $0xb4] ss:$8 sps:$4 sm:$0xff]  }
 0x4c1   : > { %v3237_v33 = vmax.f32 %v3096_v57, 0.0  ;;  %v3568_v56 = vpop.f32.mrb[136].mxu1  ;;  %v3998_v4 = vpack.c.bf16 %v3874_v30, %v3872_v32  ;;  %5034 = vmatprep.subr.bf16.mxu1 %v12770_v17 }
 0x4c2   : > { %v3569_v29 = vadd.f32 %v3568_v56, %v15112_v54  ;;  %v3570_v10 = vpop.f32.mrb[137].mxu1  ;;  %v3304_v11 = vpack.c.bf16 %v3236_v51, %v3234_v27  ;;  %5035 = vmatpush1.bf16.msra.mxu1 %v12768_v12 }
 0x4c3   : > { %v3571_v48 = vadd.f32 %v3570_v10, %v15116_v1  ;;  %v3099_v20 = vpop.f32.mrb[248].mxu0  ;;  %v3572_v37 = vpop.f32.mrb[138].mxu1  ;;  %4305 = vmatprep.mubr.bf16.mxu0 %v3998_v4  ;;  %v3305_v36 = vpack.c.bf16 %v3237_v33, %v3235_v18 }
 0x4c4   : > { %v3100_v58 = vadd.f32 %v3099_v20, %v14978_v22  ;;  %v3573_v7 = vadd.f32 %v3572_v37, %v15112_v54  ;;  %v3101_v19 = vpop.f32.mrb[249].mxu0  ;;  %v3574_v59 = vpop.f32.mrb[139].mxu1  ;;  %4306 = vmatmul.mubr.bf16.gmra.mrb[4].mxu0 %v3997_v39  ;;  %v3875_v61 = vmax.f32 %v3569_v29, 0.0 }
 0x4c5   : > { %v3102_v8 = vadd.f32 %v3101_v19, %v14982_v15  ;;  %v3575_v46 = vadd.f32 %v3574_v59, %v15116_v1  ;;  %v3103_v41 = vpop.f32.mrb[250].mxu0  ;;  %3836 = vmatprep.mubr.bf16.mxu1 %v3305_v36  ;;  %v3876_v35 = vmax.f32 %v3571_v48, 0.0 }
 0x4c6   : > { %v3877_v52 = vmax.f32 %v3573_v7, 0.0  ;;  %v3104_v3 = vadd.f32 %v3103_v41, %v14978_v22  ;;  %v3105_v25 = vpop.f32.mrb[251].mxu0  ;;  %3837 = vmatmul.mubr.bf16.gmra.mrb[244].mxu1 %v3304_v11  ;;  %v3238_v26 = vmax.f32 %v3100_v58, 0.0 }
 0x4c7   : > { %v3878_v50 = vmax.f32 %v3575_v46, 0.0  ;;  %v3106_v63 = vadd.f32 %v3105_v25, %v14982_v15  ;;  %v3239_v53 = vmax.f32 %v3102_v8, 0.0 }
 0x4c8   : > { %v3999_v24 = vpack.c.bf16 %v3877_v52, %v3875_v61  ;;  %v3240_v6 = vmax.f32 %v3104_v3, 0.0 }
 0x4c9   : > { %v3241_v9 = vmax.f32 %v3106_v63, 0.0  ;;  %v3578_v28 = vpop.f32.mrb[140].mxu1  ;;  %v4000_v2 = vpack.c.bf16 %v3878_v50, %v3876_v35 }
 0x4ca   : > { %v3579_v42 = vadd.f32 %v3578_v28, %v15112_v54  ;;  %v3580_v44 = vpop.f32.mrb[141].mxu1  ;;  %v3306_v14 = vpack.c.bf16 %v3240_v6, %v3238_v26  ;;  %v12771_v6 = vld [vmem:[#allocation12 + $0xc0] ss:$8 sps:$4 sm:$0xff]  }
 0x4cb   : > { %v3581_v55 = vadd.f32 %v3580_v44, %v15116_v1  ;;  %v3109_v49 = vpop.f32.mrb[252].mxu0  ;;  %v3582_v62 = vpop.f32.mrb[142].mxu1  ;;  %4315 = vmatprep.mubr.bf16.mxu0 %v4000_v2  ;;  %v3307_v40 = vpack.c.bf16 %v3241_v9, %v3239_v53  ;;  %v12773_v53 = vld [vmem:[#allocation12 + $0xc4] ss:$8 sps:$4 sm:$0xff]  }
 0x4cc   : > { %v3110_v31 = vadd.f32 %v3109_v49, %v14978_v22  ;;  %v3583_v16 = vadd.f32 %v3582_v62, %v15112_v54  ;;  %v3111_v38 = vpop.f32.mrb[253].mxu0  ;;  %v3584_v21 = vpop.f32.mrb[143].mxu1  ;;  %4316 = vmatmul.mubr.bf16.gmra.mrb[8].mxu0 %v3999_v24  ;;  %v3879_v34 = vmax.f32 %v3579_v42, 0.0  ;;  %5036 = vmatprep.subr.bf16.mxu1 %v12773_v53 }
 0x4cd   : > { %v3112_v60 = vadd.f32 %v3111_v38, %v14982_v15  ;;  %v3585_v13 = vadd.f32 %v3584_v21, %v15116_v1  ;;  %v3113_v23 = vpop.f32.mrb[254].mxu0  ;;  %3846 = vmatprep.mubr.bf16.mxu1 %v3307_v40  ;;  %v3880_v57 = vmax.f32 %v3581_v55, 0.0  ;;  %5037 = vmatpush1.bf16.msra.mxu1 %v12771_v6 }
 0x4ce   : > { %v3881_v5 = vmax.f32 %v3583_v16, 0.0  ;;  %v3114_v32 = vadd.f32 %v3113_v23, %v14978_v22  ;;  %v3115_v30 = vpop.f32.mrb[255].mxu0  ;;  %3847 = vmatmul.mubr.bf16.gmra.mrb[248].mxu1 %v3306_v14  ;;  %v3242_v51 = vmax.f32 %v3110_v31, 0.0 }
 0x4cf   : > { %v3882_v27 = vmax.f32 %v3585_v13, 0.0  ;;  %v3116_v39 = vadd.f32 %v3115_v30, %v14982_v15  ;;  %v3243_v56 = vmax.f32 %v3112_v60, 0.0 }
 0x4d0   : > { %v4001_v18 = vpack.c.bf16 %v3881_v5, %v3879_v34  ;;  %v3244_v33 = vmax.f32 %v3114_v32, 0.0 }
 0x4d1   : > { %v3245_v4 = vmax.f32 %v3116_v39, 0.0  ;;  %v3588_v29 = vpop.f32.mrb[144].mxu1  ;;  %v4002_v10 = vpack.c.bf16 %v3882_v27, %v3880_v57 }
 0x4d2   : > { %v3589_v11 = vadd.f32 %v3588_v29, %v15112_v54  ;;  %v3590_v48 = vpop.f32.mrb[145].mxu1  ;;  %v3308_v20 = vpack.c.bf16 %v3244_v33, %v3242_v51  ;;  %v12774_v33 = vld [vmem:[#allocation12 + $0xd0] ss:$8 sps:$4 sm:$0xff]  }
 0x4d3   : > { %v3591_v22 = vadd.f32 %v3590_v48, %v15116_v1  ;;  %v3592_v37 = vpop.f32.mrb[146].mxu1  ;;  %4325 = vmatprep.mubr.bf16.mxu0 %v4002_v10  ;;  %v3309_v36 = vpack.c.bf16 %v3245_v4, %v3243_v56  ;;  %v12776_v56 = vld [vmem:[#allocation12 + $0xd4] ss:$8 sps:$4 sm:$0xff]  }
 0x4d4   : > { %v3593_v15 = vadd.f32 %v3592_v37, %v15112_v54  ;;  %v3594_v58 = vpop.f32.mrb[147].mxu1  ;;  %4326 = vmatmul.mubr.bf16.gmra.mrb[12].mxu0 %v4001_v18  ;;  %v3883_v19 = vmax.f32 %v3589_v11, 0.0  ;;  %5038 = vmatprep.subr.bf16.mxu1 %v12776_v56 }
 0x4d5   : > { %v3595_v7 = vadd.f32 %v3594_v58, %v15116_v1  ;;  %3856 = vmatprep.mubr.bf16.mxu1 %v3309_v36  ;;  %v3884_v8 = vmax.f32 %v3591_v22, 0.0  ;;  %5039 = vmatpush1.bf16.msra.mxu1 %v12774_v33 }
 0x4d6   : > { %v3885_v59 = vmax.f32 %v3593_v15, 0.0  ;;  %3857 = vmatmul.mubr.bf16.gmra.mrb[252].mxu1 %v3308_v20 }
 0x4d7   : > { %v3886_v46 = vmax.f32 %v3595_v7, 0.0 }
 0x4d8   : > { %v4003_v41 = vpack.c.bf16 %v3885_v59, %v3883_v19 }
 0x4d9   : > { %v3598_v61 = vpop.f32.mrb[148].mxu1  ;;  %v4004_v52 = vpack.c.bf16 %v3886_v46, %v3884_v8 }
 0x4da   : > { %v3599_v3 = vadd.f32 %v3598_v61, %v15112_v54  ;;  %v3600_v25 = vpop.f32.mrb[149].mxu1 }
 0x4db   : > { %v3601_v35 = vadd.f32 %v3600_v25, %v15116_v1  ;;  %v3602_v50 = vpop.f32.mrb[150].mxu1  ;;  %4335 = vmatprep.mubr.bf16.mxu0 %v4004_v52 }
 0x4dc   : > { %v3603_v63 = vadd.f32 %v3602_v50, %v15112_v54  ;;  %v3604_v26 = vpop.f32.mrb[151].mxu1  ;;  %4336 = vmatmul.mubr.bf16.gmra.mrb[16].mxu0 %v4003_v41  ;;  %v3887_v9 = vmax.f32 %v3599_v3, 0.0 }
 0x4dd   : > { %v3605_v24 = vadd.f32 %v3604_v26, %v15116_v1  ;;  %v3888_v2 = vmax.f32 %v3601_v35, 0.0 }
 0x4de   : > { %v3889_v28 = vmax.f32 %v3603_v63, 0.0 }
 0x4df   : > { %v3890_v42 = vmax.f32 %v3605_v24, 0.0 }
 0x4e0   : > { %v4005_v44 = vpack.c.bf16 %v3889_v28, %v3887_v9  ;;  %v12777_v9 = vld [vmem:[#allocation12 + $0xe0] ss:$8 sps:$4 sm:$0xff]   ;;  %v12779_v28 = vld [vmem:[#allocation12 + $0xe4] ss:$8 sps:$4 sm:$0xff]  }
 0x4e1   : > { %v3608_v14 = vpop.f32.mrb[152].mxu1  ;;  %v4006_v55 = vpack.c.bf16 %v3890_v42, %v3888_v2  ;;  %5040 = vmatprep.subr.bf16.mxu1 %v12779_v28 }
 0x4e2   : > { %v3609_v49 = vadd.f32 %v3608_v14, %v15112_v54  ;;  %v3610_v62 = vpop.f32.mrb[153].mxu1  ;;  %5041 = vmatpush1.bf16.msra.mxu1 %v12777_v9 }
 0x4e3   : > { %v3611_v40 = vadd.f32 %v3610_v62, %v15116_v1  ;;  %v3612_v31 = vpop.f32.mrb[154].mxu1  ;;  %4345 = vmatprep.mubr.bf16.mxu0 %v4006_v55 }
 0x4e4   : > { %v3613_v16 = vadd.f32 %v3612_v31, %v15112_v54  ;;  %v3614_v38 = vpop.f32.mrb[155].mxu1  ;;  %4346 = vmatmul.mubr.bf16.gmra.mrb[20].mxu0 %v4005_v44  ;;  %v3891_v60 = vmax.f32 %v3609_v49, 0.0 }
 0x4e5   : > { %v3615_v21 = vadd.f32 %v3614_v38, %v15116_v1  ;;  %v3892_v23 = vmax.f32 %v3611_v40, 0.0 }
 0x4e6   : > { %v3893_v13 = vmax.f32 %v3613_v16, 0.0 }
 0x4e7   : > { %v3894_v12 = vmax.f32 %v3615_v21, 0.0 }
 0x4e8   : > { %v4007_v17 = vpack.c.bf16 %v3893_v13, %v3891_v60 }
 0x4e9   : > { %v3618_v34 = vpop.f32.mrb[156].mxu1  ;;  %v4008_v5 = vpack.c.bf16 %v3894_v12, %v3892_v23 }
 0x4ea   : > { %v3619_v32 = vadd.f32 %v3618_v34, %v15112_v54  ;;  %v3620_v30 = vpop.f32.mrb[157].mxu1 }
 0x4eb   : > { %v3621_v57 = vadd.f32 %v3620_v30, %v15116_v1  ;;  %v3622_v27 = vpop.f32.mrb[158].mxu1  ;;  %4355 = vmatprep.mubr.bf16.mxu0 %v4008_v5 }
 0x4ec   : > { %v3623_v39 = vadd.f32 %v3622_v27, %v15112_v54  ;;  %v3624_v51 = vpop.f32.mrb[159].mxu1  ;;  %4356 = vmatmul.mubr.bf16.gmra.mrb[24].mxu0 %v4007_v17  ;;  %v3895_v4 = vmax.f32 %v3619_v32, 0.0 }
 0x4ed   : > { %v3625_v18 = vadd.f32 %v3624_v51, %v15116_v1  ;;  %v3896_v10 = vmax.f32 %v3621_v57, 0.0 }
 0x4ee   : > { %v3897_v29 = vmax.f32 %v3623_v39, 0.0 }
 0x4ef   : > { %v3898_v11 = vmax.f32 %v3625_v18, 0.0 }
 0x4f0   : > { %v4009_v48 = vpack.c.bf16 %v3897_v29, %v3895_v4  ;;  %v12780_v4 = vld [vmem:[#allocation12 + $0xf0] ss:$8 sps:$4 sm:$0xff]   ;;  %v12782_v29 = vld [vmem:[#allocation12 + $0xf4] ss:$8 sps:$4 sm:$0xff]  }
 0x4f1   : > { %v3628_v20 = vpop.f32.mrb[160].mxu1  ;;  %v4010_v22 = vpack.c.bf16 %v3898_v11, %v3896_v10  ;;  %5042 = vmatprep.subr.bf16.mxu1 %v12782_v29 }
 0x4f2   : > { %v3629_v37 = vadd.f32 %v3628_v20, %v15112_v54  ;;  %v3630_v36 = vpop.f32.mrb[161].mxu1  ;;  %5043 = vmatpush1.bf16.msra.mxu1 %v12780_v4 }
 0x4f3   : > { %v3631_v15 = vadd.f32 %v3630_v36, %v15116_v1  ;;  %v3632_v58 = vpop.f32.mrb[162].mxu1  ;;  %4365 = vmatprep.mubr.bf16.mxu0 %v4010_v22 }
 0x4f4   : > { %v3633_v7 = vadd.f32 %v3632_v58, %v15112_v54  ;;  %v3634_v19 = vpop.f32.mrb[163].mxu1  ;;  %4366 = vmatmul.mubr.bf16.gmra.mrb[28].mxu0 %v4009_v48  ;;  %v3899_v8 = vmax.f32 %v3629_v37, 0.0 }
 0x4f5   : > { %v3635_v59 = vadd.f32 %v3634_v19, %v15116_v1  ;;  %v3900_v41 = vmax.f32 %v3631_v15, 0.0 }
 0x4f6   : > { %v3901_v46 = vmax.f32 %v3633_v7, 0.0 }
 0x4f7   : > { %v3902_v61 = vmax.f32 %v3635_v59, 0.0 }
 0x4f8   : > { %v4011_v52 = vpack.c.bf16 %v3901_v46, %v3899_v8 }
 0x4f9   : > { %v3638_v3 = vpop.f32.mrb[164].mxu1  ;;  %v4012_v25 = vpack.c.bf16 %v3902_v61, %v3900_v41 }
 0x4fa   : > { %v3639_v35 = vadd.f32 %v3638_v3, %v15112_v54  ;;  %v3640_v50 = vpop.f32.mrb[165].mxu1 }
 0x4fb   : > { %v3641_v63 = vadd.f32 %v3640_v50, %v15116_v1  ;;  %v3642_v26 = vpop.f32.mrb[166].mxu1  ;;  %4375 = vmatprep.mubr.bf16.mxu0 %v4012_v25 }
 0x4fc   : > { %v3643_v24 = vadd.f32 %v3642_v26, %v15112_v54  ;;  %v3644_v6 = vpop.f32.mrb[167].mxu1  ;;  %4376 = vmatmul.mubr.bf16.gmra.mrb[32].mxu0 %v4011_v52  ;;  %v3903_v2 = vmax.f32 %v3639_v35, 0.0 }
 0x4fd   : > { %v3645_v53 = vadd.f32 %v3644_v6, %v15116_v1  ;;  %v3904_v44 = vmax.f32 %v3641_v63, 0.0 }
 0x4fe   : > { %v3905_v42 = vmax.f32 %v3643_v24, 0.0 }
 0x4ff   : > { %v3906_v14 = vmax.f32 %v3645_v53, 0.0 }
 0x500   : > { %v4013_v55 = vpack.c.bf16 %v3905_v42, %v3903_v2 }
 0x501   : > { %v3648_v49 = vpop.f32.mrb[168].mxu1  ;;  %v4014_v62 = vpack.c.bf16 %v3906_v14, %v3904_v44  ;;  %v12785_v44 = vld [vmem:[#allocation13 + $0x4] ss:$8 sps:$4 sm:$0xff]  }
 0x502   : > { %v3649_v40 = vadd.f32 %v3648_v49, %v15112_v54  ;;  %v3650_v31 = vpop.f32.mrb[169].mxu1  ;;  %5749 = vmatprep.subr.bf16.mxu1 %v12785_v44 }
 0x503   : > { %v3651_v16 = vadd.f32 %v3650_v31, %v15116_v1  ;;  %v3652_v38 = vpop.f32.mrb[170].mxu1  ;;  %4385 = vmatprep.mubr.bf16.mxu0 %v4014_v62 }
 0x504   : > { %v3653_v21 = vadd.f32 %v3652_v38, %v15112_v54  ;;  %v3654_v60 = vpop.f32.mrb[171].mxu1  ;;  %4386 = vmatmul.mubr.bf16.gmra.mrb[36].mxu0 %v4013_v55  ;;  %v3907_v23 = vmax.f32 %v3649_v40, 0.0 }
 0x505   : > { %v3655_v13 = vadd.f32 %v3654_v60, %v15116_v1  ;;  %v3908_v17 = vmax.f32 %v3651_v16, 0.0 }
 0x506   : > { %v3909_v12 = vmax.f32 %v3653_v21, 0.0 }
 0x507   : > { %v3910_v34 = vmax.f32 %v3655_v13, 0.0 }
 0x508   : > { %v4015_v5 = vpack.c.bf16 %v3909_v12, %v3907_v23 }
 0x509   : > { %v3658_v32 = vpop.f32.mrb[172].mxu1  ;;  %v4016_v30 = vpack.c.bf16 %v3910_v34, %v3908_v17 }
 0x50a   : > { %v3659_v57 = vadd.f32 %v3658_v32, %v15112_v54  ;;  %v3660_v27 = vpop.f32.mrb[173].mxu1 }
 0x50b   : > { %v3661_v39 = vadd.f32 %v3660_v27, %v15116_v1  ;;  %v3662_v51 = vpop.f32.mrb[174].mxu1  ;;  %4395 = vmatprep.mubr.bf16.mxu0 %v4016_v30 }
 0x50c   : > { %v3663_v18 = vadd.f32 %v3662_v51, %v15112_v54  ;;  %v3664_v33 = vpop.f32.mrb[175].mxu1  ;;  %4396 = vmatmul.mubr.bf16.gmra.mrb[40].mxu0 %v4015_v5  ;;  %v3911_v10 = vmax.f32 %v3659_v57, 0.0 }
 0x50d   : > { %v3665_v56 = vadd.f32 %v3664_v33, %v15116_v1  ;;  %v3912_v48 = vmax.f32 %v3661_v39, 0.0 }
 0x50e   : > { %v3913_v11 = vmax.f32 %v3663_v18, 0.0 }
 0x50f   : > { %v3914_v20 = vmax.f32 %v3665_v56, 0.0 }
 0x510   : > { %v4017_v22 = vpack.c.bf16 %v3913_v11, %v3911_v10 }
 0x511   : > { %v3668_v37 = vpop.f32.mrb[176].mxu1  ;;  %v4018_v36 = vpack.c.bf16 %v3914_v20, %v3912_v48 }
 0x512   : > { %v3669_v15 = vadd.f32 %v3668_v37, %v15112_v54  ;;  %v3670_v58 = vpop.f32.mrb[177].mxu1 }
 0x513   : > { %v3671_v7 = vadd.f32 %v3670_v58, %v15116_v1  ;;  %v3672_v19 = vpop.f32.mrb[178].mxu1  ;;  %4405 = vmatprep.mubr.bf16.mxu0 %v4018_v36 }
 0x514   : > { %v3673_v59 = vadd.f32 %v3672_v19, %v15112_v54  ;;  %v3674_v8 = vpop.f32.mrb[179].mxu1  ;;  %4406 = vmatmul.mubr.bf16.gmra.mrb[44].mxu0 %v4017_v22  ;;  %v3915_v41 = vmax.f32 %v3669_v15, 0.0 }
 0x515   : > { %v3675_v46 = vadd.f32 %v3674_v8, %v15116_v1  ;;  %v3916_v52 = vmax.f32 %v3671_v7, 0.0 }
 0x516   : > { %v3917_v61 = vmax.f32 %v3673_v59, 0.0 }
 0x517   : > { %v3918_v3 = vmax.f32 %v3675_v46, 0.0 }
 0x518   : > { %v4019_v25 = vpack.c.bf16 %v3917_v61, %v3915_v41 }
 0x519   : > { %v3678_v35 = vpop.f32.mrb[180].mxu1  ;;  %v4020_v50 = vpack.c.bf16 %v3918_v3, %v3916_v52 }
 0x51a   : > { %v3679_v63 = vadd.f32 %v3678_v35, %v15112_v54  ;;  %v3680_v26 = vpop.f32.mrb[181].mxu1 }
 0x51b   : > { %v3681_v24 = vadd.f32 %v3680_v26, %v15116_v1  ;;  %v3682_v6 = vpop.f32.mrb[182].mxu1  ;;  %4415 = vmatprep.mubr.bf16.mxu0 %v4020_v50 }
 0x51c   : > { %v3683_v53 = vadd.f32 %v3682_v6, %v15112_v54  ;;  %v3684_v9 = vpop.f32.mrb[183].mxu1  ;;  %4416 = vmatmul.mubr.bf16.gmra.mrb[48].mxu0 %v4019_v25  ;;  %v3919_v2 = vmax.f32 %v3679_v63, 0.0 }
 0x51d   : > { %v3685_v28 = vadd.f32 %v3684_v9, %v15116_v1  ;;  %v3920_v14 = vmax.f32 %v3681_v24, 0.0 }
 0x51e   : > { %v3921_v42 = vmax.f32 %v3683_v53, 0.0 }
 0x51f   : > { %v3922_v55 = vmax.f32 %v3685_v28, 0.0 }
 0x520   : > { %v4021_v49 = vpack.c.bf16 %v3921_v42, %v3919_v2 }
 0x521   : > { %v3688_v62 = vpop.f32.mrb[184].mxu1  ;;  %v4022_v40 = vpack.c.bf16 %v3922_v55, %v3920_v14 }
 0x522   : > { %v3689_v31 = vadd.f32 %v3688_v62, %v15112_v54  ;;  %v3690_v16 = vpop.f32.mrb[185].mxu1 }
 0x523   : > { %v3691_v38 = vadd.f32 %v3690_v16, %v15116_v1  ;;  %v3692_v21 = vpop.f32.mrb[186].mxu1  ;;  %4425 = vmatprep.mubr.bf16.mxu0 %v4022_v40 }
 0x524   : > { %v3693_v60 = vadd.f32 %v3692_v21, %v15112_v54  ;;  %v3694_v13 = vpop.f32.mrb[187].mxu1  ;;  %4426 = vmatmul.mubr.bf16.gmra.mrb[52].mxu0 %v4021_v49  ;;  %v3923_v12 = vmax.f32 %v3689_v31, 0.0 }
 0x525   : > { %v3695_v23 = vadd.f32 %v3694_v13, %v15116_v1  ;;  %v3924_v34 = vmax.f32 %v3691_v38, 0.0 }
 0x526   : > { %v3925_v17 = vmax.f32 %v3693_v60, 0.0 }
 0x527   : > { %v3926_v5 = vmax.f32 %v3695_v23, 0.0 }
 0x528   : > { %v4023_v32 = vpack.c.bf16 %v3925_v17, %v3923_v12 }
 0x529   : > { %v3698_v30 = vpop.f32.mrb[188].mxu1  ;;  %v4024_v57 = vpack.c.bf16 %v3926_v5, %v3924_v34 }
 0x52a   : > { %v3699_v27 = vadd.f32 %v3698_v30, %v15112_v54  ;;  %v3700_v39 = vpop.f32.mrb[189].mxu1 }
 0x52b   : > { %v3701_v51 = vadd.f32 %v3700_v39, %v15116_v1  ;;  %v3702_v18 = vpop.f32.mrb[190].mxu1  ;;  %4435 = vmatprep.mubr.bf16.mxu0 %v4024_v57 }
 0x52c   : > { %v3703_v33 = vadd.f32 %v3702_v18, %v15112_v54  ;;  %v3704_v56 = vpop.f32.mrb[191].mxu1  ;;  %4436 = vmatmul.mubr.bf16.gmra.mrb[56].mxu0 %v4023_v32  ;;  %v3927_v29 = vmax.f32 %v3699_v27, 0.0 }
 0x52d   : > { %v3705_v4 = vadd.f32 %v3704_v56, %v15116_v1  ;;  %v3928_v11 = vmax.f32 %v3701_v51, 0.0 }
 0x52e   : > { %v3929_v10 = vmax.f32 %v3703_v33, 0.0 }
 0x52f   : > { %v3930_v48 = vmax.f32 %v3705_v4, 0.0 }
 0x530   : > { %v4025_v20 = vpack.c.bf16 %v3929_v10, %v3927_v29 }
 0x531   : > { %v3708_v22 = vpop.f32.mrb[192].mxu1  ;;  %v4026_v37 = vpack.c.bf16 %v3930_v48, %v3928_v11 }
 0x532   : > { %v3709_v36 = vadd.f32 %v3708_v22, %v15112_v54  ;;  %v3710_v15 = vpop.f32.mrb[193].mxu1 }
 0x533   : > { %v3711_v58 = vadd.f32 %v3710_v15, %v15116_v1  ;;  %v3712_v7 = vpop.f32.mrb[194].mxu1  ;;  %4445 = vmatprep.mubr.bf16.mxu0 %v4026_v37 }
 0x534   : > { %v3713_v19 = vadd.f32 %v3712_v7, %v15112_v54  ;;  %v3714_v59 = vpop.f32.mrb[195].mxu1  ;;  %4446 = vmatmul.mubr.bf16.gmra.mrb[60].mxu0 %v4025_v20  ;;  %v3931_v46 = vmax.f32 %v3709_v36, 0.0 }
 0x535   : > { %v3715_v8 = vadd.f32 %v3714_v59, %v15116_v1  ;;  %v3932_v61 = vmax.f32 %v3711_v58, 0.0 }
 0x536   : > { %v3933_v41 = vmax.f32 %v3713_v19, 0.0 }
 0x537   : > { %v3934_v52 = vmax.f32 %v3715_v8, 0.0 }
 0x538   : > { %v4027_v3 = vpack.c.bf16 %v3933_v41, %v3931_v46 }
 0x539   : > { %v3718_v25 = vpop.f32.mrb[196].mxu1  ;;  %v4028_v35 = vpack.c.bf16 %v3934_v52, %v3932_v61 }
 0x53a   : > { %v3719_v50 = vadd.f32 %v3718_v25, %v15112_v54  ;;  %v3720_v63 = vpop.f32.mrb[197].mxu1 }
 0x53b   : > { %v3721_v26 = vadd.f32 %v3720_v63, %v15116_v1  ;;  %v3722_v24 = vpop.f32.mrb[198].mxu1  ;;  %4455 = vmatprep.mubr.bf16.mxu0 %v4028_v35 }
 0x53c   : > { %v3723_v6 = vadd.f32 %v3722_v24, %v15112_v54  ;;  %v3724_v53 = vpop.f32.mrb[199].mxu1  ;;  %4456 = vmatmul.mubr.bf16.gmra.mrb[64].mxu0 %v4027_v3  ;;  %v3935_v28 = vmax.f32 %v3719_v50, 0.0 }
 0x53d   : > { %v3725_v9 = vadd.f32 %v3724_v53, %v15116_v1  ;;  %v3936_v42 = vmax.f32 %v3721_v26, 0.0 }
 0x53e   : > { %v3937_v2 = vmax.f32 %v3723_v6, 0.0 }
 0x53f   : > { %v3938_v44 = vmax.f32 %v3725_v9, 0.0 }
 0x540   : > { %v4029_v14 = vpack.c.bf16 %v3937_v2, %v3935_v28 }
 0x541   : > { %v3728_v55 = vpop.f32.mrb[200].mxu1  ;;  %v4030_v49 = vpack.c.bf16 %v3938_v44, %v3936_v42 }
 0x542   : > { %v3729_v62 = vadd.f32 %v3728_v55, %v15112_v54  ;;  %v3730_v40 = vpop.f32.mrb[201].mxu1 }
 0x543   : > { %v3731_v31 = vadd.f32 %v3730_v40, %v15116_v1  ;;  %v3732_v16 = vpop.f32.mrb[202].mxu1  ;;  %4465 = vmatprep.mubr.bf16.mxu0 %v4030_v49 }
 0x544   : > { %v3733_v38 = vadd.f32 %v3732_v16, %v15112_v54  ;;  %v3734_v21 = vpop.f32.mrb[203].mxu1  ;;  %4466 = vmatmul.mubr.bf16.gmra.mrb[68].mxu0 %v4029_v14  ;;  %v3939_v13 = vmax.f32 %v3729_v62, 0.0 }
 0x545   : > { %v3735_v60 = vadd.f32 %v3734_v21, %v15116_v1  ;;  %v3940_v12 = vmax.f32 %v3731_v31, 0.0 }
 0x546   : > { %v3941_v23 = vmax.f32 %v3733_v38, 0.0 }
 0x547   : > { %v3942_v17 = vmax.f32 %v3735_v60, 0.0 }
 0x548   : > { %v4031_v34 = vpack.c.bf16 %v3941_v23, %v3939_v13 }
 0x549   : > { %v3738_v5 = vpop.f32.mrb[204].mxu1  ;;  %v4032_v32 = vpack.c.bf16 %v3942_v17, %v3940_v12 }
 0x54a   : > { %v3739_v30 = vadd.f32 %v3738_v5, %v15112_v54  ;;  %v3740_v57 = vpop.f32.mrb[205].mxu1 }
 0x54b   : > { %v3741_v27 = vadd.f32 %v3740_v57, %v15116_v1  ;;  %v3742_v39 = vpop.f32.mrb[206].mxu1  ;;  %4475 = vmatprep.mubr.bf16.mxu0 %v4032_v32 }
 0x54c   : > { %v3743_v51 = vadd.f32 %v3742_v39, %v15112_v54  ;;  %v3744_v18 = vpop.f32.mrb[207].mxu1  ;;  %4476 = vmatmul.mubr.bf16.gmra.mrb[72].mxu0 %v4031_v34  ;;  %v3943_v56 = vmax.f32 %v3739_v30, 0.0 }
 0x54d   : > { %v3745_v33 = vadd.f32 %v3744_v18, %v15116_v1  ;;  %v3944_v29 = vmax.f32 %v3741_v27, 0.0 }
 0x54e   : > { %v3945_v4 = vmax.f32 %v3743_v51, 0.0 }
 0x54f   : > { %v3946_v10 = vmax.f32 %v3745_v33, 0.0 }
 0x550   : > { %v4033_v11 = vpack.c.bf16 %v3945_v4, %v3943_v56 }
 0x551   : > { %v3748_v48 = vpop.f32.mrb[208].mxu1  ;;  %v4034_v20 = vpack.c.bf16 %v3946_v10, %v3944_v29 }
 0x552   : > { %v3749_v22 = vadd.f32 %v3748_v48, %v15112_v54  ;;  %v3750_v37 = vpop.f32.mrb[209].mxu1 }
 0x553   : > { %v3751_v36 = vadd.f32 %v3750_v37, %v15116_v1  ;;  %v3752_v15 = vpop.f32.mrb[210].mxu1  ;;  %4485 = vmatprep.mubr.bf16.mxu0 %v4034_v20 }
 0x554   : > { %v3753_v58 = vadd.f32 %v3752_v15, %v15112_v54  ;;  %v3754_v7 = vpop.f32.mrb[211].mxu1  ;;  %4486 = vmatmul.mubr.bf16.gmra.mrb[76].mxu0 %v4033_v11  ;;  %v3947_v59 = vmax.f32 %v3749_v22, 0.0 }
 0x555   : > { %v3755_v19 = vadd.f32 %v3754_v7, %v15116_v1  ;;  %v3948_v46 = vmax.f32 %v3751_v36, 0.0 }
 0x556   : > { %v3949_v8 = vmax.f32 %v3753_v58, 0.0 }
 0x557   : > { %v3950_v41 = vmax.f32 %v3755_v19, 0.0 }
 0x558   : > { %v4035_v61 = vpack.c.bf16 %v3949_v8, %v3947_v59 }
 0x559   : > { %v3758_v52 = vpop.f32.mrb[212].mxu1  ;;  %v4036_v3 = vpack.c.bf16 %v3950_v41, %v3948_v46 }
 0x55a   : > { %v3759_v25 = vadd.f32 %v3758_v52, %v15112_v54  ;;  %v3760_v35 = vpop.f32.mrb[213].mxu1 }
 0x55b   : > { %v3761_v50 = vadd.f32 %v3760_v35, %v15116_v1  ;;  %v3762_v63 = vpop.f32.mrb[214].mxu1  ;;  %4495 = vmatprep.mubr.bf16.mxu0 %v4036_v3 }
 0x55c   : > { %v3763_v26 = vadd.f32 %v3762_v63, %v15112_v54  ;;  %v3764_v24 = vpop.f32.mrb[215].mxu1  ;;  %4496 = vmatmul.mubr.bf16.gmra.mrb[80].mxu0 %v4035_v61  ;;  %v3951_v53 = vmax.f32 %v3759_v25, 0.0 }
 0x55d   : > { %v3765_v6 = vadd.f32 %v3764_v24, %v15116_v1  ;;  %v3952_v28 = vmax.f32 %v3761_v50, 0.0 }
 0x55e   : > { %v3953_v9 = vmax.f32 %v3763_v26, 0.0 }
 0x55f   : > { %v3954_v2 = vmax.f32 %v3765_v6, 0.0 }
 0x560   : > { %v4037_v42 = vpack.c.bf16 %v3953_v9, %v3951_v53 }
 0x561   : > { %v3768_v44 = vpop.f32.mrb[216].mxu1  ;;  %v4038_v14 = vpack.c.bf16 %v3954_v2, %v3952_v28 }
 0x562   : > { %v3769_v55 = vadd.f32 %v3768_v44, %v15112_v54  ;;  %v3770_v49 = vpop.f32.mrb[217].mxu1 }
 0x563   : > { %v3771_v62 = vadd.f32 %v3770_v49, %v15116_v1  ;;  %v3772_v40 = vpop.f32.mrb[218].mxu1  ;;  %4505 = vmatprep.mubr.bf16.mxu0 %v4038_v14 }
 0x564   : > { %v3773_v31 = vadd.f32 %v3772_v40, %v15112_v54  ;;  %v3774_v16 = vpop.f32.mrb[219].mxu1  ;;  %4506 = vmatmul.mubr.bf16.gmra.mrb[84].mxu0 %v4037_v42  ;;  %v3955_v21 = vmax.f32 %v3769_v55, 0.0 }
 0x565   : > { %v3775_v38 = vadd.f32 %v3774_v16, %v15116_v1  ;;  %v3956_v13 = vmax.f32 %v3771_v62, 0.0 }
 0x566   : > { %v3957_v60 = vmax.f32 %v3773_v31, 0.0 }
 0x567   : > { %v3958_v23 = vmax.f32 %v3775_v38, 0.0 }
 0x568   : > { %v4039_v12 = vpack.c.bf16 %v3957_v60, %v3955_v21 }
 0x569   : > { %v3778_v17 = vpop.f32.mrb[220].mxu1  ;;  %v4040_v34 = vpack.c.bf16 %v3958_v23, %v3956_v13 }
 0x56a   : > { %v3779_v5 = vadd.f32 %v3778_v17, %v15112_v54  ;;  %v3780_v32 = vpop.f32.mrb[221].mxu1  ;;  %v4091_v17 = vld [vmem:[%s18284_s3] sm:$0x3]  ;;  %s18317_s3 = sld [smem:[#allocation96_spill]] }
 0x56b   : > { %v3781_v30 = vadd.f32 %v3780_v32, %v15116_v1  ;;  %v3782_v57 = vpop.f32.mrb[222].mxu1  ;;  %4515 = vmatprep.mubr.bf16.mxu0 %v4040_v34 }
 0x56c   : > { %v3783_v27 = vadd.f32 %v3782_v57, %v15112_v54  ;;  %v3784_v39 = vpop.f32.mrb[223].mxu1  ;;  %4516 = vmatmul.mubr.bf16.gmra.mrb[88].mxu0 %v4039_v12  ;;  %v3959_v18 = vmax.f32 %v3779_v5, 0.0 }
 0x56d   : > { %v3785_v51 = vadd.f32 %v3784_v39, %v15116_v1  ;;  %v3960_v56 = vmax.f32 %v3781_v30, 0.0  ;;  %v15249_v39 = vrot.slane %v4091_v17, %v14593_v45 }
 0x56e   : > { %v3961_v33 = vmax.f32 %v3783_v27, 0.0 }
 0x56f   : > { %v3962_v4 = vmax.f32 %v3785_v51, 0.0 }
 0x570   : > { %v4041_v29 = vpack.c.bf16 %v3961_v33, %v3959_v18  ;;  %v15253_v18 = vrot.slane %v4091_v17, %v14599_v47 }
 0x571   : > { %v3788_v10 = vpop.f32.mrb[224].mxu1  ;;  %v4042_v11 = vpack.c.bf16 %v3962_v4, %v3960_v56 }
 0x572   : > { %v3789_v48 = vadd.f32 %v3788_v10, %v15112_v54  ;;  %v3790_v20 = vpop.f32.mrb[225].mxu1 }
 0x573   : > { %v3791_v22 = vadd.f32 %v3790_v20, %v15116_v1  ;;  %v3792_v37 = vpop.f32.mrb[226].mxu1  ;;  %4525 = vmatprep.mubr.bf16.mxu0 %v4042_v11 }
 0x574   : > { %v3793_v36 = vadd.f32 %v3792_v37, %v15112_v54  ;;  %v3794_v15 = vpop.f32.mrb[227].mxu1  ;;  %4526 = vmatmul.mubr.bf16.gmra.mrb[92].mxu0 %v4041_v29  ;;  %v3963_v7 = vmax.f32 %v3789_v48, 0.0 }
 0x575   : > { %v3795_v58 = vadd.f32 %v3794_v15, %v15116_v1  ;;  %v3964_v59 = vmax.f32 %v3791_v22, 0.0 }
 0x576   : > { %v3965_v19 = vmax.f32 %v3793_v36, 0.0 }
 0x577   : > { %v3966_v8 = vmax.f32 %v3795_v58, 0.0 }
 0x578   : > { %v4043_v46 = vpack.c.bf16 %v3965_v19, %v3963_v7 }
 0x579   : > { %v3798_v41 = vpop.f32.mrb[228].mxu1  ;;  %v4044_v61 = vpack.c.bf16 %v3966_v8, %v3964_v59 }
 0x57a   : > { %v3799_v52 = vadd.f32 %v3798_v41, %v15112_v54  ;;  %v3800_v3 = vpop.f32.mrb[229].mxu1 }
 0x57b   : > { %v3801_v25 = vadd.f32 %v3800_v3, %v15116_v1  ;;  %v3802_v35 = vpop.f32.mrb[230].mxu1  ;;  %4535 = vmatprep.mubr.bf16.mxu0 %v4044_v61 }
 0x57c   : > { %v3803_v50 = vadd.f32 %v3802_v35, %v15112_v54  ;;  %v3804_v63 = vpop.f32.mrb[231].mxu1  ;;  %4536 = vmatmul.mubr.bf16.gmra.mrb[96].mxu0 %v4043_v46  ;;  %v3967_v24 = vmax.f32 %v3799_v52, 0.0 }
 0x57d   : > { %v3805_v26 = vadd.f32 %v3804_v63, %v15116_v1  ;;  %v3968_v53 = vmax.f32 %v3801_v25, 0.0 }
 0x57e   : > { %v3969_v6 = vmax.f32 %v3803_v50, 0.0 }
 0x57f   : > { %v3970_v9 = vmax.f32 %v3805_v26, 0.0 }
 0x580   : > { %v4045_v28 = vpack.c.bf16 %v3969_v6, %v3967_v24 }
 0x581   : > { %v3808_v2 = vpop.f32.mrb[232].mxu1  ;;  %v4046_v42 = vpack.c.bf16 %v3970_v9, %v3968_v53 }
 0x582   : > { %v3809_v44 = vadd.f32 %v3808_v2, %v15112_v54  ;;  %v3810_v14 = vpop.f32.mrb[233].mxu1 }
 0x583   : > { %v3811_v55 = vadd.f32 %v3810_v14, %v15116_v1  ;;  %v3812_v49 = vpop.f32.mrb[234].mxu1  ;;  %4545 = vmatprep.mubr.bf16.mxu0 %v4046_v42  ;;  %v12783_v42 = vld [vmem:[#allocation13] ss:$8 sps:$4 sm:$0xff]  }
 0x584   : > { %v3813_v62 = vadd.f32 %v3812_v49, %v15112_v54  ;;  %v3814_v40 = vpop.f32.mrb[235].mxu1  ;;  %4546 = vmatmul.mubr.bf16.gmra.mrb[100].mxu0 %v4045_v28  ;;  %v3971_v16 = vmax.f32 %v3809_v44, 0.0  ;;  %v12788_v49 = vld [vmem:[#allocation13 + $0x14] ss:$8 sps:$4 sm:$0xff]  }
 0x585   : > { %v3815_v31 = vadd.f32 %v3814_v40, %v15116_v1  ;;  %v3972_v21 = vmax.f32 %v3811_v55, 0.0 }
 0x586   : > { %v3973_v38 = vmax.f32 %v3813_v62, 0.0 }
 0x587   : > { %v3974_v60 = vmax.f32 %v3815_v31, 0.0 }
 0x588   : > { %v4047_v13 = vpack.c.bf16 %v3973_v38, %v3971_v16 }
 0x589   : > { %v3818_v23 = vpop.f32.mrb[236].mxu1  ;;  %v4048_v12 = vpack.c.bf16 %v3974_v60, %v3972_v21 }
 0x58a   : > { %v3819_v34 = vadd.f32 %v3818_v23, %v15112_v54  ;;  %v3820_v5 = vpop.f32.mrb[237].mxu1 }
 0x58b   : > { %v3821_v32 = vadd.f32 %v3820_v5, %v15116_v1  ;;  %v3822_v30 = vpop.f32.mrb[238].mxu1  ;;  %4555 = vmatprep.mubr.bf16.mxu0 %v4048_v12 }
 0x58c   : > { %v3823_v57 = vadd.f32 %v3822_v30, %v15112_v54  ;;  %v3824_v27 = vpop.f32.mrb[239].mxu1  ;;  %4556 = vmatmul.mubr.bf16.gmra.mrb[104].mxu0 %v4047_v13  ;;  %v3975_v33 = vmax.f32 %v3819_v34, 0.0  ;;  %v12786_v34 = vld [vmem:[#allocation13 + $0x10] ss:$8 sps:$4 sm:$0xff]  }
 0x58d   : > { %v3825_v51 = vadd.f32 %v3824_v27, %v15116_v1  ;;  %v3976_v4 = vmax.f32 %v3821_v32, 0.0  ;;  %v12791_v27 = vld [vmem:[#allocation13 + $0x24] ss:$8 sps:$4 sm:$0xff]  }
 0x58e   : > { %v3977_v56 = vmax.f32 %v3823_v57, 0.0 }
 0x58f   : > { %v3978_v29 = vmax.f32 %v3825_v51, 0.0  ;;  %v4297_v10 = vpop.f32.mrb[0].mxu0 }
 0x590   : > { %v4049_v11 = vpack.c.bf16 %v3977_v56, %v3975_v33  ;;  %v4298_v48 = vadd.f32 %v4297_v10, %v15249_v39  ;;  %v4299_v20 = vpop.f32.mrb[1].mxu0 }
 0x591   : > { %v4300_v22 = vadd.f32 %v4299_v20, %v15253_v18  ;;  %v3828_v37 = vpop.f32.mrb[240].mxu1  ;;  %v4301_v36 = vpop.f32.mrb[2].mxu0  ;;  %v4050_v15 = vpack.c.bf16 %v3978_v29, %v3976_v4 }
 0x592   : > { %v3829_v58 = vadd.f32 %v3828_v37, %v15112_v54  ;;  %v4302_v7 = vadd.f32 %v4301_v36, %v15249_v39  ;;  %v3830_v19 = vpop.f32.mrb[241].mxu1  ;;  %v4303_v59 = vpop.f32.mrb[3].mxu0  ;;  %v4616_v61 = vmax.f32 %v4298_v48, 0.0  ;;  %v12789_v37 = vld [vmem:[#allocation13 + $0x20] ss:$8 sps:$4 sm:$0xff]  }
 0x593   : > { %v3831_v8 = vadd.f32 %v3830_v19, %v15116_v1  ;;  %v4304_v46 = vadd.f32 %v4303_v59, %v15253_v18  ;;  %v3832_v41 = vpop.f32.mrb[242].mxu1  ;;  %4565 = vmatprep.mubr.bf16.mxu0 %v4050_v15  ;;  %v4617_v35 = vmax.f32 %v4300_v22, 0.0 }
 0x594   : > { %v4618_v52 = vmax.f32 %v4302_v7, 0.0  ;;  %v3833_v3 = vadd.f32 %v3832_v41, %v15112_v54  ;;  %v3834_v25 = vpop.f32.mrb[243].mxu1  ;;  %4566 = vmatmul.mubr.bf16.gmra.mrb[108].mxu0 %v4049_v11  ;;  %v3979_v26 = vmax.f32 %v3829_v58, 0.0  ;;  %v12794_v7 = vld [vmem:[#allocation13 + $0x34] ss:$8 sps:$4 sm:$0xff]  }
 0x595   : > { %v4619_v50 = vmax.f32 %v4304_v46, 0.0  ;;  %v3835_v63 = vadd.f32 %v3834_v25, %v15116_v1  ;;  %v3980_v53 = vmax.f32 %v3831_v8, 0.0 }
 0x596   : > { %v4744_v24 = vpack.c.bf16 %v4618_v52, %v4616_v61  ;;  %v3981_v6 = vmax.f32 %v3833_v3, 0.0 }
 0x597   : > { %v3982_v9 = vmax.f32 %v3835_v63, 0.0  ;;  %v4307_v28 = vpop.f32.mrb[4].mxu0  ;;  %v4745_v2 = vpack.c.bf16 %v4619_v50, %v4617_v35  ;;  %v12792_v63 = vld [vmem:[#allocation13 + $0x30] ss:$8 sps:$4 sm:$0xff]  }
 0x598   : > { %v4051_v44 = vpack.c.bf16 %v3981_v6, %v3979_v26  ;;  %v4308_v14 = vadd.f32 %v4307_v28, %v15249_v39  ;;  %v4309_v55 = vpop.f32.mrb[5].mxu0 }
 0x599   : > { %v4310_v62 = vadd.f32 %v4309_v55, %v15253_v18  ;;  %v3838_v40 = vpop.f32.mrb[244].mxu1  ;;  %v4311_v31 = vpop.f32.mrb[6].mxu0  ;;  %5044 = vmatprep.mubr.bf16.mxu1 %v4745_v2  ;;  %v4052_v16 = vpack.c.bf16 %v3982_v9, %v3980_v53  ;;  %v12797_v9 = vld [vmem:[#allocation13 + $0x44] ss:$8 sps:$4 sm:$0xff]  }
 0x59a   : > { %v3839_v38 = vadd.f32 %v3838_v40, %v15112_v54  ;;  %v4312_v21 = vadd.f32 %v4311_v31, %v15249_v39  ;;  %v3840_v60 = vpop.f32.mrb[245].mxu1  ;;  %v4313_v13 = vpop.f32.mrb[7].mxu0  ;;  %5045 = vmatmul.mubr.bf16.vlgmr.msra.gmra.mrb[128].mxu1 %v4744_v24  ;;  %v4620_v5 = vmax.f32 %v4308_v14, 0.0 }
 0x59b   : > { %v3841_v23 = vadd.f32 %v3840_v60, %v15116_v1  ;;  %v4314_v12 = vadd.f32 %v4313_v13, %v15253_v18  ;;  %v3842_v17 = vpop.f32.mrb[246].mxu1  ;;  %4575 = vmatprep.mubr.bf16.mxu0 %v4052_v16  ;;  %5750 = vmatpush1.bf16.msra.mxu1 %v12783_v42  ;;  %v4621_v51 = vmax.f32 %v4310_v62, 0.0  ;;  %v12795_v16 = vld [vmem:[#allocation13 + $0x40] ss:$8 sps:$4 sm:$0xff]   ;;  %v12800_v13 = vld [vmem:[#allocation13 + $0x54] ss:$8 sps:$4 sm:$0xff]  }
 0x59c   : > { %v4622_v32 = vmax.f32 %v4312_v21, 0.0  ;;  %v3843_v30 = vadd.f32 %v3842_v17, %v15112_v54  ;;  %v3844_v57 = vpop.f32.mrb[247].mxu1  ;;  %4576 = vmatmul.mubr.bf16.gmra.mrb[112].mxu0 %v4051_v44  ;;  %5751 = vmatprep.subr.bf16.mxu1 %v12788_v49  ;;  %v3983_v4 = vmax.f32 %v3839_v38, 0.0 }
 0x59d   : > { %v4623_v33 = vmax.f32 %v4314_v12, 0.0  ;;  %v3845_v56 = vadd.f32 %v3844_v57, %v15116_v1  ;;  %v3984_v11 = vmax.f32 %v3841_v23, 0.0 }
 0x59e   : > { %v4746_v29 = vpack.c.bf16 %v4622_v32, %v4620_v5  ;;  %v3985_v10 = vmax.f32 %v3843_v30, 0.0 }
 0x59f   : > { %v3986_v48 = vmax.f32 %v3845_v56, 0.0  ;;  %v4317_v20 = vpop.f32.mrb[8].mxu0  ;;  %v4747_v22 = vpack.c.bf16 %v4623_v33, %v4621_v51  ;;  %5752 = vmatpush1.bf16.msra.mxu1 %v12786_v34  ;;  %v12798_v56 = vld [vmem:[#allocation13 + $0x50] ss:$8 sps:$4 sm:$0xff]  }
 0x5a0   : > { %v4053_v36 = vpack.c.bf16 %v3985_v10, %v3983_v4  ;;  %v4318_v15 = vadd.f32 %v4317_v20, %v15249_v39  ;;  %v4319_v58 = vpop.f32.mrb[9].mxu0  ;;  %5753 = vmatprep.subr.bf16.mxu1 %v12791_v27 }
 0x5a1   : > { %v4320_v19 = vadd.f32 %v4319_v58, %v15253_v18  ;;  %v3848_v59 = vpop.f32.mrb[248].mxu1  ;;  %v4321_v8 = vpop.f32.mrb[10].mxu0  ;;  %5054 = vmatprep.mubr.bf16.mxu1 %v4747_v22  ;;  %v4054_v46 = vpack.c.bf16 %v3986_v48, %v3984_v11  ;;  %v12803_v48 = vld [vmem:[#allocation13 + $0x64] ss:$8 sps:$4 sm:$0xff]  }
 0x5a2   : > { %v3849_v41 = vadd.f32 %v3848_v59, %v15112_v54  ;;  %v4322_v61 = vadd.f32 %v4321_v8, %v15249_v39  ;;  %v3850_v52 = vpop.f32.mrb[249].mxu1  ;;  %v4323_v3 = vpop.f32.mrb[11].mxu0  ;;  %5055 = vmatmul.mubr.bf16.gmra.mrb[132].mxu1 %v4746_v29  ;;  %v4624_v26 = vmax.f32 %v4318_v15, 0.0 }
 0x5a3   : > { %v3851_v25 = vadd.f32 %v3850_v52, %v15116_v1  ;;  %v4324_v35 = vadd.f32 %v4323_v3, %v15253_v18  ;;  %v3852_v50 = vpop.f32.mrb[250].mxu1  ;;  %4585 = vmatprep.mubr.bf16.mxu0 %v4054_v46  ;;  %5754 = vmatpush1.bf16.msra.mxu1 %v12789_v37  ;;  %v4625_v28 = vmax.f32 %v4320_v19, 0.0  ;;  %v12801_v46 = vld [vmem:[#allocation13 + $0x60] ss:$8 sps:$4 sm:$0xff]   ;;  %v12806_v52 = vld [vmem:[#allocation13 + $0x74] ss:$8 sps:$4 sm:$0xff]  }
 0x5a4   : > { %v4626_v24 = vmax.f32 %v4322_v61, 0.0  ;;  %v3853_v6 = vadd.f32 %v3852_v50, %v15112_v54  ;;  %v3854_v53 = vpop.f32.mrb[251].mxu1  ;;  %4586 = vmatmul.mubr.bf16.gmra.mrb[116].mxu0 %v4053_v36  ;;  %5755 = vmatprep.subr.bf16.mxu1 %v12794_v7  ;;  %v3987_v44 = vmax.f32 %v3849_v41, 0.0 }
 0x5a5   : > { %v4627_v2 = vmax.f32 %v4324_v35, 0.0  ;;  %v3855_v42 = vadd.f32 %v3854_v53, %v15116_v1  ;;  %v3988_v49 = vmax.f32 %v3851_v25, 0.0  ;;  %v12809_v53 = vld [vmem:[#allocation13 + $0x84] ss:$8 sps:$4 sm:$0xff]  }
 0x5a6   : > { %v4748_v14 = vpack.c.bf16 %v4626_v24, %v4624_v26  ;;  %v3989_v55 = vmax.f32 %v3853_v6, 0.0  ;;  %v12804_v26 = vld [vmem:[#allocation13 + $0x70] ss:$8 sps:$4 sm:$0xff]  }
 0x5a7   : > { %v3990_v62 = vmax.f32 %v3855_v42, 0.0  ;;  %v4327_v40 = vpop.f32.mrb[12].mxu0  ;;  %v4749_v31 = vpack.c.bf16 %v4627_v2, %v4625_v28  ;;  %5756 = vmatpush1.bf16.msra.mxu1 %v12792_v63 }
 0x5a8   : > { %v4055_v38 = vpack.c.bf16 %v3989_v55, %v3987_v44  ;;  %v4328_v21 = vadd.f32 %v4327_v40, %v15249_v39  ;;  %v4329_v60 = vpop.f32.mrb[13].mxu0  ;;  %5757 = vmatprep.subr.bf16.mxu1 %v12797_v9 }
 0x5a9   : > { %v4330_v23 = vadd.f32 %v4329_v60, %v15253_v18  ;;  %v3858_v12 = vpop.f32.mrb[252].mxu1  ;;  %v4331_v17 = vpop.f32.mrb[14].mxu0  ;;  %5064 = vmatprep.mubr.bf16.mxu1 %v4749_v31  ;;  %v4056_v34 = vpack.c.bf16 %v3990_v62, %v3988_v49  ;;  %v12812_v62 = vld [vmem:[#allocation13 + $0x94] ss:$8 sps:$4 sm:$0xff]   ;;  %v12810_v60 = vld [vmem:[#allocation13 + $0x90] ss:$8 sps:$4 sm:$0xff]  }
 0x5aa   : > { %v3859_v5 = vadd.f32 %v3858_v12, %v15112_v54  ;;  %v4332_v32 = vadd.f32 %v4331_v17, %v15249_v39  ;;  %v3860_v30 = vpop.f32.mrb[253].mxu1  ;;  %v4333_v57 = vpop.f32.mrb[15].mxu0  ;;  %5065 = vmatmul.mubr.bf16.gmra.mrb[136].mxu1 %v4748_v14  ;;  %v4628_v4 = vmax.f32 %v4328_v21, 0.0  ;;  %v12807_v14 = vld [vmem:[#allocation13 + $0x80] ss:$8 sps:$4 sm:$0xff]  }
 0x5ab   : > { %v3861_v27 = vadd.f32 %v3860_v30, %v15116_v1  ;;  %v4334_v51 = vadd.f32 %v4333_v57, %v15253_v18  ;;  %v3862_v33 = vpop.f32.mrb[254].mxu1  ;;  %4595 = vmatprep.mubr.bf16.mxu0 %v4056_v34  ;;  %5758 = vmatpush1.bf16.msra.mxu1 %v12795_v16  ;;  %v4629_v20 = vmax.f32 %v4330_v23, 0.0  ;;  %v12813_v57 = vld [vmem:[#allocation13 + $0xa0] ss:$8 sps:$4 sm:$0xff]  }
 0x5ac   : > { %v4630_v29 = vmax.f32 %v4332_v32, 0.0  ;;  %v3863_v10 = vadd.f32 %v3862_v33, %v15112_v54  ;;  %v3864_v11 = vpop.f32.mrb[255].mxu1  ;;  %4596 = vmatmul.mubr.bf16.gmra.mrb[120].mxu0 %v4055_v38  ;;  %5759 = vmatprep.subr.bf16.mxu1 %v12800_v13  ;;  %v3991_v36 = vmax.f32 %v3859_v5, 0.0  ;;  %v12815_v5 = vld [vmem:[#allocation13 + $0xa4] ss:$8 sps:$4 sm:$0xff]  }
 0x5ad   : > { %v4631_v22 = vmax.f32 %v4334_v51, 0.0  ;;  %v3865_v37 = vadd.f32 %v3864_v11, %v15116_v1  ;;  %v3992_v7 = vmax.f32 %v3861_v27, 0.0 }
 0x5ae   : > { %v4750_v15 = vpack.c.bf16 %v4630_v29, %v4628_v4  ;;  %v3993_v58 = vmax.f32 %v3863_v10, 0.0 }
 0x5af   : > { %v3994_v19 = vmax.f32 %v3865_v37, 0.0  ;;  %v4337_v59 = vpop.f32.mrb[16].mxu0  ;;  %v4751_v8 = vpack.c.bf16 %v4631_v22, %v4629_v20  ;;  %5760 = vmatpush1.bf16.msra.mxu1 %v12798_v56 }
 0x5b0   : > { %v4057_v41 = vpack.c.bf16 %v3993_v58, %v3991_v36  ;;  %v4338_v54 = vadd.f32 %v4337_v59, %v15249_v39  ;;  %v4339_v61 = vpop.f32.mrb[17].mxu0  ;;  %5761 = vmatprep.subr.bf16.mxu1 %v12803_v48 }
 0x5b1   : > { %v4340_v3 = vadd.f32 %v4339_v61, %v15253_v18  ;;  %v4341_v25 = vpop.f32.mrb[18].mxu0  ;;  %5074 = vmatprep.mubr.bf16.mxu1 %v4751_v8  ;;  %v4058_v1 = vpack.c.bf16 %v3994_v19, %v3992_v7 }
 0x5b2   : > { %v4342_v35 = vadd.f32 %v4341_v25, %v15249_v39  ;;  %v4343_v50 = vpop.f32.mrb[19].mxu0  ;;  %5075 = vmatmul.mubr.bf16.gmra.mrb[140].mxu1 %v4750_v15  ;;  %v4632_v24 = vmax.f32 %v4338_v54, 0.0 }
 0x5b3   : > { %v4344_v63 = vadd.f32 %v4343_v50, %v15253_v18  ;;  %4605 = vmatprep.mubr.bf16.mxu0 %v4058_v1  ;;  %5762 = vmatpush1.bf16.msra.mxu1 %v12801_v46  ;;  %v4633_v9 = vmax.f32 %v4340_v3, 0.0  ;;  %v12816_v1 = vld [vmem:[#allocation13 + $0xb0] ss:$8 sps:$4 sm:$0xff]  }
 0x5b4   : > { %v4634_v6 = vmax.f32 %v4342_v35, 0.0  ;;  %4606 = vmatmul.mubr.bf16.gmra.mrb[124].mxu0 %v4057_v41  ;;  %5763 = vmatprep.subr.bf16.mxu1 %v12806_v52  ;;  %v12818_v35 = vld [vmem:[#allocation13 + $0xb4] ss:$8 sps:$4 sm:$0xff]  }
 0x5b5   : > { %v4635_v28 = vmax.f32 %v4344_v63, 0.0 }
 0x5b6   : > { %v4752_v2 = vpack.c.bf16 %v4634_v6, %v4632_v24 }
 0x5b7   : > { %v4347_v42 = vpop.f32.mrb[20].mxu0  ;;  %v4753_v44 = vpack.c.bf16 %v4635_v28, %v4633_v9  ;;  %5764 = vmatpush1.bf16.msra.mxu1 %v12804_v26 }
 0x5b8   : > { %v4348_v55 = vadd.f32 %v4347_v42, %v15249_v39  ;;  %v4349_v49 = vpop.f32.mrb[21].mxu0  ;;  %5765 = vmatprep.subr.bf16.mxu1 %v12809_v53 }
 0x5b9   : > { %v4350_v40 = vadd.f32 %v4349_v49, %v15253_v18  ;;  %v4351_v31 = vpop.f32.mrb[22].mxu0  ;;  %5084 = vmatprep.mubr.bf16.mxu1 %v4753_v44 }
 0x5ba   : > { %v4352_v16 = vadd.f32 %v4351_v31, %v15249_v39  ;;  %v4353_v38 = vpop.f32.mrb[23].mxu0  ;;  %5085 = vmatmul.mubr.bf16.gmra.mrb[144].mxu1 %v4752_v2  ;;  %v4636_v13 = vmax.f32 %v4348_v55, 0.0 }
 0x5bb   : > { %v4354_v21 = vadd.f32 %v4353_v38, %v15253_v18  ;;  %5766 = vmatpush1.bf16.msra.mxu1 %v12807_v14  ;;  %v4637_v12 = vmax.f32 %v4350_v40, 0.0 }
 0x5bc   : > { %v4638_v23 = vmax.f32 %v4352_v16, 0.0  ;;  %5767 = vmatprep.subr.bf16.mxu1 %v12812_v62 }
 0x5bd   : > { %v4639_v17 = vmax.f32 %v4354_v21, 0.0 }
 0x5be   : > { %v4754_v34 = vpack.c.bf16 %v4638_v23, %v4636_v13 }
 0x5bf   : > { %v4357_v32 = vpop.f32.mrb[24].mxu0  ;;  %v4755_v30 = vpack.c.bf16 %v4639_v17, %v4637_v12  ;;  %5768 = vmatpush1.bf16.msra.mxu1 %v12810_v60 }
 0x5c0   : > { %v4358_v27 = vadd.f32 %v4357_v32, %v15249_v39  ;;  %v4359_v51 = vpop.f32.mrb[25].mxu0  ;;  %5769 = vmatprep.subr.bf16.mxu1 %v12815_v5 }
 0x5c1   : > { %v4360_v33 = vadd.f32 %v4359_v51, %v15253_v18  ;;  %v4361_v56 = vpop.f32.mrb[26].mxu0  ;;  %5094 = vmatprep.mubr.bf16.mxu1 %v4755_v30  ;;  %v12819_v30 = vld [vmem:[#allocation13 + $0xc0] ss:$8 sps:$4 sm:$0xff]  }
 0x5c2   : > { %v4362_v4 = vadd.f32 %v4361_v56, %v15249_v39  ;;  %v4363_v29 = vpop.f32.mrb[27].mxu0  ;;  %5095 = vmatmul.mubr.bf16.gmra.mrb[148].mxu1 %v4754_v34  ;;  %v4640_v11 = vmax.f32 %v4358_v27, 0.0 }
 0x5c3   : > { %v4364_v10 = vadd.f32 %v4363_v29, %v15253_v18  ;;  %5770 = vmatpush1.bf16.msra.mxu1 %v12813_v57  ;;  %v4641_v20 = vmax.f32 %v4360_v33, 0.0  ;;  %v12821_v57 = vld [vmem:[#allocation13 + $0xc4] ss:$8 sps:$4 sm:$0xff]  }
 0x5c4   : > { %v4642_v48 = vmax.f32 %v4362_v4, 0.0  ;;  %5771 = vmatprep.subr.bf16.mxu1 %v12818_v35 }
 0x5c5   : > { %v4643_v22 = vmax.f32 %v4364_v10, 0.0 }
 0x5c6   : > { %v4756_v37 = vpack.c.bf16 %v4642_v48, %v4640_v11 }
 0x5c7   : > { %v4367_v36 = vpop.f32.mrb[28].mxu0  ;;  %v4757_v15 = vpack.c.bf16 %v4643_v22, %v4641_v20  ;;  %5772 = vmatpush1.bf16.msra.mxu1 %v12816_v1 }
 0x5c8   : > { %v4368_v58 = vadd.f32 %v4367_v36, %v15249_v39  ;;  %v4369_v7 = vpop.f32.mrb[29].mxu0  ;;  %5773 = vmatprep.subr.bf16.mxu1 %v12821_v57 }
 0x5c9   : > { %v4370_v19 = vadd.f32 %v4369_v7, %v15253_v18  ;;  %v4371_v59 = vpop.f32.mrb[30].mxu0  ;;  %5104 = vmatprep.mubr.bf16.mxu1 %v4757_v15 }
 0x5ca   : > { %v4372_v8 = vadd.f32 %v4371_v59, %v15249_v39  ;;  %v4373_v46 = vpop.f32.mrb[31].mxu0  ;;  %5105 = vmatmul.mubr.bf16.gmra.mrb[152].mxu1 %v4756_v37  ;;  %v4644_v54 = vmax.f32 %v4368_v58, 0.0 }
 0x5cb   : > { %v4374_v41 = vadd.f32 %v4373_v46, %v15253_v18  ;;  %v4645_v52 = vmax.f32 %v4370_v19, 0.0  ;;  %5774 = vmatpush1.bf16.msra.mxu1 %v12819_v30 }
 0x5cc   : > { %v4646_v61 = vmax.f32 %v4372_v8, 0.0 }
 0x5cd   : > { %v4647_v3 = vmax.f32 %v4374_v41, 0.0 }
 0x5ce   : > { %v4758_v25 = vpack.c.bf16 %v4646_v61, %v4644_v54 }
 0x5cf   : > { %v4377_v50 = vpop.f32.mrb[32].mxu0  ;;  %v4759_v63 = vpack.c.bf16 %v4647_v3, %v4645_v52 }
 0x5d0   : > { %v4378_v26 = vadd.f32 %v4377_v50, %v15249_v39  ;;  %v4379_v24 = vpop.f32.mrb[33].mxu0  ;;  %v12822_v50 = vld [vmem:[#allocation13 + $0xd0] ss:$8 sps:$4 sm:$0xff]  }
 0x5d1   : > { %v4380_v6 = vadd.f32 %v4379_v24, %v15253_v18  ;;  %v4381_v53 = vpop.f32.mrb[34].mxu0  ;;  %5114 = vmatprep.mubr.bf16.mxu1 %v4759_v63  ;;  %v12824_v63 = vld [vmem:[#allocation13 + $0xd4] ss:$8 sps:$4 sm:$0xff]  }
 0x5d2   : > { %v4382_v9 = vadd.f32 %v4381_v53, %v15249_v39  ;;  %v4383_v28 = vpop.f32.mrb[35].mxu0  ;;  %5115 = vmatmul.mubr.bf16.gmra.mrb[156].mxu1 %v4758_v25  ;;  %v4648_v42 = vmax.f32 %v4378_v26, 0.0  ;;  %5775 = vmatprep.subr.bf16.mxu1 %v12824_v63 }
 0x5d3   : > { %v4384_v2 = vadd.f32 %v4383_v28, %v15253_v18  ;;  %v4649_v14 = vmax.f32 %v4380_v6, 0.0  ;;  %5776 = vmatpush1.bf16.msra.mxu1 %v12822_v50  ;;  %v12833_v50 = vld [vmem:[#allocation16 + $0x14] ss:$8 sps:$4 sm:$0xff]  }
 0x5d4   : > { %v4650_v44 = vmax.f32 %v4382_v9, 0.0 }
 0x5d5   : > { %v4651_v55 = vmax.f32 %v4384_v2, 0.0 }
 0x5d6   : > { %v4760_v49 = vpack.c.bf16 %v4650_v44, %v4648_v42 }
 0x5d7   : > { %v4387_v62 = vpop.f32.mrb[36].mxu0  ;;  %v4761_v40 = vpack.c.bf16 %v4651_v55, %v4649_v14 }
 0x5d8   : > { %v4388_v31 = vadd.f32 %v4387_v62, %v15249_v39  ;;  %v4389_v16 = vpop.f32.mrb[37].mxu0 }
 0x5d9   : > { %v4390_v38 = vadd.f32 %v4389_v16, %v15253_v18  ;;  %v4391_v21 = vpop.f32.mrb[38].mxu0  ;;  %5124 = vmatprep.mubr.bf16.mxu1 %v4761_v40 }
 0x5da   : > { %v4392_v60 = vadd.f32 %v4391_v21, %v15249_v39  ;;  %v4393_v13 = vpop.f32.mrb[39].mxu0  ;;  %5125 = vmatmul.mubr.bf16.gmra.mrb[160].mxu1 %v4760_v49  ;;  %v4652_v12 = vmax.f32 %v4388_v31, 0.0 }
 0x5db   : > { %v4394_v23 = vadd.f32 %v4393_v13, %v15253_v18  ;;  %v4653_v34 = vmax.f32 %v4390_v38, 0.0 }
 0x5dc   : > { %v4654_v17 = vmax.f32 %v4392_v60, 0.0 }
 0x5dd   : > { %v4655_v5 = vmax.f32 %v4394_v23, 0.0 }
 0x5de   : > { %v4762_v32 = vpack.c.bf16 %v4654_v17, %v4652_v12 }
 0x5df   : > { %v4397_v27 = vpop.f32.mrb[40].mxu0  ;;  %v4763_v51 = vpack.c.bf16 %v4655_v5, %v4653_v34  ;;  %v12825_v34 = vld [vmem:[#allocation16] ss:$8 sps:$4 sm:$0xff]   ;;  %v12827_v5 = vld [vmem:[#allocation16 + $0x4] ss:$8 sps:$4 sm:$0xff]  }
 0x5e0   : > { %v4398_v33 = vadd.f32 %v4397_v27, %v15249_v39  ;;  %v4399_v56 = vpop.f32.mrb[41].mxu0  ;;  %6638 = vmatprep.subr.bf16.mxu0 %v12827_v5 }
 0x5e1   : > { %v4400_v4 = vadd.f32 %v4399_v56, %v15253_v18  ;;  %v4401_v29 = vpop.f32.mrb[42].mxu0  ;;  %5134 = vmatprep.mubr.bf16.mxu1 %v4763_v51  ;;  %6639 = vmatpush1.bf16.msra.mxu0 %v12825_v34  ;;  %v12830_v56 = vld [vmem:[#allocation13 + $0xe4] ss:$8 sps:$4 sm:$0xff]  }
 0x5e2   : > { %v4402_v10 = vadd.f32 %v4401_v29, %v15249_v39  ;;  %v4403_v11 = vpop.f32.mrb[43].mxu0  ;;  %5135 = vmatmul.mubr.bf16.gmra.mrb[164].mxu1 %v4762_v32  ;;  %v4656_v20 = vmax.f32 %v4398_v33, 0.0  ;;  %v12828_v33 = vld [vmem:[#allocation13 + $0xe0] ss:$8 sps:$4 sm:$0xff]   ;;  %5777 = vmatprep.subr.bf16.mxu1 %v12830_v56 }
 0x5e3   : > { %v4404_v48 = vadd.f32 %v4403_v11, %v15253_v18  ;;  %v4657_v37 = vmax.f32 %v4400_v4, 0.0  ;;  %5778 = vmatpush1.bf16.msra.mxu1 %v12828_v33  ;;  %6640 = vmatprep.subr.bf16.mxu0 %v12833_v50  ;;  %v12839_v33 = vld [vmem:[#allocation16 + $0x24] ss:$8 sps:$4 sm:$0xff]  }
 0x5e4   : > { %v4658_v22 = vmax.f32 %v4402_v10, 0.0 }
 0x5e5   : > { %v4659_v36 = vmax.f32 %v4404_v48, 0.0 }
 0x5e6   : > { %v4764_v15 = vpack.c.bf16 %v4658_v22, %v4656_v20 }
 0x5e7   : > { %v4407_v58 = vpop.f32.mrb[44].mxu0  ;;  %v4765_v7 = vpack.c.bf16 %v4659_v36, %v4657_v37 }
 0x5e8   : > { %v4408_v19 = vadd.f32 %v4407_v58, %v15249_v39  ;;  %v4409_v59 = vpop.f32.mrb[45].mxu0 }
 0x5e9   : > { %v4410_v8 = vadd.f32 %v4409_v59, %v15253_v18  ;;  %v4411_v46 = vpop.f32.mrb[46].mxu0  ;;  %5144 = vmatprep.mubr.bf16.mxu1 %v4765_v7 }
 0x5ea   : > { %v4412_v41 = vadd.f32 %v4411_v46, %v15249_v39  ;;  %v4413_v54 = vpop.f32.mrb[47].mxu0  ;;  %5145 = vmatmul.mubr.bf16.gmra.mrb[168].mxu1 %v4764_v15  ;;  %v4660_v52 = vmax.f32 %v4408_v19, 0.0 }
 0x5eb   : > { %v4414_v61 = vadd.f32 %v4413_v54, %v15253_v18  ;;  %v4661_v25 = vmax.f32 %v4410_v8, 0.0 }
 0x5ec   : > { %v4662_v3 = vmax.f32 %v4412_v41, 0.0 }
 0x5ed   : > { %v4663_v1 = vmax.f32 %v4414_v61, 0.0 }
 0x5ee   : > { %v4766_v35 = vpack.c.bf16 %v4662_v3, %v4660_v52 }
 0x5ef   : > { %v4417_v26 = vpop.f32.mrb[48].mxu0  ;;  %v4767_v24 = vpack.c.bf16 %v4663_v1, %v4661_v25 }
 0x5f0   : > { %v4418_v6 = vadd.f32 %v4417_v26, %v15249_v39  ;;  %v4419_v53 = vpop.f32.mrb[49].mxu0 }
 0x5f1   : > { %v4420_v9 = vadd.f32 %v4419_v53, %v15253_v18  ;;  %v4421_v28 = vpop.f32.mrb[50].mxu0  ;;  %5154 = vmatprep.mubr.bf16.mxu1 %v4767_v24 }
 0x5f2   : > { %v4422_v2 = vadd.f32 %v4421_v28, %v15249_v39  ;;  %v4423_v42 = vpop.f32.mrb[51].mxu0  ;;  %5155 = vmatmul.mubr.bf16.gmra.mrb[172].mxu1 %v4766_v35  ;;  %v4664_v14 = vmax.f32 %v4418_v6, 0.0  ;;  %v12831_v35 = vld [vmem:[#allocation16 + $0x10] ss:$8 sps:$4 sm:$0xff]  }
 0x5f3   : > { %v4424_v44 = vadd.f32 %v4423_v42, %v15253_v18  ;;  %v4665_v49 = vmax.f32 %v4420_v9, 0.0  ;;  %6641 = vmatpush1.bf16.msra.mxu0 %v12831_v35  ;;  %v12834_v9 = vld [vmem:[#allocation13 + $0xf0] ss:$8 sps:$4 sm:$0xff]   ;;  %v12836_v28 = vld [vmem:[#allocation13 + $0xf4] ss:$8 sps:$4 sm:$0xff]  }
 0x5f4   : > { %v4666_v55 = vmax.f32 %v4422_v2, 0.0  ;;  %5779 = vmatprep.subr.bf16.mxu1 %v12836_v28  ;;  %6642 = vmatprep.subr.bf16.mxu0 %v12839_v33 }
 0x5f5   : > { %v4667_v62 = vmax.f32 %v4424_v44, 0.0  ;;  %5780 = vmatpush1.bf16.msra.mxu1 %v12834_v9 }
 0x5f6   : > { %v4768_v40 = vpack.c.bf16 %v4666_v55, %v4664_v14 }
 0x5f7   : > { %v4427_v31 = vpop.f32.mrb[52].mxu0  ;;  %v4769_v16 = vpack.c.bf16 %v4667_v62, %v4665_v49 }
 0x5f8   : > { %v4428_v38 = vadd.f32 %v4427_v31, %v15249_v39  ;;  %v4429_v21 = vpop.f32.mrb[53].mxu0 }
 0x5f9   : > { %v4430_v60 = vadd.f32 %v4429_v21, %v15253_v18  ;;  %v4431_v13 = vpop.f32.mrb[54].mxu0  ;;  %5164 = vmatprep.mubr.bf16.mxu1 %v4769_v16 }
 0x5fa   : > { %v4432_v23 = vadd.f32 %v4431_v13, %v15249_v39  ;;  %v4433_v12 = vpop.f32.mrb[55].mxu0  ;;  %5165 = vmatmul.mubr.bf16.gmra.mrb[176].mxu1 %v4768_v40  ;;  %v4668_v32 = vmax.f32 %v4428_v38, 0.0 }
 0x5fb   : > { %v4434_v17 = vadd.f32 %v4433_v12, %v15253_v18  ;;  %v4669_v57 = vmax.f32 %v4430_v60, 0.0 }
 0x5fc   : > { %v4670_v30 = vmax.f32 %v4432_v23, 0.0 }
 0x5fd   : > { %v4671_v27 = vmax.f32 %v4434_v17, 0.0 }
 0x5fe   : > { %v4770_v51 = vpack.c.bf16 %v4670_v30, %v4668_v32 }
 0x5ff   : > { %v4437_v4 = vpop.f32.mrb[56].mxu0  ;;  %v4771_v29 = vpack.c.bf16 %v4671_v27, %v4669_v57 }
 0x600   : > { %v4438_v10 = vadd.f32 %v4437_v4, %v15249_v39  ;;  %v4439_v11 = vpop.f32.mrb[57].mxu0 }
 0x601   : > { %v4440_v48 = vadd.f32 %v4439_v11, %v15253_v18  ;;  %v4441_v20 = vpop.f32.mrb[58].mxu0  ;;  %5174 = vmatprep.mubr.bf16.mxu1 %v4771_v29 }
 0x602   : > { %v4442_v22 = vadd.f32 %v4441_v20, %v15249_v39  ;;  %v4443_v37 = vpop.f32.mrb[59].mxu0  ;;  %5175 = vmatmul.mubr.bf16.gmra.mrb[180].mxu1 %v4770_v51  ;;  %v4672_v15 = vmax.f32 %v4438_v10, 0.0  ;;  %v12837_v51 = vld [vmem:[#allocation16 + $0x20] ss:$8 sps:$4 sm:$0xff]  }
 0x603   : > { %v4444_v36 = vadd.f32 %v4443_v37, %v15253_v18  ;;  %v4673_v7 = vmax.f32 %v4440_v48, 0.0  ;;  %6643 = vmatpush1.bf16.msra.mxu0 %v12837_v51 }
 0x604   : > { %v4674_v58 = vmax.f32 %v4442_v22, 0.0 }
 0x605   : > { %v4675_v19 = vmax.f32 %v4444_v36, 0.0 }
 0x606   : > { %v4772_v59 = vpack.c.bf16 %v4674_v58, %v4672_v15 }
 0x607   : > { %v4447_v8 = vpop.f32.mrb[60].mxu0  ;;  %v4773_v46 = vpack.c.bf16 %v4675_v19, %v4673_v7 }
 0x608   : > { %v4448_v41 = vadd.f32 %v4447_v8, %v15249_v39  ;;  %v4449_v54 = vpop.f32.mrb[61].mxu0 }
 0x609   : > { %v4450_v61 = vadd.f32 %v4449_v54, %v15253_v18  ;;  %v4451_v52 = vpop.f32.mrb[62].mxu0  ;;  %5184 = vmatprep.mubr.bf16.mxu1 %v4773_v46 }
 0x60a   : > { %v4452_v3 = vadd.f32 %v4451_v52, %v15249_v39  ;;  %v4453_v25 = vpop.f32.mrb[63].mxu0  ;;  %5185 = vmatmul.mubr.bf16.gmra.mrb[184].mxu1 %v4772_v59  ;;  %v4676_v63 = vmax.f32 %v4448_v41, 0.0 }
 0x60b   : > { %v4454_v1 = vadd.f32 %v4453_v25, %v15253_v18  ;;  %v4677_v24 = vmax.f32 %v4450_v61, 0.0 }
 0x60c   : > { %v4678_v26 = vmax.f32 %v4452_v3, 0.0 }
 0x60d   : > { %v4679_v6 = vmax.f32 %v4454_v1, 0.0 }
 0x60e   : > { %v4774_v53 = vpack.c.bf16 %v4678_v26, %v4676_v63 }
 0x60f   : > { %v4457_v2 = vpop.f32.mrb[64].mxu0  ;;  %v4775_v42 = vpack.c.bf16 %v4679_v6, %v4677_v24  ;;  %v12840_v24 = vld [vmem:[#allocation16 + $0x30] ss:$8 sps:$4 sm:$0xff]   ;;  %v12842_v6 = vld [vmem:[#allocation16 + $0x34] ss:$8 sps:$4 sm:$0xff]  }
 0x610   : > { %v4458_v44 = vadd.f32 %v4457_v2, %v15249_v39  ;;  %v4459_v14 = vpop.f32.mrb[65].mxu0  ;;  %6644 = vmatprep.subr.bf16.mxu0 %v12842_v6 }
 0x611   : > { %v4460_v55 = vadd.f32 %v4459_v14, %v15253_v18  ;;  %v4461_v49 = vpop.f32.mrb[66].mxu0  ;;  %5194 = vmatprep.mubr.bf16.mxu1 %v4775_v42  ;;  %6645 = vmatpush1.bf16.msra.mxu0 %v12840_v24 }
 0x612   : > { %v4462_v62 = vadd.f32 %v4461_v49, %v15249_v39  ;;  %v4463_v40 = vpop.f32.mrb[67].mxu0  ;;  %5195 = vmatmul.mubr.bf16.gmra.mrb[188].mxu1 %v4774_v53  ;;  %v4680_v16 = vmax.f32 %v4458_v44, 0.0 }
 0x613   : > { %v4464_v31 = vadd.f32 %v4463_v40, %v15253_v18  ;;  %v4681_v21 = vmax.f32 %v4460_v55, 0.0 }
 0x614   : > { %v4682_v38 = vmax.f32 %v4462_v62, 0.0 }
 0x615   : > { %v4683_v60 = vmax.f32 %v4464_v31, 0.0 }
 0x616   : > { %v4776_v13 = vpack.c.bf16 %v4682_v38, %v4680_v16 }
 0x617   : > { %v4467_v23 = vpop.f32.mrb[68].mxu0  ;;  %v4777_v12 = vpack.c.bf16 %v4683_v60, %v4681_v21 }
 0x618   : > { %v4468_v17 = vadd.f32 %v4467_v23, %v15249_v39  ;;  %v4469_v34 = vpop.f32.mrb[69].mxu0 }
 0x619   : > { %v4470_v5 = vadd.f32 %v4469_v34, %v15253_v18  ;;  %v4471_v32 = vpop.f32.mrb[70].mxu0  ;;  %5204 = vmatprep.mubr.bf16.mxu1 %v4777_v12 }
 0x61a   : > { %v4472_v30 = vadd.f32 %v4471_v32, %v15249_v39  ;;  %v4473_v57 = vpop.f32.mrb[71].mxu0  ;;  %5205 = vmatmul.mubr.bf16.gmra.mrb[192].mxu1 %v4776_v13  ;;  %v4684_v56 = vmax.f32 %v4468_v17, 0.0 }
 0x61b   : > { %v4474_v27 = vadd.f32 %v4473_v57, %v15253_v18  ;;  %v4685_v29 = vmax.f32 %v4470_v5, 0.0 }
 0x61c   : > { %v4686_v4 = vmax.f32 %v4472_v30, 0.0 }
 0x61d   : > { %v4687_v10 = vmax.f32 %v4474_v27, 0.0 }
 0x61e   : > { %v4778_v11 = vpack.c.bf16 %v4686_v4, %v4684_v56  ;;  %v12843_v56 = vld [vmem:[#allocation16 + $0x40] ss:$8 sps:$4 sm:$0xff]   ;;  %v12845_v4 = vld [vmem:[#allocation16 + $0x44] ss:$8 sps:$4 sm:$0xff]  }
 0x61f   : > { %v4477_v48 = vpop.f32.mrb[72].mxu0  ;;  %v4779_v20 = vpack.c.bf16 %v4687_v10, %v4685_v29  ;;  %6646 = vmatprep.subr.bf16.mxu0 %v12845_v4 }
 0x620   : > { %v4478_v22 = vadd.f32 %v4477_v48, %v15249_v39  ;;  %v4479_v37 = vpop.f32.mrb[73].mxu0  ;;  %6647 = vmatpush1.bf16.msra.mxu0 %v12843_v56 }
 0x621   : > { %v4480_v36 = vadd.f32 %v4479_v37, %v15253_v18  ;;  %v4481_v15 = vpop.f32.mrb[74].mxu0  ;;  %5214 = vmatprep.mubr.bf16.mxu1 %v4779_v20 }
 0x622   : > { %v4482_v58 = vadd.f32 %v4481_v15, %v15249_v39  ;;  %v4483_v7 = vpop.f32.mrb[75].mxu0  ;;  %5215 = vmatmul.mubr.bf16.gmra.mrb[196].mxu1 %v4778_v11  ;;  %v4688_v59 = vmax.f32 %v4478_v22, 0.0 }
 0x623   : > { %v4484_v19 = vadd.f32 %v4483_v7, %v15253_v18  ;;  %v4689_v46 = vmax.f32 %v4480_v36, 0.0 }
 0x624   : > { %v4690_v8 = vmax.f32 %v4482_v58, 0.0 }
 0x625   : > { %v4691_v41 = vmax.f32 %v4484_v19, 0.0 }
 0x626   : > { %v4780_v54 = vpack.c.bf16 %v4690_v8, %v4688_v59 }
 0x627   : > { %v4487_v61 = vpop.f32.mrb[76].mxu0  ;;  %v4781_v52 = vpack.c.bf16 %v4691_v41, %v4689_v46 }
 0x628   : > { %v4488_v3 = vadd.f32 %v4487_v61, %v15249_v39  ;;  %v4489_v25 = vpop.f32.mrb[77].mxu0 }
 0x629   : > { %v4490_v1 = vadd.f32 %v4489_v25, %v15253_v18  ;;  %v4491_v35 = vpop.f32.mrb[78].mxu0  ;;  %5224 = vmatprep.mubr.bf16.mxu1 %v4781_v52 }
 0x62a   : > { %v4492_v50 = vadd.f32 %v4491_v35, %v15249_v39  ;;  %v4493_v63 = vpop.f32.mrb[79].mxu0  ;;  %5225 = vmatmul.mubr.bf16.gmra.mrb[200].mxu1 %v4780_v54  ;;  %v4692_v53 = vmax.f32 %v4488_v3, 0.0 }
 0x62b   : > { %v4494_v26 = vadd.f32 %v4493_v63, %v15253_v18  ;;  %v4693_v28 = vmax.f32 %v4490_v1, 0.0 }
 0x62c   : > { %v4694_v9 = vmax.f32 %v4492_v50, 0.0 }
 0x62d   : > { %v4695_v2 = vmax.f32 %v4494_v26, 0.0 }
 0x62e   : > { %v4782_v42 = vpack.c.bf16 %v4694_v9, %v4692_v53  ;;  %v12846_v53 = vld [vmem:[#allocation16 + $0x50] ss:$8 sps:$4 sm:$0xff]   ;;  %v12848_v9 = vld [vmem:[#allocation16 + $0x54] ss:$8 sps:$4 sm:$0xff]  }
 0x62f   : > { %v4497_v44 = vpop.f32.mrb[80].mxu0  ;;  %v4783_v14 = vpack.c.bf16 %v4695_v2, %v4693_v28  ;;  %6648 = vmatprep.subr.bf16.mxu0 %v12848_v9 }
 0x630   : > { %v4498_v55 = vadd.f32 %v4497_v44, %v15249_v39  ;;  %v4499_v49 = vpop.f32.mrb[81].mxu0  ;;  %6649 = vmatpush1.bf16.msra.mxu0 %v12846_v53 }
 0x631   : > { %v4500_v62 = vadd.f32 %v4499_v49, %v15253_v18  ;;  %v4501_v40 = vpop.f32.mrb[82].mxu0  ;;  %5234 = vmatprep.mubr.bf16.mxu1 %v4783_v14 }
 0x632   : > { %v4502_v31 = vadd.f32 %v4501_v40, %v15249_v39  ;;  %v4503_v16 = vpop.f32.mrb[83].mxu0  ;;  %5235 = vmatmul.mubr.bf16.gmra.mrb[204].mxu1 %v4782_v42  ;;  %v4696_v21 = vmax.f32 %v4498_v55, 0.0 }
 0x633   : > { %v4504_v38 = vadd.f32 %v4503_v16, %v15253_v18  ;;  %v4697_v13 = vmax.f32 %v4500_v62, 0.0 }
 0x634   : > { %v4698_v60 = vmax.f32 %v4502_v31, 0.0 }
 0x635   : > { %v4699_v23 = vmax.f32 %v4504_v38, 0.0 }
 0x636   : > { %v4784_v12 = vpack.c.bf16 %v4698_v60, %v4696_v21 }
 0x637   : > { %v4507_v17 = vpop.f32.mrb[84].mxu0  ;;  %v4785_v34 = vpack.c.bf16 %v4699_v23, %v4697_v13 }
 0x638   : > { %v4508_v5 = vadd.f32 %v4507_v17, %v15249_v39  ;;  %v4509_v32 = vpop.f32.mrb[85].mxu0 }
 0x639   : > { %v4510_v30 = vadd.f32 %v4509_v32, %v15253_v18  ;;  %v4511_v57 = vpop.f32.mrb[86].mxu0  ;;  %5244 = vmatprep.mubr.bf16.mxu1 %v4785_v34 }
 0x63a   : > { %v4512_v27 = vadd.f32 %v4511_v57, %v15249_v39  ;;  %v4513_v51 = vpop.f32.mrb[87].mxu0  ;;  %5245 = vmatmul.mubr.bf16.gmra.mrb[208].mxu1 %v4784_v12  ;;  %v4700_v29 = vmax.f32 %v4508_v5, 0.0 }
 0x63b   : > { %v4514_v33 = vadd.f32 %v4513_v51, %v15253_v18  ;;  %v4701_v11 = vmax.f32 %v4510_v30, 0.0 }
 0x63c   : > { %v4702_v10 = vmax.f32 %v4512_v27, 0.0 }
 0x63d   : > { %v4703_v48 = vmax.f32 %v4514_v33, 0.0 }
 0x63e   : > { %v4786_v20 = vpack.c.bf16 %v4702_v10, %v4700_v29  ;;  %v12849_v29 = vld [vmem:[#allocation16 + $0x60] ss:$8 sps:$4 sm:$0xff]   ;;  %v12851_v10 = vld [vmem:[#allocation16 + $0x64] ss:$8 sps:$4 sm:$0xff]  }
 0x63f   : > { %v4517_v22 = vpop.f32.mrb[88].mxu0  ;;  %v4787_v37 = vpack.c.bf16 %v4703_v48, %v4701_v11  ;;  %6650 = vmatprep.subr.bf16.mxu0 %v12851_v10 }
 0x640   : > { %v4518_v36 = vadd.f32 %v4517_v22, %v15249_v39  ;;  %v4519_v15 = vpop.f32.mrb[89].mxu0  ;;  %6651 = vmatpush1.bf16.msra.mxu0 %v12849_v29 }
 0x641   : > { %v4520_v58 = vadd.f32 %v4519_v15, %v15253_v18  ;;  %v4521_v7 = vpop.f32.mrb[90].mxu0  ;;  %5254 = vmatprep.mubr.bf16.mxu1 %v4787_v37 }
 0x642   : > { %v4522_v19 = vadd.f32 %v4521_v7, %v15249_v39  ;;  %v4523_v59 = vpop.f32.mrb[91].mxu0  ;;  %5255 = vmatmul.mubr.bf16.gmra.mrb[212].mxu1 %v4786_v20  ;;  %v4704_v46 = vmax.f32 %v4518_v36, 0.0 }
 0x643   : > { %v4524_v8 = vadd.f32 %v4523_v59, %v15253_v18  ;;  %v4705_v54 = vmax.f32 %v4520_v58, 0.0 }
 0x644   : > { %v4706_v41 = vmax.f32 %v4522_v19, 0.0 }
 0x645   : > { %v4707_v61 = vmax.f32 %v4524_v8, 0.0 }
 0x646   : > { %v4788_v52 = vpack.c.bf16 %v4706_v41, %v4704_v46 }
 0x647   : > { %v4527_v3 = vpop.f32.mrb[92].mxu0  ;;  %v4789_v25 = vpack.c.bf16 %v4707_v61, %v4705_v54 }
 0x648   : > { %v4528_v1 = vadd.f32 %v4527_v3, %v15249_v39  ;;  %v4529_v35 = vpop.f32.mrb[93].mxu0 }
 0x649   : > { %v4530_v50 = vadd.f32 %v4529_v35, %v15253_v18  ;;  %v4531_v63 = vpop.f32.mrb[94].mxu0  ;;  %5264 = vmatprep.mubr.bf16.mxu1 %v4789_v25 }
 0x64a   : > { %v4532_v26 = vadd.f32 %v4531_v63, %v15249_v39  ;;  %v4533_v24 = vpop.f32.mrb[95].mxu0  ;;  %5265 = vmatmul.mubr.bf16.gmra.mrb[216].mxu1 %v4788_v52  ;;  %v4708_v28 = vmax.f32 %v4528_v1, 0.0 }
 0x64b   : > { %v4534_v6 = vadd.f32 %v4533_v24, %v15253_v18  ;;  %v4709_v42 = vmax.f32 %v4530_v50, 0.0  ;;  %v4840_v50 = vld [vmem:[%s18285_s8] sm:$0x3] }
 0x64c   : > { %v4710_v2 = vmax.f32 %v4532_v26, 0.0 }
 0x64d   : > { %v4711_v44 = vmax.f32 %v4534_v6, 0.0 }
 0x64e   : > { %v4790_v14 = vpack.c.bf16 %v4710_v2, %v4708_v28  ;;  %v15386_v28 = vrot.slane %v4840_v50, %v14593_v45 }
 0x64f   : > { %v4537_v55 = vpop.f32.mrb[96].mxu0  ;;  %v4791_v49 = vpack.c.bf16 %v4711_v44, %v4709_v42  ;;  %v15390_v42 = vrot.slane %v4840_v50, %v14599_v47  ;;  %v12852_v44 = vld [vmem:[#allocation16 + $0x70] ss:$8 sps:$4 sm:$0xff]  }
 0x650   : > { %v4538_v62 = vadd.f32 %v4537_v55, %v15249_v39  ;;  %v4539_v40 = vpop.f32.mrb[97].mxu0 }
 0x651   : > { %v4540_v31 = vadd.f32 %v4539_v40, %v15253_v18  ;;  %v4541_v16 = vpop.f32.mrb[98].mxu0  ;;  %5274 = vmatprep.mubr.bf16.mxu1 %v4791_v49 }
 0x652   : > { %v4542_v38 = vadd.f32 %v4541_v16, %v15249_v39  ;;  %v4543_v21 = vpop.f32.mrb[99].mxu0  ;;  %5275 = vmatmul.mubr.bf16.gmra.mrb[220].mxu1 %v4790_v14  ;;  %v4712_v13 = vmax.f32 %v4538_v62, 0.0  ;;  %v12854_v14 = vld [vmem:[#allocation16 + $0x74] ss:$8 sps:$4 sm:$0xff]  }
 0x653   : > { %v4544_v60 = vadd.f32 %v4543_v21, %v15253_v18  ;;  %v4713_v12 = vmax.f32 %v4540_v31, 0.0  ;;  %6652 = vmatprep.subr.bf16.mxu0 %v12854_v14  ;;  %v12857_v14 = vld [vmem:[#allocation16 + $0x84] ss:$8 sps:$4 sm:$0xff]  }
 0x654   : > { %v4714_v23 = vmax.f32 %v4542_v38, 0.0  ;;  %6653 = vmatpush1.bf16.msra.mxu0 %v12852_v44  ;;  %v12855_v44 = vld [vmem:[#allocation16 + $0x80] ss:$8 sps:$4 sm:$0xff]  }
 0x655   : > { %v4715_v17 = vmax.f32 %v4544_v60, 0.0  ;;  %6654 = vmatprep.subr.bf16.mxu0 %v12857_v14 }
 0x656   : > { %v4792_v34 = vpack.c.bf16 %v4714_v23, %v4712_v13 }
 0x657   : > { %v4547_v5 = vpop.f32.mrb[100].mxu0  ;;  %v4793_v32 = vpack.c.bf16 %v4715_v17, %v4713_v12 }
 0x658   : > { %v4548_v30 = vadd.f32 %v4547_v5, %v15249_v39  ;;  %v4549_v57 = vpop.f32.mrb[101].mxu0  ;;  %6655 = vmatpush1.bf16.msra.mxu0 %v12855_v44 }
 0x659   : > { %v4550_v27 = vadd.f32 %v4549_v57, %v15253_v18  ;;  %v4551_v51 = vpop.f32.mrb[102].mxu0  ;;  %5284 = vmatprep.mubr.bf16.mxu1 %v4793_v32 }
 0x65a   : > { %v4552_v33 = vadd.f32 %v4551_v51, %v15249_v39  ;;  %v4553_v56 = vpop.f32.mrb[103].mxu0  ;;  %5285 = vmatmul.mubr.bf16.gmra.mrb[224].mxu1 %v4792_v34  ;;  %v4716_v11 = vmax.f32 %v4548_v30, 0.0 }
 0x65b   : > { %v4554_v4 = vadd.f32 %v4553_v56, %v15253_v18  ;;  %v4717_v20 = vmax.f32 %v4550_v27, 0.0 }
 0x65c   : > { %v4718_v48 = vmax.f32 %v4552_v33, 0.0 }
 0x65d   : > { %v4719_v22 = vmax.f32 %v4554_v4, 0.0 }
 0x65e   : > { %v4794_v37 = vpack.c.bf16 %v4718_v48, %v4716_v11 }
 0x65f   : > { %v4557_v36 = vpop.f32.mrb[104].mxu0  ;;  %v4795_v15 = vpack.c.bf16 %v4719_v22, %v4717_v20 }
 0x660   : > { %v4558_v58 = vadd.f32 %v4557_v36, %v15249_v39  ;;  %v4559_v7 = vpop.f32.mrb[105].mxu0 }
 0x661   : > { %v4560_v19 = vadd.f32 %v4559_v7, %v15253_v18  ;;  %v4561_v59 = vpop.f32.mrb[106].mxu0  ;;  %5294 = vmatprep.mubr.bf16.mxu1 %v4795_v15 }
 0x662   : > { %v4562_v8 = vadd.f32 %v4561_v59, %v15249_v39  ;;  %v4563_v46 = vpop.f32.mrb[107].mxu0  ;;  %5295 = vmatmul.mubr.bf16.gmra.mrb[228].mxu1 %v4794_v37  ;;  %v4720_v54 = vmax.f32 %v4558_v58, 0.0 }
 0x663   : > { %v4564_v41 = vadd.f32 %v4563_v46, %v15253_v18  ;;  %v4721_v52 = vmax.f32 %v4560_v19, 0.0 }
 0x664   : > { %v4722_v61 = vmax.f32 %v4562_v8, 0.0 }
 0x665   : > { %v4723_v3 = vmax.f32 %v4564_v41, 0.0 }
 0x666   : > { %v4796_v25 = vpack.c.bf16 %v4722_v61, %v4720_v54 }
 0x667   : > { %v4567_v1 = vpop.f32.mrb[108].mxu0  ;;  %v4797_v35 = vpack.c.bf16 %v4723_v3, %v4721_v52 }
 0x668   : > { %v4568_v63 = vadd.f32 %v4567_v1, %v15249_v39  ;;  %v4569_v26 = vpop.f32.mrb[109].mxu0 }
 0x669   : > { %v4570_v24 = vadd.f32 %v4569_v26, %v15253_v18  ;;  %v4571_v6 = vpop.f32.mrb[110].mxu0  ;;  %5304 = vmatprep.mubr.bf16.mxu1 %v4797_v35 }
 0x66a   : > { %v4572_v53 = vadd.f32 %v4571_v6, %v15249_v39  ;;  %v4573_v9 = vpop.f32.mrb[111].mxu0  ;;  %5305 = vmatmul.mubr.bf16.gmra.mrb[232].mxu1 %v4796_v25  ;;  %v4724_v55 = vmax.f32 %v4568_v63, 0.0 }
 0x66b   : > { %v4574_v2 = vadd.f32 %v4573_v9, %v15253_v18  ;;  %v4725_v62 = vmax.f32 %v4570_v24, 0.0 }
 0x66c   : > { %v4726_v49 = vmax.f32 %v4572_v53, 0.0 }
 0x66d   : > { %v4727_v40 = vmax.f32 %v4574_v2, 0.0  ;;  %v5046_v31 = vpop.f32.mrb[128].mxu1 }
 0x66e   : > { %v4798_v16 = vpack.c.bf16 %v4726_v49, %v4724_v55  ;;  %v5047_v38 = vadd.f32 %v5046_v31, %v15386_v28  ;;  %v5048_v21 = vpop.f32.mrb[129].mxu1 }
 0x66f   : > { %v5049_v60 = vadd.f32 %v5048_v21, %v15390_v42  ;;  %v4577_v13 = vpop.f32.mrb[112].mxu0  ;;  %v5050_v23 = vpop.f32.mrb[130].mxu1  ;;  %v4799_v12 = vpack.c.bf16 %v4727_v40, %v4725_v62 }
 0x670   : > { %v4578_v17 = vadd.f32 %v4577_v13, %v15249_v39  ;;  %v5051_v34 = vadd.f32 %v5050_v23, %v15386_v28  ;;  %v4579_v5 = vpop.f32.mrb[113].mxu0  ;;  %v5052_v32 = vpop.f32.mrb[131].mxu1  ;;  %v5365_v51 = vmax.f32 %v5047_v38, 0.0 }
 0x671   : > { %v4580_v30 = vadd.f32 %v4579_v5, %v15253_v18  ;;  %v5053_v57 = vadd.f32 %v5052_v32, %v15390_v42  ;;  %v4581_v27 = vpop.f32.mrb[114].mxu0  ;;  %5314 = vmatprep.mubr.bf16.mxu1 %v4799_v12  ;;  %v5366_v29 = vmax.f32 %v5049_v60, 0.0 }
 0x672   : > { %v5367_v33 = vmax.f32 %v5051_v34, 0.0  ;;  %v4582_v56 = vadd.f32 %v4581_v27, %v15249_v39  ;;  %v4583_v4 = vpop.f32.mrb[115].mxu0  ;;  %5315 = vmatmul.mubr.bf16.gmra.mrb[236].mxu1 %v4798_v16  ;;  %v4728_v48 = vmax.f32 %v4578_v17, 0.0 }
 0x673   : > { %v5368_v10 = vmax.f32 %v5053_v57, 0.0  ;;  %v4584_v11 = vadd.f32 %v4583_v4, %v15253_v18  ;;  %v4729_v37 = vmax.f32 %v4580_v30, 0.0 }
 0x674   : > { %v15400_v20 = vpack.c.bf16 %v5367_v33, %v5365_v51  ;;  %v4730_v22 = vmax.f32 %v4582_v56, 0.0 }
 0x675   : > { %v4731_v36 = vmax.f32 %v4584_v11, 0.0  ;;  %v5056_v15 = vpop.f32.mrb[132].mxu1  ;;  %v15402_v58 = vpack.c.bf16 %v5368_v10, %v5366_v29 }
 0x676   : > { %v4800_v7 = vpack.c.bf16 %v4730_v22, %v4728_v48  ;;  %v5057_v19 = vadd.f32 %v5056_v15, %v15386_v28  ;;  %v5058_v59 = vpop.f32.mrb[133].mxu1 }
 0x677   : > { %v5059_v8 = vadd.f32 %v5058_v59, %v15390_v42  ;;  %v4587_v46 = vpop.f32.mrb[116].mxu0  ;;  %v5060_v41 = vpop.f32.mrb[134].mxu1  ;;  %v4801_v54 = vpack.c.bf16 %v4731_v36, %v4729_v37 }
 0x678   : > { %v4588_v61 = vadd.f32 %v4587_v46, %v15249_v39  ;;  %v5061_v52 = vadd.f32 %v5060_v41, %v15386_v28  ;;  %v4589_v3 = vpop.f32.mrb[117].mxu0  ;;  %v5062_v25 = vpop.f32.mrb[135].mxu1  ;;  %v5369_v63 = vmax.f32 %v5057_v19, 0.0 }
 0x679   : > { %v4590_v1 = vadd.f32 %v4589_v3, %v15253_v18  ;;  %v5063_v35 = vadd.f32 %v5062_v25, %v15390_v42  ;;  %v4591_v50 = vpop.f32.mrb[118].mxu0  ;;  %5324 = vmatprep.mubr.bf16.mxu1 %v4801_v54  ;;  %v5370_v53 = vmax.f32 %v5059_v8, 0.0 }
 0x67a   : > { %v5371_v26 = vmax.f32 %v5061_v52, 0.0  ;;  %v4592_v24 = vadd.f32 %v4591_v50, %v15249_v39  ;;  %v4593_v6 = vpop.f32.mrb[119].mxu0  ;;  %5325 = vmatmul.mubr.bf16.gmra.mrb[240].mxu1 %v4800_v7  ;;  %v4732_v55 = vmax.f32 %v4588_v61, 0.0 }
 0x67b   : > { %v5372_v9 = vmax.f32 %v5063_v35, 0.0  ;;  %v4594_v2 = vadd.f32 %v4593_v6, %v15253_v18  ;;  %v4733_v40 = vmax.f32 %v4590_v1, 0.0 }
 0x67c   : > { %v4734_v49 = vmax.f32 %v4592_v24, 0.0  ;;  %v15412_v62 = vpack.c.bf16 %v5371_v26, %v5369_v63 }
 0x67d   : > { %v4735_v31 = vmax.f32 %v4594_v2, 0.0  ;;  %v5066_v16 = vpop.f32.mrb[136].mxu1  ;;  %v15414_v38 = vpack.c.bf16 %v5372_v9, %v5370_v53 }
 0x67e   : > { %v4802_v21 = vpack.c.bf16 %v4734_v49, %v4732_v55  ;;  %v5067_v60 = vadd.f32 %v5066_v16, %v15386_v28  ;;  %v5068_v13 = vpop.f32.mrb[137].mxu1 }
 0x67f   : > { %v5069_v23 = vadd.f32 %v5068_v13, %v15390_v42  ;;  %v4597_v12 = vpop.f32.mrb[120].mxu0  ;;  %v5070_v17 = vpop.f32.mrb[138].mxu1  ;;  %v4803_v34 = vpack.c.bf16 %v4735_v31, %v4733_v40  ;;  %v12858_v40 = vld [vmem:[#allocation16 + $0x90] ss:$8 sps:$4 sm:$0xff]   ;;  %v12860_v31 = vld [vmem:[#allocation16 + $0x94] ss:$8 sps:$4 sm:$0xff]  }
 0x680   : > { %v4598_v5 = vadd.f32 %v4597_v12, %v15249_v39  ;;  %v5071_v32 = vadd.f32 %v5070_v17, %v15386_v28  ;;  %v4599_v30 = vpop.f32.mrb[121].mxu0  ;;  %v5072_v57 = vpop.f32.mrb[139].mxu1  ;;  %v5373_v56 = vmax.f32 %v5067_v60, 0.0  ;;  %6656 = vmatprep.subr.bf16.mxu0 %v12860_v31 }
 0x681   : > { %v4600_v27 = vadd.f32 %v4599_v30, %v15253_v18  ;;  %v5073_v51 = vadd.f32 %v5072_v57, %v15390_v42  ;;  %v4601_v33 = vpop.f32.mrb[122].mxu0  ;;  %5334 = vmatprep.mubr.bf16.mxu1 %v4803_v34  ;;  %v5374_v11 = vmax.f32 %v5069_v23, 0.0  ;;  %6657 = vmatpush1.bf16.msra.mxu0 %v12858_v40 }
 0x682   : > { %v5375_v4 = vmax.f32 %v5071_v32, 0.0  ;;  %v4602_v29 = vadd.f32 %v4601_v33, %v15249_v39  ;;  %v4603_v10 = vpop.f32.mrb[123].mxu0  ;;  %5335 = vmatmul.mubr.bf16.gmra.mrb[244].mxu1 %v4802_v21  ;;  %v4736_v37 = vmax.f32 %v4598_v5, 0.0 }
 0x683   : > { %v5376_v48 = vmax.f32 %v5073_v51, 0.0  ;;  %v4604_v22 = vadd.f32 %v4603_v10, %v15253_v18  ;;  %v4737_v7 = vmax.f32 %v4600_v27, 0.0 }
 0x684   : > { %v4738_v36 = vmax.f32 %v4602_v29, 0.0  ;;  %v15424_v15 = vpack.c.bf16 %v5375_v4, %v5373_v56 }
 0x685   : > { %v4739_v19 = vmax.f32 %v4604_v22, 0.0  ;;  %v5076_v59 = vpop.f32.mrb[140].mxu1  ;;  %v15426_v8 = vpack.c.bf16 %v5376_v48, %v5374_v11 }
 0x686   : > { %v4804_v46 = vpack.c.bf16 %v4738_v36, %v4736_v37  ;;  %v5077_v41 = vadd.f32 %v5076_v59, %v15386_v28  ;;  %v5078_v54 = vpop.f32.mrb[141].mxu1 }
 0x687   : > { %v5079_v61 = vadd.f32 %v5078_v54, %v15390_v42  ;;  %v4607_v52 = vpop.f32.mrb[124].mxu0  ;;  %v5080_v3 = vpop.f32.mrb[142].mxu1  ;;  %v4805_v25 = vpack.c.bf16 %v4739_v19, %v4737_v7 }
 0x688   : > { %v4608_v1 = vadd.f32 %v4607_v52, %v15249_v39  ;;  %v5081_v35 = vadd.f32 %v5080_v3, %v15386_v28  ;;  %v4609_v50 = vpop.f32.mrb[125].mxu0  ;;  %v5082_v63 = vpop.f32.mrb[143].mxu1  ;;  %v5377_v53 = vmax.f32 %v5077_v41, 0.0  ;;  %v12861_v52 = vld [vmem:[#allocation16 + $0xa0] ss:$8 sps:$4 sm:$0xff]  }
 0x689   : > { %v4610_v26 = vadd.f32 %v4609_v50, %v15253_v18  ;;  %v5083_v24 = vadd.f32 %v5082_v63, %v15390_v42  ;;  %v4611_v6 = vpop.f32.mrb[126].mxu0  ;;  %5344 = vmatprep.mubr.bf16.mxu1 %v4805_v25  ;;  %v5378_v14 = vmax.f32 %v5079_v61, 0.0  ;;  %v12863_v3 = vld [vmem:[#allocation16 + $0xa4] ss:$8 sps:$4 sm:$0xff]  }
 0x68a   : > { %v5379_v9 = vmax.f32 %v5081_v35, 0.0  ;;  %v4612_v2 = vadd.f32 %v4611_v6, %v15249_v39  ;;  %v4613_v44 = vpop.f32.mrb[127].mxu0  ;;  %5345 = vmatmul.mubr.bf16.gmra.mrb[248].mxu1 %v4804_v46  ;;  %v4740_v16 = vmax.f32 %v4608_v1, 0.0  ;;  %6658 = vmatprep.subr.bf16.mxu0 %v12863_v3 }
 0x68b   : > { %v5380_v55 = vmax.f32 %v5083_v24, 0.0  ;;  %v4614_v49 = vadd.f32 %v4613_v44, %v15253_v18  ;;  %v4741_v13 = vmax.f32 %v4610_v26, 0.0  ;;  %6659 = vmatpush1.bf16.msra.mxu0 %v12861_v52 }
 0x68c   : > { %v4742_v21 = vmax.f32 %v4612_v2, 0.0  ;;  %v15436_v60 = vpack.c.bf16 %v5379_v9, %v5377_v53 }
 0x68d   : > { %v4743_v23 = vmax.f32 %v4614_v49, 0.0  ;;  %v5086_v12 = vpop.f32.mrb[144].mxu1  ;;  %v15438_v17 = vpack.c.bf16 %v5380_v55, %v5378_v14 }
 0x68e   : > { %v4806_v34 = vpack.c.bf16 %v4742_v21, %v4740_v16  ;;  %v5087_v39 = vadd.f32 %v5086_v12, %v15386_v28  ;;  %v5088_v5 = vpop.f32.mrb[145].mxu1 }
 0x68f   : > { %v5089_v32 = vadd.f32 %v5088_v5, %v15390_v42  ;;  %v5090_v18 = vpop.f32.mrb[146].mxu1  ;;  %v4807_v30 = vpack.c.bf16 %v4743_v23, %v4741_v13  ;;  %v12864_v5 = vld [vmem:[#allocation16 + $0xb0] ss:$8 sps:$4 sm:$0xff]  }
 0x690   : > { %v5091_v57 = vadd.f32 %v5090_v18, %v15386_v28  ;;  %v5092_v27 = vpop.f32.mrb[147].mxu1  ;;  %v5381_v33 = vmax.f32 %v5087_v39, 0.0 }
 0x691   : > { %v5093_v51 = vadd.f32 %v5092_v27, %v15390_v42  ;;  %5354 = vmatprep.mubr.bf16.mxu1 %v4807_v30  ;;  %v5382_v4 = vmax.f32 %v5089_v32, 0.0  ;;  %v12866_v32 = vld [vmem:[#allocation16 + $0xb4] ss:$8 sps:$4 sm:$0xff]  }
 0x692   : > { %v5383_v56 = vmax.f32 %v5091_v57, 0.0  ;;  %5355 = vmatmul.mubr.bf16.gmra.mrb[252].mxu1 %v4806_v34  ;;  %6660 = vmatprep.subr.bf16.mxu0 %v12866_v32 }
 0x693   : > { %v5384_v29 = vmax.f32 %v5093_v51, 0.0  ;;  %5781 = vmatprep.mubr.bf16.mxu1 %v15402_v58  ;;  %6661 = vmatpush1.bf16.msra.mxu0 %v12864_v5 }
 0x694   : > { %v15445_v10 = vpack.c.bf16 %v5383_v56, %v5381_v33 }
 0x695   : > { %v5096_v11 = vpop.f32.mrb[148].mxu1  ;;  %v15447_v48 = vpack.c.bf16 %v5384_v29, %v5382_v4 }
 0x696   : > { %v5097_v22 = vadd.f32 %v5096_v11, %v15386_v28  ;;  %v5098_v37 = vpop.f32.mrb[149].mxu1 }
 0x697   : > { %v5099_v36 = vadd.f32 %v5098_v37, %v15390_v42  ;;  %v5100_v7 = vpop.f32.mrb[150].mxu1 }
 0x698   : > { %v5101_v19 = vadd.f32 %v5100_v7, %v15386_v28  ;;  %v5102_v59 = vpop.f32.mrb[151].mxu1  ;;  %v5385_v41 = vmax.f32 %v5097_v22, 0.0 }
 0x699   : > { %v5103_v46 = vadd.f32 %v5102_v59, %v15390_v42  ;;  %v5386_v58 = vmax.f32 %v5099_v36, 0.0 }
 0x69a   : > { %v5387_v54 = vmax.f32 %v5101_v19, 0.0  ;;  %5782 = vmatmul.mubr.bf16.vlgmr.msra.gmra.mrb[0].mxu1 %v15400_v20 }
 0x69b   : > { %v5388_v61 = vmax.f32 %v5103_v46, 0.0  ;;  %5791 = vmatprep.mubr.bf16.mxu1 %v15414_v38 }
 0x69c   : > { %v15455_v25 = vpack.c.bf16 %v5387_v54, %v5385_v41 }
 0x69d   : > { %v5106_v1 = vpop.f32.mrb[152].mxu1  ;;  %v15457_v35 = vpack.c.bf16 %v5388_v61, %v5386_v58 }
 0x69e   : > { %v5107_v50 = vadd.f32 %v5106_v1, %v15386_v28  ;;  %v5108_v63 = vpop.f32.mrb[153].mxu1 }
 0x69f   : > { %v5109_v26 = vadd.f32 %v5108_v63, %v15390_v42  ;;  %v5110_v24 = vpop.f32.mrb[154].mxu1  ;;  %v12869_v63 = vld [vmem:[#allocation16 + $0xc4] ss:$8 sps:$4 sm:$0xff]  }
 0x6a0   : > { %v5111_v20 = vadd.f32 %v5110_v24, %v15386_v28  ;;  %v5112_v6 = vpop.f32.mrb[155].mxu1  ;;  %v5389_v53 = vmax.f32 %v5107_v50, 0.0  ;;  %v12867_v50 = vld [vmem:[#allocation16 + $0xc0] ss:$8 sps:$4 sm:$0xff]   ;;  %6662 = vmatprep.subr.bf16.mxu0 %v12869_v63 }
 0x6a1   : > { %v5113_v38 = vadd.f32 %v5112_v6, %v15390_v42  ;;  %v5390_v2 = vmax.f32 %v5109_v26, 0.0  ;;  %6663 = vmatpush1.bf16.msra.mxu0 %v12867_v50 }
 0x6a2   : > { %v5391_v9 = vmax.f32 %v5111_v20, 0.0  ;;  %5792 = vmatmul.mubr.bf16.gmra.mrb[4].mxu1 %v15412_v62 }
 0x6a3   : > { %v5392_v44 = vmax.f32 %v5113_v38, 0.0  ;;  %5801 = vmatprep.mubr.bf16.mxu1 %v15426_v8 }
 0x6a4   : > { %v15465_v14 = vpack.c.bf16 %v5391_v9, %v5389_v53 }
 0x6a5   : > { %v5116_v55 = vpop.f32.mrb[156].mxu1  ;;  %v15467_v49 = vpack.c.bf16 %v5392_v44, %v5390_v2 }
 0x6a6   : > { %v5117_v40 = vadd.f32 %v5116_v55, %v15386_v28  ;;  %v5118_v31 = vpop.f32.mrb[157].mxu1 }
 0x6a7   : > { %v5119_v16 = vadd.f32 %v5118_v31, %v15390_v42  ;;  %v5120_v21 = vpop.f32.mrb[158].mxu1 }
 0x6a8   : > { %v5121_v13 = vadd.f32 %v5120_v21, %v15386_v28  ;;  %v5122_v23 = vpop.f32.mrb[159].mxu1  ;;  %v5393_v12 = vmax.f32 %v5117_v40, 0.0 }
 0x6a9   : > { %v5123_v62 = vadd.f32 %v5122_v23, %v15390_v42  ;;  %v5394_v8 = vmax.f32 %v5119_v16, 0.0 }
 0x6aa   : > { %v5395_v34 = vmax.f32 %v5121_v13, 0.0  ;;  %5802 = vmatmul.mubr.bf16.gmra.mrb[8].mxu1 %v15424_v15 }
 0x6ab   : > { %v5396_v39 = vmax.f32 %v5123_v62, 0.0  ;;  %5811 = vmatprep.mubr.bf16.mxu1 %v15438_v17 }
 0x6ac   : > { %v15475_v18 = vpack.c.bf16 %v5395_v34, %v5393_v12 }
 0x6ad   : > { %v5126_v30 = vpop.f32.mrb[160].mxu1  ;;  %v15477_v57 = vpack.c.bf16 %v5396_v39, %v5394_v8 }
 0x6ae   : > { %v5127_v27 = vadd.f32 %v5126_v30, %v15386_v28  ;;  %v5128_v51 = vpop.f32.mrb[161].mxu1 }
 0x6af   : > { %v5129_v33 = vadd.f32 %v5128_v51, %v15390_v42  ;;  %v5130_v56 = vpop.f32.mrb[162].mxu1  ;;  %v12872_v51 = vld [vmem:[#allocation16 + $0xd4] ss:$8 sps:$4 sm:$0xff]  }
 0x6b0   : > { %v5131_v15 = vadd.f32 %v5130_v56, %v15386_v28  ;;  %v5132_v4 = vpop.f32.mrb[163].mxu1  ;;  %v5397_v29 = vmax.f32 %v5127_v27, 0.0  ;;  %v12870_v27 = vld [vmem:[#allocation16 + $0xd0] ss:$8 sps:$4 sm:$0xff]   ;;  %6664 = vmatprep.subr.bf16.mxu0 %v12872_v51 }
 0x6b1   : > { %v5133_v17 = vadd.f32 %v5132_v4, %v15390_v42  ;;  %v5398_v22 = vmax.f32 %v5129_v33, 0.0  ;;  %6665 = vmatpush1.bf16.msra.mxu0 %v12870_v27 }
 0x6b2   : > { %v5399_v11 = vmax.f32 %v5131_v15, 0.0  ;;  %5812 = vmatmul.mubr.bf16.gmra.mrb[12].mxu1 %v15436_v60 }
 0x6b3   : > { %v5400_v37 = vmax.f32 %v5133_v17, 0.0  ;;  %5821 = vmatprep.mubr.bf16.mxu1 %v15447_v48 }
 0x6b4   : > { %v15485_v36 = vpack.c.bf16 %v5399_v11, %v5397_v29 }
 0x6b5   : > { %v5136_v7 = vpop.f32.mrb[164].mxu1  ;;  %v15487_v19 = vpack.c.bf16 %v5400_v37, %v5398_v22 }
 0x6b6   : > { %v5137_v59 = vadd.f32 %v5136_v7, %v15386_v28  ;;  %v5138_v46 = vpop.f32.mrb[165].mxu1 }
 0x6b7   : > { %v5139_v41 = vadd.f32 %v5138_v46, %v15390_v42  ;;  %v5140_v54 = vpop.f32.mrb[166].mxu1 }
 0x6b8   : > { %v5141_v58 = vadd.f32 %v5140_v54, %v15386_v28  ;;  %v5142_v61 = vpop.f32.mrb[167].mxu1  ;;  %v5401_v52 = vmax.f32 %v5137_v59, 0.0 }
 0x6b9   : > { %v5143_v60 = vadd.f32 %v5142_v61, %v15390_v42  ;;  %v5402_v48 = vmax.f32 %v5139_v41, 0.0 }
 0x6ba   : > { %v5403_v3 = vmax.f32 %v5141_v58, 0.0  ;;  %5822 = vmatmul.mubr.bf16.gmra.mrb[16].mxu1 %v15445_v10 }
 0x6bb   : > { %v5404_v1 = vmax.f32 %v5143_v60, 0.0  ;;  %5831 = vmatprep.mubr.bf16.mxu1 %v15457_v35 }
 0x6bc   : > { %v15495_v26 = vpack.c.bf16 %v5403_v3, %v5401_v52 }
 0x6bd   : > { %v5146_v24 = vpop.f32.mrb[168].mxu1  ;;  %v15497_v20 = vpack.c.bf16 %v5404_v1, %v5402_v48 }
 0x6be   : > { %v5147_v6 = vadd.f32 %v5146_v24, %v15386_v28  ;;  %v5148_v38 = vpop.f32.mrb[169].mxu1 }
 0x6bf   : > { %v5149_v53 = vadd.f32 %v5148_v38, %v15390_v42  ;;  %v5150_v9 = vpop.f32.mrb[170].mxu1  ;;  %v12875_v38 = vld [vmem:[#allocation16 + $0xe4] ss:$8 sps:$4 sm:$0xff]  }
 0x6c0   : > { %v5151_v10 = vadd.f32 %v5150_v9, %v15386_v28  ;;  %v5152_v2 = vpop.f32.mrb[171].mxu1  ;;  %v5405_v44 = vmax.f32 %v5147_v6, 0.0  ;;  %v12873_v6 = vld [vmem:[#allocation16 + $0xe0] ss:$8 sps:$4 sm:$0xff]   ;;  %6666 = vmatprep.subr.bf16.mxu0 %v12875_v38 }
 0x6c1   : > { %v5153_v35 = vadd.f32 %v5152_v2, %v15390_v42  ;;  %v5406_v40 = vmax.f32 %v5149_v53, 0.0  ;;  %6667 = vmatpush1.bf16.msra.mxu0 %v12873_v6 }
 0x6c2   : > { %v5407_v55 = vmax.f32 %v5151_v10, 0.0  ;;  %5832 = vmatmul.mubr.bf16.gmra.mrb[20].mxu1 %v15455_v25 }
 0x6c3   : > { %v5408_v31 = vmax.f32 %v5153_v35, 0.0  ;;  %5841 = vmatprep.mubr.bf16.mxu1 %v15467_v49 }
 0x6c4   : > { %v15505_v16 = vpack.c.bf16 %v5407_v55, %v5405_v44 }
 0x6c5   : > { %v5156_v21 = vpop.f32.mrb[172].mxu1  ;;  %v15507_v13 = vpack.c.bf16 %v5408_v31, %v5406_v40 }
 0x6c6   : > { %v5157_v23 = vadd.f32 %v5156_v21, %v15386_v28  ;;  %v5158_v62 = vpop.f32.mrb[173].mxu1 }
 0x6c7   : > { %v5159_v12 = vadd.f32 %v5158_v62, %v15390_v42  ;;  %v5160_v34 = vpop.f32.mrb[174].mxu1 }
 0x6c8   : > { %v5161_v8 = vadd.f32 %v5160_v34, %v15386_v28  ;;  %v5162_v39 = vpop.f32.mrb[175].mxu1  ;;  %v5409_v5 = vmax.f32 %v5157_v23, 0.0 }
 0x6c9   : > { %v5163_v25 = vadd.f32 %v5162_v39, %v15390_v42  ;;  %v5410_v49 = vmax.f32 %v5159_v12, 0.0 }
 0x6ca   : > { %v5411_v32 = vmax.f32 %v5161_v8, 0.0  ;;  %5842 = vmatmul.mubr.bf16.gmra.mrb[24].mxu1 %v15465_v14 }
 0x6cb   : > { %v5412_v30 = vmax.f32 %v5163_v25, 0.0  ;;  %5851 = vmatprep.mubr.bf16.mxu1 %v15477_v57 }
 0x6cc   : > { %v15515_v33 = vpack.c.bf16 %v5411_v32, %v5409_v5 }
 0x6cd   : > { %v5166_v56 = vpop.f32.mrb[176].mxu1  ;;  %v15517_v15 = vpack.c.bf16 %v5412_v30, %v5410_v49 }
 0x6ce   : > { %v5167_v4 = vadd.f32 %v5166_v56, %v15386_v28  ;;  %v5168_v17 = vpop.f32.mrb[177].mxu1 }
 0x6cf   : > { %v5169_v29 = vadd.f32 %v5168_v17, %v15390_v42  ;;  %v5170_v11 = vpop.f32.mrb[178].mxu1  ;;  %v12878_v17 = vld [vmem:[#allocation16 + $0xf4] ss:$8 sps:$4 sm:$0xff]  }
 0x6d0   : > { %v5171_v14 = vadd.f32 %v5170_v11, %v15386_v28  ;;  %v5172_v22 = vpop.f32.mrb[179].mxu1  ;;  %v5413_v37 = vmax.f32 %v5167_v4, 0.0  ;;  %v12876_v4 = vld [vmem:[#allocation16 + $0xf0] ss:$8 sps:$4 sm:$0xff]   ;;  %6668 = vmatprep.subr.bf16.mxu0 %v12878_v17 }
 0x6d1   : > { %v5173_v57 = vadd.f32 %v5172_v22, %v15390_v42  ;;  %v5414_v59 = vmax.f32 %v5169_v29, 0.0  ;;  %6669 = vmatpush1.bf16.msra.mxu0 %v12876_v4 }
 0x6d2   : > { %v5415_v7 = vmax.f32 %v5171_v14, 0.0  ;;  %5852 = vmatmul.mubr.bf16.gmra.mrb[28].mxu1 %v15475_v18 }
 0x6d3   : > { %v5416_v46 = vmax.f32 %v5173_v57, 0.0  ;;  %5861 = vmatprep.mubr.bf16.mxu1 %v15487_v19 }
 0x6d4   : > { %v15525_v41 = vpack.c.bf16 %v5415_v7, %v5413_v37 }
 0x6d5   : > { %v5176_v54 = vpop.f32.mrb[180].mxu1  ;;  %v15527_v58 = vpack.c.bf16 %v5416_v46, %v5414_v59 }
 0x6d6   : > { %v5177_v61 = vadd.f32 %v5176_v54, %v15386_v28  ;;  %v5178_v60 = vpop.f32.mrb[181].mxu1 }
 0x6d7   : > { %v5179_v52 = vadd.f32 %v5178_v60, %v15390_v42  ;;  %v5180_v3 = vpop.f32.mrb[182].mxu1 }
 0x6d8   : > { %v5181_v48 = vadd.f32 %v5180_v3, %v15386_v28  ;;  %v5182_v1 = vpop.f32.mrb[183].mxu1  ;;  %v5417_v50 = vmax.f32 %v5177_v61, 0.0 }
 0x6d9   : > { %v5183_v18 = vadd.f32 %v5182_v1, %v15390_v42  ;;  %v5418_v19 = vmax.f32 %v5179_v52, 0.0 }
 0x6da   : > { %v5419_v63 = vmax.f32 %v5181_v48, 0.0  ;;  %5862 = vmatmul.mubr.bf16.gmra.mrb[32].mxu1 %v15485_v36 }
 0x6db   : > { %v5420_v24 = vmax.f32 %v5183_v18, 0.0  ;;  %5871 = vmatprep.mubr.bf16.mxu1 %v15497_v20 }
 0x6dc   : > { %v15535_v53 = vpack.c.bf16 %v5419_v63, %v5417_v50 }
 0x6dd   : > { %v5186_v9 = vpop.f32.mrb[184].mxu1  ;;  %v15537_v10 = vpack.c.bf16 %v5420_v24, %v5418_v19 }
 0x6de   : > { %v5187_v2 = vadd.f32 %v5186_v9, %v15386_v28  ;;  %v5188_v35 = vpop.f32.mrb[185].mxu1 }
 0x6df   : > { %v5189_v44 = vadd.f32 %v5188_v35, %v15390_v42  ;;  %v5190_v55 = vpop.f32.mrb[186].mxu1  ;;  %v12881_v35 = vld [vmem:[#allocation19 + $0x4] ss:$8 sps:$4 sm:$0xff]  }
 0x6e0   : > { %v5191_v36 = vadd.f32 %v5190_v55, %v15386_v28  ;;  %v5192_v40 = vpop.f32.mrb[187].mxu1  ;;  %v5421_v31 = vmax.f32 %v5187_v2, 0.0  ;;  %7387 = vmatprep.subr.bf16.mxu0 %v12881_v35 }
 0x6e1   : > { %v5193_v20 = vadd.f32 %v5192_v40, %v15390_v42  ;;  %v5422_v23 = vmax.f32 %v5189_v44, 0.0 }
 0x6e2   : > { %v5423_v21 = vmax.f32 %v5191_v36, 0.0  ;;  %5872 = vmatmul.mubr.bf16.gmra.mrb[36].mxu1 %v15495_v26 }
 0x6e3   : > { %v5424_v62 = vmax.f32 %v5193_v20, 0.0  ;;  %5881 = vmatprep.mubr.bf16.mxu1 %v15507_v13 }
 0x6e4   : > { %v15545_v12 = vpack.c.bf16 %v5423_v21, %v5421_v31 }
 0x6e5   : > { %v5196_v34 = vpop.f32.mrb[188].mxu1  ;;  %v15547_v8 = vpack.c.bf16 %v5424_v62, %v5422_v23 }
 0x6e6   : > { %v5197_v39 = vadd.f32 %v5196_v34, %v15386_v28  ;;  %v5198_v25 = vpop.f32.mrb[189].mxu1 }
 0x6e7   : > { %v5199_v5 = vadd.f32 %v5198_v25, %v15390_v42  ;;  %v5200_v32 = vpop.f32.mrb[190].mxu1 }
 0x6e8   : > { %v5201_v49 = vadd.f32 %v5200_v32, %v15386_v28  ;;  %v5202_v30 = vpop.f32.mrb[191].mxu1  ;;  %v5425_v27 = vmax.f32 %v5197_v39, 0.0 }
 0x6e9   : > { %v5203_v26 = vadd.f32 %v5202_v30, %v15390_v42  ;;  %v5426_v13 = vmax.f32 %v5199_v5, 0.0 }
 0x6ea   : > { %v5427_v51 = vmax.f32 %v5201_v49, 0.0  ;;  %5882 = vmatmul.mubr.bf16.gmra.mrb[40].mxu1 %v15505_v16 }
 0x6eb   : > { %v5428_v56 = vmax.f32 %v5203_v26, 0.0  ;;  %5891 = vmatprep.mubr.bf16.mxu1 %v15517_v15 }
 0x6ec   : > { %v15555_v29 = vpack.c.bf16 %v5427_v51, %v5425_v27 }
 0x6ed   : > { %v5206_v11 = vpop.f32.mrb[192].mxu1  ;;  %v15557_v14 = vpack.c.bf16 %v5428_v56, %v5426_v13 }
 0x6ee   : > { %v5207_v22 = vadd.f32 %v5206_v11, %v15386_v28  ;;  %v5208_v57 = vpop.f32.mrb[193].mxu1 }
 0x6ef   : > { %v5209_v37 = vadd.f32 %v5208_v57, %v15390_v42  ;;  %v5210_v7 = vpop.f32.mrb[194].mxu1 }
 0x6f0   : > { %v5211_v16 = vadd.f32 %v5210_v7, %v15386_v28  ;;  %v5212_v59 = vpop.f32.mrb[195].mxu1  ;;  %v5429_v46 = vmax.f32 %v5207_v22, 0.0 }
 0x6f1   : > { %v5213_v15 = vadd.f32 %v5212_v59, %v15390_v42  ;;  %v5430_v61 = vmax.f32 %v5209_v37, 0.0 }
 0x6f2   : > { %v5431_v54 = vmax.f32 %v5211_v16, 0.0  ;;  %5892 = vmatmul.mubr.bf16.gmra.mrb[44].mxu1 %v15515_v33 }
 0x6f3   : > { %v5432_v60 = vmax.f32 %v5213_v15, 0.0  ;;  %5901 = vmatprep.mubr.bf16.mxu1 %v15527_v58 }
 0x6f4   : > { %v15565_v52 = vpack.c.bf16 %v5431_v54, %v5429_v46 }
 0x6f5   : > { %v5216_v3 = vpop.f32.mrb[196].mxu1  ;;  %v5526_v48 = vpack.c.bf16 %v5432_v60, %v5430_v61 }
 0x6f6   : > { %v5217_v1 = vadd.f32 %v5216_v3, %v15386_v28  ;;  %v5218_v18 = vpop.f32.mrb[197].mxu1 }
 0x6f7   : > { %v5219_v50 = vadd.f32 %v5218_v18, %v15390_v42  ;;  %v5220_v63 = vpop.f32.mrb[198].mxu1 }
 0x6f8   : > { %v5221_v19 = vadd.f32 %v5220_v63, %v15386_v28  ;;  %v5222_v24 = vpop.f32.mrb[199].mxu1  ;;  %v5433_v33 = vmax.f32 %v5217_v1, 0.0 }
 0x6f9   : > { %v5223_v6 = vadd.f32 %v5222_v24, %v15390_v42  ;;  %v5434_v58 = vmax.f32 %v5219_v50, 0.0 }
 0x6fa   : > { %v5435_v38 = vmax.f32 %v5221_v19, 0.0  ;;  %5902 = vmatmul.mubr.bf16.gmra.mrb[48].mxu1 %v15525_v41 }
 0x6fb   : > { %v5436_v9 = vmax.f32 %v5223_v6, 0.0  ;;  %5911 = vmatprep.mubr.bf16.mxu1 %v15537_v10 }
 0x6fc   : > { %v15573_v2 = vpack.c.bf16 %v5435_v38, %v5433_v33 }
 0x6fd   : > { %v5226_v44 = vpop.f32.mrb[200].mxu1  ;;  %v5528_v55 = vpack.c.bf16 %v5436_v9, %v5434_v58 }
 0x6fe   : > { %v5227_v36 = vadd.f32 %v5226_v44, %v15386_v28  ;;  %v5228_v40 = vpop.f32.mrb[201].mxu1 }
 0x6ff   : > { %v5229_v20 = vadd.f32 %v5228_v40, %v15390_v42  ;;  %v5230_v31 = vpop.f32.mrb[202].mxu1 }
 0x700   : > { %v5231_v21 = vadd.f32 %v5230_v31, %v15386_v28  ;;  %v5232_v23 = vpop.f32.mrb[203].mxu1  ;;  %v5437_v62 = vmax.f32 %v5227_v36, 0.0 }
 0x701   : > { %v5233_v41 = vadd.f32 %v5232_v23, %v15390_v42  ;;  %v5438_v10 = vmax.f32 %v5229_v20, 0.0 }
 0x702   : > { %v5439_v34 = vmax.f32 %v5231_v21, 0.0  ;;  %5912 = vmatmul.mubr.bf16.gmra.mrb[52].mxu1 %v15535_v53 }
 0x703   : > { %v5440_v39 = vmax.f32 %v5233_v41, 0.0  ;;  %5921 = vmatprep.mubr.bf16.mxu1 %v15547_v8 }
 0x704   : > { %v15581_v25 = vpack.c.bf16 %v5439_v34, %v5437_v62 }
 0x705   : > { %v5236_v5 = vpop.f32.mrb[204].mxu1  ;;  %v5530_v32 = vpack.c.bf16 %v5440_v39, %v5438_v10 }
 0x706   : > { %v5237_v49 = vadd.f32 %v5236_v5, %v15386_v28  ;;  %v5238_v30 = vpop.f32.mrb[205].mxu1 }
 0x707   : > { %v5239_v26 = vadd.f32 %v5238_v30, %v15390_v42  ;;  %v5240_v27 = vpop.f32.mrb[206].mxu1 }
 0x708   : > { %v5241_v51 = vadd.f32 %v5240_v27, %v15386_v28  ;;  %v5242_v13 = vpop.f32.mrb[207].mxu1  ;;  %v5441_v53 = vmax.f32 %v5237_v49, 0.0 }
 0x709   : > { %v5243_v56 = vadd.f32 %v5242_v13, %v15390_v42  ;;  %v5442_v8 = vmax.f32 %v5239_v26, 0.0 }
 0x70a   : > { %v5443_v4 = vmax.f32 %v5241_v51, 0.0  ;;  %5922 = vmatmul.mubr.bf16.gmra.mrb[56].mxu1 %v15545_v12 }
 0x70b   : > { %v5444_v17 = vmax.f32 %v5243_v56, 0.0  ;;  %5931 = vmatprep.mubr.bf16.mxu1 %v15557_v14 }
 0x70c   : > { %v15589_v11 = vpack.c.bf16 %v5443_v4, %v5441_v53 }
 0x70d   : > { %v5246_v22 = vpop.f32.mrb[208].mxu1  ;;  %v5532_v57 = vpack.c.bf16 %v5444_v17, %v5442_v8 }
 0x70e   : > { %v5247_v37 = vadd.f32 %v5246_v22, %v15386_v28  ;;  %v5248_v7 = vpop.f32.mrb[209].mxu1 }
 0x70f   : > { %v5249_v16 = vadd.f32 %v5248_v7, %v15390_v42  ;;  %v5250_v59 = vpop.f32.mrb[210].mxu1 }
 0x710   : > { %v5251_v15 = vadd.f32 %v5250_v59, %v15386_v28  ;;  %v5252_v46 = vpop.f32.mrb[211].mxu1  ;;  %v5445_v12 = vmax.f32 %v5247_v37, 0.0 }
 0x711   : > { %v5253_v54 = vadd.f32 %v5252_v46, %v15390_v42  ;;  %v5446_v14 = vmax.f32 %v5249_v16, 0.0 }
 0x712   : > { %v5447_v61 = vmax.f32 %v5251_v15, 0.0  ;;  %5932 = vmatmul.mubr.bf16.gmra.mrb[60].mxu1 %v15555_v29 }
 0x713   : > { %v5448_v60 = vmax.f32 %v5253_v54, 0.0  ;;  %5941 = vmatprep.mubr.bf16.mxu1 %v5526_v48 }
 0x714   : > { %v15596_v3 = vpack.c.bf16 %v5447_v61, %v5445_v12 }
 0x715   : > { %v5256_v1 = vpop.f32.mrb[212].mxu1  ;;  %v5534_v18 = vpack.c.bf16 %v5448_v60, %v5446_v14 }
 0x716   : > { %v5257_v50 = vadd.f32 %v5256_v1, %v15386_v28  ;;  %v5258_v63 = vpop.f32.mrb[213].mxu1 }
 0x717   : > { %v5259_v19 = vadd.f32 %v5258_v63, %v15390_v42  ;;  %v5260_v24 = vpop.f32.mrb[214].mxu1 }
 0x718   : > { %v5261_v6 = vadd.f32 %v5260_v24, %v15386_v28  ;;  %v5262_v33 = vpop.f32.mrb[215].mxu1  ;;  %v5449_v58 = vmax.f32 %v5257_v50, 0.0 }
 0x719   : > { %v5263_v38 = vadd.f32 %v5262_v33, %v15390_v42  ;;  %v5450_v48 = vmax.f32 %v5259_v19, 0.0 }
 0x71a   : > { %v5451_v29 = vmax.f32 %v5261_v6, 0.0  ;;  %5942 = vmatmul.mubr.bf16.gmra.mrb[64].mxu1 %v15565_v52 }
 0x71b   : > { %v5452_v9 = vmax.f32 %v5263_v38, 0.0  ;;  %5951 = vmatprep.mubr.bf16.mxu1 %v5528_v55 }
 0x71c   : > { %v15603_v35 = vpack.c.bf16 %v5451_v29, %v5449_v58 }
 0x71d   : > { %v5266_v44 = vpop.f32.mrb[216].mxu1  ;;  %v5536_v36 = vpack.c.bf16 %v5452_v9, %v5450_v48 }
 0x71e   : > { %v5267_v40 = vadd.f32 %v5266_v44, %v15386_v28  ;;  %v5268_v20 = vpop.f32.mrb[217].mxu1 }
 0x71f   : > { %v5269_v31 = vadd.f32 %v5268_v20, %v15390_v42  ;;  %v5270_v21 = vpop.f32.mrb[218].mxu1 }
 0x720   : > { %v5271_v23 = vadd.f32 %v5270_v21, %v15386_v28  ;;  %v5272_v41 = vpop.f32.mrb[219].mxu1  ;;  %v5453_v34 = vmax.f32 %v5267_v40, 0.0 }
 0x721   : > { %v5273_v62 = vadd.f32 %v5272_v41, %v15390_v42  ;;  %v5454_v55 = vmax.f32 %v5269_v31, 0.0 }
 0x722   : > { %v5455_v52 = vmax.f32 %v5271_v23, 0.0  ;;  %5952 = vmatmul.mubr.bf16.gmra.mrb[68].mxu1 %v15573_v2 }
 0x723   : > { %v5456_v10 = vmax.f32 %v5273_v62, 0.0  ;;  %5961 = vmatprep.mubr.bf16.mxu1 %v5530_v32 }
 0x724   : > { %v15610_v39 = vpack.c.bf16 %v5455_v52, %v5453_v34 }
 0x725   : > { %v5276_v5 = vpop.f32.mrb[220].mxu1  ;;  %v5538_v49 = vpack.c.bf16 %v5456_v10, %v5454_v55 }
 0x726   : > { %v5277_v30 = vadd.f32 %v5276_v5, %v15386_v28  ;;  %v5278_v26 = vpop.f32.mrb[221].mxu1 }
 0x727   : > { %v5279_v27 = vadd.f32 %v5278_v26, %v15390_v42  ;;  %v5280_v51 = vpop.f32.mrb[222].mxu1 }
 0x728   : > { %v5281_v13 = vadd.f32 %v5280_v51, %v15386_v28  ;;  %v5282_v56 = vpop.f32.mrb[223].mxu1  ;;  %v5457_v4 = vmax.f32 %v5277_v30, 0.0 }
 0x729   : > { %v5283_v53 = vadd.f32 %v5282_v56, %v15390_v42  ;;  %v5458_v32 = vmax.f32 %v5279_v27, 0.0 }
 0x72a   : > { %v5459_v2 = vmax.f32 %v5281_v13, 0.0  ;;  %5962 = vmatmul.mubr.bf16.gmra.mrb[72].mxu1 %v15581_v25 }
 0x72b   : > { %v5460_v8 = vmax.f32 %v5283_v53, 0.0  ;;  %5971 = vmatprep.mubr.bf16.mxu1 %v5532_v57 }
 0x72c   : > { %v15617_v17 = vpack.c.bf16 %v5459_v2, %v5457_v4 }
 0x72d   : > { %v5286_v22 = vpop.f32.mrb[224].mxu1  ;;  %v5540_v37 = vpack.c.bf16 %v5460_v8, %v5458_v32 }
 0x72e   : > { %v5287_v7 = vadd.f32 %v5286_v22, %v15386_v28  ;;  %v5288_v16 = vpop.f32.mrb[225].mxu1 }
 0x72f   : > { %v5289_v59 = vadd.f32 %v5288_v16, %v15390_v42  ;;  %v5290_v15 = vpop.f32.mrb[226].mxu1 }
 0x730   : > { %v5291_v46 = vadd.f32 %v5290_v15, %v15386_v28  ;;  %v5292_v54 = vpop.f32.mrb[227].mxu1  ;;  %v5461_v61 = vmax.f32 %v5287_v7, 0.0 }
 0x731   : > { %v5293_v12 = vadd.f32 %v5292_v54, %v15390_v42  ;;  %v5462_v57 = vmax.f32 %v5289_v59, 0.0 }
 0x732   : > { %v5463_v25 = vmax.f32 %v5291_v46, 0.0  ;;  %5972 = vmatmul.mubr.bf16.gmra.mrb[76].mxu1 %v15589_v11 }
 0x733   : > { %v5464_v14 = vmax.f32 %v5293_v12, 0.0  ;;  %5981 = vmatprep.mubr.bf16.mxu1 %v5534_v18 }
 0x734   : > { %v15624_v60 = vpack.c.bf16 %v5463_v25, %v5461_v61 }
 0x735   : > { %v5296_v1 = vpop.f32.mrb[228].mxu1  ;;  %v5542_v50 = vpack.c.bf16 %v5464_v14, %v5462_v57 }
 0x736   : > { %v5297_v63 = vadd.f32 %v5296_v1, %v15386_v28  ;;  %v5298_v19 = vpop.f32.mrb[229].mxu1 }
 0x737   : > { %v5299_v24 = vadd.f32 %v5298_v19, %v15390_v42  ;;  %v5300_v6 = vpop.f32.mrb[230].mxu1 }
 0x738   : > { %v5301_v33 = vadd.f32 %v5300_v6, %v15386_v28  ;;  %v5302_v38 = vpop.f32.mrb[231].mxu1  ;;  %v5465_v29 = vmax.f32 %v5297_v63, 0.0 }
 0x739   : > { %v5303_v58 = vadd.f32 %v5302_v38, %v15390_v42  ;;  %v5466_v18 = vmax.f32 %v5299_v24, 0.0 }
 0x73a   : > { %v5467_v11 = vmax.f32 %v5301_v33, 0.0  ;;  %5982 = vmatmul.mubr.bf16.gmra.mrb[80].mxu1 %v15596_v3 }
 0x73b   : > { %v5468_v48 = vmax.f32 %v5303_v58, 0.0  ;;  %5991 = vmatprep.mubr.bf16.mxu1 %v5536_v36 }
 0x73c   : > { %v15631_v9 = vpack.c.bf16 %v5467_v11, %v5465_v29 }
 0x73d   : > { %v5306_v44 = vpop.f32.mrb[232].mxu1  ;;  %v5544_v40 = vpack.c.bf16 %v5468_v48, %v5466_v18 }
 0x73e   : > { %v5307_v20 = vadd.f32 %v5306_v44, %v15386_v28  ;;  %v5308_v31 = vpop.f32.mrb[233].mxu1 }
 0x73f   : > { %v5309_v21 = vadd.f32 %v5308_v31, %v15390_v42  ;;  %v5310_v23 = vpop.f32.mrb[234].mxu1 }
 0x740   : > { %v5311_v41 = vadd.f32 %v5310_v23, %v15386_v28  ;;  %v5312_v62 = vpop.f32.mrb[235].mxu1  ;;  %v5469_v52 = vmax.f32 %v5307_v20, 0.0 }
 0x741   : > { %v5313_v34 = vadd.f32 %v5312_v62, %v15390_v42  ;;  %v5470_v36 = vmax.f32 %v5309_v21, 0.0 }
 0x742   : > { %v5471_v3 = vmax.f32 %v5311_v41, 0.0  ;;  %5992 = vmatmul.mubr.bf16.gmra.mrb[84].mxu1 %v15603_v35 }
 0x743   : > { %v5472_v55 = vmax.f32 %v5313_v34, 0.0  ;;  %6001 = vmatprep.mubr.bf16.mxu1 %v5538_v49 }
 0x744   : > { %v15638_v10 = vpack.c.bf16 %v5471_v3, %v5469_v52 }
 0x745   : > { %v5316_v5 = vpop.f32.mrb[236].mxu1  ;;  %v5546_v30 = vpack.c.bf16 %v5472_v55, %v5470_v36 }
 0x746   : > { %v5317_v26 = vadd.f32 %v5316_v5, %v15386_v28  ;;  %v5318_v27 = vpop.f32.mrb[237].mxu1 }
 0x747   : > { %v5319_v51 = vadd.f32 %v5318_v27, %v15390_v42  ;;  %v5320_v13 = vpop.f32.mrb[238].mxu1 }
 0x748   : > { %v5321_v56 = vadd.f32 %v5320_v13, %v15386_v28  ;;  %v5322_v53 = vpop.f32.mrb[239].mxu1  ;;  %v5473_v2 = vmax.f32 %v5317_v26, 0.0 }
 0x749   : > { %v5323_v4 = vadd.f32 %v5322_v53, %v15390_v42  ;;  %v5474_v49 = vmax.f32 %v5319_v51, 0.0  ;;  %v6102_v53 = vld [vmem:[#allocation15] sm:$0x3] }
 0x74a   : > { %v5475_v35 = vmax.f32 %v5321_v56, 0.0  ;;  %6002 = vmatmul.mubr.bf16.gmra.mrb[88].mxu1 %v15610_v39 }
 0x74b   : > { %v5476_v32 = vmax.f32 %v5323_v4, 0.0  ;;  %6011 = vmatprep.mubr.bf16.mxu1 %v5540_v37 }
 0x74c   : > { %v15645_v8 = vpack.c.bf16 %v5475_v35, %v5473_v2 }
 0x74d   : > { %v5326_v22 = vpop.f32.mrb[240].mxu1  ;;  %v5548_v7 = vpack.c.bf16 %v5476_v32, %v5474_v49 }
 0x74e   : > { %v5327_v16 = vadd.f32 %v5326_v22, %v15386_v28  ;;  %v5328_v59 = vpop.f32.mrb[241].mxu1 }
 0x74f   : > { %v5329_v15 = vadd.f32 %v5328_v59, %v15390_v42  ;;  %v5330_v46 = vpop.f32.mrb[242].mxu1 }
 0x750   : > { %v5331_v54 = vadd.f32 %v5330_v46, %v15386_v28  ;;  %v5332_v12 = vpop.f32.mrb[243].mxu1  ;;  %v5477_v25 = vmax.f32 %v5327_v16, 0.0  ;;  %v15683_v16 = vrot.slane %v6102_v53, %v14599_v47 }
 0x751   : > { %v5333_v61 = vadd.f32 %v5332_v12, %v15390_v42  ;;  %v5478_v37 = vmax.f32 %v5329_v15, 0.0 }
 0x752   : > { %v5479_v39 = vmax.f32 %v5331_v54, 0.0  ;;  %6012 = vmatmul.mubr.bf16.gmra.mrb[92].mxu1 %v15617_v17 }
 0x753   : > { %v5480_v57 = vmax.f32 %v5333_v61, 0.0  ;;  %6021 = vmatprep.mubr.bf16.mxu1 %v5542_v50 }
 0x754   : > { %v15652_v14 = vpack.c.bf16 %v5479_v39, %v5477_v25 }
 0x755   : > { %v5336_v1 = vpop.f32.mrb[244].mxu1  ;;  %v15654_v63 = vpack.c.bf16 %v5480_v57, %v5478_v37 }
 0x756   : > { %v5337_v19 = vadd.f32 %v5336_v1, %v15386_v28  ;;  %v5338_v24 = vpop.f32.mrb[245].mxu1 }
 0x757   : > { %v5339_v6 = vadd.f32 %v5338_v24, %v15390_v42  ;;  %v5340_v33 = vpop.f32.mrb[246].mxu1 }
 0x758   : > { %v5341_v38 = vadd.f32 %v5340_v33, %v15386_v28  ;;  %v5342_v58 = vpop.f32.mrb[247].mxu1  ;;  %v5481_v17 = vmax.f32 %v5337_v19, 0.0 }
 0x759   : > { %v5343_v29 = vadd.f32 %v5342_v58, %v15390_v42  ;;  %v5482_v50 = vmax.f32 %v5339_v6, 0.0  ;;  %v12879_v6 = vld [vmem:[#allocation19] ss:$8 sps:$4 sm:$0xff]   ;;  %v12884_v58 = vld [vmem:[#allocation19 + $0x14] ss:$8 sps:$4 sm:$0xff]  }
 0x75a   : > { %v5483_v11 = vmax.f32 %v5341_v38, 0.0  ;;  %6022 = vmatmul.mubr.bf16.gmra.mrb[96].mxu1 %v15624_v60 }
 0x75b   : > { %v5484_v18 = vmax.f32 %v5343_v29, 0.0  ;;  %6031 = vmatprep.mubr.bf16.mxu1 %v5544_v40 }
 0x75c   : > { %v15661_v48 = vpack.c.bf16 %v5483_v11, %v5481_v17 }
 0x75d   : > { %v5346_v44 = vpop.f32.mrb[248].mxu1  ;;  %v15663_v20 = vpack.c.bf16 %v5484_v18, %v5482_v50 }
 0x75e   : > { %v5347_v31 = vadd.f32 %v5346_v44, %v15386_v28  ;;  %v5348_v21 = vpop.f32.mrb[249].mxu1 }
 0x75f   : > { %v5349_v23 = vadd.f32 %v5348_v21, %v15390_v42  ;;  %v5350_v41 = vpop.f32.mrb[250].mxu1 }
 0x760   : > { %v5351_v62 = vadd.f32 %v5350_v41, %v15386_v28  ;;  %v5352_v34 = vpop.f32.mrb[251].mxu1  ;;  %v5485_v60 = vmax.f32 %v5347_v31, 0.0  ;;  %v12887_v31 = vld [vmem:[#allocation19 + $0x24] ss:$8 sps:$4 sm:$0xff]  }
 0x761   : > { %v5353_v52 = vadd.f32 %v5352_v34, %v15390_v42  ;;  %v5486_v40 = vmax.f32 %v5349_v23, 0.0 }
 0x762   : > { %v5487_v3 = vmax.f32 %v5351_v62, 0.0  ;;  %6032 = vmatmul.mubr.bf16.gmra.mrb[100].mxu1 %v15631_v9 }
 0x763   : > { %v5488_v36 = vmax.f32 %v5353_v52, 0.0  ;;  %6041 = vmatprep.mubr.bf16.mxu1 %v5546_v30  ;;  %v15680_v30 = vrot.slane %v6102_v53, %v14593_v45  ;;  %v12885_v52 = vld [vmem:[#allocation19 + $0x20] ss:$8 sps:$4 sm:$0xff]   ;;  %v12893_v53 = vld [vmem:[#allocation19 + $0x44] ss:$8 sps:$4 sm:$0xff]  }
 0x764   : > { %v15670_v55 = vpack.c.bf16 %v5487_v3, %v5485_v60 }
 0x765   : > { %v5356_v5 = vpop.f32.mrb[252].mxu1  ;;  %v15672_v26 = vpack.c.bf16 %v5488_v36, %v5486_v40  ;;  %v12890_v40 = vld [vmem:[#allocation19 + $0x34] ss:$8 sps:$4 sm:$0xff]  }
 0x766   : > { %v5357_v27 = vadd.f32 %v5356_v5, %v15386_v28  ;;  %v5358_v51 = vpop.f32.mrb[253].mxu1 }
 0x767   : > { %v5359_v13 = vadd.f32 %v5358_v51, %v15390_v42  ;;  %v5360_v56 = vpop.f32.mrb[254].mxu1  ;;  %v12888_v51 = vld [vmem:[#allocation19 + $0x30] ss:$8 sps:$4 sm:$0xff]  }
 0x768   : > { %v5361_v4 = vadd.f32 %v5360_v56, %v15386_v28  ;;  %v5362_v2 = vpop.f32.mrb[255].mxu1  ;;  %v5489_v35 = vmax.f32 %v5357_v27, 0.0 }
 0x769   : > { %v5363_v9 = vadd.f32 %v5362_v2, %v15390_v42  ;;  %v5490_v32 = vmax.f32 %v5359_v13, 0.0 }
 0x76a   : > { %v5491_v49 = vmax.f32 %v5361_v4, 0.0  ;;  %6042 = vmatmul.mubr.bf16.gmra.mrb[104].mxu1 %v15638_v10 }
 0x76b   : > { %v5492_v22 = vmax.f32 %v5363_v9, 0.0  ;;  %6051 = vmatprep.mubr.bf16.mxu1 %v5548_v7 }
 0x76c   : > { %v15685_v59 = vpack.c.bf16 %v5491_v49, %v5489_v35 }
 0x76d   : > { %v5783_v15 = vpop.f32.mrb[0].mxu1  ;;  %v15687_v28 = vpack.c.bf16 %v5492_v22, %v5490_v32  ;;  %v12891_v32 = vld [vmem:[#allocation19 + $0x40] ss:$8 sps:$4 sm:$0xff]  }
 0x76e   : > { %v6114_v42 = vadd.f32 %v15680_v30, %v5783_v15  ;;  %v5785_v46 = vpop.f32.mrb[1].mxu1 }
 0x76f   : > { %v6115_v54 = vadd.f32 %v15683_v16, %v5785_v46  ;;  %v5787_v10 = vpop.f32.mrb[2].mxu1 }
 0x770   : > { %v6116_v12 = vadd.f32 %v15680_v30, %v5787_v10  ;;  %v5789_v61 = vpop.f32.mrb[3].mxu1  ;;  %v6242_v7 = vmax.f32 %v6114_v42, 0.0  ;;  %v12896_v42 = vld [vmem:[#allocation19 + $0x54] ss:$8 sps:$4 sm:$0xff]  }
 0x771   : > { %v6117_v25 = vadd.f32 %v15683_v16, %v5789_v61  ;;  %v6243_v37 = vmax.f32 %v6115_v54, 0.0 }
 0x772   : > { %v6244_v39 = vmax.f32 %v6116_v12, 0.0  ;;  %6052 = vmatmul.mubr.bf16.gmra.mrb[108].mxu1 %v15645_v8  ;;  %v12894_v12 = vld [vmem:[#allocation19 + $0x50] ss:$8 sps:$4 sm:$0xff]  }
 0x773   : > { %v6245_v57 = vmax.f32 %v6117_v25, 0.0  ;;  %6061 = vmatprep.mubr.bf16.mxu1 %v15654_v63  ;;  %v12882_v63 = vld [vmem:[#allocation19 + $0x10] ss:$8 sps:$4 sm:$0xff]  }
 0x774   : > { %v6370_v1 = vpack.c.bf16 %v6244_v39, %v6242_v7  ;;  %v12899_v7 = vld [vmem:[#allocation19 + $0x64] ss:$8 sps:$4 sm:$0xff]  }
 0x775   : > { %v5793_v19 = vpop.f32.mrb[4].mxu1  ;;  %v6371_v24 = vpack.c.bf16 %v6245_v57, %v6243_v37 }
 0x776   : > { %v6118_v33 = vadd.f32 %v15680_v30, %v5793_v19  ;;  %v5795_v38 = vpop.f32.mrb[5].mxu1 }
 0x777   : > { %v6119_v29 = vadd.f32 %v15683_v16, %v5795_v38  ;;  %v5797_v17 = vpop.f32.mrb[6].mxu1  ;;  %6670 = vmatprep.mubr.bf16.mxu0 %v6371_v24  ;;  %v12897_v24 = vld [vmem:[#allocation19 + $0x60] ss:$8 sps:$4 sm:$0xff]   ;;  %v12902_v38 = vld [vmem:[#allocation19 + $0x74] ss:$8 sps:$4 sm:$0xff]  }
 0x778   : > { %v6120_v11 = vadd.f32 %v15680_v30, %v5797_v17  ;;  %v5799_v50 = vpop.f32.mrb[7].mxu1  ;;  %6671 = vmatmul.mubr.bf16.vlgmr.msra.gmra.mrb[128].mxu0 %v6370_v1  ;;  %v6246_v18 = vmax.f32 %v6118_v33, 0.0 }
 0x779   : > { %v6121_v8 = vadd.f32 %v15683_v16, %v5799_v50  ;;  %7388 = vmatpush1.bf16.msra.mxu0 %v12879_v6  ;;  %v6247_v21 = vmax.f32 %v6119_v29, 0.0 }
 0x77a   : > { %v6248_v44 = vmax.f32 %v6120_v11, 0.0  ;;  %6062 = vmatmul.mubr.bf16.gmra.mrb[112].mxu1 %v15652_v14  ;;  %7389 = vmatprep.subr.bf16.mxu0 %v12884_v58  ;;  %v12900_v11 = vld [vmem:[#allocation19 + $0x70] ss:$8 sps:$4 sm:$0xff]  }
 0x77b   : > { %v6249_v23 = vmax.f32 %v6121_v8, 0.0  ;;  %6071 = vmatprep.mubr.bf16.mxu1 %v15663_v20 }
 0x77c   : > { %v6372_v41 = vpack.c.bf16 %v6248_v44, %v6246_v18 }
 0x77d   : > { %v5803_v62 = vpop.f32.mrb[8].mxu1  ;;  %v6373_v34 = vpack.c.bf16 %v6249_v23, %v6247_v21  ;;  %7390 = vmatpush1.bf16.msra.mxu0 %v12882_v63  ;;  %v12905_v63 = vld [vmem:[#allocation19 + $0x84] ss:$8 sps:$4 sm:$0xff]  }
 0x77e   : > { %v6122_v60 = vadd.f32 %v15680_v30, %v5803_v62  ;;  %v5805_v3 = vpop.f32.mrb[9].mxu1  ;;  %7391 = vmatprep.subr.bf16.mxu0 %v12887_v31 }
 0x77f   : > { %v6123_v36 = vadd.f32 %v15683_v16, %v5805_v3  ;;  %v5807_v5 = vpop.f32.mrb[10].mxu1  ;;  %6680 = vmatprep.mubr.bf16.mxu0 %v6373_v34 }
 0x780   : > { %v6124_v14 = vadd.f32 %v15680_v30, %v5807_v5  ;;  %v5809_v27 = vpop.f32.mrb[11].mxu1  ;;  %6681 = vmatmul.mubr.bf16.gmra.mrb[132].mxu0 %v6372_v41  ;;  %v6250_v13 = vmax.f32 %v6122_v60, 0.0  ;;  %v12903_v41 = vld [vmem:[#allocation19 + $0x80] ss:$8 sps:$4 sm:$0xff]   ;;  %v12906_v5 = vld [vmem:[#allocation19 + $0x90] ss:$8 sps:$4 sm:$0xff]  }
 0x781   : > { %v6125_v20 = vadd.f32 %v15683_v16, %v5809_v27  ;;  %7392 = vmatpush1.bf16.msra.mxu0 %v12885_v52  ;;  %v6251_v4 = vmax.f32 %v6123_v36, 0.0  ;;  %v12908_v52 = vld [vmem:[#allocation19 + $0x94] ss:$8 sps:$4 sm:$0xff]  }
 0x782   : > { %v6252_v56 = vmax.f32 %v6124_v14, 0.0  ;;  %6072 = vmatmul.mubr.bf16.gmra.mrb[116].mxu1 %v15661_v48  ;;  %7393 = vmatprep.subr.bf16.mxu0 %v12890_v40 }
 0x783   : > { %v6253_v2 = vmax.f32 %v6125_v20, 0.0  ;;  %6081 = vmatprep.mubr.bf16.mxu1 %v15672_v26 }
 0x784   : > { %v6374_v9 = vpack.c.bf16 %v6252_v56, %v6250_v13  ;;  %v12911_v56 = vld [vmem:[#allocation19 + $0xa4] ss:$8 sps:$4 sm:$0xff]  }
 0x785   : > { %v5813_v35 = vpop.f32.mrb[12].mxu1  ;;  %v6375_v49 = vpack.c.bf16 %v6253_v2, %v6251_v4  ;;  %7394 = vmatpush1.bf16.msra.mxu0 %v12888_v51  ;;  %v12909_v2 = vld [vmem:[#allocation19 + $0xa0] ss:$8 sps:$4 sm:$0xff]  }
 0x786   : > { %v6126_v22 = vadd.f32 %v15680_v30, %v5813_v35  ;;  %v5815_v15 = vpop.f32.mrb[13].mxu1  ;;  %7395 = vmatprep.subr.bf16.mxu0 %v12893_v53 }
 0x787   : > { %v6127_v46 = vadd.f32 %v15683_v16, %v5815_v15  ;;  %v5817_v54 = vpop.f32.mrb[14].mxu1  ;;  %6690 = vmatprep.mubr.bf16.mxu0 %v6375_v49 }
 0x788   : > { %v6128_v48 = vadd.f32 %v15680_v30, %v5817_v54  ;;  %v5819_v10 = vpop.f32.mrb[15].mxu1  ;;  %6691 = vmatmul.mubr.bf16.gmra.mrb[136].mxu0 %v6374_v9  ;;  %v6254_v61 = vmax.f32 %v6126_v22, 0.0 }
 0x789   : > { %v6129_v26 = vadd.f32 %v15683_v16, %v5819_v10  ;;  %7396 = vmatpush1.bf16.msra.mxu0 %v12891_v32  ;;  %v6255_v39 = vmax.f32 %v6127_v46, 0.0 }
 0x78a   : > { %v6256_v25 = vmax.f32 %v6128_v48, 0.0  ;;  %6082 = vmatmul.mubr.bf16.gmra.mrb[120].mxu1 %v15670_v55  ;;  %7397 = vmatprep.subr.bf16.mxu0 %v12896_v42 }
 0x78b   : > { %v6257_v37 = vmax.f32 %v6129_v26, 0.0  ;;  %6091 = vmatprep.mubr.bf16.mxu1 %v15687_v28 }
 0x78c   : > { %v6376_v57 = vpack.c.bf16 %v6256_v25, %v6254_v61 }
 0x78d   : > { %v5823_v1 = vpop.f32.mrb[16].mxu1  ;;  %v6377_v19 = vpack.c.bf16 %v6257_v37, %v6255_v39  ;;  %7398 = vmatpush1.bf16.msra.mxu0 %v12894_v12 }
 0x78e   : > { %v6130_v6 = vadd.f32 %v15680_v30, %v5823_v1  ;;  %v5825_v33 = vpop.f32.mrb[17].mxu1  ;;  %7399 = vmatprep.subr.bf16.mxu0 %v12899_v7 }
 0x78f   : > { %v6131_v58 = vadd.f32 %v15683_v16, %v5825_v33  ;;  %v5827_v29 = vpop.f32.mrb[18].mxu1  ;;  %6700 = vmatprep.mubr.bf16.mxu0 %v6377_v19 }
 0x790   : > { %v6132_v55 = vadd.f32 %v15680_v30, %v5827_v29  ;;  %v5829_v17 = vpop.f32.mrb[19].mxu1  ;;  %6701 = vmatmul.mubr.bf16.gmra.mrb[140].mxu0 %v6376_v57  ;;  %v6258_v50 = vmax.f32 %v6130_v6, 0.0  ;;  %v12912_v29 = vld [vmem:[#allocation19 + $0xb0] ss:$8 sps:$4 sm:$0xff]  }
 0x791   : > { %v6133_v28 = vadd.f32 %v15683_v16, %v5829_v17  ;;  %7400 = vmatpush1.bf16.msra.mxu0 %v12897_v24  ;;  %v6259_v18 = vmax.f32 %v6131_v58, 0.0 }
 0x792   : > { %v6260_v8 = vmax.f32 %v6132_v55, 0.0  ;;  %6092 = vmatmul.mubr.bf16.gmra.mrb[124].mxu1 %v15685_v59  ;;  %7401 = vmatprep.subr.bf16.mxu0 %v12902_v38  ;;  %v12914_v55 = vld [vmem:[#allocation19 + $0xb4] ss:$8 sps:$4 sm:$0xff]  }
 0x793   : > { %v6261_v44 = vmax.f32 %v6133_v28, 0.0 }
 0x794   : > { %v6378_v31 = vpack.c.bf16 %v6260_v8, %v6258_v50 }
 0x795   : > { %v5833_v21 = vpop.f32.mrb[20].mxu1  ;;  %v6379_v23 = vpack.c.bf16 %v6261_v44, %v6259_v18  ;;  %7402 = vmatpush1.bf16.msra.mxu0 %v12900_v11 }
 0x796   : > { %v6134_v62 = vadd.f32 %v15680_v30, %v5833_v21  ;;  %v5835_v34 = vpop.f32.mrb[21].mxu1  ;;  %7403 = vmatprep.subr.bf16.mxu0 %v12905_v63 }
 0x797   : > { %v6135_v60 = vadd.f32 %v15683_v16, %v5835_v34  ;;  %v5837_v3 = vpop.f32.mrb[22].mxu1  ;;  %6710 = vmatprep.mubr.bf16.mxu0 %v6379_v23 }
 0x798   : > { %v6136_v59 = vadd.f32 %v15680_v30, %v5837_v3  ;;  %v5839_v40 = vpop.f32.mrb[23].mxu1  ;;  %6711 = vmatmul.mubr.bf16.gmra.mrb[144].mxu0 %v6378_v31  ;;  %v6262_v14 = vmax.f32 %v6134_v62, 0.0 }
 0x799   : > { %v6137_v36 = vadd.f32 %v15683_v16, %v5839_v40  ;;  %7404 = vmatpush1.bf16.msra.mxu0 %v12903_v41  ;;  %v6263_v20 = vmax.f32 %v6135_v60, 0.0 }
 0x79a   : > { %v6264_v27 = vmax.f32 %v6136_v59, 0.0  ;;  %7405 = vmatprep.subr.bf16.mxu0 %v12908_v52 }
 0x79b   : > { %v6265_v51 = vmax.f32 %v6137_v36, 0.0 }
 0x79c   : > { %v6380_v13 = vpack.c.bf16 %v6264_v27, %v6262_v14 }
 0x79d   : > { %v5843_v53 = vpop.f32.mrb[24].mxu1  ;;  %v6381_v4 = vpack.c.bf16 %v6265_v51, %v6263_v20  ;;  %7406 = vmatpush1.bf16.msra.mxu0 %v12906_v5 }
 0x79e   : > { %v6138_v9 = vadd.f32 %v15680_v30, %v5843_v53  ;;  %v5845_v35 = vpop.f32.mrb[25].mxu1  ;;  %7407 = vmatprep.subr.bf16.mxu0 %v12911_v56 }
 0x79f   : > { %v6139_v49 = vadd.f32 %v15683_v16, %v5845_v35  ;;  %v5847_v32 = vpop.f32.mrb[26].mxu1  ;;  %6720 = vmatprep.mubr.bf16.mxu0 %v6381_v4  ;;  %v12915_v4 = vld [vmem:[#allocation19 + $0xc0] ss:$8 sps:$4 sm:$0xff]  }
 0x7a0   : > { %v6140_v22 = vadd.f32 %v15680_v30, %v5847_v32  ;;  %v5849_v15 = vpop.f32.mrb[27].mxu1  ;;  %6721 = vmatmul.mubr.bf16.gmra.mrb[148].mxu0 %v6380_v13  ;;  %v6266_v46 = vmax.f32 %v6138_v9, 0.0 }
 0x7a1   : > { %v6141_v42 = vadd.f32 %v15683_v16, %v5849_v15  ;;  %7408 = vmatpush1.bf16.msra.mxu0 %v12909_v2  ;;  %v6267_v48 = vmax.f32 %v6139_v49, 0.0  ;;  %v12917_v2 = vld [vmem:[#allocation19 + $0xc4] ss:$8 sps:$4 sm:$0xff]  }
 0x7a2   : > { %v6268_v54 = vmax.f32 %v6140_v22, 0.0  ;;  %7409 = vmatprep.subr.bf16.mxu0 %v12914_v55 }
 0x7a3   : > { %v6269_v10 = vmax.f32 %v6141_v42, 0.0 }
 0x7a4   : > { %v6382_v26 = vpack.c.bf16 %v6268_v54, %v6266_v46 }
 0x7a5   : > { %v5853_v12 = vpop.f32.mrb[28].mxu1  ;;  %v6383_v61 = vpack.c.bf16 %v6269_v10, %v6267_v48  ;;  %7410 = vmatpush1.bf16.msra.mxu0 %v12912_v29 }
 0x7a6   : > { %v6142_v25 = vadd.f32 %v15680_v30, %v5853_v12  ;;  %v5855_v7 = vpop.f32.mrb[29].mxu1  ;;  %7411 = vmatprep.subr.bf16.mxu0 %v12917_v2 }
 0x7a7   : > { %v6143_v39 = vadd.f32 %v15683_v16, %v5855_v7  ;;  %v5857_v37 = vpop.f32.mrb[30].mxu1  ;;  %6730 = vmatprep.mubr.bf16.mxu0 %v6383_v61 }
 0x7a8   : > { %v6144_v57 = vadd.f32 %v15680_v30, %v5857_v37  ;;  %v5859_v1 = vpop.f32.mrb[31].mxu1  ;;  %6731 = vmatmul.mubr.bf16.gmra.mrb[152].mxu0 %v6382_v26  ;;  %v6270_v24 = vmax.f32 %v6142_v25, 0.0 }
 0x7a9   : > { %v6145_v19 = vadd.f32 %v15683_v16, %v5859_v1  ;;  %v6271_v33 = vmax.f32 %v6143_v39, 0.0  ;;  %7412 = vmatpush1.bf16.msra.mxu0 %v12915_v4  ;;  %v12923_v4 = vld [vmem:[#allocation22 + $0x4] ss:$12 sps:$4 sm:$0xff]  }
 0x7aa   : > { %v6272_v6 = vmax.f32 %v6144_v57, 0.0  ;;  %8269 = vmatprep.subr.bf16.mxu1 %v12923_v4 }
 0x7ab   : > { %v6273_v38 = vmax.f32 %v6145_v19, 0.0 }
 0x7ac   : > { %v6384_v58 = vpack.c.bf16 %v6272_v6, %v6270_v24 }
 0x7ad   : > { %v5863_v17 = vpop.f32.mrb[32].mxu1  ;;  %v6385_v28 = vpack.c.bf16 %v6273_v38, %v6271_v33 }
 0x7ae   : > { %v6146_v11 = vadd.f32 %v15680_v30, %v5863_v17  ;;  %v5865_v50 = vpop.f32.mrb[33].mxu1  ;;  %v12918_v17 = vld [vmem:[#allocation19 + $0xd0] ss:$8 sps:$4 sm:$0xff]  }
 0x7af   : > { %v6147_v8 = vadd.f32 %v15683_v16, %v5865_v50  ;;  %v5867_v63 = vpop.f32.mrb[34].mxu1  ;;  %6740 = vmatprep.mubr.bf16.mxu0 %v6385_v28  ;;  %v12920_v28 = vld [vmem:[#allocation19 + $0xd4] ss:$8 sps:$4 sm:$0xff]  }
 0x7b0   : > { %v6148_v18 = vadd.f32 %v15680_v30, %v5867_v63  ;;  %v5869_v44 = vpop.f32.mrb[35].mxu1  ;;  %6741 = vmatmul.mubr.bf16.gmra.mrb[156].mxu0 %v6384_v58  ;;  %v6274_v21 = vmax.f32 %v6146_v11, 0.0  ;;  %7413 = vmatprep.subr.bf16.mxu0 %v12920_v28  ;;  %v12927_v28 = vld [vmem:[#allocation22 + $0x18] ss:$12 sps:$4 sm:$0xff]  }
 0x7b1   : > { %v6149_v31 = vadd.f32 %v15683_v16, %v5869_v44  ;;  %v6275_v41 = vmax.f32 %v6147_v8, 0.0  ;;  %7414 = vmatpush1.bf16.msra.mxu0 %v12918_v17 }
 0x7b2   : > { %v6276_v23 = vmax.f32 %v6148_v18, 0.0 }
 0x7b3   : > { %v6277_v62 = vmax.f32 %v6149_v31, 0.0 }
 0x7b4   : > { %v6386_v34 = vpack.c.bf16 %v6276_v23, %v6274_v21 }
 0x7b5   : > { %v5873_v52 = vpop.f32.mrb[36].mxu1  ;;  %v6387_v60 = vpack.c.bf16 %v6277_v62, %v6275_v41 }
 0x7b6   : > { %v6150_v3 = vadd.f32 %v15680_v30, %v5873_v52  ;;  %v5875_v59 = vpop.f32.mrb[37].mxu1 }
 0x7b7   : > { %v6151_v40 = vadd.f32 %v15683_v16, %v5875_v59  ;;  %v5877_v36 = vpop.f32.mrb[38].mxu1  ;;  %6750 = vmatprep.mubr.bf16.mxu0 %v6387_v60 }
 0x7b8   : > { %v6152_v5 = vadd.f32 %v15680_v30, %v5877_v36  ;;  %v5879_v14 = vpop.f32.mrb[39].mxu1  ;;  %6751 = vmatmul.mubr.bf16.gmra.mrb[160].mxu0 %v6386_v34  ;;  %v6278_v20 = vmax.f32 %v6150_v3, 0.0 }
 0x7b9   : > { %v6153_v27 = vadd.f32 %v15683_v16, %v5879_v14  ;;  %v6279_v13 = vmax.f32 %v6151_v40, 0.0 }
 0x7ba   : > { %v6280_v51 = vmax.f32 %v6152_v5, 0.0 }
 0x7bb   : > { %v6281_v56 = vmax.f32 %v6153_v27, 0.0 }
 0x7bc   : > { %v6388_v53 = vpack.c.bf16 %v6280_v51, %v6278_v20 }
 0x7bd   : > { %v5883_v9 = vpop.f32.mrb[40].mxu1  ;;  %v6389_v35 = vpack.c.bf16 %v6281_v56, %v6279_v13 }
 0x7be   : > { %v6154_v49 = vadd.f32 %v15680_v30, %v5883_v9  ;;  %v5885_v32 = vpop.f32.mrb[41].mxu1 }
 0x7bf   : > { %v6155_v22 = vadd.f32 %v15683_v16, %v5885_v32  ;;  %v5887_v15 = vpop.f32.mrb[42].mxu1  ;;  %6760 = vmatprep.mubr.bf16.mxu0 %v6389_v35  ;;  %v12926_v32 = vld [vmem:[#allocation19 + $0xe4] ss:$8 sps:$4 sm:$0xff]  }
 0x7c0   : > { %v6156_v42 = vadd.f32 %v15680_v30, %v5887_v15  ;;  %v5889_v46 = vpop.f32.mrb[43].mxu1  ;;  %6761 = vmatmul.mubr.bf16.gmra.mrb[164].mxu0 %v6388_v53  ;;  %v6282_v48 = vmax.f32 %v6154_v49, 0.0  ;;  %v12921_v53 = vld [vmem:[#allocation22] ss:$12 sps:$4 sm:$0xff]   ;;  %7415 = vmatprep.subr.bf16.mxu0 %v12926_v32  ;;  %v12933_v32 = vld [vmem:[#allocation22 + $0x30] ss:$12 sps:$4 sm:$0xff]  }
 0x7c1   : > { %v6157_v54 = vadd.f32 %v15683_v16, %v5889_v46  ;;  %v6283_v26 = vmax.f32 %v6155_v22, 0.0  ;;  %v12924_v49 = vld [vmem:[#allocation19 + $0xe0] ss:$8 sps:$4 sm:$0xff]   ;;  %8270 = vmatpush1.bf16.msra.mxu1 %v12921_v53 }
 0x7c2   : > { %v6284_v10 = vmax.f32 %v6156_v42, 0.0  ;;  %7416 = vmatpush1.bf16.msra.mxu0 %v12924_v49 }
 0x7c3   : > { %v6285_v12 = vmax.f32 %v6157_v54, 0.0 }
 0x7c4   : > { %v6390_v61 = vpack.c.bf16 %v6284_v10, %v6282_v48 }
 0x7c5   : > { %v5893_v25 = vpop.f32.mrb[44].mxu1  ;;  %v6391_v7 = vpack.c.bf16 %v6285_v12, %v6283_v26 }
 0x7c6   : > { %v6158_v39 = vadd.f32 %v15680_v30, %v5893_v25  ;;  %v5895_v37 = vpop.f32.mrb[45].mxu1 }
 0x7c7   : > { %v6159_v57 = vadd.f32 %v15683_v16, %v5895_v37  ;;  %v5897_v1 = vpop.f32.mrb[46].mxu1  ;;  %6770 = vmatprep.mubr.bf16.mxu0 %v6391_v7 }
 0x7c8   : > { %v6160_v19 = vadd.f32 %v15680_v30, %v5897_v1  ;;  %v5899_v24 = vpop.f32.mrb[47].mxu1  ;;  %6771 = vmatmul.mubr.bf16.gmra.mrb[168].mxu0 %v6390_v61  ;;  %v6286_v33 = vmax.f32 %v6158_v39, 0.0 }
 0x7c9   : > { %v6161_v6 = vadd.f32 %v15683_v16, %v5899_v24  ;;  %v6287_v58 = vmax.f32 %v6159_v57, 0.0 }
 0x7ca   : > { %v6288_v38 = vmax.f32 %v6160_v19, 0.0 }
 0x7cb   : > { %v6289_v29 = vmax.f32 %v6161_v6, 0.0 }
 0x7cc   : > { %v6392_v55 = vpack.c.bf16 %v6288_v38, %v6286_v33 }
 0x7cd   : > { %v5903_v11 = vpop.f32.mrb[48].mxu1  ;;  %v6393_v50 = vpack.c.bf16 %v6289_v29, %v6287_v58 }
 0x7ce   : > { %v6162_v8 = vadd.f32 %v15680_v30, %v5903_v11  ;;  %v5905_v63 = vpop.f32.mrb[49].mxu1  ;;  %v12929_v11 = vld [vmem:[#allocation22 + $0x1c] ss:$12 sps:$4 sm:$0xff]  }
 0x7cf   : > { %v6163_v18 = vadd.f32 %v15683_v16, %v5905_v63  ;;  %v5907_v44 = vpop.f32.mrb[50].mxu1  ;;  %6780 = vmatprep.mubr.bf16.mxu0 %v6393_v50  ;;  %8271 = vmatprep.subr.bf16.mxu1 %v12929_v11 }
 0x7d0   : > { %v6164_v31 = vadd.f32 %v15680_v30, %v5907_v44  ;;  %v5909_v21 = vpop.f32.mrb[51].mxu1  ;;  %6781 = vmatmul.mubr.bf16.gmra.mrb[172].mxu0 %v6392_v55  ;;  %v6290_v41 = vmax.f32 %v6162_v8, 0.0  ;;  %v12932_v44 = vld [vmem:[#allocation19 + $0xf4] ss:$8 sps:$4 sm:$0xff]   ;;  %8272 = vmatpush1.bf16.msra.mxu1 %v12927_v28 }
 0x7d1   : > { %v6165_v23 = vadd.f32 %v15683_v16, %v5909_v21  ;;  %v6291_v34 = vmax.f32 %v6163_v18, 0.0  ;;  %v12930_v18 = vld [vmem:[#allocation19 + $0xf0] ss:$8 sps:$4 sm:$0xff]   ;;  %7417 = vmatprep.subr.bf16.mxu0 %v12932_v44 }
 0x7d2   : > { %v6292_v62 = vmax.f32 %v6164_v31, 0.0  ;;  %7418 = vmatpush1.bf16.msra.mxu0 %v12930_v18  ;;  %v12938_v18 = vld [vmem:[#allocation22 + $0x4c] ss:$12 sps:$4 sm:$0xff]  }
 0x7d3   : > { %v6293_v52 = vmax.f32 %v6165_v23, 0.0  ;;  %8622 = vmatprep.subr.bf16.mxu0 %v18177_v0 }
 0x7d4   : > { %v6394_v60 = vpack.c.bf16 %v6292_v62, %v6290_v41 }
 0x7d5   : > { %v5913_v3 = vpop.f32.mrb[52].mxu1  ;;  %v6395_v59 = vpack.c.bf16 %v6293_v52, %v6291_v34 }
 0x7d6   : > { %v6166_v40 = vadd.f32 %v15680_v30, %v5913_v3  ;;  %v5915_v36 = vpop.f32.mrb[53].mxu1 }
 0x7d7   : > { %v6167_v5 = vadd.f32 %v15683_v16, %v5915_v36  ;;  %v5917_v14 = vpop.f32.mrb[54].mxu1  ;;  %6790 = vmatprep.mubr.bf16.mxu0 %v6395_v59 }
 0x7d8   : > { %v6168_v27 = vadd.f32 %v15680_v30, %v5917_v14  ;;  %v5919_v20 = vpop.f32.mrb[55].mxu1  ;;  %6791 = vmatmul.mubr.bf16.gmra.mrb[176].mxu0 %v6394_v60  ;;  %v6294_v13 = vmax.f32 %v6166_v40, 0.0 }
 0x7d9   : > { %v6169_v51 = vadd.f32 %v15683_v16, %v5919_v20  ;;  %v6295_v2 = vmax.f32 %v6167_v5, 0.0 }
 0x7da   : > { %v6296_v56 = vmax.f32 %v6168_v27, 0.0 }
 0x7db   : > { %v6297_v9 = vmax.f32 %v6169_v51, 0.0 }
 0x7dc   : > { %v6396_v35 = vpack.c.bf16 %v6296_v56, %v6294_v13 }
 0x7dd   : > { %v5923_v22 = vpop.f32.mrb[56].mxu1  ;;  %v6397_v15 = vpack.c.bf16 %v6297_v9, %v6295_v2 }
 0x7de   : > { %v6170_v42 = vadd.f32 %v15680_v30, %v5923_v22  ;;  %v5925_v46 = vpop.f32.mrb[57].mxu1  ;;  %v12935_v22 = vld [vmem:[#allocation22 + $0x34] ss:$12 sps:$4 sm:$0xff]  }
 0x7df   : > { %v6171_v54 = vadd.f32 %v15683_v16, %v5925_v46  ;;  %v5927_v48 = vpop.f32.mrb[58].mxu1  ;;  %6800 = vmatprep.mubr.bf16.mxu0 %v6397_v15  ;;  %8273 = vmatprep.subr.bf16.mxu1 %v12935_v22 }
 0x7e0   : > { %v6172_v10 = vadd.f32 %v15680_v30, %v5927_v48  ;;  %v5929_v26 = vpop.f32.mrb[59].mxu1  ;;  %6801 = vmatmul.mubr.bf16.gmra.mrb[180].mxu0 %v6396_v35  ;;  %v6298_v61 = vmax.f32 %v6170_v42, 0.0  ;;  %8274 = vmatpush1.bf16.msra.mxu1 %v12933_v32 }
 0x7e1   : > { %v6173_v12 = vadd.f32 %v15683_v16, %v5929_v26  ;;  %v6299_v7 = vmax.f32 %v6171_v54, 0.0  ;;  %8275 = vmatprep.subr.bf16.mxu1 %v12938_v18 }
 0x7e2   : > { %v6300_v25 = vmax.f32 %v6172_v10, 0.0 }
 0x7e3   : > { %v6301_v39 = vmax.f32 %v6173_v12, 0.0 }
 0x7e4   : > { %v6398_v37 = vpack.c.bf16 %v6300_v25, %v6298_v61 }
 0x7e5   : > { %v5933_v57 = vpop.f32.mrb[60].mxu1  ;;  %v6399_v1 = vpack.c.bf16 %v6301_v39, %v6299_v7 }
 0x7e6   : > { %v6174_v19 = vadd.f32 %v15680_v30, %v5933_v57  ;;  %v5935_v24 = vpop.f32.mrb[61].mxu1 }
 0x7e7   : > { %v6175_v6 = vadd.f32 %v15683_v16, %v5935_v24  ;;  %v5937_v33 = vpop.f32.mrb[62].mxu1  ;;  %6810 = vmatprep.mubr.bf16.mxu0 %v6399_v1 }
 0x7e8   : > { %v6176_v38 = vadd.f32 %v15680_v30, %v5937_v33  ;;  %v5939_v58 = vpop.f32.mrb[63].mxu1  ;;  %6811 = vmatmul.mubr.bf16.gmra.mrb[184].mxu0 %v6398_v37  ;;  %v6302_v55 = vmax.f32 %v6174_v19, 0.0 }
 0x7e9   : > { %v6177_v29 = vadd.f32 %v15683_v16, %v5939_v58  ;;  %v6303_v50 = vmax.f32 %v6175_v6, 0.0 }
 0x7ea   : > { %v6304_v17 = vmax.f32 %v6176_v38, 0.0 }
 0x7eb   : > { %v6305_v8 = vmax.f32 %v6177_v29, 0.0 }
 0x7ec   : > { %v6400_v63 = vpack.c.bf16 %v6304_v17, %v6302_v55 }
 0x7ed   : > { %v5943_v31 = vpop.f32.mrb[64].mxu1  ;;  %v6401_v21 = vpack.c.bf16 %v6305_v8, %v6303_v50 }
 0x7ee   : > { %v6178_v23 = vadd.f32 %v15680_v30, %v5943_v31  ;;  %v5945_v41 = vpop.f32.mrb[65].mxu1 }
 0x7ef   : > { %v6179_v62 = vadd.f32 %v15683_v16, %v5945_v41  ;;  %v5947_v34 = vpop.f32.mrb[66].mxu1  ;;  %6820 = vmatprep.mubr.bf16.mxu0 %v6401_v21 }
 0x7f0   : > { %v6180_v52 = vadd.f32 %v15680_v30, %v5947_v34  ;;  %v5949_v60 = vpop.f32.mrb[67].mxu1  ;;  %6821 = vmatmul.mubr.bf16.gmra.mrb[188].mxu0 %v6400_v63  ;;  %v6306_v59 = vmax.f32 %v6178_v23, 0.0  ;;  %v12936_v63 = vld [vmem:[#allocation22 + $0x48] ss:$12 sps:$4 sm:$0xff]  }
 0x7f1   : > { %v6181_v3 = vadd.f32 %v15683_v16, %v5949_v60  ;;  %v6307_v36 = vmax.f32 %v6179_v62, 0.0  ;;  %8276 = vmatpush1.bf16.msra.mxu1 %v12936_v63 }
 0x7f2   : > { %v6308_v40 = vmax.f32 %v6180_v52, 0.0 }
 0x7f3   : > { %v6309_v5 = vmax.f32 %v6181_v3, 0.0 }
 0x7f4   : > { %v6402_v14 = vpack.c.bf16 %v6308_v40, %v6306_v59 }
 0x7f5   : > { %v5953_v27 = vpop.f32.mrb[68].mxu1  ;;  %v6403_v20 = vpack.c.bf16 %v6309_v5, %v6307_v36 }
 0x7f6   : > { %v6182_v51 = vadd.f32 %v15680_v30, %v5953_v27  ;;  %v5955_v13 = vpop.f32.mrb[69].mxu1 }
 0x7f7   : > { %v6183_v56 = vadd.f32 %v15683_v16, %v5955_v13  ;;  %v5957_v53 = vpop.f32.mrb[70].mxu1  ;;  %6830 = vmatprep.mubr.bf16.mxu0 %v6403_v20 }
 0x7f8   : > { %v6184_v4 = vadd.f32 %v15680_v30, %v5957_v53  ;;  %v5959_v2 = vpop.f32.mrb[71].mxu1  ;;  %6831 = vmatmul.mubr.bf16.gmra.mrb[192].mxu0 %v6402_v14  ;;  %v6310_v35 = vmax.f32 %v6182_v51, 0.0 }
 0x7f9   : > { %v6185_v9 = vadd.f32 %v15683_v16, %v5959_v2  ;;  %v6311_v15 = vmax.f32 %v6183_v56, 0.0 }
 0x7fa   : > { %v6312_v49 = vmax.f32 %v6184_v4, 0.0 }
 0x7fb   : > { %v6313_v42 = vmax.f32 %v6185_v9, 0.0 }
 0x7fc   : > { %v6404_v46 = vpack.c.bf16 %v6312_v49, %v6310_v35 }
 0x7fd   : > { %v5963_v54 = vpop.f32.mrb[72].mxu1  ;;  %v6405_v48 = vpack.c.bf16 %v6313_v42, %v6311_v15  ;;  %v12939_v15 = vld [vmem:[#allocation22 + $0x60] ss:$12 sps:$4 sm:$0xff]   ;;  %v12941_v42 = vld [vmem:[#allocation22 + $0x64] ss:$12 sps:$4 sm:$0xff]  }
 0x7fe   : > { %v6186_v10 = vadd.f32 %v15680_v30, %v5963_v54  ;;  %v5965_v26 = vpop.f32.mrb[73].mxu1  ;;  %8277 = vmatprep.subr.bf16.mxu1 %v12941_v42 }
 0x7ff   : > { %v6187_v12 = vadd.f32 %v15683_v16, %v5965_v26  ;;  %v5967_v61 = vpop.f32.mrb[74].mxu1  ;;  %6840 = vmatprep.mubr.bf16.mxu0 %v6405_v48  ;;  %8278 = vmatpush1.bf16.msra.mxu1 %v12939_v15 }
 0x800   : > { %v6188_v25 = vadd.f32 %v15680_v30, %v5967_v61  ;;  %v5969_v7 = vpop.f32.mrb[75].mxu1  ;;  %6841 = vmatmul.mubr.bf16.gmra.mrb[196].mxu0 %v6404_v46  ;;  %v6314_v37 = vmax.f32 %v6186_v10, 0.0 }
 0x801   : > { %v6189_v39 = vadd.f32 %v15683_v16, %v5969_v7  ;;  %v6315_v1 = vmax.f32 %v6187_v12, 0.0 }
 0x802   : > { %v6316_v57 = vmax.f32 %v6188_v25, 0.0 }
 0x803   : > { %v6317_v19 = vmax.f32 %v6189_v39, 0.0 }
 0x804   : > { %v6406_v24 = vpack.c.bf16 %v6316_v57, %v6314_v37 }
 0x805   : > { %v5973_v6 = vpop.f32.mrb[76].mxu1  ;;  %v6407_v33 = vpack.c.bf16 %v6317_v19, %v6315_v1 }
 0x806   : > { %v6190_v38 = vadd.f32 %v15680_v30, %v5973_v6  ;;  %v5975_v58 = vpop.f32.mrb[77].mxu1 }
 0x807   : > { %v6191_v29 = vadd.f32 %v15683_v16, %v5975_v58  ;;  %v5977_v55 = vpop.f32.mrb[78].mxu1  ;;  %6850 = vmatprep.mubr.bf16.mxu0 %v6407_v33 }
 0x808   : > { %v6192_v17 = vadd.f32 %v15680_v30, %v5977_v55  ;;  %v5979_v28 = vpop.f32.mrb[79].mxu1  ;;  %6851 = vmatmul.mubr.bf16.gmra.mrb[200].mxu0 %v6406_v24  ;;  %v6318_v50 = vmax.f32 %v6190_v38, 0.0 }
 0x809   : > { %v6193_v11 = vadd.f32 %v15683_v16, %v5979_v28  ;;  %v6319_v44 = vmax.f32 %v6191_v29, 0.0 }
 0x80a   : > { %v6320_v8 = vmax.f32 %v6192_v17, 0.0 }
 0x80b   : > { %v6321_v31 = vmax.f32 %v6193_v11, 0.0 }
 0x80c   : > { %v6408_v21 = vpack.c.bf16 %v6320_v8, %v6318_v50 }
 0x80d   : > { %v5983_v23 = vpop.f32.mrb[80].mxu1  ;;  %v6409_v41 = vpack.c.bf16 %v6321_v31, %v6319_v44  ;;  %v12942_v44 = vld [vmem:[#allocation22 + $0x78] ss:$12 sps:$4 sm:$0xff]   ;;  %v12944_v31 = vld [vmem:[#allocation22 + $0x7c] ss:$12 sps:$4 sm:$0xff]  }
 0x80e   : > { %v6194_v62 = vadd.f32 %v15680_v30, %v5983_v23  ;;  %v5985_v34 = vpop.f32.mrb[81].mxu1  ;;  %8279 = vmatprep.subr.bf16.mxu1 %v12944_v31 }
 0x80f   : > { %v6195_v52 = vadd.f32 %v15683_v16, %v5985_v34  ;;  %v5987_v60 = vpop.f32.mrb[82].mxu1  ;;  %6860 = vmatprep.mubr.bf16.mxu0 %v6409_v41  ;;  %8280 = vmatpush1.bf16.msra.mxu1 %v12942_v44 }
 0x810   : > { %v6196_v3 = vadd.f32 %v15680_v30, %v5987_v60  ;;  %v5989_v59 = vpop.f32.mrb[83].mxu1  ;;  %6861 = vmatmul.mubr.bf16.gmra.mrb[204].mxu0 %v6408_v21  ;;  %v6322_v36 = vmax.f32 %v6194_v62, 0.0 }
 0x811   : > { %v6197_v40 = vadd.f32 %v15683_v16, %v5989_v59  ;;  %v6323_v14 = vmax.f32 %v6195_v52, 0.0 }
 0x812   : > { %v6324_v5 = vmax.f32 %v6196_v3, 0.0 }
 0x813   : > { %v6325_v27 = vmax.f32 %v6197_v40, 0.0 }
 0x814   : > { %v6410_v20 = vpack.c.bf16 %v6324_v5, %v6322_v36 }
 0x815   : > { %v5993_v51 = vpop.f32.mrb[84].mxu1  ;;  %v6411_v13 = vpack.c.bf16 %v6325_v27, %v6323_v14 }
 0x816   : > { %v6198_v56 = vadd.f32 %v15680_v30, %v5993_v51  ;;  %v5995_v53 = vpop.f32.mrb[85].mxu1 }
 0x817   : > { %v6199_v4 = vadd.f32 %v15683_v16, %v5995_v53  ;;  %v5997_v2 = vpop.f32.mrb[86].mxu1  ;;  %6870 = vmatprep.mubr.bf16.mxu0 %v6411_v13 }
 0x818   : > { %v6200_v9 = vadd.f32 %v15680_v30, %v5997_v2  ;;  %v5999_v35 = vpop.f32.mrb[87].mxu1  ;;  %6871 = vmatmul.mubr.bf16.gmra.mrb[208].mxu0 %v6410_v20  ;;  %v6326_v32 = vmax.f32 %v6198_v56, 0.0 }
 0x819   : > { %v6201_v49 = vadd.f32 %v15683_v16, %v5999_v35  ;;  %v6327_v46 = vmax.f32 %v6199_v4, 0.0 }
 0x81a   : > { %v6328_v22 = vmax.f32 %v6200_v9, 0.0 }
 0x81b   : > { %v6329_v54 = vmax.f32 %v6201_v49, 0.0 }
 0x81c   : > { %v6412_v48 = vpack.c.bf16 %v6328_v22, %v6326_v32 }
 0x81d   : > { %v6003_v10 = vpop.f32.mrb[88].mxu1  ;;  %v6413_v26 = vpack.c.bf16 %v6329_v54, %v6327_v46  ;;  %v12945_v46 = vld [vmem:[#allocation22 + $0x90] ss:$12 sps:$4 sm:$0xff]   ;;  %v12947_v54 = vld [vmem:[#allocation22 + $0x94] ss:$12 sps:$4 sm:$0xff]  }
 0x81e   : > { %v6202_v12 = vadd.f32 %v15680_v30, %v6003_v10  ;;  %v6005_v61 = vpop.f32.mrb[89].mxu1  ;;  %8281 = vmatprep.subr.bf16.mxu1 %v12947_v54 }
 0x81f   : > { %v6203_v25 = vadd.f32 %v15683_v16, %v6005_v61  ;;  %v6007_v7 = vpop.f32.mrb[90].mxu1  ;;  %6880 = vmatprep.mubr.bf16.mxu0 %v6413_v26  ;;  %8282 = vmatpush1.bf16.msra.mxu1 %v12945_v46 }
 0x820   : > { %v6204_v39 = vadd.f32 %v15680_v30, %v6007_v7  ;;  %v6009_v37 = vpop.f32.mrb[91].mxu1  ;;  %6881 = vmatmul.mubr.bf16.gmra.mrb[212].mxu0 %v6412_v48  ;;  %v6330_v1 = vmax.f32 %v6202_v12, 0.0 }
 0x821   : > { %v6205_v57 = vadd.f32 %v15683_v16, %v6009_v37  ;;  %v6331_v24 = vmax.f32 %v6203_v25, 0.0 }
 0x822   : > { %v6332_v19 = vmax.f32 %v6204_v39, 0.0 }
 0x823   : > { %v6333_v6 = vmax.f32 %v6205_v57, 0.0 }
 0x824   : > { %v6414_v33 = vpack.c.bf16 %v6332_v19, %v6330_v1 }
 0x825   : > { %v6013_v38 = vpop.f32.mrb[92].mxu1  ;;  %v6415_v58 = vpack.c.bf16 %v6333_v6, %v6331_v24 }
 0x826   : > { %v6206_v29 = vadd.f32 %v15680_v30, %v6013_v38  ;;  %v6015_v55 = vpop.f32.mrb[93].mxu1 }
 0x827   : > { %v6207_v17 = vadd.f32 %v15683_v16, %v6015_v55  ;;  %v6017_v28 = vpop.f32.mrb[94].mxu1  ;;  %6890 = vmatprep.mubr.bf16.mxu0 %v6415_v58 }
 0x828   : > { %v6208_v11 = vadd.f32 %v15680_v30, %v6017_v28  ;;  %v6019_v50 = vpop.f32.mrb[95].mxu1  ;;  %6891 = vmatmul.mubr.bf16.gmra.mrb[216].mxu0 %v6414_v33  ;;  %v6334_v63 = vmax.f32 %v6206_v29, 0.0 }
 0x829   : > { %v6209_v8 = vadd.f32 %v15683_v16, %v6019_v50  ;;  %v6335_v21 = vmax.f32 %v6207_v17, 0.0  ;;  %v6466_v17 = vld [vmem:[#allocation18] sm:$0x3] }
 0x82a   : > { %v6336_v18 = vmax.f32 %v6208_v11, 0.0  ;;  %v15811_v44 = vrot.slane %v6466_v17, %v14593_v45 }
 0x82b   : > { %v6337_v23 = vmax.f32 %v6209_v8, 0.0 }
 0x82c   : > { %v6416_v41 = vpack.c.bf16 %v6336_v18, %v6334_v63 }
 0x82d   : > { %v6023_v62 = vpop.f32.mrb[96].mxu1  ;;  %v6417_v34 = vpack.c.bf16 %v6337_v23, %v6335_v21  ;;  %v15815_v21 = vrot.slane %v6466_v17, %v14599_v47 }
 0x82e   : > { %v6210_v52 = vadd.f32 %v15680_v30, %v6023_v62  ;;  %v6025_v60 = vpop.f32.mrb[97].mxu1  ;;  %v12948_v62 = vld [vmem:[#allocation22 + $0xa8] ss:$12 sps:$4 sm:$0xff]  }
 0x82f   : > { %v6211_v3 = vadd.f32 %v15683_v16, %v6025_v60  ;;  %v6027_v59 = vpop.f32.mrb[98].mxu1  ;;  %6900 = vmatprep.mubr.bf16.mxu0 %v6417_v34  ;;  %v12950_v34 = vld [vmem:[#allocation22 + $0xac] ss:$12 sps:$4 sm:$0xff]  }
 0x830   : > { %v6212_v40 = vadd.f32 %v15680_v30, %v6027_v59  ;;  %v6029_v36 = vpop.f32.mrb[99].mxu1  ;;  %6901 = vmatmul.mubr.bf16.gmra.mrb[220].mxu0 %v6416_v41  ;;  %v6338_v14 = vmax.f32 %v6210_v52, 0.0  ;;  %8283 = vmatprep.subr.bf16.mxu1 %v12950_v34  ;;  %v12951_v34 = vld [vmem:[#allocation22 + $0xc0] ss:$12 sps:$4 sm:$0xff]  }
 0x831   : > { %v6213_v5 = vadd.f32 %v15683_v16, %v6029_v36  ;;  %v6339_v20 = vmax.f32 %v6211_v3, 0.0  ;;  %8284 = vmatpush1.bf16.msra.mxu1 %v12948_v62 }
 0x832   : > { %v6340_v27 = vmax.f32 %v6212_v40, 0.0 }
 0x833   : > { %v6341_v51 = vmax.f32 %v6213_v5, 0.0 }
 0x834   : > { %v6418_v13 = vpack.c.bf16 %v6340_v27, %v6338_v14 }
 0x835   : > { %v6033_v56 = vpop.f32.mrb[100].mxu1  ;;  %v6419_v53 = vpack.c.bf16 %v6341_v51, %v6339_v20 }
 0x836   : > { %v6214_v4 = vadd.f32 %v15680_v30, %v6033_v56  ;;  %v6035_v2 = vpop.f32.mrb[101].mxu1 }
 0x837   : > { %v6215_v9 = vadd.f32 %v15683_v16, %v6035_v2  ;;  %v6037_v35 = vpop.f32.mrb[102].mxu1  ;;  %6910 = vmatprep.mubr.bf16.mxu0 %v6419_v53 }
 0x838   : > { %v6216_v49 = vadd.f32 %v15680_v30, %v6037_v35  ;;  %v6039_v32 = vpop.f32.mrb[103].mxu1  ;;  %6911 = vmatmul.mubr.bf16.gmra.mrb[224].mxu0 %v6418_v13  ;;  %v6342_v15 = vmax.f32 %v6214_v4, 0.0 }
 0x839   : > { %v6217_v22 = vadd.f32 %v15683_v16, %v6039_v32  ;;  %v6343_v48 = vmax.f32 %v6215_v9, 0.0 }
 0x83a   : > { %v6344_v42 = vmax.f32 %v6216_v49, 0.0 }
 0x83b   : > { %v6345_v10 = vmax.f32 %v6217_v22, 0.0 }
 0x83c   : > { %v6420_v26 = vpack.c.bf16 %v6344_v42, %v6342_v15 }
 0x83d   : > { %v6043_v12 = vpop.f32.mrb[104].mxu1  ;;  %v6421_v61 = vpack.c.bf16 %v6345_v10, %v6343_v48 }
 0x83e   : > { %v6218_v25 = vadd.f32 %v15680_v30, %v6043_v12  ;;  %v6045_v7 = vpop.f32.mrb[105].mxu1 }
 0x83f   : > { %v6219_v39 = vadd.f32 %v15683_v16, %v6045_v7  ;;  %v6047_v37 = vpop.f32.mrb[106].mxu1  ;;  %6920 = vmatprep.mubr.bf16.mxu0 %v6421_v61 }
 0x840   : > { %v6220_v57 = vadd.f32 %v15680_v30, %v6047_v37  ;;  %v6049_v1 = vpop.f32.mrb[107].mxu1  ;;  %6921 = vmatmul.mubr.bf16.gmra.mrb[228].mxu0 %v6420_v26  ;;  %v6346_v24 = vmax.f32 %v6218_v25, 0.0 }
 0x841   : > { %v6221_v19 = vadd.f32 %v15683_v16, %v6049_v1  ;;  %v6347_v33 = vmax.f32 %v6219_v39, 0.0 }
 0x842   : > { %v6348_v6 = vmax.f32 %v6220_v57, 0.0 }
 0x843   : > { %v6349_v38 = vmax.f32 %v6221_v19, 0.0 }
 0x844   : > { %v6422_v58 = vpack.c.bf16 %v6348_v6, %v6346_v24 }
 0x845   : > { %v6053_v29 = vpop.f32.mrb[108].mxu1  ;;  %v6423_v55 = vpack.c.bf16 %v6349_v38, %v6347_v33 }
 0x846   : > { %v6222_v28 = vadd.f32 %v15680_v30, %v6053_v29  ;;  %v6055_v11 = vpop.f32.mrb[109].mxu1 }
 0x847   : > { %v6223_v50 = vadd.f32 %v15683_v16, %v6055_v11  ;;  %v6057_v8 = vpop.f32.mrb[110].mxu1  ;;  %6930 = vmatprep.mubr.bf16.mxu0 %v6423_v55 }
 0x848   : > { %v6224_v63 = vadd.f32 %v15680_v30, %v6057_v8  ;;  %v6059_v18 = vpop.f32.mrb[111].mxu1  ;;  %6931 = vmatmul.mubr.bf16.gmra.mrb[232].mxu0 %v6422_v58  ;;  %v6350_v23 = vmax.f32 %v6222_v28, 0.0 }
 0x849   : > { %v6225_v31 = vadd.f32 %v15683_v16, %v6059_v18  ;;  %v6351_v52 = vmax.f32 %v6223_v50, 0.0 }
 0x84a   : > { %v6352_v41 = vmax.f32 %v6224_v63, 0.0 }
 0x84b   : > { %v6353_v60 = vmax.f32 %v6225_v31, 0.0  ;;  %v6672_v3 = vpop.f32.mrb[128].mxu0 }
 0x84c   : > { %v6424_v59 = vpack.c.bf16 %v6352_v41, %v6350_v23  ;;  %v6673_v40 = vadd.f32 %v6672_v3, %v15811_v44  ;;  %v6674_v36 = vpop.f32.mrb[129].mxu0 }
 0x84d   : > { %v6675_v5 = vadd.f32 %v6674_v36, %v15815_v21  ;;  %v6063_v14 = vpop.f32.mrb[112].mxu1  ;;  %v6676_v27 = vpop.f32.mrb[130].mxu0  ;;  %v6425_v20 = vpack.c.bf16 %v6353_v60, %v6351_v52  ;;  %v12953_v52 = vld [vmem:[#allocation22 + $0xc4] ss:$12 sps:$4 sm:$0xff]  }
 0x84e   : > { %v6226_v51 = vadd.f32 %v15680_v30, %v6063_v14  ;;  %v6677_v13 = vadd.f32 %v6676_v27, %v15811_v44  ;;  %v6065_v56 = vpop.f32.mrb[113].mxu1  ;;  %v6678_v53 = vpop.f32.mrb[131].mxu0  ;;  %v6991_v35 = vmax.f32 %v6673_v40, 0.0  ;;  %8285 = vmatprep.subr.bf16.mxu1 %v12953_v52 }
 0x84f   : > { %v6227_v4 = vadd.f32 %v15683_v16, %v6065_v56  ;;  %v6679_v2 = vadd.f32 %v6678_v53, %v15815_v21  ;;  %v6067_v9 = vpop.f32.mrb[114].mxu1  ;;  %6940 = vmatprep.mubr.bf16.mxu0 %v6425_v20  ;;  %v6992_v15 = vmax.f32 %v6675_v5, 0.0  ;;  %8286 = vmatpush1.bf16.msra.mxu1 %v12951_v34 }
 0x850   : > { %v6993_v49 = vmax.f32 %v6677_v13, 0.0  ;;  %v6228_v32 = vadd.f32 %v15680_v30, %v6067_v9  ;;  %v6069_v22 = vpop.f32.mrb[115].mxu1  ;;  %6941 = vmatmul.mubr.bf16.gmra.mrb[236].mxu0 %v6424_v59  ;;  %v6354_v54 = vmax.f32 %v6226_v51, 0.0 }
 0x851   : > { %v6994_v42 = vmax.f32 %v6679_v2, 0.0  ;;  %v6229_v46 = vadd.f32 %v15683_v16, %v6069_v22  ;;  %v6355_v26 = vmax.f32 %v6227_v4, 0.0 }
 0x852   : > { %v15825_v48 = vpack.c.bf16 %v6993_v49, %v6991_v35  ;;  %v6356_v10 = vmax.f32 %v6228_v32, 0.0 }
 0x853   : > { %v6357_v12 = vmax.f32 %v6229_v46, 0.0  ;;  %v6682_v61 = vpop.f32.mrb[132].mxu0  ;;  %v15827_v25 = vpack.c.bf16 %v6994_v42, %v6992_v15 }
 0x854   : > { %v6426_v7 = vpack.c.bf16 %v6356_v10, %v6354_v54  ;;  %v6683_v39 = vadd.f32 %v6682_v61, %v15811_v44  ;;  %v6684_v37 = vpop.f32.mrb[133].mxu0 }
 0x855   : > { %v6685_v57 = vadd.f32 %v6684_v37, %v15815_v21  ;;  %v6073_v1 = vpop.f32.mrb[116].mxu1  ;;  %v6686_v19 = vpop.f32.mrb[134].mxu0  ;;  %v6427_v24 = vpack.c.bf16 %v6357_v12, %v6355_v26 }
 0x856   : > { %v6230_v6 = vadd.f32 %v15680_v30, %v6073_v1  ;;  %v6687_v33 = vadd.f32 %v6686_v19, %v15811_v44  ;;  %v6075_v38 = vpop.f32.mrb[117].mxu1  ;;  %v6688_v58 = vpop.f32.mrb[135].mxu0  ;;  %v6995_v28 = vmax.f32 %v6683_v39, 0.0 }
 0x857   : > { %v6231_v29 = vadd.f32 %v15683_v16, %v6075_v38  ;;  %v6689_v55 = vadd.f32 %v6688_v58, %v15815_v21  ;;  %v6077_v17 = vpop.f32.mrb[118].mxu1  ;;  %6950 = vmatprep.mubr.bf16.mxu0 %v6427_v24  ;;  %v6996_v63 = vmax.f32 %v6685_v57, 0.0 }
 0x858   : > { %v6997_v11 = vmax.f32 %v6687_v33, 0.0  ;;  %v6232_v50 = vadd.f32 %v15680_v30, %v6077_v17  ;;  %v6079_v8 = vpop.f32.mrb[119].mxu1  ;;  %6951 = vmatmul.mubr.bf16.gmra.mrb[240].mxu0 %v6426_v7  ;;  %v6358_v23 = vmax.f32 %v6230_v6, 0.0 }
 0x859   : > { %v6998_v18 = vmax.f32 %v6689_v55, 0.0  ;;  %v6233_v31 = vadd.f32 %v15683_v16, %v6079_v8  ;;  %v6359_v60 = vmax.f32 %v6231_v29, 0.0 }
 0x85a   : > { %v15837_v41 = vpack.c.bf16 %v6997_v11, %v6995_v28  ;;  %v6360_v62 = vmax.f32 %v6232_v50, 0.0 }
 0x85b   : > { %v6361_v3 = vmax.f32 %v6233_v31, 0.0  ;;  %v6692_v59 = vpop.f32.mrb[136].mxu0  ;;  %v15839_v40 = vpack.c.bf16 %v6998_v18, %v6996_v63 }
 0x85c   : > { %v6428_v36 = vpack.c.bf16 %v6360_v62, %v6358_v23  ;;  %v6693_v5 = vadd.f32 %v6692_v59, %v15811_v44  ;;  %v6694_v14 = vpop.f32.mrb[137].mxu0 }
 0x85d   : > { %v6695_v27 = vadd.f32 %v6694_v14, %v15815_v21  ;;  %v6083_v20 = vpop.f32.mrb[120].mxu1  ;;  %v6696_v51 = vpop.f32.mrb[138].mxu0  ;;  %v6429_v13 = vpack.c.bf16 %v6361_v3, %v6359_v60 }
 0x85e   : > { %v6234_v56 = vadd.f32 %v15680_v30, %v6083_v20  ;;  %v6697_v53 = vadd.f32 %v6696_v51, %v15811_v44  ;;  %v6085_v4 = vpop.f32.mrb[121].mxu1  ;;  %v6698_v2 = vpop.f32.mrb[139].mxu0  ;;  %v6999_v32 = vmax.f32 %v6693_v5, 0.0  ;;  %v12956_v5 = vld [vmem:[#allocation22 + $0xdc] ss:$12 sps:$4 sm:$0xff]  }
 0x85f   : > { %v6235_v9 = vadd.f32 %v15683_v16, %v6085_v4  ;;  %v6699_v35 = vadd.f32 %v6698_v2, %v15815_v21  ;;  %v6087_v49 = vpop.f32.mrb[122].mxu1  ;;  %6960 = vmatprep.mubr.bf16.mxu0 %v6429_v13  ;;  %v7000_v46 = vmax.f32 %v6695_v27, 0.0  ;;  %8287 = vmatprep.subr.bf16.mxu1 %v12956_v5 }
 0x860   : > { %v7001_v22 = vmax.f32 %v6697_v53, 0.0  ;;  %v6236_v15 = vadd.f32 %v15680_v30, %v6087_v49  ;;  %v6089_v42 = vpop.f32.mrb[123].mxu1  ;;  %6961 = vmatmul.mubr.bf16.gmra.mrb[244].mxu0 %v6428_v36  ;;  %v6362_v26 = vmax.f32 %v6234_v56, 0.0  ;;  %v12954_v36 = vld [vmem:[#allocation22 + $0xd8] ss:$12 sps:$4 sm:$0xff]  }
 0x861   : > { %v7002_v54 = vmax.f32 %v6699_v35, 0.0  ;;  %v6237_v10 = vadd.f32 %v15683_v16, %v6089_v42  ;;  %v6363_v7 = vmax.f32 %v6235_v9, 0.0  ;;  %8288 = vmatpush1.bf16.msra.mxu1 %v12954_v36 }
 0x862   : > { %v15849_v12 = vpack.c.bf16 %v7001_v22, %v6999_v32  ;;  %v6364_v61 = vmax.f32 %v6236_v15, 0.0 }
 0x863   : > { %v6365_v39 = vmax.f32 %v6237_v10, 0.0  ;;  %v6702_v37 = vpop.f32.mrb[140].mxu0  ;;  %v15851_v57 = vpack.c.bf16 %v7002_v54, %v7000_v46 }
 0x864   : > { %v6430_v1 = vpack.c.bf16 %v6364_v61, %v6362_v26  ;;  %v6703_v19 = vadd.f32 %v6702_v37, %v15811_v44  ;;  %v6704_v24 = vpop.f32.mrb[141].mxu0 }
 0x865   : > { %v6705_v6 = vadd.f32 %v6704_v24, %v15815_v21  ;;  %v6093_v33 = vpop.f32.mrb[124].mxu1  ;;  %v6706_v38 = vpop.f32.mrb[142].mxu0  ;;  %v6431_v58 = vpack.c.bf16 %v6365_v39, %v6363_v7 }
 0x866   : > { %v6238_v29 = vadd.f32 %v15680_v30, %v6093_v33  ;;  %v6707_v55 = vadd.f32 %v6706_v38, %v15811_v44  ;;  %v6095_v17 = vpop.f32.mrb[125].mxu1  ;;  %v6708_v28 = vpop.f32.mrb[143].mxu0  ;;  %v7003_v63 = vmax.f32 %v6703_v19, 0.0  ;;  %v12957_v38 = vld [vmem:[#allocation22 + $0xf0] ss:$12 sps:$4 sm:$0xff]  }
 0x867   : > { %v6239_v11 = vadd.f32 %v15683_v16, %v6095_v17  ;;  %v6709_v50 = vadd.f32 %v6708_v28, %v15815_v21  ;;  %v6097_v8 = vpop.f32.mrb[126].mxu1  ;;  %6970 = vmatprep.mubr.bf16.mxu0 %v6431_v58  ;;  %v7004_v62 = vmax.f32 %v6705_v6, 0.0  ;;  %v12959_v58 = vld [vmem:[#allocation22 + $0xf4] ss:$12 sps:$4 sm:$0xff]  }
 0x868   : > { %v7005_v18 = vmax.f32 %v6707_v55, 0.0  ;;  %v6240_v31 = vadd.f32 %v15680_v30, %v6097_v8  ;;  %v6099_v23 = vpop.f32.mrb[127].mxu1  ;;  %6971 = vmatmul.mubr.bf16.gmra.mrb[248].mxu0 %v6430_v1  ;;  %v6366_v60 = vmax.f32 %v6238_v29, 0.0  ;;  %8289 = vmatprep.subr.bf16.mxu1 %v12959_v58 }
 0x869   : > { %v7006_v34 = vmax.f32 %v6709_v50, 0.0  ;;  %v6241_v52 = vadd.f32 %v15683_v16, %v6099_v23  ;;  %v6367_v14 = vmax.f32 %v6239_v11, 0.0  ;;  %8290 = vmatpush1.bf16.msra.mxu1 %v12957_v38 }
 0x86a   : > { %v15861_v3 = vpack.c.bf16 %v7005_v18, %v7003_v63  ;;  %v6368_v59 = vmax.f32 %v6240_v31, 0.0 }
 0x86b   : > { %v6369_v27 = vmax.f32 %v6241_v52, 0.0  ;;  %v6712_v20 = vpop.f32.mrb[144].mxu0  ;;  %v15863_v51 = vpack.c.bf16 %v7006_v34, %v7004_v62 }
 0x86c   : > { %v6432_v13 = vpack.c.bf16 %v6368_v59, %v6366_v60  ;;  %v6713_v30 = vadd.f32 %v6712_v20, %v15811_v44  ;;  %v6714_v56 = vpop.f32.mrb[145].mxu0 }
 0x86d   : > { %v6715_v53 = vadd.f32 %v6714_v56, %v15815_v21  ;;  %v6716_v4 = vpop.f32.mrb[146].mxu0  ;;  %v6433_v16 = vpack.c.bf16 %v6369_v27, %v6367_v14 }
 0x86e   : > { %v6717_v2 = vadd.f32 %v6716_v4, %v15811_v44  ;;  %v6718_v9 = vpop.f32.mrb[147].mxu0  ;;  %v7007_v49 = vmax.f32 %v6713_v30, 0.0  ;;  %v12962_v4 = vld [vmem:[#allocation22 + $0x10c] ss:$12 sps:$4 sm:$0xff]  }
 0x86f   : > { %v6719_v35 = vadd.f32 %v6718_v9, %v15815_v21  ;;  %6980 = vmatprep.mubr.bf16.mxu0 %v6433_v16  ;;  %v7008_v22 = vmax.f32 %v6715_v53, 0.0  ;;  %v12960_v53 = vld [vmem:[#allocation22 + $0x108] ss:$12 sps:$4 sm:$0xff]   ;;  %8291 = vmatprep.subr.bf16.mxu1 %v12962_v4 }
 0x870   : > { %v7009_v32 = vmax.f32 %v6717_v2, 0.0  ;;  %6981 = vmatmul.mubr.bf16.gmra.mrb[252].mxu0 %v6432_v13  ;;  %8292 = vmatpush1.bf16.msra.mxu1 %v12960_v53 }
 0x871   : > { %v7010_v15 = vmax.f32 %v6719_v35, 0.0  ;;  %7419 = vmatprep.mubr.bf16.mxu0 %v15827_v25 }
 0x872   : > { %v15870_v42 = vpack.c.bf16 %v7009_v32, %v7007_v49 }
 0x873   : > { %v6722_v46 = vpop.f32.mrb[148].mxu0  ;;  %v15872_v54 = vpack.c.bf16 %v7010_v15, %v7008_v22 }
 0x874   : > { %v6723_v10 = vadd.f32 %v6722_v46, %v15811_v44  ;;  %v6724_v26 = vpop.f32.mrb[149].mxu0 }
 0x875   : > { %v6725_v61 = vadd.f32 %v6724_v26, %v15815_v21  ;;  %v6726_v7 = vpop.f32.mrb[150].mxu0 }
 0x876   : > { %v6727_v39 = vadd.f32 %v6726_v7, %v15811_v44  ;;  %v6728_v37 = vpop.f32.mrb[151].mxu0  ;;  %v7011_v19 = vmax.f32 %v6723_v10, 0.0 }
 0x877   : > { %v6729_v1 = vadd.f32 %v6728_v37, %v15815_v21  ;;  %v7012_v25 = vmax.f32 %v6725_v61, 0.0 }
 0x878   : > { %v7013_v24 = vmax.f32 %v6727_v39, 0.0  ;;  %7420 = vmatmul.mubr.bf16.vlgmr.msra.gmra.mrb[0].mxu0 %v15825_v48 }
 0x879   : > { %v7014_v6 = vmax.f32 %v6729_v1, 0.0  ;;  %7429 = vmatprep.mubr.bf16.mxu0 %v15839_v40 }
 0x87a   : > { %v15880_v33 = vpack.c.bf16 %v7013_v24, %v7011_v19 }
 0x87b   : > { %v6732_v29 = vpop.f32.mrb[152].mxu0  ;;  %v15882_v55 = vpack.c.bf16 %v7014_v6, %v7012_v25 }
 0x87c   : > { %v6733_v17 = vadd.f32 %v6732_v29, %v15811_v44  ;;  %v6734_v28 = vpop.f32.mrb[153].mxu0 }
 0x87d   : > { %v6735_v11 = vadd.f32 %v6734_v28, %v15815_v21  ;;  %v6736_v50 = vpop.f32.mrb[154].mxu0  ;;  %v12963_v28 = vld [vmem:[#allocation22 + $0x120] ss:$12 sps:$4 sm:$0xff]  }
 0x87e   : > { %v6737_v48 = vadd.f32 %v6736_v50, %v15811_v44  ;;  %v6738_v8 = vpop.f32.mrb[155].mxu0  ;;  %v7015_v63 = vmax.f32 %v6733_v17, 0.0 }
 0x87f   : > { %v6739_v40 = vadd.f32 %v6738_v8, %v15815_v21  ;;  %v7016_v31 = vmax.f32 %v6735_v11, 0.0  ;;  %v12965_v11 = vld [vmem:[#allocation22 + $0x124] ss:$12 sps:$4 sm:$0xff]  }
 0x880   : > { %v7017_v18 = vmax.f32 %v6737_v48, 0.0  ;;  %7430 = vmatmul.mubr.bf16.gmra.mrb[4].mxu0 %v15837_v41  ;;  %8293 = vmatprep.subr.bf16.mxu1 %v12965_v11 }
 0x881   : > { %v7018_v23 = vmax.f32 %v6739_v40, 0.0  ;;  %7439 = vmatprep.mubr.bf16.mxu0 %v15851_v57  ;;  %8294 = vmatpush1.bf16.msra.mxu1 %v12963_v28  ;;  %v12972_v28 = vld [vmem:[#allocation22 + $0x8] ss:$12 sps:$4 sm:$0xff]  }
 0x882   : > { %v15890_v62 = vpack.c.bf16 %v7017_v18, %v7015_v63  ;;  %8623 = vmatpush1.bf16.msra.mxu0 %v12972_v28 }
 0x883   : > { %v6742_v34 = vpop.f32.mrb[156].mxu0  ;;  %v15892_v52 = vpack.c.bf16 %v7018_v23, %v7016_v31  ;;  %8624 = vmatprep.subr.bf16.mxu0 %v18177_v0 }
 0x884   : > { %v6743_v60 = vadd.f32 %v6742_v34, %v15811_v44  ;;  %v6744_v59 = vpop.f32.mrb[157].mxu0 }
 0x885   : > { %v6745_v36 = vadd.f32 %v6744_v59, %v15815_v21  ;;  %v6746_v5 = vpop.f32.mrb[158].mxu0 }
 0x886   : > { %v6747_v14 = vadd.f32 %v6746_v5, %v15811_v44  ;;  %v6748_v27 = vpop.f32.mrb[159].mxu0  ;;  %v7019_v20 = vmax.f32 %v6743_v60, 0.0 }
 0x887   : > { %v6749_v41 = vadd.f32 %v6748_v27, %v15815_v21  ;;  %v7020_v57 = vmax.f32 %v6745_v36, 0.0 }
 0x888   : > { %v7021_v13 = vmax.f32 %v6747_v14, 0.0  ;;  %7440 = vmatmul.mubr.bf16.gmra.mrb[8].mxu0 %v15849_v12 }
 0x889   : > { %v7022_v30 = vmax.f32 %v6749_v41, 0.0  ;;  %7449 = vmatprep.mubr.bf16.mxu0 %v15863_v51 }
 0x88a   : > { %v15900_v56 = vpack.c.bf16 %v7021_v13, %v7019_v20 }
 0x88b   : > { %v6752_v16 = vpop.f32.mrb[160].mxu0  ;;  %v15902_v2 = vpack.c.bf16 %v7022_v30, %v7020_v57 }
 0x88c   : > { %v6753_v9 = vadd.f32 %v6752_v16, %v15811_v44  ;;  %v6754_v35 = vpop.f32.mrb[161].mxu0 }
 0x88d   : > { %v6755_v49 = vadd.f32 %v6754_v35, %v15815_v21  ;;  %v6756_v32 = vpop.f32.mrb[162].mxu0  ;;  %v12966_v35 = vld [vmem:[#allocation22 + $0x138] ss:$12 sps:$4 sm:$0xff]  }
 0x88e   : > { %v6757_v12 = vadd.f32 %v6756_v32, %v15811_v44  ;;  %v6758_v22 = vpop.f32.mrb[163].mxu0  ;;  %v7023_v15 = vmax.f32 %v6753_v9, 0.0 }
 0x88f   : > { %v6759_v51 = vadd.f32 %v6758_v22, %v15815_v21  ;;  %v7024_v10 = vmax.f32 %v6755_v49, 0.0  ;;  %v12968_v49 = vld [vmem:[#allocation22 + $0x13c] ss:$12 sps:$4 sm:$0xff]  }
 0x890   : > { %v7025_v46 = vmax.f32 %v6757_v12, 0.0  ;;  %7450 = vmatmul.mubr.bf16.gmra.mrb[12].mxu0 %v15861_v3  ;;  %8295 = vmatprep.subr.bf16.mxu1 %v12968_v49 }
 0x891   : > { %v7026_v26 = vmax.f32 %v6759_v51, 0.0  ;;  %7459 = vmatprep.mubr.bf16.mxu0 %v15872_v54  ;;  %8296 = vmatpush1.bf16.msra.mxu1 %v12966_v35 }
 0x892   : > { %v15910_v61 = vpack.c.bf16 %v7025_v46, %v7023_v15 }
 0x893   : > { %v6762_v7 = vpop.f32.mrb[164].mxu0  ;;  %v15912_v39 = vpack.c.bf16 %v7026_v26, %v7024_v10 }
 0x894   : > { %v6763_v37 = vadd.f32 %v6762_v7, %v15811_v44  ;;  %v6764_v1 = vpop.f32.mrb[165].mxu0 }
 0x895   : > { %v6765_v19 = vadd.f32 %v6764_v1, %v15815_v21  ;;  %v6766_v24 = vpop.f32.mrb[166].mxu0 }
 0x896   : > { %v6767_v25 = vadd.f32 %v6766_v24, %v15811_v44  ;;  %v6768_v6 = vpop.f32.mrb[167].mxu0  ;;  %v7027_v38 = vmax.f32 %v6763_v37, 0.0 }
 0x897   : > { %v6769_v3 = vadd.f32 %v6768_v6, %v15815_v21  ;;  %v7028_v54 = vmax.f32 %v6765_v19, 0.0 }
 0x898   : > { %v7029_v58 = vmax.f32 %v6767_v25, 0.0  ;;  %7460 = vmatmul.mubr.bf16.gmra.mrb[16].mxu0 %v15870_v42 }
 0x899   : > { %v7030_v29 = vmax.f32 %v6769_v3, 0.0  ;;  %7469 = vmatprep.mubr.bf16.mxu0 %v15882_v55 }
 0x89a   : > { %v15920_v17 = vpack.c.bf16 %v7029_v58, %v7027_v38 }
 0x89b   : > { %v6772_v50 = vpop.f32.mrb[168].mxu0  ;;  %v15922_v48 = vpack.c.bf16 %v7030_v29, %v7028_v54 }
 0x89c   : > { %v6773_v8 = vadd.f32 %v6772_v50, %v15811_v44  ;;  %v6774_v40 = vpop.f32.mrb[169].mxu0 }
 0x89d   : > { %v6775_v63 = vadd.f32 %v6774_v40, %v15815_v21  ;;  %v6776_v18 = vpop.f32.mrb[170].mxu0 }
 0x89e   : > { %v6777_v42 = vadd.f32 %v6776_v18, %v15811_v44  ;;  %v6778_v31 = vpop.f32.mrb[171].mxu0  ;;  %v7031_v23 = vmax.f32 %v6773_v8, 0.0  ;;  %v12971_v18 = vld [vmem:[#allocation22 + $0x154] ss:$12 sps:$4 sm:$0xff]  }
 0x89f   : > { %v6779_v55 = vadd.f32 %v6778_v31, %v15815_v21  ;;  %v7032_v60 = vmax.f32 %v6775_v63, 0.0  ;;  %v12969_v63 = vld [vmem:[#allocation22 + $0x150] ss:$12 sps:$4 sm:$0xff]   ;;  %8297 = vmatprep.subr.bf16.mxu1 %v12971_v18 }
 0x8a0   : > { %v7033_v34 = vmax.f32 %v6777_v42, 0.0  ;;  %7470 = vmatmul.mubr.bf16.gmra.mrb[20].mxu0 %v15880_v33  ;;  %8298 = vmatpush1.bf16.msra.mxu1 %v12969_v63  ;;  %v12982_v63 = vld [vmem:[#allocation22 + $0xb0] ss:$12 sps:$4 sm:$0xff]  }
 0x8a1   : > { %v7034_v59 = vmax.f32 %v6779_v55, 0.0  ;;  %7479 = vmatprep.mubr.bf16.mxu0 %v15892_v52  ;;  %v12973_v55 = vld [vmem:[#allocation22 + $0x20] ss:$12 sps:$4 sm:$0xff]  }
 0x8a2   : > { %v15930_v36 = vpack.c.bf16 %v7033_v34, %v7031_v23  ;;  %8625 = vmatpush1.bf16.msra.mxu0 %v12973_v55 }
 0x8a3   : > { %v6782_v5 = vpop.f32.mrb[172].mxu0  ;;  %v15932_v14 = vpack.c.bf16 %v7034_v59, %v7032_v60  ;;  %8626 = vmatprep.subr.bf16.mxu0 %v18177_v0 }
 0x8a4   : > { %v6783_v27 = vadd.f32 %v6782_v5, %v15811_v44  ;;  %v6784_v41 = vpop.f32.mrb[173].mxu0 }
 0x8a5   : > { %v6785_v20 = vadd.f32 %v6784_v41, %v15815_v21  ;;  %v6786_v13 = vpop.f32.mrb[174].mxu0 }
 0x8a6   : > { %v6787_v57 = vadd.f32 %v6786_v13, %v15811_v44  ;;  %v6788_v30 = vpop.f32.mrb[175].mxu0  ;;  %v7035_v53 = vmax.f32 %v6783_v27, 0.0  ;;  %v12974_v27 = vld [vmem:[#allocation22 + $0x38] ss:$12 sps:$4 sm:$0xff]  }
 0x8a7   : > { %v6789_v33 = vadd.f32 %v6788_v30, %v15815_v21  ;;  %v7036_v52 = vmax.f32 %v6785_v20, 0.0  ;;  %8627 = vmatpush1.bf16.msra.mxu0 %v12974_v27 }
 0x8a8   : > { %v7037_v4 = vmax.f32 %v6787_v57, 0.0  ;;  %7480 = vmatmul.mubr.bf16.gmra.mrb[24].mxu0 %v15890_v62  ;;  %8628 = vmatprep.subr.bf16.mxu0 %v18177_v0 }
 0x8a9   : > { %v7038_v16 = vmax.f32 %v6789_v33, 0.0  ;;  %7489 = vmatprep.mubr.bf16.mxu0 %v15902_v2 }
 0x8aa   : > { %v15940_v9 = vpack.c.bf16 %v7037_v4, %v7035_v53  ;;  %v12975_v4 = vld [vmem:[#allocation22 + $0x50] ss:$12 sps:$4 sm:$0xff]  }
 0x8ab   : > { %v6792_v32 = vpop.f32.mrb[176].mxu0  ;;  %v15942_v12 = vpack.c.bf16 %v7038_v16, %v7036_v52  ;;  %8629 = vmatpush1.bf16.msra.mxu0 %v12975_v4 }
 0x8ac   : > { %v6793_v22 = vadd.f32 %v6792_v32, %v15811_v44  ;;  %v6794_v51 = vpop.f32.mrb[177].mxu0  ;;  %8630 = vmatprep.subr.bf16.mxu0 %v18177_v0 }
 0x8ad   : > { %v6795_v15 = vadd.f32 %v6794_v51, %v15815_v21  ;;  %v6796_v46 = vpop.f32.mrb[178].mxu0 }
 0x8ae   : > { %v6797_v62 = vadd.f32 %v6796_v46, %v15811_v44  ;;  %v6798_v10 = vpop.f32.mrb[179].mxu0  ;;  %v7039_v26 = vmax.f32 %v6793_v22, 0.0  ;;  %v12979_v22 = vld [vmem:[#allocation22 + $0x68] ss:$12 sps:$4 sm:$0xff]  }
 0x8af   : > { %v6799_v2 = vadd.f32 %v6798_v10, %v15815_v21  ;;  %v7040_v37 = vmax.f32 %v6795_v15, 0.0  ;;  %8631 = vmatpush1.bf16.msra.mxu0 %v12979_v22 }
 0x8b0   : > { %v7041_v7 = vmax.f32 %v6797_v62, 0.0  ;;  %7490 = vmatmul.mubr.bf16.gmra.mrb[28].mxu0 %v15900_v56  ;;  %8632 = vmatprep.subr.bf16.mxu0 %v18177_v0 }
 0x8b1   : > { %v7042_v1 = vmax.f32 %v6799_v2, 0.0  ;;  %7499 = vmatprep.mubr.bf16.mxu0 %v15912_v39  ;;  %v12976_v2 = vld [vmem:[#allocation22 + $0x168] ss:$12 sps:$4 sm:$0xff]  }
 0x8b2   : > { %v15950_v19 = vpack.c.bf16 %v7041_v7, %v7039_v26  ;;  %v12978_v26 = vld [vmem:[#allocation22 + $0x16c] ss:$12 sps:$4 sm:$0xff]  }
 0x8b3   : > { %v6802_v24 = vpop.f32.mrb[180].mxu0  ;;  %v15952_v25 = vpack.c.bf16 %v7042_v1, %v7040_v37  ;;  %v12980_v1 = vld [vmem:[#allocation22 + $0x80] ss:$12 sps:$4 sm:$0xff]   ;;  %8299 = vmatprep.subr.bf16.mxu1 %v12978_v26 }
 0x8b4   : > { %v6803_v6 = vadd.f32 %v6802_v24, %v15811_v44  ;;  %v6804_v3 = vpop.f32.mrb[181].mxu0  ;;  %8300 = vmatpush1.bf16.msra.mxu1 %v12976_v2  ;;  %8633 = vmatpush1.bf16.msra.mxu0 %v12980_v1 }
 0x8b5   : > { %v6805_v38 = vadd.f32 %v6804_v3, %v15815_v21  ;;  %v6806_v58 = vpop.f32.mrb[182].mxu0  ;;  %8634 = vmatprep.subr.bf16.mxu0 %v18177_v0 }
 0x8b6   : > { %v6807_v54 = vadd.f32 %v6806_v58, %v15811_v44  ;;  %v6808_v29 = vpop.f32.mrb[183].mxu0  ;;  %v7043_v11 = vmax.f32 %v6803_v6, 0.0 }
 0x8b7   : > { %v6809_v56 = vadd.f32 %v6808_v29, %v15815_v21  ;;  %v7044_v39 = vmax.f32 %v6805_v38, 0.0 }
 0x8b8   : > { %v7045_v50 = vmax.f32 %v6807_v54, 0.0  ;;  %7500 = vmatmul.mubr.bf16.gmra.mrb[32].mxu0 %v15910_v61  ;;  %v12981_v54 = vld [vmem:[#allocation22 + $0x98] ss:$12 sps:$4 sm:$0xff]  }
 0x8b9   : > { %v7046_v8 = vmax.f32 %v6809_v56, 0.0  ;;  %7509 = vmatprep.mubr.bf16.mxu0 %v15922_v48  ;;  %8635 = vmatpush1.bf16.msra.mxu0 %v12981_v54 }
 0x8ba   : > { %v15960_v40 = vpack.c.bf16 %v7045_v50, %v7043_v11  ;;  %8636 = vmatprep.subr.bf16.mxu0 %v18177_v0 }
 0x8bb   : > { %v6812_v42 = vpop.f32.mrb[184].mxu0  ;;  %v15963_v31 = vpack.c.bf16 %v7046_v8, %v7044_v39 }
 0x8bc   : > { %v6813_v23 = vadd.f32 %v6812_v42, %v15811_v44  ;;  %v6814_v34 = vpop.f32.mrb[185].mxu0 }
 0x8bd   : > { %v6815_v61 = vadd.f32 %v6814_v34, %v15815_v21  ;;  %v6816_v60 = vpop.f32.mrb[186].mxu0  ;;  %8637 = vmatpush1.bf16.msra.mxu0 %v12982_v63 }
 0x8be   : > { %v6817_v48 = vadd.f32 %v6816_v60, %v15811_v44  ;;  %v6818_v59 = vpop.f32.mrb[187].mxu0  ;;  %v7047_v41 = vmax.f32 %v6813_v23, 0.0  ;;  %8638 = vmatprep.subr.bf16.mxu0 %v18177_v0 }
 0x8bf   : > { %v6819_v5 = vadd.f32 %v6818_v59, %v15815_v21  ;;  %v7048_v13 = vmax.f32 %v6815_v61, 0.0  ;;  %v12984_v61 = vld [vmem:[#allocation22 + $0xc8] ss:$12 sps:$4 sm:$0xff]  }
 0x8c0   : > { %v7049_v20 = vmax.f32 %v6817_v48, 0.0  ;;  %7510 = vmatmul.mubr.bf16.gmra.mrb[36].mxu0 %v15920_v17 }
 0x8c1   : > { %v7050_v57 = vmax.f32 %v6819_v5, 0.0  ;;  %7519 = vmatprep.mubr.bf16.mxu0 %v15932_v14  ;;  %8639 = vmatpush1.bf16.msra.mxu0 %v12984_v61 }
 0x8c2   : > { %v15972_v30 = vpack.c.bf16 %v7049_v20, %v7047_v41  ;;  %v16010_v41 = vld [vmem:[#allocation24] sm:$0xff]   ;;  %8640 = vmatprep.subr.bf16.mxu0 %v18177_v0 }
 0x8c3   : > { %v6822_v33 = vpop.f32.mrb[188].mxu0  ;;  %v15975_v53 = vpack.c.bf16 %v7050_v57, %v7048_v13  ;;  %v12985_v57 = vld [vmem:[#allocation22 + $0xe0] ss:$12 sps:$4 sm:$0xff]   ;;  %12038 = vmatprep.subr.bf16.mxu1 %v16010_v41 }
 0x8c4   : > { %v6823_v52 = vadd.f32 %v6822_v33, %v15811_v44  ;;  %v6824_v16 = vpop.f32.mrb[189].mxu0 }
 0x8c5   : > { %v6825_v35 = vadd.f32 %v6824_v16, %v15815_v21  ;;  %v6826_v49 = vpop.f32.mrb[190].mxu0  ;;  %8641 = vmatpush1.bf16.msra.mxu0 %v12985_v57 }
 0x8c6   : > { %v6827_v17 = vadd.f32 %v6826_v49, %v15811_v44  ;;  %v6828_v32 = vpop.f32.mrb[191].mxu0  ;;  %v7051_v51 = vmax.f32 %v6823_v52, 0.0  ;;  %8642 = vmatprep.subr.bf16.mxu0 %v18177_v0  ;;  %v12986_v49 = vld [vmem:[#allocation22 + $0xf8] ss:$12 sps:$4 sm:$0xff]  }
 0x8c7   : > { %v6829_v14 = vadd.f32 %v6828_v32, %v15815_v21  ;;  %v7052_v46 = vmax.f32 %v6825_v35, 0.0 }
 0x8c8   : > { %v7053_v15 = vmax.f32 %v6827_v17, 0.0  ;;  %7520 = vmatmul.mubr.bf16.gmra.mrb[40].mxu0 %v15930_v36 }
 0x8c9   : > { %v7054_v62 = vmax.f32 %v6829_v14, 0.0  ;;  %7529 = vmatprep.mubr.bf16.mxu0 %v15942_v12  ;;  %8643 = vmatpush1.bf16.msra.mxu0 %v12986_v49 }
 0x8ca   : > { %v15984_v10 = vpack.c.bf16 %v7053_v15, %v7051_v51  ;;  %8644 = vmatprep.subr.bf16.mxu0 %v18177_v0 }
 0x8cb   : > { %v6832_v7 = vpop.f32.mrb[192].mxu0  ;;  %v15987_v37 = vpack.c.bf16 %v7054_v62, %v7052_v46  ;;  %v12987_v62 = vld [vmem:[#allocation22 + $0x110] ss:$12 sps:$4 sm:$0xff]  }
 0x8cc   : > { %v6833_v24 = vadd.f32 %v6832_v7, %v15811_v44  ;;  %v6834_v6 = vpop.f32.mrb[193].mxu0 }
 0x8cd   : > { %v6835_v36 = vadd.f32 %v6834_v6, %v15815_v21  ;;  %v6836_v3 = vpop.f32.mrb[194].mxu0  ;;  %8645 = vmatpush1.bf16.msra.mxu0 %v12987_v62  ;;  %v12988_v6 = vld [vmem:[#allocation22 + $0x128] ss:$12 sps:$4 sm:$0xff]  }
 0x8ce   : > { %v6837_v12 = vadd.f32 %v6836_v3, %v15811_v44  ;;  %v6838_v38 = vpop.f32.mrb[195].mxu0  ;;  %v7055_v29 = vmax.f32 %v6833_v24, 0.0  ;;  %8646 = vmatprep.subr.bf16.mxu0 %v18177_v0 }
 0x8cf   : > { %v6839_v58 = vadd.f32 %v6838_v38, %v15815_v21  ;;  %v7056_v28 = vmax.f32 %v6835_v36, 0.0 }
 0x8d0   : > { %v7057_v56 = vmax.f32 %v6837_v12, 0.0  ;;  %7530 = vmatmul.mubr.bf16.gmra.mrb[44].mxu0 %v15940_v9 }
 0x8d1   : > { %v7058_v11 = vmax.f32 %v6839_v58, 0.0  ;;  %7539 = vmatprep.mubr.bf16.mxu0 %v15952_v25  ;;  %8647 = vmatpush1.bf16.msra.mxu0 %v12988_v6 }
 0x8d2   : > { %v15996_v50 = vpack.c.bf16 %v7057_v56, %v7055_v29  ;;  %8648 = vmatprep.subr.bf16.mxu0 %v18177_v0  ;;  %v12989_v56 = vld [vmem:[#allocation22 + $0x140] ss:$12 sps:$4 sm:$0xff]  }
 0x8d3   : > { %v6842_v39 = vpop.f32.mrb[196].mxu0  ;;  %v15999_v8 = vpack.c.bf16 %v7058_v11, %v7056_v28 }
 0x8d4   : > { %v6843_v18 = vadd.f32 %v6842_v39, %v15811_v44  ;;  %v6844_v42 = vpop.f32.mrb[197].mxu0 }
 0x8d5   : > { %v6845_v55 = vadd.f32 %v6844_v42, %v15815_v21  ;;  %v6846_v23 = vpop.f32.mrb[198].mxu0  ;;  %8649 = vmatpush1.bf16.msra.mxu0 %v12989_v56  ;;  %v12990_v42 = vld [vmem:[#allocation22 + $0x158] ss:$12 sps:$4 sm:$0xff]  }
 0x8d6   : > { %v6847_v9 = vadd.f32 %v6846_v23, %v15811_v44  ;;  %v6848_v34 = vpop.f32.mrb[199].mxu0  ;;  %v7059_v60 = vmax.f32 %v6843_v18, 0.0  ;;  %8650 = vmatprep.subr.bf16.mxu0 %v18177_v0 }
 0x8d7   : > { %v6849_v25 = vadd.f32 %v6848_v34, %v15815_v21  ;;  %v7060_v59 = vmax.f32 %v6845_v55, 0.0 }
 0x8d8   : > { %v7061_v48 = vmax.f32 %v6847_v9, 0.0  ;;  %7540 = vmatmul.mubr.bf16.gmra.mrb[48].mxu0 %v15950_v19 }
 0x8d9   : > { %v7062_v5 = vmax.f32 %v6849_v25, 0.0  ;;  %7549 = vmatprep.mubr.bf16.mxu0 %v15963_v31  ;;  %8651 = vmatpush1.bf16.msra.mxu0 %v12990_v42 }
 0x8da   : > { %v16008_v27 = vpack.c.bf16 %v7061_v48, %v7059_v60  ;;  %8652 = vmatprep.subr.bf16.mxu0 %v18177_v0  ;;  %v12991_v48 = vld [vmem:[#allocation22 + $0x170] ss:$12 sps:$4 sm:$0xff]  }
 0x8db   : > { %v6852_v20 = vpop.f32.mrb[200].mxu0  ;;  %v16013_v13 = vpack.c.bf16 %v7062_v5, %v7060_v59 }
 0x8dc   : > { %v6853_v33 = vadd.f32 %v6852_v20, %v15811_v44  ;;  %v6854_v4 = vpop.f32.mrb[201].mxu0 }
 0x8dd   : > { %v6855_v19 = vadd.f32 %v6854_v4, %v15815_v21  ;;  %v6856_v52 = vpop.f32.mrb[202].mxu0  ;;  %8653 = vmatpush1.bf16.msra.mxu0 %v12991_v48 }
 0x8de   : > { %v6857_v31 = vadd.f32 %v6856_v52, %v15811_v44  ;;  %v6858_v16 = vpop.f32.mrb[203].mxu0  ;;  %v7063_v17 = vmax.f32 %v6853_v33, 0.0 }
 0x8df   : > { %v6859_v35 = vadd.f32 %v6858_v16, %v15815_v21  ;;  %v7064_v14 = vmax.f32 %v6855_v19, 0.0 }
 0x8e0   : > { %v7065_v32 = vmax.f32 %v6857_v31, 0.0  ;;  %7550 = vmatmul.mubr.bf16.gmra.mrb[52].mxu0 %v15960_v40 }
 0x8e1   : > { %v7066_v22 = vmax.f32 %v6859_v35, 0.0  ;;  %7559 = vmatprep.mubr.bf16.mxu0 %v15975_v53 }
 0x8e2   : > { %v16023_v51 = vpack.c.bf16 %v7065_v32, %v7063_v17 }
 0x8e3   : > { %v6862_v15 = vpop.f32.mrb[204].mxu0  ;;  %v16026_v46 = vpack.c.bf16 %v7066_v22, %v7064_v14 }
 0x8e4   : > { %v6863_v2 = vadd.f32 %v6862_v15, %v15811_v44  ;;  %v6864_v26 = vpop.f32.mrb[205].mxu0 }
 0x8e5   : > { %v6865_v7 = vadd.f32 %v6864_v26, %v15815_v21  ;;  %v6866_v1 = vpop.f32.mrb[206].mxu0 }
 0x8e6   : > { %v6867_v40 = vadd.f32 %v6866_v1, %v15811_v44  ;;  %v6868_v24 = vpop.f32.mrb[207].mxu0  ;;  %v7067_v36 = vmax.f32 %v6863_v2, 0.0 }
 0x8e7   : > { %v6869_v53 = vadd.f32 %v6868_v24, %v15815_v21  ;;  %v7068_v12 = vmax.f32 %v6865_v7, 0.0 }
 0x8e8   : > { %v7069_v3 = vmax.f32 %v6867_v40, 0.0  ;;  %7560 = vmatmul.mubr.bf16.gmra.mrb[56].mxu0 %v15972_v30 }
 0x8e9   : > { %v7070_v38 = vmax.f32 %v6869_v53, 0.0  ;;  %7569 = vmatprep.mubr.bf16.mxu0 %v15987_v37 }
 0x8ea   : > { %v16035_v58 = vpack.c.bf16 %v7069_v3, %v7067_v36 }
 0x8eb   : > { %v6872_v54 = vpop.f32.mrb[208].mxu0  ;;  %v16038_v29 = vpack.c.bf16 %v7070_v38, %v7068_v12 }
 0x8ec   : > { %v6873_v28 = vadd.f32 %v6872_v54, %v15811_v44  ;;  %v6874_v11 = vpop.f32.mrb[209].mxu0 }
 0x8ed   : > { %v6875_v39 = vadd.f32 %v6874_v11, %v15815_v21  ;;  %v6876_v63 = vpop.f32.mrb[210].mxu0 }
 0x8ee   : > { %v6877_v30 = vadd.f32 %v6876_v63, %v15811_v44  ;;  %v6878_v18 = vpop.f32.mrb[211].mxu0  ;;  %v7071_v55 = vmax.f32 %v6873_v28, 0.0 }
 0x8ef   : > { %v6879_v37 = vadd.f32 %v6878_v18, %v15815_v21  ;;  %v7072_v9 = vmax.f32 %v6875_v39, 0.0 }
 0x8f0   : > { %v7073_v23 = vmax.f32 %v6877_v30, 0.0  ;;  %7570 = vmatmul.mubr.bf16.gmra.mrb[60].mxu0 %v15984_v10 }
 0x8f1   : > { %v7074_v34 = vmax.f32 %v6879_v37, 0.0  ;;  %7579 = vmatprep.mubr.bf16.mxu0 %v15999_v8 }
 0x8f2   : > { %v16047_v25 = vpack.c.bf16 %v7073_v23, %v7071_v55 }
 0x8f3   : > { %v6882_v61 = vpop.f32.mrb[212].mxu0  ;;  %v7160_v60 = vpack.c.bf16 %v7074_v34, %v7072_v9 }
 0x8f4   : > { %v6883_v59 = vadd.f32 %v6882_v61, %v15811_v44  ;;  %v6884_v5 = vpop.f32.mrb[213].mxu0 }
 0x8f5   : > { %v6885_v20 = vadd.f32 %v6884_v5, %v15815_v21  ;;  %v6886_v57 = vpop.f32.mrb[214].mxu0 }
 0x8f6   : > { %v6887_v10 = vadd.f32 %v6886_v57, %v15811_v44  ;;  %v6888_v33 = vpop.f32.mrb[215].mxu0  ;;  %v7075_v4 = vmax.f32 %v6883_v59, 0.0 }
 0x8f7   : > { %v6889_v8 = vadd.f32 %v6888_v33, %v15815_v21  ;;  %v7076_v52 = vmax.f32 %v6885_v20, 0.0 }
 0x8f8   : > { %v7077_v19 = vmax.f32 %v6887_v10, 0.0  ;;  %7580 = vmatmul.mubr.bf16.gmra.mrb[64].mxu0 %v15996_v50 }
 0x8f9   : > { %v7078_v31 = vmax.f32 %v6889_v8, 0.0  ;;  %7589 = vmatprep.mubr.bf16.mxu0 %v16013_v13 }
 0x8fa   : > { %v16056_v16 = vpack.c.bf16 %v7077_v19, %v7075_v4 }
 0x8fb   : > { %v6892_v35 = vpop.f32.mrb[216].mxu0  ;;  %v7162_v49 = vpack.c.bf16 %v7078_v31, %v7076_v52 }
 0x8fc   : > { %v6893_v17 = vadd.f32 %v6892_v35, %v15811_v44  ;;  %v6894_v32 = vpop.f32.mrb[217].mxu0 }
 0x8fd   : > { %v6895_v14 = vadd.f32 %v6894_v32, %v15815_v21  ;;  %v6896_v22 = vpop.f32.mrb[218].mxu0 }
 0x8fe   : > { %v6897_v15 = vadd.f32 %v6896_v22, %v15811_v44  ;;  %v6898_v62 = vpop.f32.mrb[219].mxu0  ;;  %v7079_v50 = vmax.f32 %v6893_v17, 0.0 }
 0x8ff   : > { %v6899_v2 = vadd.f32 %v6898_v62, %v15815_v21  ;;  %v7080_v13 = vmax.f32 %v6895_v14, 0.0 }
 0x900   : > { %v7081_v26 = vmax.f32 %v6897_v15, 0.0  ;;  %7590 = vmatmul.mubr.bf16.gmra.mrb[68].mxu0 %v16008_v27 }
 0x901   : > { %v7082_v7 = vmax.f32 %v6899_v2, 0.0  ;;  %7599 = vmatprep.mubr.bf16.mxu0 %v16026_v46 }
 0x902   : > { %v16064_v1 = vpack.c.bf16 %v7081_v26, %v7079_v50 }
 0x903   : > { %v6902_v40 = vpop.f32.mrb[220].mxu0  ;;  %v7164_v24 = vpack.c.bf16 %v7082_v7, %v7080_v13 }
 0x904   : > { %v6903_v53 = vadd.f32 %v6902_v40, %v15811_v44  ;;  %v6904_v6 = vpop.f32.mrb[221].mxu0 }
 0x905   : > { %v6905_v36 = vadd.f32 %v6904_v6, %v15815_v21  ;;  %v6906_v3 = vpop.f32.mrb[222].mxu0 }
 0x906   : > { %v6907_v12 = vadd.f32 %v6906_v3, %v15811_v44  ;;  %v6908_v38 = vpop.f32.mrb[223].mxu0  ;;  %v7083_v27 = vmax.f32 %v6903_v53, 0.0 }
 0x907   : > { %v6909_v54 = vadd.f32 %v6908_v38, %v15815_v21  ;;  %v7084_v46 = vmax.f32 %v6905_v36, 0.0 }
 0x908   : > { %v7085_v56 = vmax.f32 %v6907_v12, 0.0  ;;  %7600 = vmatmul.mubr.bf16.gmra.mrb[72].mxu0 %v16023_v51 }
 0x909   : > { %v7086_v28 = vmax.f32 %v6909_v54, 0.0  ;;  %7609 = vmatprep.mubr.bf16.mxu0 %v16038_v29 }
 0x90a   : > { %v16072_v11 = vpack.c.bf16 %v7085_v56, %v7083_v27 }
 0x90b   : > { %v6912_v39 = vpop.f32.mrb[224].mxu0  ;;  %v7166_v63 = vpack.c.bf16 %v7086_v28, %v7084_v46 }
 0x90c   : > { %v6913_v30 = vadd.f32 %v6912_v39, %v15811_v44  ;;  %v6914_v18 = vpop.f32.mrb[225].mxu0 }
 0x90d   : > { %v6915_v37 = vadd.f32 %v6914_v18, %v15815_v21  ;;  %v6916_v42 = vpop.f32.mrb[226].mxu0 }
 0x90e   : > { %v6917_v55 = vadd.f32 %v6916_v42, %v15811_v44  ;;  %v6918_v23 = vpop.f32.mrb[227].mxu0  ;;  %v7087_v51 = vmax.f32 %v6913_v30, 0.0 }
 0x90f   : > { %v6919_v9 = vadd.f32 %v6918_v23, %v15815_v21  ;;  %v7088_v29 = vmax.f32 %v6915_v37, 0.0 }
 0x910   : > { %v7089_v34 = vmax.f32 %v6917_v55, 0.0  ;;  %7610 = vmatmul.mubr.bf16.gmra.mrb[76].mxu0 %v16035_v58 }
 0x911   : > { %v7090_v61 = vmax.f32 %v6919_v9, 0.0  ;;  %7619 = vmatprep.mubr.bf16.mxu0 %v7160_v60 }
 0x912   : > { %v16079_v48 = vpack.c.bf16 %v7089_v34, %v7087_v51 }
 0x913   : > { %v6922_v59 = vpop.f32.mrb[228].mxu0  ;;  %v7168_v5 = vpack.c.bf16 %v7090_v61, %v7088_v29 }
 0x914   : > { %v6923_v20 = vadd.f32 %v6922_v59, %v15811_v44  ;;  %v6924_v57 = vpop.f32.mrb[229].mxu0 }
 0x915   : > { %v6925_v10 = vadd.f32 %v6924_v57, %v15815_v21  ;;  %v6926_v33 = vpop.f32.mrb[230].mxu0 }
 0x916   : > { %v6927_v8 = vadd.f32 %v6926_v33, %v15811_v44  ;;  %v6928_v4 = vpop.f32.mrb[231].mxu0  ;;  %v7091_v52 = vmax.f32 %v6923_v20, 0.0 }
 0x917   : > { %v6929_v19 = vadd.f32 %v6928_v4, %v15815_v21  ;;  %v7092_v60 = vmax.f32 %v6925_v10, 0.0 }
 0x918   : > { %v7093_v58 = vmax.f32 %v6927_v8, 0.0  ;;  %7620 = vmatmul.mubr.bf16.gmra.mrb[80].mxu0 %v16047_v25 }
 0x919   : > { %v7094_v31 = vmax.f32 %v6929_v19, 0.0  ;;  %7629 = vmatprep.mubr.bf16.mxu0 %v7162_v49 }
 0x91a   : > { %v16086_v35 = vpack.c.bf16 %v7093_v58, %v7091_v52 }
 0x91b   : > { %v6932_v17 = vpop.f32.mrb[232].mxu0  ;;  %v7170_v32 = vpack.c.bf16 %v7094_v31, %v7092_v60 }
 0x91c   : > { %v6933_v14 = vadd.f32 %v6932_v17, %v15811_v44  ;;  %v6934_v22 = vpop.f32.mrb[233].mxu0 }
 0x91d   : > { %v6935_v15 = vadd.f32 %v6934_v22, %v15815_v21  ;;  %v6936_v62 = vpop.f32.mrb[234].mxu0 }
 0x91e   : > { %v6937_v2 = vadd.f32 %v6936_v62, %v15811_v44  ;;  %v6938_v50 = vpop.f32.mrb[235].mxu0  ;;  %v7095_v13 = vmax.f32 %v6933_v14, 0.0 }
 0x91f   : > { %v6939_v26 = vadd.f32 %v6938_v50, %v15815_v21  ;;  %v7096_v49 = vmax.f32 %v6935_v15, 0.0 }
 0x920   : > { %v7097_v25 = vmax.f32 %v6937_v2, 0.0  ;;  %7630 = vmatmul.mubr.bf16.gmra.mrb[84].mxu0 %v16056_v16 }
 0x921   : > { %v7098_v7 = vmax.f32 %v6939_v26, 0.0  ;;  %7639 = vmatprep.mubr.bf16.mxu0 %v7164_v24 }
 0x922   : > { %v16093_v40 = vpack.c.bf16 %v7097_v25, %v7095_v13 }
 0x923   : > { %v6942_v53 = vpop.f32.mrb[236].mxu0  ;;  %v7172_v6 = vpack.c.bf16 %v7098_v7, %v7096_v49 }
 0x924   : > { %v6943_v36 = vadd.f32 %v6942_v53, %v15811_v44  ;;  %v6944_v3 = vpop.f32.mrb[237].mxu0 }
 0x925   : > { %v6945_v12 = vadd.f32 %v6944_v3, %v15815_v21  ;;  %v6946_v38 = vpop.f32.mrb[238].mxu0 }
 0x926   : > { %v6947_v54 = vadd.f32 %v6946_v38, %v15811_v44  ;;  %v6948_v27 = vpop.f32.mrb[239].mxu0  ;;  %v7099_v46 = vmax.f32 %v6943_v36, 0.0 }
 0x927   : > { %v6949_v56 = vadd.f32 %v6948_v27, %v15815_v21  ;;  %v7100_v24 = vmax.f32 %v6945_v12, 0.0 }
 0x928   : > { %v7101_v16 = vmax.f32 %v6947_v54, 0.0  ;;  %7640 = vmatmul.mubr.bf16.gmra.mrb[88].mxu0 %v16064_v1 }
 0x929   : > { %v7102_v28 = vmax.f32 %v6949_v56, 0.0  ;;  %7649 = vmatprep.mubr.bf16.mxu0 %v7166_v63  ;;  %v7215_v56 = vld [vmem:[#allocation21] sm:$0x3] }
 0x92a   : > { %v16100_v39 = vpack.c.bf16 %v7101_v16, %v7099_v46 }
 0x92b   : > { %v6952_v30 = vpop.f32.mrb[240].mxu0  ;;  %v7174_v18 = vpack.c.bf16 %v7102_v28, %v7100_v24 }
 0x92c   : > { %v6953_v37 = vadd.f32 %v6952_v30, %v15811_v44  ;;  %v6954_v42 = vpop.f32.mrb[241].mxu0 }
 0x92d   : > { %v6955_v55 = vadd.f32 %v6954_v42, %v15815_v21  ;;  %v6956_v23 = vpop.f32.mrb[242].mxu0  ;;  %v16138_v42 = vrot.slane %v7215_v56, %v14599_v47 }
 0x92e   : > { %v6957_v9 = vadd.f32 %v6956_v23, %v15811_v44  ;;  %v6958_v51 = vpop.f32.mrb[243].mxu0  ;;  %v7103_v29 = vmax.f32 %v6953_v37, 0.0 }
 0x92f   : > { %v6959_v34 = vadd.f32 %v6958_v51, %v15815_v21  ;;  %v7104_v63 = vmax.f32 %v6955_v55, 0.0 }
 0x930   : > { %v7105_v1 = vmax.f32 %v6957_v9, 0.0  ;;  %7650 = vmatmul.mubr.bf16.gmra.mrb[92].mxu0 %v16072_v11 }
 0x931   : > { %v7106_v61 = vmax.f32 %v6959_v34, 0.0  ;;  %7659 = vmatprep.mubr.bf16.mxu0 %v7168_v5 }
 0x932   : > { %v16107_v59 = vpack.c.bf16 %v7105_v1, %v7103_v29 }
 0x933   : > { %v6962_v20 = vpop.f32.mrb[244].mxu0  ;;  %v16109_v57 = vpack.c.bf16 %v7106_v61, %v7104_v63 }
 0x934   : > { %v6963_v10 = vadd.f32 %v6962_v20, %v15811_v44  ;;  %v6964_v33 = vpop.f32.mrb[245].mxu0 }
 0x935   : > { %v6965_v8 = vadd.f32 %v6964_v33, %v15815_v21  ;;  %v6966_v4 = vpop.f32.mrb[246].mxu0 }
 0x936   : > { %v6967_v19 = vadd.f32 %v6966_v4, %v15811_v44  ;;  %v6968_v52 = vpop.f32.mrb[247].mxu0  ;;  %v7107_v11 = vmax.f32 %v6963_v10, 0.0 }
 0x937   : > { %v6969_v58 = vadd.f32 %v6968_v52, %v15815_v21  ;;  %v7108_v5 = vmax.f32 %v6965_v8, 0.0  ;;  %v12992_v52 = vld [vmem:[#allocation24 + $0x8] sm:$0xff]  }
 0x938   : > { %v7109_v60 = vmax.f32 %v6967_v19, 0.0  ;;  %7660 = vmatmul.mubr.bf16.gmra.mrb[96].mxu0 %v16079_v48 }
 0x939   : > { %v7110_v31 = vmax.f32 %v6969_v58, 0.0  ;;  %7669 = vmatprep.mubr.bf16.mxu0 %v7170_v32 }
 0x93a   : > { %v16116_v17 = vpack.c.bf16 %v7109_v60, %v7107_v11 }
 0x93b   : > { %v6972_v14 = vpop.f32.mrb[248].mxu0  ;;  %v16118_v22 = vpack.c.bf16 %v7110_v31, %v7108_v5 }
 0x93c   : > { %v6973_v15 = vadd.f32 %v6972_v14, %v15811_v44  ;;  %v6974_v62 = vpop.f32.mrb[249].mxu0  ;;  %v12993_v14 = vld [vmem:[#allocation24 + $0x10] sm:$0xff]  }
 0x93d   : > { %v6975_v2 = vadd.f32 %v6974_v62, %v15815_v21  ;;  %v6976_v50 = vpop.f32.mrb[250].mxu0 }
 0x93e   : > { %v6977_v26 = vadd.f32 %v6976_v50, %v15811_v44  ;;  %v6978_v13 = vpop.f32.mrb[251].mxu0  ;;  %v7111_v48 = vmax.f32 %v6973_v15, 0.0 }
 0x93f   : > { %v6979_v25 = vadd.f32 %v6978_v13, %v15815_v21  ;;  %v7112_v32 = vmax.f32 %v6975_v2, 0.0 }
 0x940   : > { %v7113_v49 = vmax.f32 %v6977_v26, 0.0  ;;  %7670 = vmatmul.mubr.bf16.gmra.mrb[100].mxu0 %v16086_v35 }
 0x941   : > { %v7114_v7 = vmax.f32 %v6979_v25, 0.0  ;;  %7679 = vmatprep.mubr.bf16.mxu0 %v7172_v6  ;;  %v16135_v6 = vrot.slane %v7215_v56, %v14593_v45 }
 0x942   : > { %v16125_v53 = vpack.c.bf16 %v7113_v49, %v7111_v48 }
 0x943   : > { %v6982_v36 = vpop.f32.mrb[252].mxu0  ;;  %v16127_v3 = vpack.c.bf16 %v7114_v7, %v7112_v32 }
 0x944   : > { %v6983_v12 = vadd.f32 %v6982_v36, %v15811_v44  ;;  %v6984_v38 = vpop.f32.mrb[253].mxu0 }
 0x945   : > { %v6985_v54 = vadd.f32 %v6984_v38, %v15815_v21  ;;  %v6986_v27 = vpop.f32.mrb[254].mxu0 }
 0x946   : > { %v6987_v46 = vadd.f32 %v6986_v27, %v15811_v44  ;;  %v6988_v16 = vpop.f32.mrb[255].mxu0  ;;  %v7115_v24 = vmax.f32 %v6983_v12, 0.0  ;;  %v12995_v12 = vld [vmem:[#allocation24 + $0x20] sm:$0xff]  }
 0x947   : > { %v6989_v35 = vadd.f32 %v6988_v16, %v15815_v21  ;;  %v7116_v30 = vmax.f32 %v6985_v54, 0.0 }
 0x948   : > { %v7117_v28 = vmax.f32 %v6987_v46, 0.0  ;;  %7680 = vmatmul.mubr.bf16.gmra.mrb[104].mxu0 %v16093_v40 }
 0x949   : > { %v7118_v37 = vmax.f32 %v6989_v35, 0.0  ;;  %7689 = vmatprep.mubr.bf16.mxu0 %v7174_v18 }
 0x94a   : > { %v16140_v55 = vpack.c.bf16 %v7117_v28, %v7115_v24 }
 0x94b   : > { %v7421_v23 = vpop.f32.mrb[0].mxu0  ;;  %v16142_v44 = vpack.c.bf16 %v7118_v37, %v7116_v30 }
 0x94c   : > { %v7422_v21 = vadd.f32 %v7421_v23, %v16135_v6  ;;  %v7423_v9 = vpop.f32.mrb[1].mxu0 }
 0x94d   : > { %v7424_v51 = vadd.f32 %v7423_v9, %v16138_v42  ;;  %v7425_v40 = vpop.f32.mrb[2].mxu0 }
 0x94e   : > { %v7426_v34 = vadd.f32 %v7425_v40, %v16135_v6  ;;  %v7427_v29 = vpop.f32.mrb[3].mxu0  ;;  %v7740_v18 = vmax.f32 %v7422_v21, 0.0 }
 0x94f   : > { %v7428_v1 = vadd.f32 %v7427_v29, %v16138_v42  ;;  %v7741_v61 = vmax.f32 %v7424_v51, 0.0 }
 0x950   : > { %v7742_v63 = vmax.f32 %v7426_v34, 0.0  ;;  %7690 = vmatmul.mubr.bf16.gmra.mrb[108].mxu0 %v16100_v39 }
 0x951   : > { %v7743_v20 = vmax.f32 %v7428_v1, 0.0  ;;  %7699 = vmatprep.mubr.bf16.mxu0 %v16109_v57 }
 0x952   : > { %v16150_v10 = vpack.c.bf16 %v7742_v63, %v7740_v18 }
 0x953   : > { %v7431_v33 = vpop.f32.mrb[4].mxu0  ;;  %v16152_v8 = vpack.c.bf16 %v7743_v20, %v7741_v61 }
 0x954   : > { %v7432_v4 = vadd.f32 %v7431_v33, %v16135_v6  ;;  %v7433_v19 = vpop.f32.mrb[5].mxu0 }
 0x955   : > { %v7434_v58 = vadd.f32 %v7433_v19, %v16138_v42  ;;  %v7435_v11 = vpop.f32.mrb[6].mxu0  ;;  %8301 = vmatprep.mubr.bf16.mxu1 %v16152_v8 }
 0x956   : > { %v7436_v39 = vadd.f32 %v7435_v11, %v16135_v6  ;;  %v7437_v60 = vpop.f32.mrb[7].mxu0  ;;  %8302 = vmatmul.mubr.bf16.vlgmr.msra.gmra.mrb[128].mxu1 %v16150_v10  ;;  %v7744_v5 = vmax.f32 %v7432_v4, 0.0 }
 0x957   : > { %v7438_v57 = vadd.f32 %v7437_v60, %v16138_v42  ;;  %12039 = vmatpush3.bf16.msra.mxu1 %v16010_v41  ;;  %v7745_v15 = vmax.f32 %v7434_v58, 0.0  ;;  %v12994_v41 = vld [vmem:[#allocation24 + $0x18] sm:$0xff]  }
 0x958   : > { %v7746_v31 = vmax.f32 %v7436_v39, 0.0  ;;  %7700 = vmatmul.mubr.bf16.gmra.mrb[112].mxu0 %v16107_v59  ;;  %12040 = vmatprep.subr.bf16.mxu1 %v12992_v52 }
 0x959   : > { %v7747_v62 = vmax.f32 %v7438_v57, 0.0  ;;  %7709 = vmatprep.mubr.bf16.mxu0 %v16118_v22 }
 0x95a   : > { %v16163_v2 = vpack.c.bf16 %v7746_v31, %v7744_v5 }
 0x95b   : > { %v7441_v50 = vpop.f32.mrb[8].mxu0  ;;  %v16165_v26 = vpack.c.bf16 %v7747_v62, %v7745_v15  ;;  %12041 = vmatpush3.bf16.msra.mxu1 %v12992_v52 }
 0x95c   : > { %v7442_v13 = vadd.f32 %v7441_v50, %v16135_v6  ;;  %v7443_v25 = vpop.f32.mrb[9].mxu0  ;;  %12042 = vmatprep.subr.bf16.mxu1 %v12993_v14 }
 0x95d   : > { %v7444_v48 = vadd.f32 %v7443_v25, %v16138_v42  ;;  %v7445_v59 = vpop.f32.mrb[10].mxu0  ;;  %8311 = vmatprep.mubr.bf16.mxu1 %v16165_v26 }
 0x95e   : > { %v7446_v49 = vadd.f32 %v7445_v59, %v16135_v6  ;;  %v7447_v32 = vpop.f32.mrb[11].mxu0  ;;  %8312 = vmatmul.mubr.bf16.gmra.mrb[132].mxu1 %v16163_v2  ;;  %v7748_v7 = vmax.f32 %v7442_v13, 0.0 }
 0x95f   : > { %v7448_v22 = vadd.f32 %v7447_v32, %v16138_v42  ;;  %12043 = vmatpush3.bf16.msra.mxu1 %v12993_v14  ;;  %v7749_v38 = vmax.f32 %v7444_v48, 0.0  ;;  %v12996_v48 = vld [vmem:[#allocation24 + $0x28] sm:$0xff]  }
 0x960   : > { %v7750_v36 = vmax.f32 %v7446_v49, 0.0  ;;  %7710 = vmatmul.mubr.bf16.gmra.mrb[116].mxu0 %v16116_v17  ;;  %12044 = vmatprep.subr.bf16.mxu1 %v12994_v41 }
 0x961   : > { %v7751_v54 = vmax.f32 %v7448_v22, 0.0  ;;  %7719 = vmatprep.mubr.bf16.mxu0 %v16127_v3 }
 0x962   : > { %v16175_v27 = vpack.c.bf16 %v7750_v36, %v7748_v7 }
 0x963   : > { %v7451_v56 = vpop.f32.mrb[12].mxu0  ;;  %v16177_v46 = vpack.c.bf16 %v7751_v54, %v7749_v38  ;;  %12045 = vmatpush3.bf16.msra.mxu1 %v12994_v41 }
 0x964   : > { %v7452_v16 = vadd.f32 %v7451_v56, %v16135_v6  ;;  %v7453_v35 = vpop.f32.mrb[13].mxu0  ;;  %12046 = vmatprep.subr.bf16.mxu1 %v12995_v12 }
 0x965   : > { %v7454_v24 = vadd.f32 %v7453_v35, %v16138_v42  ;;  %v7455_v28 = vpop.f32.mrb[14].mxu0  ;;  %8321 = vmatprep.mubr.bf16.mxu1 %v16177_v46 }
 0x966   : > { %v7456_v17 = vadd.f32 %v7455_v28, %v16135_v6  ;;  %v7457_v30 = vpop.f32.mrb[15].mxu0  ;;  %8322 = vmatmul.mubr.bf16.gmra.mrb[136].mxu1 %v16175_v27  ;;  %v7752_v37 = vmax.f32 %v7452_v16, 0.0 }
 0x967   : > { %v7458_v3 = vadd.f32 %v7457_v30, %v16138_v42  ;;  %12047 = vmatpush3.bf16.msra.mxu1 %v12995_v12  ;;  %v7753_v21 = vmax.f32 %v7454_v24, 0.0 }
 0x968   : > { %v7754_v23 = vmax.f32 %v7456_v17, 0.0  ;;  %7720 = vmatmul.mubr.bf16.gmra.mrb[120].mxu0 %v16125_v53  ;;  %12048 = vmatprep.subr.bf16.mxu1 %v12996_v48 }
 0x969   : > { %v7755_v9 = vmax.f32 %v7458_v3, 0.0  ;;  %7729 = vmatprep.mubr.bf16.mxu0 %v16142_v44 }
 0x96a   : > { %v16187_v51 = vpack.c.bf16 %v7754_v23, %v7752_v37 }
 0x96b   : > { %v7461_v40 = vpop.f32.mrb[16].mxu0  ;;  %v16189_v34 = vpack.c.bf16 %v7755_v9, %v7753_v21  ;;  %12049 = vmatpush3.bf16.msra.mxu1 %v12996_v48 }
 0x96c   : > { %v7462_v29 = vadd.f32 %v7461_v40, %v16135_v6  ;;  %v7463_v1 = vpop.f32.mrb[17].mxu0 }
 0x96d   : > { %v7464_v18 = vadd.f32 %v7463_v1, %v16138_v42  ;;  %v7465_v63 = vpop.f32.mrb[18].mxu0  ;;  %8331 = vmatprep.mubr.bf16.mxu1 %v16189_v34 }
 0x96e   : > { %v7466_v61 = vadd.f32 %v7465_v63, %v16135_v6  ;;  %v7467_v53 = vpop.f32.mrb[19].mxu0  ;;  %8332 = vmatmul.mubr.bf16.gmra.mrb[140].mxu1 %v16187_v51  ;;  %v7756_v20 = vmax.f32 %v7462_v29, 0.0 }
 0x96f   : > { %v7468_v44 = vadd.f32 %v7467_v53, %v16138_v42  ;;  %v7757_v4 = vmax.f32 %v7464_v18, 0.0 }
 0x970   : > { %v7758_v33 = vmax.f32 %v7466_v61, 0.0  ;;  %7730 = vmatmul.mubr.bf16.gmra.mrb[124].mxu0 %v16140_v55 }
 0x971   : > { %v7759_v19 = vmax.f32 %v7468_v44, 0.0  ;;  %8654 = vmatprep.mubr.bf16.mxu0 %v16152_v8 }
 0x972   : > { %v16199_v52 = vpack.c.bf16 %v7758_v33, %v7756_v20 }
 0x973   : > { %v7471_v58 = vpop.f32.mrb[20].mxu0  ;;  %v16201_v11 = vpack.c.bf16 %v7759_v19, %v7757_v4 }
 0x974   : > { %v7472_v39 = vadd.f32 %v7471_v58, %v16135_v6  ;;  %v7473_v60 = vpop.f32.mrb[21].mxu0 }
 0x975   : > { %v7474_v57 = vadd.f32 %v7473_v60, %v16138_v42  ;;  %v7475_v5 = vpop.f32.mrb[22].mxu0  ;;  %8341 = vmatprep.mubr.bf16.mxu1 %v16201_v11 }
 0x976   : > { %v7476_v31 = vadd.f32 %v7475_v5, %v16135_v6  ;;  %v7477_v55 = vpop.f32.mrb[23].mxu0  ;;  %8342 = vmatmul.mubr.bf16.gmra.mrb[144].mxu1 %v16199_v52  ;;  %v7760_v14 = vmax.f32 %v7472_v39, 0.0 }
 0x977   : > { %v7478_v8 = vadd.f32 %v7477_v55, %v16138_v42  ;;  %v7761_v62 = vmax.f32 %v7474_v57, 0.0 }
 0x978   : > { %v7762_v15 = vmax.f32 %v7476_v31, 0.0  ;;  %8655 = vmatmul.mubr.bf16.vlgmr.msra.gmra.mrb[128].mxu0 %v16150_v10 }
 0x979   : > { %v7763_v50 = vmax.f32 %v7478_v8, 0.0  ;;  %8662 = vmatprep.mubr.bf16.mxu0 %v16165_v26 }
 0x97a   : > { %v16211_v13 = vpack.c.bf16 %v7762_v15, %v7760_v14 }
 0x97b   : > { %v7481_v25 = vpop.f32.mrb[24].mxu0  ;;  %v16213_v41 = vpack.c.bf16 %v7763_v50, %v7761_v62 }
 0x97c   : > { %v7482_v59 = vadd.f32 %v7481_v25, %v16135_v6  ;;  %v7483_v49 = vpop.f32.mrb[25].mxu0 }
 0x97d   : > { %v7484_v32 = vadd.f32 %v7483_v49, %v16138_v42  ;;  %v7485_v22 = vpop.f32.mrb[26].mxu0  ;;  %8351 = vmatprep.mubr.bf16.mxu1 %v16213_v41  ;;  %v12997_v49 = vld [vmem:[#allocation24 + $0x30] sm:$0xff]  }
 0x97e   : > { %v7486_v10 = vadd.f32 %v7485_v22, %v16135_v6  ;;  %v7487_v7 = vpop.f32.mrb[27].mxu0  ;;  %8352 = vmatmul.mubr.bf16.gmra.mrb[148].mxu1 %v16211_v13  ;;  %v7764_v36 = vmax.f32 %v7482_v59, 0.0  ;;  %12050 = vmatprep.subr.bf16.mxu1 %v12997_v49 }
 0x97f   : > { %v7488_v26 = vadd.f32 %v7487_v7, %v16138_v42  ;;  %v7765_v38 = vmax.f32 %v7484_v32, 0.0  ;;  %12051 = vmatpush3.bf16.msra.mxu1 %v12997_v49 }
 0x980   : > { %v7766_v12 = vmax.f32 %v7486_v10, 0.0  ;;  %8663 = vmatmul.mubr.bf16.gmra.mrb[132].mxu0 %v16163_v2 }
 0x981   : > { %v7767_v54 = vmax.f32 %v7488_v26, 0.0  ;;  %8670 = vmatprep.mubr.bf16.mxu0 %v16177_v46 }
 0x982   : > { %v16223_v56 = vpack.c.bf16 %v7766_v12, %v7764_v36 }
 0x983   : > { %v7491_v16 = vpop.f32.mrb[28].mxu0  ;;  %v16225_v35 = vpack.c.bf16 %v7767_v54, %v7765_v38 }
 0x984   : > { %v7492_v24 = vadd.f32 %v7491_v16, %v16135_v6  ;;  %v7493_v28 = vpop.f32.mrb[29].mxu0 }
 0x985   : > { %v7494_v17 = vadd.f32 %v7493_v28, %v16138_v42  ;;  %v7495_v30 = vpop.f32.mrb[30].mxu0  ;;  %8361 = vmatprep.mubr.bf16.mxu1 %v16225_v35 }
 0x986   : > { %v7496_v3 = vadd.f32 %v7495_v30, %v16135_v6  ;;  %v7497_v2 = vpop.f32.mrb[31].mxu0  ;;  %8362 = vmatmul.mubr.bf16.gmra.mrb[152].mxu1 %v16223_v56  ;;  %v7768_v37 = vmax.f32 %v7492_v24, 0.0 }
 0x987   : > { %v7498_v46 = vadd.f32 %v7497_v2, %v16138_v42  ;;  %v7769_v21 = vmax.f32 %v7494_v17, 0.0 }
 0x988   : > { %v7770_v23 = vmax.f32 %v7496_v3, 0.0  ;;  %8671 = vmatmul.mubr.bf16.gmra.mrb[136].mxu0 %v16175_v27 }
 0x989   : > { %v7771_v9 = vmax.f32 %v7498_v46, 0.0  ;;  %8678 = vmatprep.mubr.bf16.mxu0 %v16189_v34 }
 0x98a   : > { %v16235_v40 = vpack.c.bf16 %v7770_v23, %v7768_v37 }
 0x98b   : > { %v7501_v29 = vpop.f32.mrb[32].mxu0  ;;  %v16237_v1 = vpack.c.bf16 %v7771_v9, %v7769_v21 }
 0x98c   : > { %v7502_v18 = vadd.f32 %v7501_v29, %v16135_v6  ;;  %v7503_v63 = vpop.f32.mrb[33].mxu0 }
 0x98d   : > { %v7504_v61 = vadd.f32 %v7503_v63, %v16138_v42  ;;  %v7505_v53 = vpop.f32.mrb[34].mxu0  ;;  %8371 = vmatprep.mubr.bf16.mxu1 %v16237_v1 }
 0x98e   : > { %v7506_v44 = vadd.f32 %v7505_v53, %v16135_v6  ;;  %v7507_v27 = vpop.f32.mrb[35].mxu0  ;;  %8372 = vmatmul.mubr.bf16.gmra.mrb[156].mxu1 %v16235_v40  ;;  %v7772_v20 = vmax.f32 %v7502_v18, 0.0 }
 0x98f   : > { %v7508_v34 = vadd.f32 %v7507_v27, %v16138_v42  ;;  %v7773_v4 = vmax.f32 %v7504_v61, 0.0 }
 0x990   : > { %v7774_v33 = vmax.f32 %v7506_v44, 0.0  ;;  %8679 = vmatmul.mubr.bf16.gmra.mrb[140].mxu0 %v16187_v51 }
 0x991   : > { %v7775_v19 = vmax.f32 %v7508_v34, 0.0  ;;  %8686 = vmatprep.mubr.bf16.mxu0 %v16201_v11 }
 0x992   : > { %v16247_v58 = vpack.c.bf16 %v7774_v33, %v7772_v20 }
 0x993   : > { %v7511_v39 = vpop.f32.mrb[36].mxu0  ;;  %v16249_v60 = vpack.c.bf16 %v7775_v19, %v7773_v4 }
 0x994   : > { %v7512_v57 = vadd.f32 %v7511_v39, %v16135_v6  ;;  %v7513_v5 = vpop.f32.mrb[37].mxu0 }
 0x995   : > { %v7514_v31 = vadd.f32 %v7513_v5, %v16138_v42  ;;  %v7515_v55 = vpop.f32.mrb[38].mxu0  ;;  %8381 = vmatprep.mubr.bf16.mxu1 %v16249_v60 }
 0x996   : > { %v7516_v8 = vadd.f32 %v7515_v55, %v16135_v6  ;;  %v7517_v51 = vpop.f32.mrb[39].mxu0  ;;  %8382 = vmatmul.mubr.bf16.gmra.mrb[160].mxu1 %v16247_v58  ;;  %v7776_v14 = vmax.f32 %v7512_v57, 0.0 }
 0x997   : > { %v7518_v11 = vadd.f32 %v7517_v51, %v16138_v42  ;;  %v7777_v62 = vmax.f32 %v7514_v31, 0.0 }
 0x998   : > { %v7778_v15 = vmax.f32 %v7516_v8, 0.0  ;;  %8687 = vmatmul.mubr.bf16.gmra.mrb[144].mxu0 %v16199_v52 }
 0x999   : > { %v7779_v50 = vmax.f32 %v7518_v11, 0.0  ;;  %8694 = vmatprep.mubr.bf16.mxu0 %v16213_v41 }
 0x99a   : > { %v16259_v25 = vpack.c.bf16 %v7778_v15, %v7776_v14 }
 0x99b   : > { %v7521_v48 = vpop.f32.mrb[40].mxu0  ;;  %v16261_v59 = vpack.c.bf16 %v7779_v50, %v7777_v62 }
 0x99c   : > { %v7522_v32 = vadd.f32 %v7521_v48, %v16135_v6  ;;  %v7523_v22 = vpop.f32.mrb[41].mxu0 }
 0x99d   : > { %v7524_v10 = vadd.f32 %v7523_v22, %v16138_v42  ;;  %v7525_v7 = vpop.f32.mrb[42].mxu0  ;;  %8391 = vmatprep.mubr.bf16.mxu1 %v16261_v59  ;;  %v12998_v22 = vld [vmem:[#allocation24 + $0x38] sm:$0xff]  }
 0x99e   : > { %v7526_v52 = vadd.f32 %v7525_v7, %v16135_v6  ;;  %v7527_v26 = vpop.f32.mrb[43].mxu0  ;;  %8392 = vmatmul.mubr.bf16.gmra.mrb[164].mxu1 %v16259_v25  ;;  %v7780_v36 = vmax.f32 %v7522_v32, 0.0  ;;  %12052 = vmatprep.subr.bf16.mxu1 %v12998_v22 }
 0x99f   : > { %v7528_v41 = vadd.f32 %v7527_v26, %v16138_v42  ;;  %v7781_v38 = vmax.f32 %v7524_v10, 0.0  ;;  %12053 = vmatpush3.bf16.msra.mxu1 %v12998_v22 }
 0x9a0   : > { %v7782_v12 = vmax.f32 %v7526_v52, 0.0  ;;  %8695 = vmatmul.mubr.bf16.gmra.mrb[148].mxu0 %v16211_v13  ;;  %9648 = vmatprep.subr.bf16.mxu1 %v18177_v0 }
 0x9a1   : > { %v7783_v54 = vmax.f32 %v7528_v41, 0.0  ;;  %8702 = vmatprep.mubr.bf16.mxu0 %v16225_v35 }
 0x9a2   : > { %v16271_v16 = vpack.c.bf16 %v7782_v12, %v7780_v36 }
 0x9a3   : > { %v7531_v24 = vpop.f32.mrb[44].mxu0  ;;  %v16273_v28 = vpack.c.bf16 %v7783_v54, %v7781_v38 }
 0x9a4   : > { %v7532_v17 = vadd.f32 %v7531_v24, %v16135_v6  ;;  %v7533_v30 = vpop.f32.mrb[45].mxu0 }
 0x9a5   : > { %v7534_v3 = vadd.f32 %v7533_v30, %v16138_v42  ;;  %v7535_v2 = vpop.f32.mrb[46].mxu0  ;;  %8401 = vmatprep.mubr.bf16.mxu1 %v16273_v28 }
 0x9a6   : > { %v7536_v46 = vadd.f32 %v7535_v2, %v16135_v6  ;;  %v7537_v13 = vpop.f32.mrb[47].mxu0  ;;  %8402 = vmatmul.mubr.bf16.gmra.mrb[168].mxu1 %v16271_v16  ;;  %v7784_v37 = vmax.f32 %v7532_v17, 0.0 }
 0x9a7   : > { %v7538_v35 = vadd.f32 %v7537_v13, %v16138_v42  ;;  %v7785_v21 = vmax.f32 %v7534_v3, 0.0 }
 0x9a8   : > { %v7786_v23 = vmax.f32 %v7536_v46, 0.0  ;;  %8703 = vmatmul.mubr.bf16.gmra.mrb[152].mxu0 %v16223_v56 }
 0x9a9   : > { %v7787_v9 = vmax.f32 %v7538_v35, 0.0  ;;  %8710 = vmatprep.mubr.bf16.mxu0 %v16237_v1 }
 0x9aa   : > { %v16283_v29 = vpack.c.bf16 %v7786_v23, %v7784_v37 }
 0x9ab   : > { %v7541_v18 = vpop.f32.mrb[48].mxu0  ;;  %v16285_v63 = vpack.c.bf16 %v7787_v9, %v7785_v21 }
 0x9ac   : > { %v7542_v61 = vadd.f32 %v7541_v18, %v16135_v6  ;;  %v7543_v53 = vpop.f32.mrb[49].mxu0 }
 0x9ad   : > { %v7544_v44 = vadd.f32 %v7543_v53, %v16138_v42  ;;  %v7545_v27 = vpop.f32.mrb[50].mxu0  ;;  %8411 = vmatprep.mubr.bf16.mxu1 %v16285_v63 }
 0x9ae   : > { %v7546_v34 = vadd.f32 %v7545_v27, %v16135_v6  ;;  %v7547_v56 = vpop.f32.mrb[51].mxu0  ;;  %8412 = vmatmul.mubr.bf16.gmra.mrb[172].mxu1 %v16283_v29  ;;  %v7788_v20 = vmax.f32 %v7542_v61, 0.0 }
 0x9af   : > { %v7548_v1 = vadd.f32 %v7547_v56, %v16138_v42  ;;  %v7789_v4 = vmax.f32 %v7544_v44, 0.0 }
 0x9b0   : > { %v7790_v33 = vmax.f32 %v7546_v34, 0.0  ;;  %8711 = vmatmul.mubr.bf16.gmra.mrb[156].mxu0 %v16235_v40 }
 0x9b1   : > { %v7791_v19 = vmax.f32 %v7548_v1, 0.0  ;;  %8718 = vmatprep.mubr.bf16.mxu0 %v16249_v60 }
 0x9b2   : > { %v16295_v39 = vpack.c.bf16 %v7790_v33, %v7788_v20 }
 0x9b3   : > { %v7551_v57 = vpop.f32.mrb[52].mxu0  ;;  %v16297_v5 = vpack.c.bf16 %v7791_v19, %v7789_v4 }
 0x9b4   : > { %v7552_v31 = vadd.f32 %v7551_v57, %v16135_v6  ;;  %v7553_v55 = vpop.f32.mrb[53].mxu0 }
 0x9b5   : > { %v7554_v8 = vadd.f32 %v7553_v55, %v16138_v42  ;;  %v7555_v51 = vpop.f32.mrb[54].mxu0  ;;  %8421 = vmatprep.mubr.bf16.mxu1 %v16297_v5 }
 0x9b6   : > { %v7556_v11 = vadd.f32 %v7555_v51, %v16135_v6  ;;  %v7557_v40 = vpop.f32.mrb[55].mxu0  ;;  %8422 = vmatmul.mubr.bf16.gmra.mrb[176].mxu1 %v16295_v39  ;;  %v7792_v14 = vmax.f32 %v7552_v31, 0.0 }
 0x9b7   : > { %v7558_v60 = vadd.f32 %v7557_v40, %v16138_v42  ;;  %v7793_v62 = vmax.f32 %v7554_v8, 0.0 }
 0x9b8   : > { %v7794_v15 = vmax.f32 %v7556_v11, 0.0  ;;  %8719 = vmatmul.mubr.bf16.gmra.mrb[160].mxu0 %v16247_v58 }
 0x9b9   : > { %v7795_v50 = vmax.f32 %v7558_v60, 0.0  ;;  %8726 = vmatprep.mubr.bf16.mxu0 %v16261_v59 }
 0x9ba   : > { %v16307_v48 = vpack.c.bf16 %v7794_v15, %v7792_v14 }
 0x9bb   : > { %v7561_v49 = vpop.f32.mrb[56].mxu0  ;;  %v16309_v32 = vpack.c.bf16 %v7795_v50, %v7793_v62 }
 0x9bc   : > { %v7562_v10 = vadd.f32 %v7561_v49, %v16135_v6  ;;  %v7563_v7 = vpop.f32.mrb[57].mxu0 }
 0x9bd   : > { %v7564_v52 = vadd.f32 %v7563_v7, %v16138_v42  ;;  %v7565_v26 = vpop.f32.mrb[58].mxu0  ;;  %8431 = vmatprep.mubr.bf16.mxu1 %v16309_v32 }
 0x9be   : > { %v7566_v58 = vadd.f32 %v7565_v26, %v16135_v6  ;;  %v7567_v41 = vpop.f32.mrb[59].mxu0  ;;  %8432 = vmatmul.mubr.bf16.gmra.mrb[180].mxu1 %v16307_v48  ;;  %v7796_v36 = vmax.f32 %v7562_v10, 0.0 }
 0x9bf   : > { %v7568_v59 = vadd.f32 %v7567_v41, %v16138_v42  ;;  %v7797_v38 = vmax.f32 %v7564_v52, 0.0 }
 0x9c0   : > { %v7798_v12 = vmax.f32 %v7566_v58, 0.0  ;;  %8727 = vmatmul.mubr.bf16.gmra.mrb[164].mxu0 %v16259_v25 }
 0x9c1   : > { %v7799_v54 = vmax.f32 %v7568_v59, 0.0  ;;  %8734 = vmatprep.mubr.bf16.mxu0 %v16273_v28 }
 0x9c2   : > { %v16320_v24 = vpack.c.bf16 %v7798_v12, %v7796_v36 }
 0x9c3   : > { %v7571_v17 = vpop.f32.mrb[60].mxu0  ;;  %v16322_v30 = vpack.c.bf16 %v7799_v54, %v7797_v38 }
 0x9c4   : > { %v7572_v3 = vadd.f32 %v7571_v17, %v16135_v6  ;;  %v7573_v2 = vpop.f32.mrb[61].mxu0 }
 0x9c5   : > { %v7574_v46 = vadd.f32 %v7573_v2, %v16138_v42  ;;  %v7575_v13 = vpop.f32.mrb[62].mxu0  ;;  %8441 = vmatprep.mubr.bf16.mxu1 %v16322_v30 }
 0x9c6   : > { %v7576_v25 = vadd.f32 %v7575_v13, %v16135_v6  ;;  %v7577_v35 = vpop.f32.mrb[63].mxu0  ;;  %8442 = vmatmul.mubr.bf16.gmra.mrb[184].mxu1 %v16320_v24  ;;  %v7800_v37 = vmax.f32 %v7572_v3, 0.0 }
 0x9c7   : > { %v7578_v28 = vadd.f32 %v7577_v35, %v16138_v42  ;;  %v7801_v21 = vmax.f32 %v7574_v46, 0.0 }
 0x9c8   : > { %v7802_v23 = vmax.f32 %v7576_v25, 0.0  ;;  %8735 = vmatmul.mubr.bf16.gmra.mrb[168].mxu0 %v16271_v16 }
 0x9c9   : > { %v7803_v9 = vmax.f32 %v7578_v28, 0.0  ;;  %8742 = vmatprep.mubr.bf16.mxu0 %v16285_v63 }
 0x9ca   : > { %v16332_v18 = vpack.c.bf16 %v7802_v23, %v7800_v37 }
 0x9cb   : > { %v7581_v61 = vpop.f32.mrb[64].mxu0  ;;  %v16334_v53 = vpack.c.bf16 %v7803_v9, %v7801_v21 }
 0x9cc   : > { %v7582_v44 = vadd.f32 %v7581_v61, %v16135_v6  ;;  %v7583_v27 = vpop.f32.mrb[65].mxu0 }
 0x9cd   : > { %v7584_v34 = vadd.f32 %v7583_v27, %v16138_v42  ;;  %v7585_v56 = vpop.f32.mrb[66].mxu0  ;;  %8451 = vmatprep.mubr.bf16.mxu1 %v16334_v53 }
 0x9ce   : > { %v7586_v1 = vadd.f32 %v7585_v56, %v16135_v6  ;;  %v7587_v16 = vpop.f32.mrb[67].mxu0  ;;  %8452 = vmatmul.mubr.bf16.gmra.mrb[188].mxu1 %v16332_v18  ;;  %v7804_v20 = vmax.f32 %v7582_v44, 0.0 }
 0x9cf   : > { %v7588_v63 = vadd.f32 %v7587_v16, %v16138_v42  ;;  %v7805_v4 = vmax.f32 %v7584_v34, 0.0 }
 0x9d0   : > { %v7806_v33 = vmax.f32 %v7586_v1, 0.0  ;;  %8743 = vmatmul.mubr.bf16.gmra.mrb[172].mxu0 %v16283_v29 }
 0x9d1   : > { %v7807_v19 = vmax.f32 %v7588_v63, 0.0  ;;  %8750 = vmatprep.mubr.bf16.mxu0 %v16297_v5 }
 0x9d2   : > { %v16344_v57 = vpack.c.bf16 %v7806_v33, %v7804_v20 }
 0x9d3   : > { %v16346_v31 = vpack.c.bf16 %v7807_v19, %v7805_v4  ;;  %v7591_v55 = vpop.f32.mrb[68].mxu0 }
 0x9d4   : > { %v7592_v8 = vadd.f32 %v7591_v55, %v16135_v6  ;;  %v7593_v51 = vpop.f32.mrb[69].mxu0 }
 0x9d5   : > { %v7594_v11 = vadd.f32 %v7593_v51, %v16138_v42  ;;  %v7595_v40 = vpop.f32.mrb[70].mxu0  ;;  %8461 = vmatprep.mubr.bf16.mxu1 %v16346_v31 }
 0x9d6   : > { %v7596_v60 = vadd.f32 %v7595_v40, %v16135_v6  ;;  %v7597_v29 = vpop.f32.mrb[71].mxu0  ;;  %8462 = vmatmul.mubr.bf16.gmra.mrb[192].mxu1 %v16344_v57  ;;  %v7808_v14 = vmax.f32 %v7592_v8, 0.0 }
 0x9d7   : > { %v7598_v5 = vadd.f32 %v7597_v29, %v16138_v42  ;;  %v7809_v62 = vmax.f32 %v7594_v11, 0.0 }
 0x9d8   : > { %v7810_v15 = vmax.f32 %v7596_v60, 0.0  ;;  %8751 = vmatmul.mubr.bf16.gmra.mrb[176].mxu0 %v16295_v39 }
 0x9d9   : > { %v7811_v50 = vmax.f32 %v7598_v5, 0.0  ;;  %8758 = vmatprep.mubr.bf16.mxu0 %v16309_v32 }
 0x9da   : > { %v16356_v49 = vpack.c.bf16 %v7810_v15, %v7808_v14 }
 0x9db   : > { %v16358_v22 = vpack.c.bf16 %v7811_v50, %v7809_v62  ;;  %v7601_v10 = vpop.f32.mrb[72].mxu0 }
 0x9dc   : > { %v7602_v7 = vadd.f32 %v7601_v10, %v16135_v6  ;;  %v7603_v52 = vpop.f32.mrb[73].mxu0 }
 0x9dd   : > { %v7604_v26 = vadd.f32 %v7603_v52, %v16138_v42  ;;  %v7605_v58 = vpop.f32.mrb[74].mxu0  ;;  %8471 = vmatprep.mubr.bf16.mxu1 %v16358_v22 }
 0x9de   : > { %v7606_v41 = vadd.f32 %v7605_v58, %v16135_v6  ;;  %v7607_v39 = vpop.f32.mrb[75].mxu0  ;;  %8472 = vmatmul.mubr.bf16.gmra.mrb[196].mxu1 %v16356_v49  ;;  %v7812_v59 = vmax.f32 %v7602_v7, 0.0 }
 0x9df   : > { %v7608_v32 = vadd.f32 %v7607_v39, %v16138_v42  ;;  %v7813_v12 = vmax.f32 %v7604_v26, 0.0 }
 0x9e0   : > { %v7814_v36 = vmax.f32 %v7606_v41, 0.0  ;;  %8759 = vmatmul.mubr.bf16.gmra.mrb[180].mxu0 %v16307_v48 }
 0x9e1   : > { %v7815_v38 = vmax.f32 %v7608_v32, 0.0  ;;  %8766 = vmatprep.mubr.bf16.mxu0 %v16322_v30 }
 0x9e2   : > { %v16368_v54 = vpack.c.bf16 %v7814_v36, %v7812_v59 }
 0x9e3   : > { %v16370_v17 = vpack.c.bf16 %v7815_v38, %v7813_v12  ;;  %v7611_v3 = vpop.f32.mrb[76].mxu0 }
 0x9e4   : > { %v7612_v2 = vadd.f32 %v7611_v3, %v16135_v6  ;;  %v7613_v46 = vpop.f32.mrb[77].mxu0 }
 0x9e5   : > { %v7614_v13 = vadd.f32 %v7613_v46, %v16138_v42  ;;  %v7615_v25 = vpop.f32.mrb[78].mxu0  ;;  %8481 = vmatprep.mubr.bf16.mxu1 %v16370_v17 }
 0x9e6   : > { %v7616_v35 = vadd.f32 %v7615_v25, %v16135_v6  ;;  %v7617_v48 = vpop.f32.mrb[79].mxu0  ;;  %8482 = vmatmul.mubr.bf16.gmra.mrb[200].mxu1 %v16368_v54  ;;  %v7816_v28 = vmax.f32 %v7612_v2, 0.0 }
 0x9e7   : > { %v7618_v30 = vadd.f32 %v7617_v48, %v16138_v42  ;;  %v7817_v23 = vmax.f32 %v7614_v13, 0.0 }
 0x9e8   : > { %v7818_v37 = vmax.f32 %v7616_v35, 0.0  ;;  %8767 = vmatmul.mubr.bf16.gmra.mrb[184].mxu0 %v16320_v24 }
 0x9e9   : > { %v7819_v21 = vmax.f32 %v7618_v30, 0.0  ;;  %8774 = vmatprep.mubr.bf16.mxu0 %v16334_v53 }
 0x9ea   : > { %v16380_v9 = vpack.c.bf16 %v7818_v37, %v7816_v28 }
 0x9eb   : > { %v16382_v61 = vpack.c.bf16 %v7819_v21, %v7817_v23  ;;  %v7621_v44 = vpop.f32.mrb[80].mxu0 }
 0x9ec   : > { %v7622_v27 = vadd.f32 %v7621_v44, %v16135_v6  ;;  %v7623_v34 = vpop.f32.mrb[81].mxu0 }
 0x9ed   : > { %v7624_v56 = vadd.f32 %v7623_v34, %v16138_v42  ;;  %v7625_v1 = vpop.f32.mrb[82].mxu0  ;;  %8491 = vmatprep.mubr.bf16.mxu1 %v16382_v61 }
 0x9ee   : > { %v7626_v16 = vadd.f32 %v7625_v1, %v16135_v6  ;;  %v7627_v24 = vpop.f32.mrb[83].mxu0  ;;  %8492 = vmatmul.mubr.bf16.gmra.mrb[204].mxu1 %v16380_v9  ;;  %v7820_v63 = vmax.f32 %v7622_v27, 0.0 }
 0x9ef   : > { %v7628_v53 = vadd.f32 %v7627_v24, %v16138_v42  ;;  %v7821_v33 = vmax.f32 %v7624_v56, 0.0 }
 0x9f0   : > { %v7822_v20 = vmax.f32 %v7626_v16, 0.0  ;;  %8775 = vmatmul.mubr.bf16.gmra.mrb[188].mxu0 %v16332_v18 }
 0x9f1   : > { %v7823_v4 = vmax.f32 %v7628_v53, 0.0  ;;  %8782 = vmatprep.mubr.bf16.mxu0 %v16346_v31 }
 0x9f2   : > { %v16392_v19 = vpack.c.bf16 %v7822_v20, %v7820_v63 }
 0x9f3   : > { %v16394_v55 = vpack.c.bf16 %v7823_v4, %v7821_v33  ;;  %v7631_v8 = vpop.f32.mrb[84].mxu0 }
 0x9f4   : > { %v7632_v51 = vadd.f32 %v7631_v8, %v16135_v6  ;;  %v7633_v11 = vpop.f32.mrb[85].mxu0 }
 0x9f5   : > { %v7634_v40 = vadd.f32 %v7633_v11, %v16138_v42  ;;  %v7635_v60 = vpop.f32.mrb[86].mxu0  ;;  %8501 = vmatprep.mubr.bf16.mxu1 %v16394_v55 }
 0x9f6   : > { %v7636_v29 = vadd.f32 %v7635_v60, %v16135_v6  ;;  %v7637_v18 = vpop.f32.mrb[87].mxu0  ;;  %8502 = vmatmul.mubr.bf16.gmra.mrb[208].mxu1 %v16392_v19  ;;  %v7824_v5 = vmax.f32 %v7632_v51, 0.0 }
 0x9f7   : > { %v7638_v31 = vadd.f32 %v7637_v18, %v16138_v42  ;;  %v7825_v15 = vmax.f32 %v7634_v40, 0.0 }
 0x9f8   : > { %v7826_v14 = vmax.f32 %v7636_v29, 0.0  ;;  %8783 = vmatmul.mubr.bf16.gmra.mrb[192].mxu0 %v16344_v57 }
 0x9f9   : > { %v7827_v62 = vmax.f32 %v7638_v31, 0.0  ;;  %8790 = vmatprep.mubr.bf16.mxu0 %v16358_v22 }
 0x9fa   : > { %v16404_v50 = vpack.c.bf16 %v7826_v14, %v7824_v5 }
 0x9fb   : > { %v16406_v10 = vpack.c.bf16 %v7827_v62, %v7825_v15  ;;  %v7641_v7 = vpop.f32.mrb[88].mxu0 }
 0x9fc   : > { %v7642_v52 = vadd.f32 %v7641_v7, %v16135_v6  ;;  %v7643_v26 = vpop.f32.mrb[89].mxu0 }
 0x9fd   : > { %v7644_v58 = vadd.f32 %v7643_v26, %v16138_v42  ;;  %v7645_v41 = vpop.f32.mrb[90].mxu0  ;;  %8511 = vmatprep.mubr.bf16.mxu1 %v16406_v10 }
 0x9fe   : > { %v7646_v39 = vadd.f32 %v7645_v41, %v16135_v6  ;;  %v7647_v57 = vpop.f32.mrb[91].mxu0  ;;  %8512 = vmatmul.mubr.bf16.gmra.mrb[212].mxu1 %v16404_v50  ;;  %v7828_v32 = vmax.f32 %v7642_v52, 0.0 }
 0x9ff   : > { %v7648_v22 = vadd.f32 %v7647_v57, %v16138_v42  ;;  %v7829_v36 = vmax.f32 %v7644_v58, 0.0 }
 0xa00   : > { %v7830_v59 = vmax.f32 %v7646_v39, 0.0  ;;  %8791 = vmatmul.mubr.bf16.gmra.mrb[196].mxu0 %v16356_v49 }
 0xa01   : > { %v7831_v12 = vmax.f32 %v7648_v22, 0.0  ;;  %8798 = vmatprep.mubr.bf16.mxu0 %v16370_v17 }
 0xa02   : > { %v16416_v38 = vpack.c.bf16 %v7830_v59, %v7828_v32 }
 0xa03   : > { %v16418_v3 = vpack.c.bf16 %v7831_v12, %v7829_v36  ;;  %v7651_v2 = vpop.f32.mrb[92].mxu0 }
 0xa04   : > { %v7652_v46 = vadd.f32 %v7651_v2, %v16135_v6  ;;  %v7653_v13 = vpop.f32.mrb[93].mxu0 }
 0xa05   : > { %v7654_v25 = vadd.f32 %v7653_v13, %v16138_v42  ;;  %v7655_v35 = vpop.f32.mrb[94].mxu0  ;;  %8521 = vmatprep.mubr.bf16.mxu1 %v16418_v3 }
 0xa06   : > { %v7656_v48 = vadd.f32 %v7655_v35, %v16135_v6  ;;  %v7657_v49 = vpop.f32.mrb[95].mxu0  ;;  %8522 = vmatmul.mubr.bf16.gmra.mrb[216].mxu1 %v16416_v38  ;;  %v7832_v30 = vmax.f32 %v7652_v46, 0.0 }
 0xa07   : > { %v7658_v17 = vadd.f32 %v7657_v49, %v16138_v42  ;;  %v7833_v37 = vmax.f32 %v7654_v25, 0.0 }
 0xa08   : > { %v7834_v28 = vmax.f32 %v7656_v48, 0.0  ;;  %8799 = vmatmul.mubr.bf16.gmra.mrb[200].mxu0 %v16368_v54 }
 0xa09   : > { %v7835_v23 = vmax.f32 %v7658_v17, 0.0  ;;  %8806 = vmatprep.mubr.bf16.mxu0 %v16382_v61 }
 0xa0a   : > { %v16428_v21 = vpack.c.bf16 %v7834_v28, %v7832_v30 }
 0xa0b   : > { %v16430_v44 = vpack.c.bf16 %v7835_v23, %v7833_v37  ;;  %v7661_v27 = vpop.f32.mrb[96].mxu0 }
 0xa0c   : > { %v7662_v34 = vadd.f32 %v7661_v27, %v16135_v6  ;;  %v7663_v56 = vpop.f32.mrb[97].mxu0 }
 0xa0d   : > { %v7664_v1 = vadd.f32 %v7663_v56, %v16138_v42  ;;  %v7665_v16 = vpop.f32.mrb[98].mxu0  ;;  %8531 = vmatprep.mubr.bf16.mxu1 %v16430_v44 }
 0xa0e   : > { %v7666_v24 = vadd.f32 %v7665_v16, %v16135_v6  ;;  %v7667_v54 = vpop.f32.mrb[99].mxu0  ;;  %8532 = vmatmul.mubr.bf16.gmra.mrb[220].mxu1 %v16428_v21  ;;  %v7836_v53 = vmax.f32 %v7662_v34, 0.0 }
 0xa0f   : > { %v7668_v61 = vadd.f32 %v7667_v54, %v16138_v42  ;;  %v7837_v20 = vmax.f32 %v7664_v1, 0.0 }
 0xa10   : > { %v7838_v63 = vmax.f32 %v7666_v24, 0.0  ;;  %8807 = vmatmul.mubr.bf16.gmra.mrb[204].mxu0 %v16380_v9 }
 0xa11   : > { %v7839_v33 = vmax.f32 %v7668_v61, 0.0  ;;  %8814 = vmatprep.mubr.bf16.mxu0 %v16394_v55 }
 0xa12   : > { %v16440_v4 = vpack.c.bf16 %v7838_v63, %v7836_v53 }
 0xa13   : > { %v16442_v8 = vpack.c.bf16 %v7839_v33, %v7837_v20  ;;  %v7671_v51 = vpop.f32.mrb[100].mxu0 }
 0xa14   : > { %v7672_v11 = vadd.f32 %v7671_v51, %v16135_v6  ;;  %v7673_v40 = vpop.f32.mrb[101].mxu0 }
 0xa15   : > { %v7674_v60 = vadd.f32 %v7673_v40, %v16138_v42  ;;  %v7675_v29 = vpop.f32.mrb[102].mxu0  ;;  %8541 = vmatprep.mubr.bf16.mxu1 %v16442_v8 }
 0xa16   : > { %v7676_v18 = vadd.f32 %v7675_v29, %v16135_v6  ;;  %v7677_v9 = vpop.f32.mrb[103].mxu0  ;;  %8542 = vmatmul.mubr.bf16.gmra.mrb[224].mxu1 %v16440_v4  ;;  %v7840_v31 = vmax.f32 %v7672_v11, 0.0 }
 0xa17   : > { %v7678_v55 = vadd.f32 %v7677_v9, %v16138_v42  ;;  %v7841_v14 = vmax.f32 %v7674_v60, 0.0 }
 0xa18   : > { %v7842_v5 = vmax.f32 %v7676_v18, 0.0  ;;  %8815 = vmatmul.mubr.bf16.gmra.mrb[208].mxu0 %v16392_v19 }
 0xa19   : > { %v7843_v15 = vmax.f32 %v7678_v55, 0.0  ;;  %8822 = vmatprep.mubr.bf16.mxu0 %v16406_v10 }
 0xa1a   : > { %v16452_v62 = vpack.c.bf16 %v7842_v5, %v7840_v31 }
 0xa1b   : > { %v16454_v7 = vpack.c.bf16 %v7843_v15, %v7841_v14  ;;  %v7681_v52 = vpop.f32.mrb[104].mxu0 }
 0xa1c   : > { %v7682_v26 = vadd.f32 %v7681_v52, %v16135_v6  ;;  %v7683_v58 = vpop.f32.mrb[105].mxu0 }
 0xa1d   : > { %v7684_v41 = vadd.f32 %v7683_v58, %v16138_v42  ;;  %v7685_v39 = vpop.f32.mrb[106].mxu0  ;;  %8551 = vmatprep.mubr.bf16.mxu1 %v16454_v7 }
 0xa1e   : > { %v7686_v57 = vadd.f32 %v7685_v39, %v16135_v6  ;;  %v7687_v19 = vpop.f32.mrb[107].mxu0  ;;  %8552 = vmatmul.mubr.bf16.gmra.mrb[228].mxu1 %v16452_v62  ;;  %v7844_v22 = vmax.f32 %v7682_v26, 0.0 }
 0xa1f   : > { %v7688_v10 = vadd.f32 %v7687_v19, %v16138_v42  ;;  %v7845_v59 = vmax.f32 %v7684_v41, 0.0 }
 0xa20   : > { %v7846_v32 = vmax.f32 %v7686_v57, 0.0  ;;  %8823 = vmatmul.mubr.bf16.gmra.mrb[212].mxu0 %v16404_v50  ;;  %v16474_v50 = vld [vmem:[%s18286_s19] sm:$0x7] }
 0xa21   : > { %v7847_v36 = vmax.f32 %v7688_v10, 0.0  ;;  %8830 = vmatprep.mubr.bf16.mxu0 %v16418_v3  ;;  %v16482_v37 = vrot.slane %v16474_v50, %v14593_v45  ;;  %v16487_v56 = vrot.slane %v16474_v50, %v14599_v47 }
 0xa22   : > { %v16464_v12 = vpack.c.bf16 %v7846_v32, %v7844_v22 }
 0xa23   : > { %v16466_v2 = vpack.c.bf16 %v7847_v36, %v7845_v59  ;;  %v7691_v46 = vpop.f32.mrb[108].mxu0 }
 0xa24   : > { %v7692_v13 = vadd.f32 %v7691_v46, %v16135_v6  ;;  %v7693_v25 = vpop.f32.mrb[109].mxu0 }
 0xa25   : > { %v7694_v35 = vadd.f32 %v7693_v25, %v16138_v42  ;;  %v7695_v48 = vpop.f32.mrb[110].mxu0  ;;  %8561 = vmatprep.mubr.bf16.mxu1 %v16466_v2 }
 0xa26   : > { %v7696_v3 = vadd.f32 %v7695_v48, %v16135_v6  ;;  %v7697_v49 = vpop.f32.mrb[111].mxu0  ;;  %8562 = vmatmul.mubr.bf16.gmra.mrb[232].mxu1 %v16464_v12  ;;  %v7848_v30 = vmax.f32 %v7692_v13, 0.0 }
 0xa27   : > { %v7698_v17 = vadd.f32 %v7697_v49, %v16138_v42  ;;  %v7849_v23 = vmax.f32 %v7694_v35, 0.0 }
 0xa28   : > { %v7850_v28 = vmax.f32 %v7696_v3, 0.0  ;;  %8831 = vmatmul.mubr.bf16.gmra.mrb[216].mxu0 %v16416_v38 }
 0xa29   : > { %v7851_v27 = vmax.f32 %v7698_v17, 0.0  ;;  %v8303_v34 = vpop.f32.mrb[128].mxu1  ;;  %8838 = vmatprep.mubr.bf16.mxu0 %v16430_v44 }
 0xa2a   : > { %v16489_v1 = vpack.c.bf16 %v7850_v28, %v7848_v30  ;;  %v8305_v16 = vpop.f32.mrb[129].mxu1  ;;  %v16494_v61 = vadd.f32 %v8303_v34, %v16482_v37 }
 0xa2b   : > { %v16491_v24 = vpack.c.bf16 %v7851_v27, %v7849_v23  ;;  %v7701_v54 = vpop.f32.mrb[112].mxu0  ;;  %v8307_v38 = vpop.f32.mrb[130].mxu1  ;;  %v16501_v47 = vadd.f32 %v8305_v16, %v16487_v56 }
 0xa2c   : > { %v7702_v45 = vadd.f32 %v7701_v54, %v16135_v6  ;;  %v16498_v53 = vadd.f32 %v8307_v38, %v16482_v37  ;;  %v7703_v44 = vpop.f32.mrb[113].mxu0  ;;  %v8309_v63 = vpop.f32.mrb[131].mxu1 }
 0xa2d   : > { %v7704_v20 = vadd.f32 %v7703_v44, %v16138_v42  ;;  %v16505_v33 = vadd.f32 %v8309_v63, %v16487_v56  ;;  %v7705_v51 = vpop.f32.mrb[114].mxu0  ;;  %8571 = vmatprep.mubr.bf16.mxu1 %v16491_v24 }
 0xa2e   : > { %v7706_v40 = vadd.f32 %v7705_v51, %v16135_v6  ;;  %v7707_v60 = vpop.f32.mrb[115].mxu0  ;;  %8572 = vmatmul.mubr.bf16.gmra.mrb[236].mxu1 %v16489_v1  ;;  %v7852_v9 = vmax.f32 %v7702_v45, 0.0 }
 0xa2f   : > { %v7708_v29 = vadd.f32 %v7707_v60, %v16138_v42  ;;  %v7853_v31 = vmax.f32 %v7704_v20, 0.0 }
 0xa30   : > { %v7854_v55 = vmax.f32 %v7706_v40, 0.0  ;;  %8839 = vmatmul.mubr.bf16.gmra.mrb[220].mxu0 %v16428_v21 }
 0xa31   : > { %v7855_v5 = vmax.f32 %v7708_v29, 0.0  ;;  %v8313_v14 = vpop.f32.mrb[132].mxu1  ;;  %8846 = vmatprep.mubr.bf16.mxu0 %v16442_v8 }
 0xa32   : > { %v16517_v15 = vpack.c.bf16 %v7854_v55, %v7852_v9  ;;  %v8315_v52 = vpop.f32.mrb[133].mxu1  ;;  %v16522_v39 = vadd.f32 %v8313_v14, %v16482_v37 }
 0xa33   : > { %v16519_v26 = vpack.c.bf16 %v7855_v5, %v7853_v31  ;;  %v7711_v58 = vpop.f32.mrb[116].mxu0  ;;  %v8317_v41 = vpop.f32.mrb[134].mxu1  ;;  %v16529_v22 = vadd.f32 %v8315_v52, %v16487_v56 }
 0xa34   : > { %v7712_v57 = vadd.f32 %v7711_v58, %v16135_v6  ;;  %v16526_v19 = vadd.f32 %v8317_v41, %v16482_v37  ;;  %v7713_v21 = vpop.f32.mrb[117].mxu0  ;;  %v8319_v10 = vpop.f32.mrb[135].mxu1 }
 0xa35   : > { %v7714_v8 = vadd.f32 %v7713_v21, %v16138_v42  ;;  %v16533_v32 = vadd.f32 %v8319_v10, %v16487_v56  ;;  %v7715_v59 = vpop.f32.mrb[118].mxu0  ;;  %8581 = vmatprep.mubr.bf16.mxu1 %v16519_v26 }
 0xa36   : > { %v7716_v46 = vadd.f32 %v7715_v59, %v16135_v6  ;;  %v7717_v13 = vpop.f32.mrb[119].mxu0  ;;  %8582 = vmatmul.mubr.bf16.gmra.mrb[240].mxu1 %v16517_v15  ;;  %v7856_v48 = vmax.f32 %v7712_v57, 0.0 }
 0xa37   : > { %v7718_v25 = vadd.f32 %v7717_v13, %v16138_v42  ;;  %v7857_v49 = vmax.f32 %v7714_v8, 0.0 }
 0xa38   : > { %v7858_v3 = vmax.f32 %v7716_v46, 0.0  ;;  %8847 = vmatmul.mubr.bf16.gmra.mrb[224].mxu0 %v16440_v4 }
 0xa39   : > { %v7859_v17 = vmax.f32 %v7718_v25, 0.0  ;;  %v8323_v30 = vpop.f32.mrb[136].mxu1  ;;  %8854 = vmatprep.mubr.bf16.mxu0 %v16454_v7 }
 0xa3a   : > { %v16545_v28 = vpack.c.bf16 %v7858_v3, %v7856_v48  ;;  %v8325_v23 = vpop.f32.mrb[137].mxu1  ;;  %v16550_v54 = vadd.f32 %v8323_v30, %v16482_v37  ;;  %v8008_v48 = vsub.s32 2, %v14586_v43 }
 0xa3b   : > { %v16547_v27 = vpack.c.bf16 %v7859_v17, %v7857_v49  ;;  %v7721_v34 = vpop.f32.mrb[120].mxu0  ;;  %v8327_v16 = vpop.f32.mrb[138].mxu1  ;;  %v16557_v63 = vadd.f32 %v8325_v23, %v16487_v56 }
 0xa3c   : > { %v7722_v38 = vadd.f32 %v7721_v34, %v16135_v6  ;;  %v16554_v45 = vadd.f32 %v8327_v16, %v16482_v37  ;;  %v7723_v4 = vpop.f32.mrb[121].mxu0  ;;  %v8329_v44 = vpop.f32.mrb[139].mxu1 }
 0xa3d   : > { %v7724_v7 = vadd.f32 %v7723_v4, %v16138_v42  ;;  %v16561_v20 = vadd.f32 %v8329_v44, %v16487_v56  ;;  %v7725_v51 = vpop.f32.mrb[122].mxu0  ;;  %8591 = vmatprep.mubr.bf16.mxu1 %v16547_v27  ;;  %v16602_v44 = vrot.slane %v16474_v50, %v8008_v48 }
 0xa3e   : > { %v7726_v60 = vadd.f32 %v7725_v51, %v16135_v6  ;;  %v7727_v29 = vpop.f32.mrb[123].mxu0  ;;  %8592 = vmatmul.mubr.bf16.gmra.mrb[244].mxu1 %v16545_v28  ;;  %v7860_v31 = vmax.f32 %v7722_v38, 0.0 }
 0xa3f   : > { %v7728_v9 = vadd.f32 %v7727_v29, %v16138_v42  ;;  %v7861_v14 = vmax.f32 %v7724_v7, 0.0 }
 0xa40   : > { %v7862_v5 = vmax.f32 %v7726_v60, 0.0  ;;  %8855 = vmatmul.mubr.bf16.gmra.mrb[228].mxu0 %v16452_v62 }
 0xa41   : > { %v7863_v52 = vmax.f32 %v7728_v9, 0.0  ;;  %v8333_v58 = vpop.f32.mrb[140].mxu1  ;;  %8862 = vmatprep.mubr.bf16.mxu0 %v16466_v2 }
 0xa42   : > { %v16573_v41 = vpack.c.bf16 %v7862_v5, %v7860_v31  ;;  %v8335_v57 = vpop.f32.mrb[141].mxu1  ;;  %v16578_v59 = vadd.f32 %v8333_v58, %v16482_v37  ;;  %v12999_v5 = vld [vmem:[%s14393_s1] sm:$0xff]  }
 0xa43   : > { %v16575_v21 = vpack.c.bf16 %v7863_v52, %v7861_v14  ;;  %v7731_v10 = vpop.f32.mrb[124].mxu0  ;;  %v8337_v8 = vpop.f32.mrb[142].mxu1  ;;  %v16586_v2 = vadd.f32 %v8335_v57, %v16487_v56 }
 0xa44   : > { %v7732_v46 = vadd.f32 %v7731_v10, %v16135_v6  ;;  %v16582_v13 = vadd.f32 %v8337_v8, %v16482_v37  ;;  %v7733_v62 = vpop.f32.mrb[125].mxu0  ;;  %v8339_v25 = vpop.f32.mrb[143].mxu1 }
 0xa45   : > { %v7734_v3 = vadd.f32 %v7733_v62, %v16138_v42  ;;  %v16590_v49 = vadd.f32 %v8339_v25, %v16487_v56  ;;  %v7735_v17 = vpop.f32.mrb[126].mxu0  ;;  %8601 = vmatprep.mubr.bf16.mxu1 %v16575_v21 }
 0xa46   : > { %v7736_v23 = vadd.f32 %v7735_v17, %v16135_v6  ;;  %v7737_v34 = vpop.f32.mrb[127].mxu0  ;;  %8602 = vmatmul.mubr.bf16.gmra.mrb[248].mxu1 %v16573_v41  ;;  %v7864_v38 = vmax.f32 %v7732_v46, 0.0  ;;  %v13000_v17 = vld [vmem:[%s14393_s1 + $0x8] sm:$0xff]  }
 0xa47   : > { %v7738_v43 = vadd.f32 %v7737_v34, %v16138_v42  ;;  %v7865_v7 = vmax.f32 %v7734_v3, 0.0 }
 0xa48   : > { %v7866_v4 = vmax.f32 %v7736_v23, 0.0  ;;  %8863 = vmatmul.mubr.bf16.gmra.mrb[232].mxu0 %v16464_v12 }
 0xa49   : > { %v7867_v51 = vmax.f32 %v7738_v43, 0.0  ;;  %v8343_v60 = vpop.f32.mrb[144].mxu1  ;;  %8870 = vmatprep.mubr.bf16.mxu0 %v16491_v24  ;;  %v13001_v43 = vld [vmem:[%s18287_s30] sm:$0xff]   ;;  %s18492_s30 = sld [smem:[#allocation98_spill]] }
 0xa4a   : > { %v16605_v6 = vpack.c.bf16 %v7866_v4, %v7864_v38  ;;  %v8345_v29 = vpop.f32.mrb[145].mxu1  ;;  %v16611_v14 = vadd.f32 %v8343_v60, %v16482_v37  ;;  %v13002_v38 = vld [vmem:[%s14393_s1 + $0x10] sm:$0xff]  }
 0xa4b   : > { %v16607_v9 = vpack.c.bf16 %v7867_v51, %v7865_v7  ;;  %v8347_v42 = vpop.f32.mrb[146].mxu1  ;;  %v8656_v31 = vpop.f32.mrb[128].mxu0  ;;  %v16618_v24 = vadd.f32 %v8345_v29, %v16487_v56 }
 0xa4c   : > { %v16614_v12 = vadd.f32 %v8347_v42, %v16482_v37  ;;  %v8657_v50 = vadd.f32 %v8656_v31, %v16602_v44  ;;  %v8349_v52 = vpop.f32.mrb[147].mxu1  ;;  %v8658_v58 = vpop.f32.mrb[129].mxu0 }
 0xa4d   : > { %v16621_v57 = vadd.f32 %v8349_v52, %v16487_v56  ;;  %8611 = vmatprep.mubr.bf16.mxu1 %v16607_v9  ;;  %v8659_v10 = vpop.f32.mrb[130].mxu0 }
 0xa4e   : > { %v8661_v46 = vpop.f32.mrb[131].mxu0  ;;  %10977 = vrot.lane.b32.xlu0 %v8657_v50, %s13828_s22  ;;  %8612 = vmatmul.mubr.bf16.gmra.mrb[252].mxu1 %v16605_v6  ;;  %v8660_v25 = vadd.f32 %v8659_v10, %v16602_v44  ;;  %v13004_v50 = vld [vmem:[%s18288_s26 + $0x8] sm:$0xff]  }
 0xa4f   : > { %12054 = vmatprep.mubr.bf16.mxu1 %v12999_v5  ;;  %s17794_s23 = scalar_lea.vmem %s18492_s30, %s11487_s14 }
 0xa50   : > { %8871 = vmatmul.mubr.bf16.gmra.mrb[236].mxu0 %v16489_v1 }
 0xa51   : > { %v8353_v48 = vpop.f32.mrb[148].mxu1  ;;  %8878 = vmatprep.mubr.bf16.mxu0 %v16519_v26 }
 0xa52   : > { %v8355_v3 = vpop.f32.mrb[149].mxu1  ;;  %10979 = vrot.lane.b32.xlu0 %v8660_v25, %s13828_s22  ;;  %v16640_v4 = vadd.f32 %v8353_v48, %v16482_v37  ;;  %v13003_v25 = vld [vmem:[%s14393_s1 + $0x18] sm:$0xff]  }
 0xa53   : > { %v8357_v23 = vpop.f32.mrb[150].mxu1  ;;  %v8664_v34 = vpop.f32.mrb[132].mxu0  ;;  %v16647_v60 = vadd.f32 %v8355_v3, %v16487_v56 }
 0xa54   : > { %v16643_v7 = vadd.f32 %v8357_v23, %v16482_v37  ;;  %v8665_v1 = vadd.f32 %v8664_v34, %v16602_v44  ;;  %v8359_v26 = vpop.f32.mrb[151].mxu1  ;;  %v8666_v51 = vpop.f32.mrb[133].mxu0  ;;  %v13007_v23 = vld [vmem:[%s18288_s26 + $0x10] sm:$0xff]  }
 0xa55   : > { %v16650_v29 = vadd.f32 %v8359_v26, %v16487_v56  ;;  %v8667_v42 = vpop.f32.mrb[134].mxu0 }
 0xa56   : > { %v8669_v5 = vpop.f32.mrb[135].mxu0  ;;  %10981 = vrot.lane.b32.xlu1 %v8665_v1, %s13828_s22  ;;  %12055 = vmatmul.mubr.bf16.vlgmr.msra.gmra.mrb[0].mxu1 %v13000_v17  ;;  %v8668_v58 = vadd.f32 %v8667_v42, %v16602_v44  ;;  %v13005_v17 = vld [vmem:[%s14393_s1 + $0x20] sm:$0xff]  }
 0xa57   : > { %9649 = vmatpush1.bf16.msra.mxu1 %v13001_v43  ;;  %12058 = vmatprep.mubr.bf16.mxu1 %v13002_v38 }
 0xa58   : > { %8879 = vmatmul.mubr.bf16.gmra.mrb[240].mxu0 %v16517_v15  ;;  %9650 = vmatprep.subr.bf16.mxu1 %v18177_v0 }
 0xa59   : > { %v8363_v10 = vpop.f32.mrb[152].mxu1  ;;  %8886 = vmatprep.mubr.bf16.mxu0 %v16547_v27 }
 0xa5a   : > { %v8365_v46 = vpop.f32.mrb[153].mxu1  ;;  %10983 = vrot.lane.b32.xlu1 %v8668_v58, %s13828_s22  ;;  %v16671_v34 = vadd.f32 %v8363_v10, %v16482_v37  ;;  %v13010_v58 = vld [vmem:[%s18288_s26 + $0x18] sm:$0xff]  }
 0xa5b   : > { %v8367_v48 = vpop.f32.mrb[154].mxu1  ;;  %v8672_v3 = vpop.f32.mrb[136].mxu0  ;;  %9651 = vmatpush1.bf16.msra.mxu1 %v13004_v50  ;;  %v16679_v1 = vadd.f32 %v8365_v46, %v16487_v56 }
 0xa5c   : > { %v16674_v15 = vadd.f32 %v8367_v48, %v16482_v37  ;;  %v8673_v27 = vadd.f32 %v8672_v3, %v16602_v44  ;;  %v8369_v43 = vpop.f32.mrb[155].mxu1  ;;  %v8674_v38 = vpop.f32.mrb[137].mxu0  ;;  %9652 = vmatprep.subr.bf16.mxu1 %v18177_v0 }
 0xa5d   : > { %v16682_v26 = vadd.f32 %v8369_v43, %v16487_v56  ;;  %v8675_v51 = vpop.f32.mrb[138].mxu0 }
 0xa5e   : > { %v8676_v5 = vadd.f32 %v8675_v51, %v16602_v44  ;;  %v8677_v50 = vpop.f32.mrb[139].mxu0  ;;  %10985 = vrot.lane.b32.xlu0 %v8673_v27, %s13828_s22  ;;  %12059 = vmatmul.mubr.bf16.gmra.mrb[4].mxu1 %v13003_v25  ;;  %v13006_v25 = vld [vmem:[%s14393_s1 + $0x28] sm:$0xff]   ;;  %v13013_v27 = vld [vmem:[%s18288_s26 + $0x20] sm:$0xff]  }
 0xa5f   : > { %12062 = vmatprep.mubr.bf16.mxu1 %v13005_v17  ;;  %9653 = vmatpush1.bf16.msra.mxu1 %v13007_v23  ;;  %v13008_v23 = vld [vmem:[%s14393_s1 + $0x30] sm:$0xff]  }
 0xa60   : > { %8887 = vmatmul.mubr.bf16.gmra.mrb[244].mxu0 %v16545_v28  ;;  %10987 = vrot.lane.b32.xlu1 %v8676_v5, %s13828_s22 }
 0xa61   : > { %v8373_v46 = vpop.f32.mrb[156].mxu1  ;;  %8894 = vmatprep.mubr.bf16.mxu0 %v16575_v21  ;;  %9654 = vmatprep.subr.bf16.mxu1 %v18177_v0 }
 0xa62   : > { %v8375_v48 = vpop.f32.mrb[157].mxu1  ;;  %v16703_v43 = vadd.f32 %v8373_v46, %v16482_v37 }
 0xa63   : > { %v8377_v3 = vpop.f32.mrb[158].mxu1  ;;  %v8680_v17 = vpop.f32.mrb[140].mxu0  ;;  %9655 = vmatpush1.bf16.msra.mxu1 %v13010_v58  ;;  %v16711_v5 = vadd.f32 %v8375_v48, %v16487_v56  ;;  %v13016_v48 = vld [vmem:[%s18288_s26 + $0x28] sm:$0xff]  }
 0xa64   : > { %v16706_v28 = vadd.f32 %v8377_v3, %v16482_v37  ;;  %v8681_v21 = vadd.f32 %v8680_v17, %v16602_v44  ;;  %v8379_v38 = vpop.f32.mrb[159].mxu1  ;;  %v8682_v51 = vpop.f32.mrb[141].mxu0  ;;  %9656 = vmatprep.subr.bf16.mxu1 %v18177_v0 }
 0xa65   : > { %v16714_v50 = vadd.f32 %v8379_v38, %v16487_v56  ;;  %v8683_v58 = vpop.f32.mrb[142].mxu0  ;;  %v13019_v51 = vld [vmem:[%s18288_s26 + $0x30] sm:$0xff]  }
 0xa66   : > { %v8684_v3 = vadd.f32 %v8683_v58, %v16602_v44  ;;  %v8685_v42 = vpop.f32.mrb[143].mxu0  ;;  %10989 = vrot.lane.b32.xlu0 %v8681_v21, %s13828_s22  ;;  %12063 = vmatmul.mubr.bf16.gmra.mrb[8].mxu1 %v13006_v25  ;;  %v13009_v25 = vld [vmem:[%s14393_s1 + $0x38] sm:$0xff]   ;;  %v13011_v21 = vld [vmem:[%s14393_s1 + $0x40] sm:$0xff]  }
 0xa67   : > { %12066 = vmatprep.mubr.bf16.mxu1 %v13008_v23  ;;  %9657 = vmatpush1.bf16.msra.mxu1 %v13013_v27 }
 0xa68   : > { %8895 = vmatmul.mubr.bf16.gmra.mrb[248].mxu0 %v16573_v41  ;;  %10991 = vrot.lane.b32.xlu1 %v8684_v3, %s13828_s22 }
 0xa69   : > { %v8383_v38 = vpop.f32.mrb[160].mxu1  ;;  %8902 = vmatprep.mubr.bf16.mxu0 %v16607_v9  ;;  %9658 = vmatprep.subr.bf16.mxu1 %v18177_v0 }
 0xa6a   : > { %v8385_v42 = vpop.f32.mrb[161].mxu1  ;;  %v16735_v58 = vadd.f32 %v8383_v38, %v16482_v37 }
 0xa6b   : > { %v8387_v23 = vpop.f32.mrb[162].mxu1  ;;  %v8688_v27 = vpop.f32.mrb[144].mxu0  ;;  %9659 = vmatpush1.bf16.msra.mxu1 %v13016_v48  ;;  %v16743_v17 = vadd.f32 %v8385_v42, %v16487_v56 }
 0xa6c   : > { %v16738_v41 = vadd.f32 %v8387_v23, %v16482_v37  ;;  %v8689_v9 = vadd.f32 %v8688_v27, %v16602_v44  ;;  %v8389_v3 = vpop.f32.mrb[163].mxu1  ;;  %v8690_v46 = vpop.f32.mrb[145].mxu0  ;;  %9660 = vmatprep.subr.bf16.mxu1 %v18177_v0 }
 0xa6d   : > { %v16746_v48 = vadd.f32 %v8389_v3, %v16487_v56  ;;  %v8691_v10 = vpop.f32.mrb[146].mxu0  ;;  %v13022_v46 = vld [vmem:[%s18288_s26 + $0x38] sm:$0xff]  }
 0xa6e   : > { %v8692_v23 = vadd.f32 %v8691_v10, %v16602_v44  ;;  %v8693_v31 = vpop.f32.mrb[147].mxu0  ;;  %10993 = vrot.lane.b32.xlu0 %v8689_v9, %s13828_s22  ;;  %12067 = vmatmul.mubr.bf16.gmra.mrb[12].mxu1 %v13009_v25  ;;  %v13012_v10 = vld [vmem:[%s14393_s1 + $0x48] sm:$0xff]  }
 0xa6f   : > { %12070 = vmatprep.mubr.bf16.mxu1 %v13011_v21  ;;  %9661 = vmatpush1.bf16.msra.mxu1 %v13019_v51  ;;  %v13014_v21 = vld [vmem:[%s14393_s1 + $0x50] sm:$0xff]   ;;  %v13025_v51 = vld [vmem:[%s18288_s26 + $0x40] sm:$0xff]  }
 0xa70   : > { %10995 = vrot.lane.b32.xlu1 %v8692_v23, %s13828_s22  ;;  %8903 = vmatmul.mubr.bf16.gmra.mrb[252].mxu0 %v16605_v6 }
 0xa71   : > { %v8393_v27 = vpop.f32.mrb[164].mxu1  ;;  %9662 = vmatprep.subr.bf16.mxu1 %v18177_v0 }
 0xa72   : > { %v8395_v31 = vpop.f32.mrb[165].mxu1  ;;  %v16766_v3 = vadd.f32 %v8393_v27, %v16482_v37 }
 0xa73   : > { %v8397_v9 = vpop.f32.mrb[166].mxu1  ;;  %v8696_v25 = vpop.f32.mrb[148].mxu0  ;;  %9663 = vmatpush1.bf16.msra.mxu1 %v13022_v46  ;;  %v16774_v52 = vadd.f32 %v8395_v31, %v16487_v56 }
 0xa74   : > { %v16769_v23 = vadd.f32 %v8397_v9, %v16482_v37  ;;  %v8697_v6 = vadd.f32 %v8696_v25, %v16602_v44  ;;  %v8399_v38 = vpop.f32.mrb[167].mxu1  ;;  %v8698_v42 = vpop.f32.mrb[149].mxu0  ;;  %9664 = vmatprep.subr.bf16.mxu1 %v18177_v0 }
 0xa75   : > { %v16777_v46 = vadd.f32 %v8399_v38, %v16487_v56  ;;  %v8699_v8 = vpop.f32.mrb[150].mxu0  ;;  %v13028_v42 = vld [vmem:[%s18288_s26 + $0x48] sm:$0xff]  }
 0xa76   : > { %v8700_v9 = vadd.f32 %v8699_v8, %v16602_v44  ;;  %v8701_v62 = vpop.f32.mrb[151].mxu0  ;;  %10997 = vrot.lane.b32.xlu0 %v8697_v6, %s13828_s22  ;;  %12071 = vmatmul.mubr.bf16.gmra.mrb[16].mxu1 %v13012_v10  ;;  %v13015_v8 = vld [vmem:[%s14393_s1 + $0x58] sm:$0xff]   ;;  %v13017_v6 = vld [vmem:[%s14393_s1 + $0x60] sm:$0xff]   ;;  %v13031_v10 = vld [vmem:[%s18288_s26 + $0x50] sm:$0xff]  }
 0xa77   : > { %12074 = vmatprep.mubr.bf16.mxu1 %v13014_v21  ;;  %9665 = vmatpush1.bf16.msra.mxu1 %v13025_v51 }
 0xa78   : > { %10999 = vrot.lane.b32.xlu1 %v8700_v9, %s13828_s22  ;;  %9666 = vmatprep.subr.bf16.mxu1 %v18177_v0 }
 0xa79   : > { %v8403_v31 = vpop.f32.mrb[168].mxu1 }
 0xa7a   : > { %v8405_v25 = vpop.f32.mrb[169].mxu1  ;;  %v16796_v21 = vadd.f32 %v8403_v31, %v16482_v37 }
 0xa7b   : > { %v8407_v62 = vpop.f32.mrb[170].mxu1  ;;  %v8704_v27 = vpop.f32.mrb[152].mxu0  ;;  %9667 = vmatpush1.bf16.msra.mxu1 %v13028_v42  ;;  %v16804_v16 = vadd.f32 %v8405_v25, %v16487_v56 }
 0xa7c   : > { %18289 = vst [vmem:[#allocation36_spill] sm:$0xff] %v16796_v21  ;;  %v16799_v51 = vadd.f32 %v8407_v62, %v16482_v37  ;;  %v8705_v9 = vadd.f32 %v8704_v27, %v16602_v44  ;;  %v8409_v38 = vpop.f32.mrb[171].mxu1  ;;  %v8706_v30 = vpop.f32.mrb[153].mxu0  ;;  %9668 = vmatprep.subr.bf16.mxu1 %v18177_v0  ;;  %v13029_v21 = vld [vmem:[%s14393_s1 + $0xa0] sm:$0xff]  }
 0xa7d   : > { %v16807_v42 = vadd.f32 %v8409_v38, %v16487_v56  ;;  %v8707_v40 = vpop.f32.mrb[154].mxu0  ;;  %v13034_v30 = vld [vmem:[%s18288_s26 + $0x58] sm:$0xff]  }
 0xa7e   : > { %v8708_v62 = vadd.f32 %v8707_v40, %v16602_v44  ;;  %v8709_v55 = vpop.f32.mrb[155].mxu0  ;;  %11001 = vrot.lane.b32.xlu0 %v8705_v9, %s13828_s22  ;;  %12075 = vmatmul.mubr.bf16.gmra.mrb[20].mxu1 %v13015_v8  ;;  %v13018_v40 = vld [vmem:[%s14393_s1 + $0x68] sm:$0xff]   ;;  %v13020_v9 = vld [vmem:[%s14393_s1 + $0x70] sm:$0xff]   ;;  %v13037_v8 = vld [vmem:[%s18288_s26 + $0x60] sm:$0xff]  }
 0xa7f   : > { %12078 = vmatprep.mubr.bf16.mxu1 %v13017_v6  ;;  %9669 = vmatpush1.bf16.msra.mxu1 %v13031_v10 }
 0xa80   : > { %11003 = vrot.lane.b32.xlu1 %v8708_v62, %s13828_s22  ;;  %9670 = vmatprep.subr.bf16.mxu1 %v18177_v0 }
 0xa81   : > { %v8413_v38 = vpop.f32.mrb[172].mxu1 }
 0xa82   : > { %v8415_v25 = vpop.f32.mrb[173].mxu1  ;;  %v16826_v6 = vadd.f32 %v8413_v38, %v16482_v37 }
 0xa83   : > { %v8417_v55 = vpop.f32.mrb[174].mxu1  ;;  %v8712_v31 = vpop.f32.mrb[156].mxu0  ;;  %9671 = vmatpush1.bf16.msra.mxu1 %v13034_v30  ;;  %v16834_v35 = vadd.f32 %v8415_v25, %v16487_v56 }
 0xa84   : > { %18290 = vst [vmem:[#allocation37_spill] sm:$0xff] %v16826_v6  ;;  %v16829_v10 = vadd.f32 %v8417_v55, %v16482_v37  ;;  %v8713_v62 = vadd.f32 %v8712_v31, %v16602_v44  ;;  %v8419_v27 = vpop.f32.mrb[175].mxu1  ;;  %v8714_v36 = vpop.f32.mrb[157].mxu0  ;;  %9672 = vmatprep.subr.bf16.mxu1 %v18177_v0  ;;  %v18296_v6 = vmov 0  }
 0xa85   : > { %18292 = vst [vmem:[#allocation39_spill] sm:$0xff] %v16834_v35  ;;  %v16837_v30 = vadd.f32 %v8419_v27, %v16487_v56  ;;  %v8715_v11 = vpop.f32.mrb[158].mxu0  ;;  %v13040_v36 = vld [vmem:[%s18288_s26 + $0x68] sm:$0xff]  }
 0xa86   : > { %18291 = vst [vmem:[#allocation38_spill] sm:$0xff] %v16829_v10  ;;  %v8716_v55 = vadd.f32 %v8715_v11, %v16602_v44  ;;  %v8717_v18 = vpop.f32.mrb[159].mxu0  ;;  %11005 = vrot.lane.b32.xlu0 %v8713_v62, %s13828_s22  ;;  %12079 = vmatmul.mubr.bf16.gmra.mrb[24].mxu1 %v13018_v40  ;;  %v13021_v11 = vld [vmem:[%s14393_s1 + $0x78] sm:$0xff]   ;;  %v13023_v62 = vld [vmem:[%s14393_s1 + $0x80] sm:$0xff]   ;;  %v13043_v40 = vld [vmem:[%s18288_s26 + $0x70] sm:$0xff]  }
 0xa87   : > { %18293 = vst [vmem:[#allocation40_spill] sm:$0xff] %v16837_v30  ;;  %12082 = vmatprep.mubr.bf16.mxu1 %v13020_v9  ;;  %9673 = vmatpush1.bf16.msra.mxu1 %v13037_v8 }
 0xa88   : > { %11007 = vrot.lane.b32.xlu1 %v8716_v55, %s13828_s22  ;;  %9674 = vmatprep.subr.bf16.mxu1 %v18177_v0 }
 0xa89   : > { %v8423_v27 = vpop.f32.mrb[176].mxu1 }
 0xa8a   : > { %v8425_v25 = vpop.f32.mrb[177].mxu1  ;;  %v16856_v9 = vadd.f32 %v8423_v27, %v16482_v37 }
 0xa8b   : > { %v8427_v18 = vpop.f32.mrb[178].mxu1  ;;  %v8720_v38 = vpop.f32.mrb[160].mxu0  ;;  %9675 = vmatpush1.bf16.msra.mxu1 %v13040_v36  ;;  %v16864_v10 = vadd.f32 %v8425_v25, %v16487_v56 }
 0xa8c   : > { %18294 = vst [vmem:[#allocation41_spill] sm:$0xff] %v16856_v9  ;;  %v16859_v8 = vadd.f32 %v8427_v18, %v16482_v37  ;;  %v8721_v55 = vadd.f32 %v8720_v38, %v16602_v44  ;;  %v8429_v31 = vpop.f32.mrb[179].mxu1  ;;  %v8722_v0 = vpop.f32.mrb[161].mxu0  ;;  %9676 = vmatprep.subr.bf16.mxu1 %v18296_v6 }
 0xa8d   : > { %18297 = vst [vmem:[#allocation43_spill] sm:$0xff] %v16864_v10  ;;  %v16867_v36 = vadd.f32 %v8429_v31, %v16487_v56  ;;  %v8723_v35 = vpop.f32.mrb[162].mxu0  ;;  %v13046_v0 = vld [vmem:[%s18288_s26 + $0x78] sm:$0xff]  }
 0xa8e   : > { %18295 = vst [vmem:[#allocation42_spill] sm:$0xff] %v16859_v8  ;;  %v8724_v18 = vadd.f32 %v8723_v35, %v16602_v44  ;;  %v8725_v30 = vpop.f32.mrb[163].mxu0  ;;  %11009 = vrot.lane.b32.xlu0 %v8721_v55, %s13828_s22  ;;  %12083 = vmatmul.mubr.bf16.gmra.mrb[28].mxu1 %v13021_v11  ;;  %v13024_v35 = vld [vmem:[%s14393_s1 + $0x88] sm:$0xff]   ;;  %v13026_v55 = vld [vmem:[%s14393_s1 + $0x90] sm:$0xff]  }
 0xa8f   : > { %18298 = vst [vmem:[#allocation44_spill] sm:$0xff] %v16867_v36  ;;  %12086 = vmatprep.mubr.bf16.mxu1 %v13023_v62  ;;  %9677 = vmatpush1.bf16.msra.mxu1 %v13043_v40 }
 0xa90   : > { %11011 = vrot.lane.b32.xlu1 %v8724_v18, %s13828_s22  ;;  %9678 = vmatprep.subr.bf16.mxu1 %v18296_v6 }
 0xa91   : > { %v8433_v31 = vpop.f32.mrb[180].mxu1 }
 0xa92   : > { %v8435_v25 = vpop.f32.mrb[181].mxu1  ;;  %v16883_v11 = vadd.f32 %v8433_v31, %v16482_v37 }
 0xa93   : > { %v8437_v30 = vpop.f32.mrb[182].mxu1  ;;  %v8728_v27 = vpop.f32.mrb[164].mxu0  ;;  %9679 = vmatpush1.bf16.msra.mxu1 %v13046_v0  ;;  %v16890_v6 = vadd.f32 %v8435_v25, %v16487_v56 }
 0xa94   : > { %18299 = vst [vmem:[#allocation45_spill] sm:$0xff] %v16883_v11  ;;  %v16886_v62 = vadd.f32 %v8437_v30, %v16482_v37  ;;  %v8729_v40 = vadd.f32 %v8728_v27, %v16602_v44  ;;  %v8439_v38 = vpop.f32.mrb[183].mxu1  ;;  %v8730_v18 = vpop.f32.mrb[165].mxu0 }
 0xa95   : > { %18301 = vst [vmem:[#allocation47_spill] sm:$0xff] %v16890_v6  ;;  %v16893_v9 = vadd.f32 %v8439_v38, %v16487_v56  ;;  %v8731_v8 = vpop.f32.mrb[166].mxu0  ;;  %v13027_v38 = vld [vmem:[%s14393_s1 + $0x98] sm:$0xff]  }
 0xa96   : > { %18300 = vst [vmem:[#allocation46_spill] sm:$0xff] %v16886_v62  ;;  %v8732_v31 = vadd.f32 %v8731_v8, %v16602_v44  ;;  %v8733_v30 = vpop.f32.mrb[167].mxu0  ;;  %11013 = vrot.lane.b32.xlu0 %v8729_v40, %s13828_s22  ;;  %12087 = vmatmul.mubr.bf16.gmra.mrb[32].mxu1 %v13024_v35 }
 0xa97   : > { %18302 = vst [vmem:[#allocation48_spill] sm:$0xff] %v16893_v9  ;;  %12090 = vmatprep.mubr.bf16.mxu1 %v13026_v55  ;;  %v13032_v9 = vld [vmem:[%s14393_s1 + $0xb0] sm:$0xff]  }
 0xa98   : > { %11015 = vrot.lane.b32.xlu1 %v8732_v31, %s13828_s22 }
 0xa99   : > { %v8443_v25 = vpop.f32.mrb[184].mxu1 }
 0xa9a   : > { %v8445_v18 = vpop.f32.mrb[185].mxu1  ;;  %v16905_v0 = vadd.f32 %v8443_v25, %v16482_v37 }
 0xa9b   : > { %v8447_v10 = vpop.f32.mrb[186].mxu1  ;;  %v8736_v36 = vpop.f32.mrb[168].mxu0  ;;  %v16912_v30 = vadd.f32 %v8445_v18, %v16487_v56 }
 0xa9c   : > { %18303 = vst [vmem:[#allocation49_spill] sm:$0xff] %v16905_v0  ;;  %v16908_v8 = vadd.f32 %v8447_v10, %v16482_v37  ;;  %v8737_v35 = vadd.f32 %v8736_v36, %v16602_v44  ;;  %v8449_v55 = vpop.f32.mrb[187].mxu1  ;;  %v8738_v40 = vpop.f32.mrb[169].mxu0 }
 0xa9d   : > { %18305 = vst [vmem:[#allocation51_spill] sm:$0xff] %v16912_v30  ;;  %v16915_v31 = vadd.f32 %v8449_v55, %v16487_v56  ;;  %v8739_v27 = vpop.f32.mrb[170].mxu0  ;;  %v13030_v55 = vld [vmem:[%s14393_s1 + $0xa8] sm:$0xff]  }
 0xa9e   : > { %18304 = vst [vmem:[#allocation50_spill] sm:$0xff] %v16908_v8  ;;  %v8740_v11 = vadd.f32 %v8739_v27, %v16602_v44  ;;  %v8741_v10 = vpop.f32.mrb[171].mxu0  ;;  %11017 = vrot.lane.b32.xlu0 %v8737_v35, %s13828_s22  ;;  %12091 = vmatmul.mubr.bf16.gmra.mrb[36].mxu1 %v13027_v38 }
 0xa9f   : > { %18306 = vst [vmem:[#allocation52_spill] sm:$0xff] %v16915_v31  ;;  %12094 = vmatprep.mubr.bf16.mxu1 %v13029_v21  ;;  %v13035_v31 = vld [vmem:[%s14393_s1 + $0xc0] sm:$0xff]  }
 0xaa0   : > { %11019 = vrot.lane.b32.xlu1 %v8740_v11, %s13828_s22 }
 0xaa1   : > { %v8453_v18 = vpop.f32.mrb[188].mxu1 }
 0xaa2   : > { %v8455_v40 = vpop.f32.mrb[189].mxu1  ;;  %v16927_v25 = vadd.f32 %v8453_v18, %v16482_v37 }
 0xaa3   : > { %v8457_v62 = vpop.f32.mrb[190].mxu1  ;;  %v8744_v6 = vpop.f32.mrb[172].mxu0  ;;  %v16934_v10 = vadd.f32 %v8455_v40, %v16487_v56 }
 0xaa4   : > { %18307 = vst [vmem:[#allocation53_spill] sm:$0xff] %v16927_v25  ;;  %v16930_v27 = vadd.f32 %v8457_v62, %v16482_v37  ;;  %v8745_v38 = vadd.f32 %v8744_v6, %v16602_v44  ;;  %v8459_v21 = vpop.f32.mrb[191].mxu1  ;;  %v8746_v35 = vpop.f32.mrb[173].mxu0 }
 0xaa5   : > { %18309 = vst [vmem:[#allocation55_spill] sm:$0xff] %v16934_v10  ;;  %v16937_v11 = vadd.f32 %v8459_v21, %v16487_v56  ;;  %v8747_v36 = vpop.f32.mrb[174].mxu0  ;;  %v13033_v21 = vld [vmem:[%s14393_s1 + $0xb8] sm:$0xff]  }
 0xaa6   : > { %18308 = vst [vmem:[#allocation54_spill] sm:$0xff] %v16930_v27  ;;  %v8748_v0 = vadd.f32 %v8747_v36, %v16602_v44  ;;  %v8749_v62 = vpop.f32.mrb[175].mxu0  ;;  %11021 = vrot.lane.b32.xlu0 %v8745_v38, %s13828_s22  ;;  %12095 = vmatmul.mubr.bf16.gmra.mrb[40].mxu1 %v13030_v55 }
 0xaa7   : > { %18310 = vst [vmem:[#allocation56_spill] sm:$0xff] %v16937_v11  ;;  %12098 = vmatprep.mubr.bf16.mxu1 %v13032_v9  ;;  %v13038_v11 = vld [vmem:[%s14393_s1 + $0xd0] sm:$0xff]  }
 0xaa8   : > { %11023 = vrot.lane.b32.xlu1 %v8748_v0, %s13828_s22 }
 0xaa9   : > { %v8463_v40 = vpop.f32.mrb[192].mxu1 }
 0xaaa   : > { %v8465_v35 = vpop.f32.mrb[193].mxu1  ;;  %v16949_v18 = vadd.f32 %v8463_v40, %v16482_v37 }
 0xaab   : > { %v8467_v8 = vpop.f32.mrb[194].mxu1  ;;  %v8752_v30 = vpop.f32.mrb[176].mxu0  ;;  %v16956_v62 = vadd.f32 %v8465_v35, %v16487_v56 }
 0xaac   : > { %18311 = vst [vmem:[#allocation57_spill] sm:$0xff] %v16949_v18  ;;  %v16952_v36 = vadd.f32 %v8467_v8, %v16482_v37  ;;  %v8753_v55 = vadd.f32 %v8752_v30, %v16602_v44  ;;  %v8469_v9 = vpop.f32.mrb[195].mxu1  ;;  %v8754_v38 = vpop.f32.mrb[177].mxu0 }
 0xaad   : > { %18313 = vst [vmem:[#allocation59_spill] sm:$0xff] %v16956_v62  ;;  %v16959_v0 = vadd.f32 %v8469_v9, %v16487_v56  ;;  %v8755_v6 = vpop.f32.mrb[178].mxu0  ;;  %v13036_v9 = vld [vmem:[%s14393_s1 + $0xc8] sm:$0xff]  }
 0xaae   : > { %18312 = vst [vmem:[#allocation58_spill] sm:$0xff] %v16952_v36  ;;  %v8756_v25 = vadd.f32 %v8755_v6, %v16602_v44  ;;  %v8757_v8 = vpop.f32.mrb[179].mxu0  ;;  %11025 = vrot.lane.b32.xlu0 %v8753_v55, %s13828_s22  ;;  %12099 = vmatmul.mubr.bf16.gmra.mrb[44].mxu1 %v13033_v21  ;;  %v13039_v36 = vld [vmem:[%s14393_s1 + $0xd8] sm:$0xff]  }
 0xaaf   : > { %18314 = vst [vmem:[#allocation60_spill] sm:$0xff] %v16959_v0  ;;  %12102 = vmatprep.mubr.bf16.mxu1 %v13035_v31  ;;  %v13047_v31 = vld [vmem:[%s18317_s3] sm:$0xff]  }
 0xab0   : > { %11027 = vrot.lane.b32.xlu1 %v8756_v25, %s13828_s22  ;;  %12118 = vmatprep.subr.bf16.mxu0 %v13047_v31 }
 0xab1   : > { %v8473_v35 = vpop.f32.mrb[196].mxu1  ;;  %12119 = vmatpush3.bf16.msra.mxu0 %v13047_v31 }
 0xab2   : > { %v8475_v38 = vpop.f32.mrb[197].mxu1  ;;  %v16971_v40 = vadd.f32 %v8473_v35, %v16482_v37 }
 0xab3   : > { %v8477_v27 = vpop.f32.mrb[198].mxu1  ;;  %v8760_v10 = vpop.f32.mrb[180].mxu0  ;;  %v16981_v25 = vadd.f32 %v8475_v38, %v16487_v56 }
 0xab4   : > { %18315 = vst [vmem:[#allocation61_spill] sm:$0xff] %v16971_v40  ;;  %v16974_v6 = vadd.f32 %v8477_v27, %v16482_v37  ;;  %v8761_v21 = vadd.f32 %v8760_v10, %v16602_v44  ;;  %v8479_v55 = vpop.f32.mrb[199].mxu1  ;;  %v8762_v8 = vpop.f32.mrb[181].mxu0  ;;  %v13041_v27 = vld [vmem:[%s14393_s1 + $0xe0] sm:$0xff]  }
 0xab5   : > { %18318 = vst [vmem:[#allocation63_spill] sm:$0xff] %v16981_v25  ;;  %v16984_v30 = vadd.f32 %v8479_v55, %v16487_v56  ;;  %v8763_v35 = vpop.f32.mrb[182].mxu0 }
 0xab6   : > { %18316 = vst [vmem:[#allocation62_spill] sm:$0xff] %v16974_v6  ;;  %v8764_v10 = vadd.f32 %v8763_v35, %v16602_v44  ;;  %v8765_v18 = vpop.f32.mrb[183].mxu0  ;;  %11029 = vrot.lane.b32.xlu0 %v8761_v21, %s13828_s22  ;;  %12103 = vmatmul.mubr.bf16.gmra.mrb[48].mxu1 %v13036_v9 }
 0xab7   : > { %18319 = vst [vmem:[#allocation64_spill] sm:$0xff] %v16984_v30  ;;  %12106 = vmatprep.mubr.bf16.mxu1 %v13038_v11  ;;  %v13044_v30 = vld [vmem:[%s14393_s1 + $0xf0] sm:$0xff]  }
 0xab8   : > { %11031 = vrot.lane.b32.xlu1 %v8764_v10, %s13828_s22 }
 0xab9   : > { %v8483_v38 = vpop.f32.mrb[200].mxu1 }
 0xaba   : > { %v8485_v55 = vpop.f32.mrb[201].mxu1  ;;  %v16996_v35 = vadd.f32 %v8483_v38, %v16482_v37 }
 0xabb   : > { %v8487_v62 = vpop.f32.mrb[202].mxu1  ;;  %v8768_v0 = vpop.f32.mrb[184].mxu0  ;;  %v17003_v10 = vadd.f32 %v8485_v55, %v16487_v56 }
 0xabc   : > { %18320 = vst [vmem:[#allocation65_spill] sm:$0xff] %v16996_v35  ;;  %v16999_v18 = vadd.f32 %v8487_v62, %v16482_v37  ;;  %v8769_v9 = vadd.f32 %v8768_v0, %v16602_v44  ;;  %v8489_v11 = vpop.f32.mrb[203].mxu1  ;;  %v8770_v21 = vpop.f32.mrb[185].mxu0 }
 0xabd   : > { %18322 = vst [vmem:[#allocation67_spill] sm:$0xff] %v17003_v10  ;;  %v17006_v31 = vadd.f32 %v8489_v11, %v16487_v56  ;;  %v8771_v8 = vpop.f32.mrb[186].mxu0  ;;  %v13042_v11 = vld [vmem:[%s14393_s1 + $0xe8] sm:$0xff]  }
 0xabe   : > { %18321 = vst [vmem:[#allocation66_spill] sm:$0xff] %v16999_v18  ;;  %v8772_v40 = vadd.f32 %v8771_v8, %v16602_v44  ;;  %v8773_v62 = vpop.f32.mrb[187].mxu0  ;;  %11033 = vrot.lane.b32.xlu0 %v8769_v9, %s13828_s22  ;;  %12107 = vmatmul.mubr.bf16.gmra.mrb[52].mxu1 %v13039_v36 }
 0xabf   : > { %18323 = vst [vmem:[#allocation68_spill] sm:$0xff] %v17006_v31  ;;  %12110 = vmatprep.mubr.bf16.mxu1 %v13041_v27 }
 0xac0   : > { %11035 = vrot.lane.b32.xlu1 %v8772_v40, %s13828_s22 }
 0xac1   : > { %v8493_v55 = vpop.f32.mrb[204].mxu1 }
 0xac2   : > { %v8495_v21 = vpop.f32.mrb[205].mxu1  ;;  %v17018_v38 = vadd.f32 %v8493_v55, %v16482_v37 }
 0xac3   : > { %v8497_v6 = vpop.f32.mrb[206].mxu1  ;;  %v8776_v25 = vpop.f32.mrb[188].mxu0  ;;  %v17025_v27 = vadd.f32 %v8495_v21, %v16487_v56 }
 0xac4   : > { %18324 = vst [vmem:[#allocation69_spill] sm:$0xff] %v17018_v38  ;;  %v17021_v8 = vadd.f32 %v8497_v6, %v16482_v37  ;;  %v8777_v36 = vadd.f32 %v8776_v25, %v16602_v44  ;;  %v8499_v9 = vpop.f32.mrb[207].mxu1  ;;  %v8778_v62 = vpop.f32.mrb[189].mxu0 }
 0xac5   : > { %v17028_v40 = vadd.f32 %v8499_v9, %v16487_v56  ;;  %v8779_v0 = vpop.f32.mrb[190].mxu0  ;;  %v13045_v9 = vld [vmem:[%s14393_s1 + $0xf8] sm:$0xff]  }
 0xac6   : > { %18325 = vst [vmem:[#allocation70_spill] sm:$0xff] %v17021_v8  ;;  %v8780_v55 = vadd.f32 %v8779_v0, %v16602_v44  ;;  %v8781_v18 = vpop.f32.mrb[191].mxu0  ;;  %11037 = vrot.lane.b32.xlu0 %v8777_v36, %s13828_s22  ;;  %12111 = vmatmul.mubr.bf16.gmra.mrb[56].mxu1 %v13042_v11 }
 0xac7   : > { %12114 = vmatprep.mubr.bf16.mxu1 %v13044_v30 }
 0xac8   : > { %11039 = vrot.lane.b32.xlu1 %v8780_v55, %s13828_s22 }
 0xac9   : > { %v8503_v25 = vpop.f32.mrb[208].mxu1 }
 0xaca   : > { %v8505_v21 = vpop.f32.mrb[209].mxu1  ;;  %v17039_v31 = vadd.f32 %v8503_v25, %v16482_v37 }
 0xacb   : > { %v8507_v62 = vpop.f32.mrb[210].mxu1  ;;  %v8784_v10 = vpop.f32.mrb[192].mxu0  ;;  %v17046_v35 = vadd.f32 %v8505_v21, %v16487_v56  ;;  %v18326_v21 = vpack.c.bf16 %v16505_v33, %v16501_v47  ;;  %v13048_v47 = vld [vmem:[%s18317_s3 + $0x8] sm:$0xff]  }
 0xacc   : > { %v17042_v0 = vadd.f32 %v8507_v62, %v16482_v37  ;;  %v8785_v18 = vadd.f32 %v8784_v10, %v16602_v44  ;;  %v8509_v11 = vpop.f32.mrb[211].mxu1  ;;  %v8786_v36 = vpop.f32.mrb[193].mxu0  ;;  %12120 = vmatprep.subr.bf16.mxu0 %v13048_v47 }
 0xacd   : > { %v17049_v30 = vadd.f32 %v8509_v11, %v16487_v56  ;;  %v8787_v55 = vpop.f32.mrb[194].mxu0  ;;  %12121 = vmatpush3.bf16.msra.mxu0 %v13048_v47 }
 0xace   : > { %v8788_v25 = vadd.f32 %v8787_v55, %v16602_v44  ;;  %v8789_v38 = vpop.f32.mrb[195].mxu0  ;;  %11041 = vrot.lane.b32.xlu0 %v8785_v18, %s13828_s22  ;;  %12115 = vmatmul.mubr.bf16.gmra.mrb[60].mxu1 %v13045_v9 }
 0xacf   : > { %9680 = vmatprep.mubr.bf16.mxu1 %v18326_v21 }
 0xad0   : > { %11043 = vrot.lane.b32.xlu1 %v8788_v25, %s13828_s22 }
 0xad1   : > { %v8513_v62 = vpop.f32.mrb[212].mxu1 }
 0xad2   : > { %v8515_v11 = vpop.f32.mrb[213].mxu1  ;;  %v17062_v6 = vadd.f32 %v8513_v62, %v16482_v37 }
 0xad3   : > { %v8517_v36 = vpop.f32.mrb[214].mxu1  ;;  %v8792_v8 = vpop.f32.mrb[196].mxu0  ;;  %v17072_v33 = vadd.f32 %v8515_v11, %v16487_v56 }
 0xad4   : > { %v17065_v38 = vadd.f32 %v8517_v36, %v16482_v37  ;;  %v8793_v9 = vadd.f32 %v8792_v8, %v16602_v44  ;;  %v8519_v18 = vpop.f32.mrb[215].mxu1  ;;  %v8794_v55 = vpop.f32.mrb[197].mxu0  ;;  %v18327_v8 = vpack.c.bf16 %v16498_v53, %v16494_v61 }
 0xad5   : > { %v17075_v25 = vadd.f32 %v8519_v18, %v16487_v56  ;;  %v8795_v21 = vpop.f32.mrb[198].mxu0  ;;  %v18328_v18 = vpack.c.bf16 %v16533_v32, %v16529_v22 }
 0xad6   : > { %v8796_v36 = vadd.f32 %v8795_v21, %v16602_v44  ;;  %v8797_v10 = vpop.f32.mrb[199].mxu0  ;;  %11045 = vrot.lane.b32.xlu0 %v8793_v9, %s13828_s22  ;;  %9681 = vmatmul.mubr.bf16.vlgmr.msra.gmra.mrb[64].mxu1 %v18327_v8 }
 0xad7   : > { %9688 = vmatprep.mubr.bf16.mxu1 %v18328_v18 }
 0xad8   : > { %11047 = vrot.lane.b32.xlu1 %v8796_v36, %s13828_s22 }
 0xad9   : > { %v8523_v55 = vpop.f32.mrb[216].mxu1 }
 0xada   : > { %v8525_v21 = vpop.f32.mrb[217].mxu1  ;;  %v17091_v9 = vadd.f32 %v8523_v55, %v16482_v37 }
 0xadb   : > { %v8527_v10 = vpop.f32.mrb[218].mxu1  ;;  %v8800_v62 = vpop.f32.mrb[200].mxu0  ;;  %v17098_v22 = vadd.f32 %v8525_v21, %v16487_v56  ;;  %v18330_v21 = vpack.c.bf16 %v16561_v20, %v16557_v63 }
 0xadc   : > { %v17094_v61 = vadd.f32 %v8527_v10, %v16482_v37  ;;  %v8801_v53 = vadd.f32 %v8800_v62, %v16602_v44  ;;  %v8529_v8 = vpop.f32.mrb[219].mxu1  ;;  %v8802_v11 = vpop.f32.mrb[201].mxu0  ;;  %v18329_v62 = vpack.c.bf16 %v16526_v19, %v16522_v39 }
 0xadd   : > { %v17101_v32 = vadd.f32 %v8529_v8, %v16487_v56  ;;  %v8803_v47 = vpop.f32.mrb[202].mxu0 }
 0xade   : > { %v8804_v18 = vadd.f32 %v8803_v47, %v16602_v44  ;;  %v8805_v55 = vpop.f32.mrb[203].mxu0  ;;  %11049 = vrot.lane.b32.xlu0 %v8801_v53, %s13828_s22  ;;  %9689 = vmatmul.mubr.bf16.gmra.mrb[68].mxu1 %v18329_v62 }
 0xadf   : > { %9696 = vmatprep.mubr.bf16.mxu1 %v18330_v21 }
 0xae0   : > { %11051 = vrot.lane.b32.xlu1 %v8804_v18, %s13828_s22 }
 0xae1   : > { %v8533_v10 = vpop.f32.mrb[220].mxu1 }
 0xae2   : > { %v8535_v8 = vpop.f32.mrb[221].mxu1  ;;  %v17117_v55 = vadd.f32 %v8533_v10, %v16482_v37 }
 0xae3   : > { %v8537_v36 = vpop.f32.mrb[222].mxu1  ;;  %v8808_v47 = vpop.f32.mrb[204].mxu0  ;;  %v17124_v11 = vadd.f32 %v8535_v8, %v16487_v56 }
 0xae4   : > { %v17120_v53 = vadd.f32 %v8537_v36, %v16482_v37  ;;  %v8809_v39 = vadd.f32 %v8808_v47, %v16602_v44  ;;  %v8539_v19 = vpop.f32.mrb[223].mxu1  ;;  %v8810_v62 = vpop.f32.mrb[205].mxu0  ;;  %v18331_v36 = vpack.c.bf16 %v16554_v45, %v16550_v54  ;;  %v18332_v47 = vpack.c.bf16 %v16590_v49, %v16586_v2 }
 0xae5   : > { %v17127_v63 = vadd.f32 %v8539_v19, %v16487_v56  ;;  %v8811_v20 = vpop.f32.mrb[206].mxu0 }
 0xae6   : > { %v8812_v21 = vadd.f32 %v8811_v20, %v16602_v44  ;;  %v8813_v10 = vpop.f32.mrb[207].mxu0  ;;  %11053 = vrot.lane.b32.xlu0 %v8809_v39, %s13828_s22  ;;  %9697 = vmatmul.mubr.bf16.gmra.mrb[72].mxu1 %v18331_v36 }
 0xae7   : > { %9704 = vmatprep.mubr.bf16.mxu1 %v18332_v47 }
 0xae8   : > { %11055 = vrot.lane.b32.xlu1 %v8812_v21, %s13828_s22 }
 0xae9   : > { %v8543_v19 = vpop.f32.mrb[224].mxu1 }
 0xaea   : > { %v8545_v62 = vpop.f32.mrb[225].mxu1  ;;  %v17143_v10 = vadd.f32 %v8543_v19, %v16482_v37 }
 0xaeb   : > { %v8547_v18 = vpop.f32.mrb[226].mxu1  ;;  %v8816_v20 = vpop.f32.mrb[208].mxu0  ;;  %v17150_v8 = vadd.f32 %v8545_v62, %v16487_v56 }
 0xaec   : > { %v17146_v39 = vadd.f32 %v8547_v18, %v16482_v37  ;;  %v8817_v54 = vadd.f32 %v8816_v20, %v16602_v44  ;;  %v8549_v45 = vpop.f32.mrb[227].mxu1  ;;  %v8818_v36 = vpop.f32.mrb[209].mxu0  ;;  %v18333_v18 = vpack.c.bf16 %v16582_v13, %v16578_v59  ;;  %v18334_v20 = vpack.c.bf16 %v16621_v57, %v16618_v24  ;;  %v13049_v24 = vld [vmem:[%s18317_s3 + $0x10] sm:$0xff]  }
 0xaed   : > { %v17153_v2 = vadd.f32 %v8549_v45, %v16487_v56  ;;  %v8819_v49 = vpop.f32.mrb[210].mxu0  ;;  %12122 = vmatprep.subr.bf16.mxu0 %v13049_v24 }
 0xaee   : > { %v8820_v47 = vadd.f32 %v8819_v49, %v16602_v44  ;;  %v8821_v19 = vpop.f32.mrb[211].mxu0  ;;  %11057 = vrot.lane.b32.xlu0 %v8817_v54, %s13828_s22  ;;  %9705 = vmatmul.mubr.bf16.gmra.mrb[76].mxu1 %v18333_v18 }
 0xaef   : > { %9712 = vmatprep.mubr.bf16.mxu1 %v18334_v20  ;;  %12123 = vmatpush3.bf16.msra.mxu0 %v13049_v24 }
 0xaf0   : > { %11059 = vrot.lane.b32.xlu1 %v8820_v47, %s13828_s22 }
 0xaf1   : > { %v8553_v45 = vpop.f32.mrb[228].mxu1 }
 0xaf2   : > { %v8555_v36 = vpop.f32.mrb[229].mxu1  ;;  %v17169_v19 = vadd.f32 %v8553_v45, %v16482_v37 }
 0xaf3   : > { %v8557_v21 = vpop.f32.mrb[230].mxu1  ;;  %v8824_v49 = vpop.f32.mrb[212].mxu0  ;;  %v17179_v57 = vadd.f32 %v8555_v36, %v16487_v56 }
 0xaf4   : > { %v17172_v54 = vadd.f32 %v8557_v21, %v16482_v37  ;;  %v8825_v59 = vadd.f32 %v8824_v49, %v16602_v44  ;;  %v8559_v13 = vpop.f32.mrb[231].mxu1  ;;  %v8826_v18 = vpop.f32.mrb[213].mxu0  ;;  %v18335_v49 = vpack.c.bf16 %v16614_v12, %v16611_v14 }
 0xaf5   : > { %v17182_v47 = vadd.f32 %v8559_v13, %v16487_v56  ;;  %v8827_v20 = vpop.f32.mrb[214].mxu0  ;;  %v18336_v13 = vpack.c.bf16 %v16650_v29, %v16647_v60 }
 0xaf6   : > { %v8828_v21 = vadd.f32 %v8827_v20, %v16602_v44  ;;  %v8829_v62 = vpop.f32.mrb[215].mxu0  ;;  %11061 = vrot.lane.b32.xlu0 %v8825_v59, %s13828_s22  ;;  %9713 = vmatmul.mubr.bf16.gmra.mrb[80].mxu1 %v18335_v49 }
 0xaf7   : > { %9720 = vmatprep.mubr.bf16.mxu1 %v18336_v13 }
 0xaf8   : > { %11063 = vrot.lane.b32.xlu1 %v8828_v21, %s13828_s22 }
 0xaf9   : > { %v8563_v18 = vpop.f32.mrb[232].mxu1 }
 0xafa   : > { %v8565_v20 = vpop.f32.mrb[233].mxu1  ;;  %v17198_v59 = vadd.f32 %v8563_v18, %v16482_v37 }
 0xafb   : > { %v8567_v62 = vpop.f32.mrb[234].mxu1  ;;  %v8832_v45 = vpop.f32.mrb[216].mxu0  ;;  %v17205_v60 = vadd.f32 %v8565_v20, %v16487_v56  ;;  %v18338_v20 = vpack.c.bf16 %v16682_v26, %v16679_v1 }
 0xafc   : > { %v17201_v14 = vadd.f32 %v8567_v62, %v16482_v37  ;;  %v8833_v12 = vadd.f32 %v8832_v45, %v16602_v44  ;;  %v8569_v49 = vpop.f32.mrb[235].mxu1  ;;  %v8834_v36 = vpop.f32.mrb[217].mxu0  ;;  %v18337_v45 = vpack.c.bf16 %v16643_v7, %v16640_v4 }
 0xafd   : > { %v17208_v29 = vadd.f32 %v8569_v49, %v16487_v56  ;;  %v8835_v24 = vpop.f32.mrb[218].mxu0 }
 0xafe   : > { %v8836_v13 = vadd.f32 %v8835_v24, %v16602_v44  ;;  %v8837_v18 = vpop.f32.mrb[219].mxu0  ;;  %11065 = vrot.lane.b32.xlu0 %v8833_v12, %s13828_s22  ;;  %9721 = vmatmul.mubr.bf16.gmra.mrb[84].mxu1 %v18337_v45 }
 0xaff   : > { %9728 = vmatprep.mubr.bf16.mxu1 %v18338_v20 }
 0xb00   : > { %11067 = vrot.lane.b32.xlu1 %v8836_v13, %s13828_s22 }
 0xb01   : > { %v8573_v62 = vpop.f32.mrb[236].mxu1 }
 0xb02   : > { %v8575_v49 = vpop.f32.mrb[237].mxu1  ;;  %v17224_v18 = vadd.f32 %v8573_v62, %v16482_v37 }
 0xb03   : > { %v8577_v21 = vpop.f32.mrb[238].mxu1  ;;  %v8840_v24 = vpop.f32.mrb[220].mxu0  ;;  %v17231_v36 = vadd.f32 %v8575_v49, %v16487_v56 }
 0xb04   : > { %v17227_v12 = vadd.f32 %v8577_v21, %v16482_v37  ;;  %v8841_v4 = vadd.f32 %v8840_v24, %v16602_v44  ;;  %v8579_v7 = vpop.f32.mrb[239].mxu1  ;;  %v8842_v45 = vpop.f32.mrb[221].mxu0  ;;  %v18339_v21 = vpack.c.bf16 %v16674_v15, %v16671_v34  ;;  %v18340_v24 = vpack.c.bf16 %v16714_v50, %v16711_v5 }
 0xb05   : > { %v17234_v1 = vadd.f32 %v8579_v7, %v16487_v56  ;;  %v8843_v26 = vpop.f32.mrb[222].mxu0 }
 0xb06   : > { %v8844_v20 = vadd.f32 %v8843_v26, %v16602_v44  ;;  %v8845_v62 = vpop.f32.mrb[223].mxu0  ;;  %11069 = vrot.lane.b32.xlu0 %v8841_v4, %s13828_s22  ;;  %9729 = vmatmul.mubr.bf16.gmra.mrb[88].mxu1 %v18339_v21 }
 0xb07   : > { %9736 = vmatprep.mubr.bf16.mxu1 %v18340_v24 }
 0xb08   : > { %11071 = vrot.lane.b32.xlu1 %v8844_v20, %s13828_s22 }
 0xb09   : > { %v8583_v7 = vpop.f32.mrb[240].mxu1 }
 0xb0a   : > { %v8585_v45 = vpop.f32.mrb[241].mxu1  ;;  %v17250_v62 = vadd.f32 %v8583_v7, %v16482_v37 }
 0xb0b   : > { %v8587_v13 = vpop.f32.mrb[242].mxu1  ;;  %v8848_v26 = vpop.f32.mrb[224].mxu0  ;;  %v17257_v49 = vadd.f32 %v8585_v45, %v16487_v56 }
 0xb0c   : > { %v17253_v4 = vadd.f32 %v8587_v13, %v16482_v37  ;;  %v8849_v34 = vadd.f32 %v8848_v26, %v16602_v44  ;;  %v8589_v15 = vpop.f32.mrb[243].mxu1  ;;  %v8850_v21 = vpop.f32.mrb[225].mxu0  ;;  %v18341_v13 = vpack.c.bf16 %v16706_v28, %v16703_v43  ;;  %v18342_v26 = vpack.c.bf16 %v16746_v48, %v16743_v17  ;;  %v13050_v17 = vld [vmem:[%s18317_s3 + $0x18] sm:$0xff]  }
 0xb0d   : > { %v17260_v5 = vadd.f32 %v8589_v15, %v16487_v56  ;;  %v8851_v50 = vpop.f32.mrb[226].mxu0  ;;  %12124 = vmatprep.subr.bf16.mxu0 %v13050_v17 }
 0xb0e   : > { %v8852_v24 = vadd.f32 %v8851_v50, %v16602_v44  ;;  %v8853_v7 = vpop.f32.mrb[227].mxu0  ;;  %11073 = vrot.lane.b32.xlu0 %v8849_v34, %s13828_s22  ;;  %9737 = vmatmul.mubr.bf16.gmra.mrb[92].mxu1 %v18341_v13 }
 0xb0f   : > { %9744 = vmatprep.mubr.bf16.mxu1 %v18342_v26  ;;  %12125 = vmatpush3.bf16.msra.mxu0 %v13050_v17 }
 0xb10   : > { %11075 = vrot.lane.b32.xlu1 %v8852_v24, %s13828_s22 }
 0xb11   : > { %v8593_v15 = vpop.f32.mrb[244].mxu1 }
 0xb12   : > { %v8595_v21 = vpop.f32.mrb[245].mxu1  ;;  %v17276_v7 = vadd.f32 %v8593_v15, %v16482_v37 }
 0xb13   : > { %v8597_v20 = vpop.f32.mrb[246].mxu1  ;;  %v8856_v50 = vpop.f32.mrb[228].mxu0  ;;  %v17286_v48 = vadd.f32 %v8595_v21, %v16487_v56 }
 0xb14   : > { %v17279_v34 = vadd.f32 %v8597_v20, %v16482_v37  ;;  %v8857_v43 = vadd.f32 %v8856_v50, %v16602_v44  ;;  %v8599_v28 = vpop.f32.mrb[247].mxu1  ;;  %v8858_v13 = vpop.f32.mrb[229].mxu0  ;;  %v18343_v50 = vpack.c.bf16 %v16738_v41, %v16735_v58 }
 0xb15   : > { %v17289_v24 = vadd.f32 %v8599_v28, %v16487_v56  ;;  %v8859_v26 = vpop.f32.mrb[230].mxu0  ;;  %v18344_v28 = vpack.c.bf16 %v16777_v46, %v16774_v52 }
 0xb16   : > { %v8860_v20 = vadd.f32 %v8859_v26, %v16602_v44  ;;  %v8861_v45 = vpop.f32.mrb[231].mxu0  ;;  %11077 = vrot.lane.b32.xlu0 %v8857_v43, %s13828_s22  ;;  %9745 = vmatmul.mubr.bf16.gmra.mrb[96].mxu1 %v18343_v50 }
 0xb17   : > { %9752 = vmatprep.mubr.bf16.mxu1 %v18344_v28 }
 0xb18   : > { %11079 = vrot.lane.b32.xlu1 %v8860_v20, %s13828_s22 }
 0xb19   : > { %v8603_v13 = vpop.f32.mrb[248].mxu1 }
 0xb1a   : > { %v8605_v26 = vpop.f32.mrb[249].mxu1  ;;  %v17305_v43 = vadd.f32 %v8603_v13, %v16482_v37 }
 0xb1b   : > { %v8607_v45 = vpop.f32.mrb[250].mxu1  ;;  %v8864_v15 = vpop.f32.mrb[232].mxu0  ;;  %v17312_v52 = vadd.f32 %v8605_v26, %v16487_v56  ;;  %v18350_v26 = vpack.c.bf16 %v16807_v42, %v16804_v16 }
 0xb1c   : > { %18345 = vst [vmem:[#allocation71_spill] sm:$0xff] %v17305_v43  ;;  %v17308_v58 = vadd.f32 %v8607_v45, %v16482_v37  ;;  %v8865_v41 = vadd.f32 %v8864_v15, %v16602_v44  ;;  %v8609_v50 = vpop.f32.mrb[251].mxu1  ;;  %v8866_v21 = vpop.f32.mrb[233].mxu0  ;;  %v18349_v15 = vpack.c.bf16 %v16769_v23, %v16766_v3  ;;  %v18369_v43 = vld [vmem:[#allocation41_spill] sm:$0xff] }
 0xb1d   : > { %18347 = vst [vmem:[#allocation73_spill] sm:$0xff] %v17312_v52  ;;  %v17315_v46 = vadd.f32 %v8609_v50, %v16487_v56  ;;  %v8867_v17 = vpop.f32.mrb[234].mxu0  ;;  %v18381_v52 = vld [vmem:[#allocation51_spill] sm:$0xff] }
 0xb1e   : > { %18346 = vst [vmem:[#allocation72_spill] sm:$0xff] %v17308_v58  ;;  %v8868_v28 = vadd.f32 %v8867_v17, %v16602_v44  ;;  %v8869_v13 = vpop.f32.mrb[235].mxu0  ;;  %11081 = vrot.lane.b32.xlu0 %v8865_v41, %s13828_s22  ;;  %9753 = vmatmul.mubr.bf16.gmra.mrb[100].mxu1 %v18349_v15 }
 0xb1f   : > { %18348 = vst [vmem:[#allocation74_spill] sm:$0xff] %v17315_v46  ;;  %9760 = vmatprep.mubr.bf16.mxu1 %v18350_v26 }
 0xb20   : > { %11083 = vrot.lane.b32.xlu1 %v8868_v28, %s13828_s22 }
 0xb21   : > { %v8613_v45 = vpop.f32.mrb[252].mxu1 }
 0xb22   : > { %v8615_v50 = vpop.f32.mrb[253].mxu1  ;;  %v17331_v13 = vadd.f32 %v8613_v45, %v16482_v37 }
 0xb23   : > { %v8617_v20 = vpop.f32.mrb[254].mxu1  ;;  %v8872_v17 = vpop.f32.mrb[236].mxu0  ;;  %v17338_v21 = vadd.f32 %v8615_v50, %v16487_v56  ;;  %v18361_v50 = vld [vmem:[#allocation37_spill] sm:$0xff] }
 0xb24   : > { %18351 = vst [vmem:[#allocation75_spill] sm:$0xff] %v17331_v13  ;;  %v17334_v41 = vadd.f32 %v8617_v20, %v16482_v37  ;;  %v8873_v3 = vadd.f32 %v8872_v17, %v16602_v44  ;;  %v8619_v23 = vpop.f32.mrb[255].mxu1  ;;  %v8874_v15 = vpop.f32.mrb[237].mxu0  ;;  %v18355_v37 = vld [vmem:[#allocation36_spill] sm:$0xff] }
 0xb25   : > { %18353 = vst [vmem:[#allocation77_spill] sm:$0xff] %v17338_v21  ;;  %v17341_v16 = vadd.f32 %v8619_v23, %v16487_v56  ;;  %v8875_v42 = vpop.f32.mrb[238].mxu0  ;;  %v18356_v20 = vpack.c.bf16 %v16799_v51, %v18355_v37  ;;  %v18357_v17 = vld [vmem:[#allocation40_spill] sm:$0xff]  ;;  %v18358_v15 = vld [vmem:[#allocation39_spill] sm:$0xff] }
 0xb26   : > { %18352 = vst [vmem:[#allocation76_spill] sm:$0xff] %v17334_v41  ;;  %v8876_v26 = vadd.f32 %v8875_v42, %v16602_v44  ;;  %v8877_v45 = vpop.f32.mrb[239].mxu0  ;;  %11085 = vrot.lane.b32.xlu0 %v8873_v3, %s13828_s22  ;;  %v18359_v56 = vpack.c.bf16 %v18357_v17, %v18358_v15  ;;  %v13051_v51 = vld [vmem:[%s18317_s3 + $0x20] sm:$0xff]  }
 0xb27   : > { %18354 = vst [vmem:[#allocation78_spill] sm:$0xff] %v17341_v16  ;;  %9761 = vmatmul.mubr.bf16.gmra.mrb[104].mxu1 %v18356_v20  ;;  %12126 = vmatprep.subr.bf16.mxu0 %v13051_v51  ;;  %v18363_v41 = vld [vmem:[#allocation44_spill] sm:$0xff]  ;;  %v18364_v21 = vld [vmem:[#allocation43_spill] sm:$0xff] }
 0xb28   : > { %9768 = vmatprep.mubr.bf16.mxu1 %v18359_v56  ;;  %11087 = vrot.lane.b32.xlu1 %v8876_v26, %s13828_s22  ;;  %v18360_v56 = vld [vmem:[#allocation38_spill] sm:$0xff]  ;;  %v18365_v16 = vpack.c.bf16 %v18363_v41, %v18364_v21 }
 0xb29   : > { %v17356_v23 = vpop.f32.mrb[0].mxu1  ;;  %v18362_v13 = vpack.c.bf16 %v18360_v56, %v18361_v50  ;;  %12127 = vmatpush3.bf16.msra.mxu0 %v13051_v51  ;;  %v13053_v21 = vld [vmem:[%s18317_s3 + $0x30] sm:$0xff]  }
 0xb2a   : > { %v17358_v28 = vpop.f32.mrb[1].mxu1  ;;  %v18368_v56 = vld [vmem:[#allocation42_spill] sm:$0xff] }
 0xb2b   : > { %v8880_v42 = vpop.f32.mrb[240].mxu0  ;;  %v17360_v45 = vpop.f32.mrb[2].mxu1  ;;  %v18370_v58 = vpack.c.bf16 %v18368_v56, %v18369_v43 }
 0xb2c   : > { %v8881_v3 = vadd.f32 %v8880_v42, %v16602_v44  ;;  %v8882_v37 = vpop.f32.mrb[241].mxu0  ;;  %v17366_v20 = vpop.f32.mrb[3].mxu1  ;;  %v13052_v42 = vld [vmem:[%s18317_s3 + $0x28] sm:$0xff]  }
 0xb2d   : > { %v8883_v17 = vpop.f32.mrb[242].mxu0  ;;  %12128 = vmatprep.subr.bf16.mxu0 %v13052_v42 }
 0xb2e   : > { %v8884_v26 = vadd.f32 %v8883_v17, %v16602_v44  ;;  %v8885_v15 = vpop.f32.mrb[243].mxu0  ;;  %11089 = vrot.lane.b32.xlu0 %v8881_v3, %s13828_s22  ;;  %12129 = vmatpush3.bf16.msra.mxu0 %v13052_v42  ;;  %v18371_v42 = vld [vmem:[#allocation48_spill] sm:$0xff] }
 0xb2f   : > { %9769 = vmatmul.mubr.bf16.gmra.mrb[108].mxu1 %v18362_v13  ;;  %12130 = vmatprep.subr.bf16.mxu0 %v13053_v21 }
 0xb30   : > { %9776 = vmatprep.mubr.bf16.mxu1 %v18365_v16  ;;  %11091 = vrot.lane.b32.xlu1 %v8884_v26, %s13828_s22 }
 0xb31   : > { %v17380_v37 = vpop.f32.mrb[4].mxu1 }
 0xb32   : > { %18366 = vst [vmem:[#allocation36_spill] sm:$0xff] %v17380_v37  ;;  %v17382_v17 = vpop.f32.mrb[5].mxu1  ;;  %12131 = vmatpush3.bf16.msra.mxu0 %v13053_v21 }
 0xb33   : > { %v8888_v3 = vpop.f32.mrb[244].mxu0  ;;  %v17384_v15 = vpop.f32.mrb[6].mxu1 }
 0xb34   : > { %18367 = vst [vmem:[#allocation40_spill] sm:$0xff] %v17384_v15  ;;  %v8889_v13 = vadd.f32 %v8888_v3, %v16602_v44  ;;  %v8890_v41 = vpop.f32.mrb[245].mxu0  ;;  %v17390_v16 = vpop.f32.mrb[7].mxu1  ;;  %v18372_v15 = vld [vmem:[#allocation47_spill] sm:$0xff] }
 0xb35   : > { %v8891_v50 = vpop.f32.mrb[246].mxu0  ;;  %v18373_v37 = vpack.c.bf16 %v18371_v42, %v18372_v15  ;;  %v13054_v3 = vld [vmem:[%s18317_s3 + $0x38] sm:$0xff]   ;;  %v18378_v42 = vld [vmem:[#allocation45_spill] sm:$0xff] }
 0xb36   : > { %v8892_v51 = vadd.f32 %v8891_v50, %v16602_v44  ;;  %v8893_v26 = vpop.f32.mrb[247].mxu0  ;;  %11093 = vrot.lane.b32.xlu0 %v8889_v13, %s13828_s22  ;;  %12132 = vmatprep.subr.bf16.mxu0 %v13054_v3 }
 0xb37   : > { %9777 = vmatmul.mubr.bf16.gmra.mrb[112].mxu1 %v18370_v58  ;;  %12133 = vmatpush3.bf16.msra.mxu0 %v13054_v3 }
 0xb38   : > { %9784 = vmatprep.mubr.bf16.mxu1 %v18373_v37  ;;  %11095 = vrot.lane.b32.xlu1 %v8892_v51, %s13828_s22  ;;  %v18377_v51 = vld [vmem:[#allocation46_spill] sm:$0xff] }
 0xb39   : > { %v17404_v41 = vpop.f32.mrb[8].mxu1 }
 0xb3a   : > { %18374 = vst [vmem:[#allocation39_spill] sm:$0xff] %v17404_v41  ;;  %v17406_v50 = vpop.f32.mrb[9].mxu1  ;;  %v18379_v41 = vpack.c.bf16 %v18377_v51, %v18378_v42 }
 0xb3b   : > { %18375 = vst [vmem:[#allocation38_spill] sm:$0xff] %v17406_v50  ;;  %v8896_v13 = vpop.f32.mrb[248].mxu0  ;;  %v17408_v26 = vpop.f32.mrb[10].mxu1  ;;  %v18380_v50 = vld [vmem:[#allocation52_spill] sm:$0xff] }
 0xb3c   : > { %18376 = vst [vmem:[#allocation37_spill] sm:$0xff] %v17408_v26  ;;  %v8897_v43 = vadd.f32 %v8896_v13, %v16602_v44  ;;  %v8898_v58 = vpop.f32.mrb[249].mxu0  ;;  %v17411_v37 = vpop.f32.mrb[11].mxu1  ;;  %v18382_v46 = vpack.c.bf16 %v18380_v50, %v18381_v52  ;;  %v18387_v52 = vld [vmem:[#allocation50_spill] sm:$0xff] }
 0xb3d   : > { %v8899_v15 = vpop.f32.mrb[250].mxu0 }
 0xb3e   : > { %v8900_v21 = vadd.f32 %v8899_v15, %v16602_v44  ;;  %v8901_v56 = vpop.f32.mrb[251].mxu0  ;;  %11097 = vrot.lane.b32.xlu0 %v8897_v43, %s13828_s22 }
 0xb3f   : > { %9785 = vmatmul.mubr.bf16.gmra.mrb[116].mxu1 %v18379_v41 }
 0xb40   : > { %9792 = vmatprep.mubr.bf16.mxu1 %v18382_v46  ;;  %11099 = vrot.lane.b32.xlu1 %v8900_v21, %s13828_s22  ;;  %v18388_v46 = vld [vmem:[#allocation49_spill] sm:$0xff]  ;;  %v18390_v21 = vld [vmem:[#allocation56_spill] sm:$0xff] }
 0xb41   : > { %v17422_v3 = vpop.f32.mrb[12].mxu1  ;;  %v18389_v50 = vpack.c.bf16 %v18387_v52, %v18388_v46  ;;  %v18400_v52 = vld [vmem:[#allocation60_spill] sm:$0xff]  ;;  %v18401_v46 = vld [vmem:[#allocation59_spill] sm:$0xff] }
 0xb42   : > { %18383 = vst [vmem:[#allocation44_spill] sm:$0xff] %v17422_v3  ;;  %v17424_v13 = vpop.f32.mrb[13].mxu1  ;;  %v18391_v3 = vld [vmem:[#allocation55_spill] sm:$0xff] }
 0xb43   : > { %18384 = vst [vmem:[#allocation43_spill] sm:$0xff] %v17424_v13  ;;  %v8904_v58 = vpop.f32.mrb[252].mxu0  ;;  %v17426_v26 = vpop.f32.mrb[14].mxu1  ;;  %v18392_v13 = vpack.c.bf16 %v18390_v21, %v18391_v3 }
 0xb44   : > { %18385 = vst [vmem:[#allocation42_spill] sm:$0xff] %v17426_v26  ;;  %v8905_v15 = vadd.f32 %v8904_v58, %v16602_v44  ;;  %v8906_v43 = vpop.f32.mrb[253].mxu0  ;;  %v17429_v56 = vpop.f32.mrb[15].mxu1 }
 0xb45   : > { %18386 = vst [vmem:[#allocation41_spill] sm:$0xff] %v17429_v56  ;;  %v8907_v51 = vpop.f32.mrb[254].mxu0  ;;  %v18411_v56 = vld [vmem:[#allocation63_spill] sm:$0xff] }
 0xb46   : > { %v8908_v41 = vadd.f32 %v8907_v51, %v16602_v44  ;;  %v8909_v42 = vpop.f32.mrb[255].mxu0  ;;  %11101 = vrot.lane.b32.xlu0 %v8905_v15, %s13828_s22  ;;  %v18397_v51 = vld [vmem:[#allocation54_spill] sm:$0xff]  ;;  %v18398_v15 = vld [vmem:[#allocation53_spill] sm:$0xff] }
 0xb47   : > { %9793 = vmatmul.mubr.bf16.gmra.mrb[120].mxu1 %v18389_v50  ;;  %v18399_v42 = vpack.c.bf16 %v18397_v51, %v18398_v15  ;;  %v18402_v50 = vpack.c.bf16 %v18400_v52, %v18401_v46 }
 0xb48   : > { %9800 = vmatprep.mubr.bf16.mxu1 %v18392_v13  ;;  %11103 = vrot.lane.b32.xlu1 %v8908_v41, %s13828_s22 }
 0xb49   : > { %v17440_v58 = vpop.f32.mrb[16].mxu1 }
 0xb4a   : > { %18393 = vst [vmem:[#allocation48_spill] sm:$0xff] %v17440_v58  ;;  %v17442_v43 = vpop.f32.mrb[17].mxu1  ;;  %v18407_v58 = vld [vmem:[#allocation58_spill] sm:$0xff] }
 0xb4b   : > { %18394 = vst [vmem:[#allocation47_spill] sm:$0xff] %v17442_v43  ;;  %v17444_v26 = vpop.f32.mrb[18].mxu1 }
 0xb4c   : > { %18395 = vst [vmem:[#allocation46_spill] sm:$0xff] %v17444_v26  ;;  %v17446_v44 = vpop.f32.mrb[19].mxu1  ;;  %v18408_v26 = vld [vmem:[#allocation57_spill] sm:$0xff] }
 0xb4d   : > { %18396 = vst [vmem:[#allocation45_spill] sm:$0xff] %v17446_v44  ;;  %v18409_v43 = vpack.c.bf16 %v18407_v58, %v18408_v26  ;;  %v18410_v44 = vld [vmem:[#allocation64_spill] sm:$0xff] }
 0xb4e   : > { %v18412_v51 = vpack.c.bf16 %v18410_v44, %v18411_v56 }
 0xb4f   : > { %9801 = vmatmul.mubr.bf16.gmra.mrb[124].mxu1 %v18399_v42 }
 0xb50   : > { %9808 = vmatprep.mubr.bf16.mxu1 %v18402_v50  ;;  %v18415_v50 = vld [vmem:[#allocation62_spill] sm:$0xff] }
 0xb51   : > { %v17454_v3 = vpop.f32.mrb[20].mxu1 }
 0xb52   : > { %18403 = vst [vmem:[#allocation52_spill] sm:$0xff] %v17454_v3  ;;  %v17456_v13 = vpop.f32.mrb[21].mxu1 }
 0xb53   : > { %18404 = vst [vmem:[#allocation51_spill] sm:$0xff] %v17456_v13  ;;  %v17458_v41 = vpop.f32.mrb[22].mxu1  ;;  %v18419_v13 = vld [vmem:[#allocation67_spill] sm:$0xff] }
 0xb54   : > { %18405 = vst [vmem:[#allocation50_spill] sm:$0xff] %v17458_v41  ;;  %v17460_v21 = vpop.f32.mrb[23].mxu1  ;;  %v18416_v41 = vld [vmem:[#allocation61_spill] sm:$0xff] }
 0xb55   : > { %18406 = vst [vmem:[#allocation49_spill] sm:$0xff] %v17460_v21  ;;  %v18417_v3 = vpack.c.bf16 %v18415_v50, %v18416_v41  ;;  %v18418_v21 = vld [vmem:[#allocation68_spill] sm:$0xff]  ;;  %v18426_v41 = vpack.c.bf16 %v17028_v40, %v17025_v27 }
 0xb56   : > { %v18420_v26 = vpack.c.bf16 %v18418_v21, %v18419_v13 }
 0xb57   : > { %9809 = vmatmul.mubr.bf16.gmra.mrb[128].mxu1 %v18409_v43 }
 0xb58   : > { %9816 = vmatprep.mubr.bf16.mxu1 %v18412_v51  ;;  %v18423_v51 = vld [vmem:[#allocation66_spill] sm:$0xff] }
 0xb59   : > { %v17468_v15 = vpop.f32.mrb[24].mxu1 }
 0xb5a   : > { %18413 = vst [vmem:[#allocation56_spill] sm:$0xff] %v17468_v15  ;;  %v17470_v42 = vpop.f32.mrb[25].mxu1 }
 0xb5b   : > { %v17472_v52 = vpop.f32.mrb[26].mxu1 }
 0xb5c   : > { %18414 = vst [vmem:[#allocation55_spill] sm:$0xff] %v17472_v52  ;;  %v17474_v46 = vpop.f32.mrb[27].mxu1  ;;  %v18424_v52 = vld [vmem:[#allocation65_spill] sm:$0xff] }
 0xb5d   : > { %v18425_v15 = vpack.c.bf16 %v18423_v51, %v18424_v52  ;;  %v18430_v52 = vpack.c.bf16 %v17049_v30, %v17046_v35 }
 0xb5f   : > { %9817 = vmatmul.mubr.bf16.gmra.mrb[132].mxu1 %v18417_v3 }
 0xb60   : > { %9824 = vmatprep.mubr.bf16.mxu1 %v18420_v26  ;;  %v18427_v26 = vld [vmem:[#allocation70_spill] sm:$0xff] }
 0xb61   : > { %v17482_v58 = vpop.f32.mrb[28].mxu1 }
 0xb62   : > { %18421 = vst [vmem:[#allocation54_spill] sm:$0xff] %v17482_v58  ;;  %v17484_v56 = vpop.f32.mrb[29].mxu1 }
 0xb63   : > { %v17486_v43 = vpop.f32.mrb[30].mxu1 }
 0xb64   : > { %18422 = vst [vmem:[#allocation53_spill] sm:$0xff] %v17486_v43  ;;  %v17488_v44 = vpop.f32.mrb[31].mxu1  ;;  %v18428_v43 = vld [vmem:[#allocation69_spill] sm:$0xff] }
 0xb65   : > { %v18429_v58 = vpack.c.bf16 %v18427_v26, %v18428_v43  ;;  %v18432_v43 = vpack.c.bf16 %v17075_v25, %v17072_v33 }
 0xb67   : > { %9825 = vmatmul.mubr.bf16.gmra.mrb[136].mxu1 %v18425_v15 }
 0xb68   : > { %9832 = vmatprep.mubr.bf16.mxu1 %v18426_v41  ;;  %v18431_v41 = vpack.c.bf16 %v17042_v0, %v17039_v31  ;;  %v18434_v31 = vpack.c.bf16 %v17101_v32, %v17098_v22 }
 0xb69   : > { %v17496_v3 = vpop.f32.mrb[32].mxu1 }
 0xb6a   : > { %v17498_v13 = vpop.f32.mrb[33].mxu1 }
 0xb6b   : > { %v17500_v21 = vpop.f32.mrb[34].mxu1 }
 0xb6c   : > { %v17502_v50 = vpop.f32.mrb[35].mxu1 }
 0xb6f   : > { %9833 = vmatmul.mubr.bf16.gmra.mrb[140].mxu1 %v18429_v58 }
 0xb70   : > { %9840 = vmatprep.mubr.bf16.mxu1 %v18430_v52  ;;  %v18433_v52 = vpack.c.bf16 %v17065_v38, %v17062_v6  ;;  %v18436_v6 = vpack.c.bf16 %v17127_v63, %v17124_v11 }
 0xb71   : > { %v17510_v15 = vpop.f32.mrb[36].mxu1 }
 0xb72   : > { %v17512_v27 = vpop.f32.mrb[37].mxu1 }
 0xb73   : > { %v17514_v40 = vpop.f32.mrb[38].mxu1 }
 0xb74   : > { %v17516_v51 = vpop.f32.mrb[39].mxu1 }
 0xb77   : > { %9841 = vmatmul.mubr.bf16.gmra.mrb[144].mxu1 %v18431_v41 }
 0xb78   : > { %9848 = vmatprep.mubr.bf16.mxu1 %v18432_v43  ;;  %v18435_v43 = vpack.c.bf16 %v17094_v61, %v17091_v9  ;;  %v18438_v9 = vpack.c.bf16 %v17153_v2, %v17150_v8 }
 0xb79   : > { %v17524_v58 = vpop.f32.mrb[40].mxu1 }
 0xb7a   : > { %v17526_v35 = vpop.f32.mrb[41].mxu1 }
 0xb7b   : > { %v17528_v30 = vpop.f32.mrb[42].mxu1 }
 0xb7c   : > { %v17530_v26 = vpop.f32.mrb[43].mxu1 }
 0xb7f   : > { %9849 = vmatmul.mubr.bf16.gmra.mrb[148].mxu1 %v18433_v52 }
 0xb80   : > { %9856 = vmatprep.mubr.bf16.mxu1 %v18434_v31  ;;  %v18437_v31 = vpack.c.bf16 %v17120_v53, %v17117_v55  ;;  %v18440_v55 = vpack.c.bf16 %v17182_v47, %v17179_v57 }
 0xb81   : > { %v17538_v0 = vpop.f32.mrb[44].mxu1 }
 0xb82   : > { %v17540_v33 = vpop.f32.mrb[45].mxu1 }
 0xb83   : > { %v17542_v25 = vpop.f32.mrb[46].mxu1 }
 0xb84   : > { %v17544_v41 = vpop.f32.mrb[47].mxu1 }
 0xb87   : > { %9857 = vmatmul.mubr.bf16.gmra.mrb[152].mxu1 %v18435_v43 }
 0xb88   : > { %9864 = vmatprep.mubr.bf16.mxu1 %v18436_v6  ;;  %v18439_v6 = vpack.c.bf16 %v17146_v39, %v17143_v10  ;;  %v18442_v10 = vpack.c.bf16 %v17208_v29, %v17205_v60  ;;  %v17611_v60 = vld [vmem:[%s18448_s28] ss:$0 sm:$0xff] }
 0xb89   : > { %v17552_v38 = vpop.f32.mrb[48].mxu1 }
 0xb8a   : > { %v17554_v22 = vpop.f32.mrb[49].mxu1 }
 0xb8b   : > { %v17556_v32 = vpop.f32.mrb[50].mxu1 }
 0xb8c   : > { %v17558_v52 = vpop.f32.mrb[51].mxu1 }
 0xb8f   : > { %9865 = vmatmul.mubr.bf16.gmra.mrb[156].mxu1 %v18437_v31 }
 0xb90   : > { %9872 = vmatprep.mubr.bf16.mxu1 %v18438_v9  ;;  %v18441_v9 = vpack.c.bf16 %v17172_v54, %v17169_v19  ;;  %v18447_v19 = vpack.c.bf16 %v17234_v1, %v17231_v36  ;;  %v18449_v36 = vpack.c.bf16 %v17227_v12, %v17224_v18  ;;  %v18450_v1 = vpack.c.bf16 %v17260_v5, %v17257_v49 }
 0xb91   : > { %v17566_v61 = vpop.f32.mrb[52].mxu1  ;;  %v18451_v12 = vpack.c.bf16 %v17253_v4, %v17250_v62  ;;  %v18452_v49 = vpack.c.bf16 %v17289_v24, %v17286_v48  ;;  %v18453_v4 = vpack.c.bf16 %v17279_v34, %v17276_v7  ;;  %v18454_v48 = vld [vmem:[#allocation74_spill] sm:$0xff]  ;;  %v18455_v24 = vld [vmem:[#allocation73_spill] sm:$0xff]  ;;  %v18459_v34 = vld [vmem:[#allocation72_spill] sm:$0xff] }
 0xb92   : > { %v17568_v11 = vpop.f32.mrb[53].mxu1 }
 0xb93   : > { %v17570_v63 = vpop.f32.mrb[54].mxu1 }
 0xb94   : > { %v17572_v43 = vpop.f32.mrb[55].mxu1 }
 0xb97   : > { %9873 = vmatmul.mubr.bf16.gmra.mrb[160].mxu1 %v18439_v6 }
 0xb98   : > { %9880 = vmatprep.mubr.bf16.mxu1 %v18440_v55  ;;  %v18446_v55 = vpack.c.bf16 %v17201_v14, %v17198_v59 }
 0xb99   : > { %v17580_v53 = vpop.f32.mrb[56].mxu1 }
 0xb9a   : > { %v17582_v8 = vpop.f32.mrb[57].mxu1 }
 0xb9b   : > { %v17584_v2 = vpop.f32.mrb[58].mxu1 }
 0xb9c   : > { %v17586_v31 = vpop.f32.mrb[59].mxu1 }
 0xb9f   : > { %9881 = vmatmul.mubr.bf16.gmra.mrb[164].mxu1 %v18441_v9 }
 0xba0   : > { %9888 = vmatprep.mubr.bf16.mxu1 %v18442_v10 }
 0xba1   : > { %v17594_v39 = vpop.f32.mrb[60].mxu1 }
 0xba2   : > { %18443 = vst [vmem:[#allocation60_spill] sm:$0xff] %v17594_v39  ;;  %v17596_v57 = vpop.f32.mrb[61].mxu1 }
 0xba3   : > { %v17598_v47 = vpop.f32.mrb[62].mxu1 }
 0xba4   : > { %18444 = vst [vmem:[#allocation59_spill] sm:$0xff] %v17598_v47  ;;  %v17600_v6 = vpop.f32.mrb[63].mxu1 }
 0xba5   : > { %18445 = vst [vmem:[#allocation58_spill] sm:$0xff] %v17600_v6 }
 0xba7   : > { %9889 = vmatmul.mubr.bf16.gmra.mrb[168].mxu1 %v18446_v55 }
 0xba8   : > { %9896 = vmatprep.mubr.bf16.mxu1 %v18447_v19 }
 0xba9   : > { %v9682_v54 = vpop.f32.mrb[64].mxu1 }
 0xbaa   : > { %v9683_v29 = vadd.f32 %v9682_v54, %v17358_v28  ;;  %v9684_v9 = vpop.f32.mrb[65].mxu1 }
 0xbab   : > { %v9685_v10 = vpop.f32.mrb[66].mxu1 }
 0xbac   : > { %v9944_v47 = vadd.f32 %v17611_v60, %v9683_v29  ;;  %v9686_v39 = vadd.f32 %v9685_v10, %v17366_v20  ;;  %v9687_v59 = vpop.f32.mrb[67].mxu1 }
 0xbae   : > { %v9945_v14 = vadd.f32 %v17611_v60, %v9686_v39  ;;  %v10008_v55 = vmax.f32 %v9944_v47, 0.0 }
 0xbaf   : > { %9897 = vmatmul.mubr.bf16.gmra.mrb[172].mxu1 %v18449_v36 }
 0xbb0   : > { %9904 = vmatprep.mubr.bf16.mxu1 %v18450_v1  ;;  %v10009_v19 = vmax.f32 %v9945_v14, 0.0 }
 0xbb1   : > { %v9690_v28 = vpop.f32.mrb[68].mxu1 }
 0xbb2   : > { %v9691_v54 = vadd.f32 %v17356_v23, %v9690_v28  ;;  %v9692_v9 = vpop.f32.mrb[69].mxu1  ;;  %v10072_v29 = vpack.c.bf16 %v10009_v19, %v10008_v55  ;;  %v18456_v19 = vpack.c.bf16 %v18454_v48, %v18455_v24 }
 0xbb3   : > { %v9693_v6 = vpop.f32.mrb[70].mxu1  ;;  %v18457_v9 = vld [vmem:[#allocation36_spill] sm:$0xff] }
 0xbb4   : > { %v9946_v20 = vadd.f32 %v17611_v60, %v9691_v54  ;;  %v9694_v39 = vadd.f32 %v17360_v45, %v9693_v6  ;;  %v9695_v10 = vpop.f32.mrb[71].mxu1  ;;  %12134 = vmatprep.mubr.bf16.mxu0 %v10072_v29 }
 0xbb6   : > { %v9947_v18 = vadd.f32 %v17611_v60, %v9694_v39  ;;  %v10010_v5 = vmax.f32 %v9946_v20, 0.0 }
 0xbb7   : > { %9905 = vmatmul.mubr.bf16.gmra.mrb[176].mxu1 %v18451_v12 }
 0xbb8   : > { %9912 = vmatprep.mubr.bf16.mxu1 %v18452_v49  ;;  %v10011_v23 = vmax.f32 %v9947_v18, 0.0  ;;  %v18458_v18 = vld [vmem:[#allocation40_spill] sm:$0xff] }
 0xbb9   : > { %v9698_v47 = vpop.f32.mrb[72].mxu1 }
 0xbba   : > { %v10073_v59 = vpack.c.bf16 %v10011_v23, %v10010_v5  ;;  %v9699_v14 = vadd.f32 %v9698_v47, %v17382_v17  ;;  %v9700_v36 = vpop.f32.mrb[73].mxu1  ;;  %v18460_v5 = vld [vmem:[#allocation71_spill] sm:$0xff]  ;;  %v18462_v47 = vld [vmem:[#allocation78_spill] sm:$0xff] }
 0xbbb   : > { %v9701_v45 = vpop.f32.mrb[74].mxu1  ;;  %v18461_v23 = vpack.c.bf16 %v18459_v34, %v18460_v5  ;;  %v18470_v5 = vld [vmem:[#allocation37_spill] sm:$0xff] }
 0xbbc   : > { %v9948_v6 = vadd.f32 %v17611_v60, %v9699_v14  ;;  %v9702_v1 = vadd.f32 %v9701_v45, %v17390_v16  ;;  %v9703_v55 = vpop.f32.mrb[75].mxu1  ;;  %12135 = vmatmul.mubr.bf16.vlgmr.msra.gmra.mrb[0].mxu0 %v10073_v59  ;;  %v18463_v59 = vld [vmem:[#allocation77_spill] sm:$0xff] }
 0xbbd   : > { %v18464_v14 = vpack.c.bf16 %v18462_v47, %v18463_v59  ;;  %v18465_v55 = vld [vmem:[#allocation38_spill] sm:$0xff] }
 0xbbe   : > { %v9949_v62 = vadd.f32 %v17611_v60, %v9702_v1  ;;  %v10012_v28 = vmax.f32 %v9948_v6, 0.0 }
 0xbbf   : > { %9913 = vmatmul.mubr.bf16.gmra.mrb[180].mxu1 %v18453_v4 }
 0xbc0   : > { %9920 = vmatprep.mubr.bf16.mxu1 %v18456_v19  ;;  %v10013_v17 = vmax.f32 %v9949_v62, 0.0 }
 0xbc1   : > { %v9706_v54 = vpop.f32.mrb[76].mxu1 }
 0xbc2   : > { %v9707_v29 = vadd.f32 %v18457_v9, %v9706_v54  ;;  %v9708_v20 = vpop.f32.mrb[77].mxu1  ;;  %v10074_v39 = vpack.c.bf16 %v10013_v17, %v10012_v28  ;;  %v18466_v54 = vld [vmem:[#allocation76_spill] sm:$0xff]  ;;  %v18467_v9 = vld [vmem:[#allocation75_spill] sm:$0xff] }
 0xbc3   : > { %v9709_v16 = vpop.f32.mrb[78].mxu1 }
 0xbc4   : > { %v9950_v10 = vadd.f32 %v17611_v60, %v9707_v29  ;;  %v9710_v12 = vadd.f32 %v18458_v18, %v9709_v16  ;;  %v9711_v49 = vpop.f32.mrb[79].mxu1  ;;  %12138 = vmatprep.mubr.bf16.mxu0 %v10074_v39  ;;  %v18468_v29 = vpack.c.bf16 %v18466_v54, %v18467_v9 }
 0xbc6   : > { %v9951_v7 = vadd.f32 %v17611_v60, %v9710_v12  ;;  %v10014_v36 = vmax.f32 %v9950_v10, 0.0  ;;  %v18469_v10 = vld [vmem:[#allocation39_spill] sm:$0xff] }
 0xbc7   : > { %9921 = vmatmul.mubr.bf16.gmra.mrb[184].mxu1 %v18461_v23 }
 0xbc8   : > { %9928 = vmatprep.mubr.bf16.mxu1 %v18464_v14  ;;  %v10015_v45 = vmax.f32 %v9951_v7, 0.0 }
 0xbc9   : > { %v9714_v6 = vpop.f32.mrb[80].mxu1 }
 0xbca   : > { %v10075_v1 = vpack.c.bf16 %v10015_v45, %v10014_v36  ;;  %v9715_v62 = vadd.f32 %v9714_v6, %v18465_v55  ;;  %v9716_v4 = vpop.f32.mrb[81].mxu1  ;;  %v18471_v6 = vld [vmem:[#allocation43_spill] sm:$0xff] }
 0xbcb   : > { %v9717_v48 = vpop.f32.mrb[82].mxu1 }
 0xbcc   : > { %v9952_v24 = vadd.f32 %v17611_v60, %v9715_v62  ;;  %v9718_v19 = vadd.f32 %v9717_v48, %v17411_v37  ;;  %v9719_v28 = vpop.f32.mrb[83].mxu1  ;;  %12139 = vmatmul.mubr.bf16.gmra.mrb[4].mxu0 %v10075_v1  ;;  %v18472_v48 = vld [vmem:[#allocation41_spill] sm:$0xff] }
 0xbce   : > { %v9953_v17 = vadd.f32 %v17611_v60, %v9718_v19  ;;  %v10016_v20 = vmax.f32 %v9952_v24, 0.0 }
 0xbcf   : > { %9929 = vmatmul.mubr.bf16.gmra.mrb[188].mxu1 %v18468_v29  ;;  %v18473_v29 = vld [vmem:[#allocation44_spill] sm:$0xff] }
 0xbd0   : > { %v10017_v39 = vmax.f32 %v9953_v17, 0.0 }
 0xbd1   : > { %v9722_v16 = vpop.f32.mrb[84].mxu1 }
 0xbd2   : > { %v9723_v18 = vadd.f32 %v18469_v10, %v9722_v16  ;;  %v9724_v12 = vpop.f32.mrb[85].mxu1  ;;  %v10076_v49 = vpack.c.bf16 %v10017_v39, %v10016_v20 }
 0xbd3   : > { %v9725_v7 = vpop.f32.mrb[86].mxu1  ;;  %v18474_v12 = vld [vmem:[#allocation42_spill] sm:$0xff] }
 0xbd4   : > { %v9954_v34 = vadd.f32 %v17611_v60, %v9723_v18  ;;  %v9726_v37 = vadd.f32 %v18470_v5, %v9725_v7  ;;  %v9727_v23 = vpop.f32.mrb[87].mxu1  ;;  %12142 = vmatprep.mubr.bf16.mxu0 %v10076_v49 }
 0xbd6   : > { %v9955_v47 = vadd.f32 %v17611_v60, %v9726_v37  ;;  %v10018_v59 = vmax.f32 %v9954_v34, 0.0 }
 0xbd8   : > { %v10019_v14 = vmax.f32 %v9955_v47, 0.0 }
 0xbd9   : > { %v9730_v36 = vpop.f32.mrb[88].mxu1 }
 0xbda   : > { %v10077_v45 = vpack.c.bf16 %v10019_v14, %v10018_v59  ;;  %v9731_v1 = vadd.f32 %v9730_v36, %v18471_v6  ;;  %v9732_v55 = vpop.f32.mrb[89].mxu1  ;;  %v18475_v59 = vld [vmem:[#allocation47_spill] sm:$0xff] }
 0xbdb   : > { %v9733_v62 = vpop.f32.mrb[90].mxu1 }
 0xbdc   : > { %v9956_v4 = vadd.f32 %v17611_v60, %v9731_v1  ;;  %v9734_v24 = vadd.f32 %v9733_v62, %v18472_v48  ;;  %v9735_v19 = vpop.f32.mrb[91].mxu1  ;;  %12143 = vmatmul.mubr.bf16.gmra.mrb[8].mxu0 %v10077_v45  ;;  %v18476_v1 = vld [vmem:[#allocation45_spill] sm:$0xff] }
 0xbde   : > { %v9957_v28 = vadd.f32 %v17611_v60, %v9734_v24  ;;  %v10020_v17 = vmax.f32 %v9956_v4, 0.0 }
 0xbe0   : > { %v10021_v54 = vmax.f32 %v9957_v28, 0.0  ;;  %v18477_v28 = vld [vmem:[#allocation48_spill] sm:$0xff] }
 0xbe1   : > { %v9738_v9 = vpop.f32.mrb[92].mxu1 }
 0xbe2   : > { %v9739_v20 = vadd.f32 %v18473_v29, %v9738_v9  ;;  %v9740_v39 = vpop.f32.mrb[93].mxu1  ;;  %v10078_v16 = vpack.c.bf16 %v10021_v54, %v10020_v17 }
 0xbe3   : > { %v9741_v10 = vpop.f32.mrb[94].mxu1  ;;  %v18478_v39 = vld [vmem:[#allocation46_spill] sm:$0xff] }
 0xbe4   : > { %v9958_v18 = vadd.f32 %v17611_v60, %v9739_v20  ;;  %v9742_v49 = vadd.f32 %v18474_v12, %v9741_v10  ;;  %v9743_v7 = vpop.f32.mrb[95].mxu1  ;;  %12146 = vmatprep.mubr.bf16.mxu0 %v10078_v16 }
 0xbe6   : > { %v9959_v34 = vadd.f32 %v17611_v60, %v9742_v49  ;;  %v10022_v5 = vmax.f32 %v9958_v18, 0.0 }
 0xbe8   : > { %v10023_v37 = vmax.f32 %v9959_v34, 0.0 }
 0xbe9   : > { %v9746_v23 = vpop.f32.mrb[96].mxu1 }
 0xbea   : > { %v10079_v47 = vpack.c.bf16 %v10023_v37, %v10022_v5  ;;  %v9747_v14 = vadd.f32 %v9746_v23, %v18475_v59  ;;  %v9748_v36 = vpop.f32.mrb[97].mxu1  ;;  %v18479_v5 = vld [vmem:[#allocation51_spill] sm:$0xff] }
 0xbeb   : > { %v9749_v45 = vpop.f32.mrb[98].mxu1 }
 0xbec   : > { %v9960_v6 = vadd.f32 %v17611_v60, %v9747_v14  ;;  %v9750_v55 = vadd.f32 %v9749_v45, %v18476_v1  ;;  %v9751_v62 = vpop.f32.mrb[99].mxu1  ;;  %12147 = vmatmul.mubr.bf16.gmra.mrb[12].mxu0 %v10079_v47  ;;  %v18480_v14 = vld [vmem:[#allocation49_spill] sm:$0xff] }
 0xbee   : > { %v9961_v4 = vadd.f32 %v17611_v60, %v9750_v55  ;;  %v10024_v48 = vmax.f32 %v9960_v6, 0.0 }
 0xbf0   : > { %v10025_v24 = vmax.f32 %v9961_v4, 0.0  ;;  %v18481_v4 = vld [vmem:[#allocation52_spill] sm:$0xff] }
 0xbf1   : > { %v9754_v19 = vpop.f32.mrb[100].mxu1 }
 0xbf2   : > { %v9755_v17 = vadd.f32 %v18477_v28, %v9754_v19  ;;  %v9756_v54 = vpop.f32.mrb[101].mxu1  ;;  %v10080_v9 = vpack.c.bf16 %v10025_v24, %v10024_v48 }
 0xbf3   : > { %v9757_v29 = vpop.f32.mrb[102].mxu1  ;;  %v18482_v54 = vld [vmem:[#allocation50_spill] sm:$0xff] }
 0xbf4   : > { %v9962_v20 = vadd.f32 %v17611_v60, %v9755_v17  ;;  %v9758_v16 = vadd.f32 %v18478_v39, %v9757_v29  ;;  %v9759_v10 = vpop.f32.mrb[103].mxu1  ;;  %12150 = vmatprep.mubr.bf16.mxu0 %v10080_v9 }
 0xbf6   : > { %v9963_v18 = vadd.f32 %v17611_v60, %v9758_v16  ;;  %v10026_v12 = vmax.f32 %v9962_v20, 0.0 }
 0xbf8   : > { %v10027_v49 = vmax.f32 %v9963_v18, 0.0 }
 0xbfa   : > { %v9762_v7 = vpop.f32.mrb[104].mxu1  ;;  %v10081_v34 = vpack.c.bf16 %v10027_v49, %v10026_v12 }
 0xbfb   : > { %v9763_v37 = vadd.f32 %v9762_v7, %v18479_v5  ;;  %v9764_v23 = vpop.f32.mrb[105].mxu1 }
 0xbfc   : > { %v9765_v47 = vpop.f32.mrb[106].mxu1  ;;  %12151 = vmatmul.mubr.bf16.gmra.mrb[16].mxu0 %v10081_v34 }
 0xbfd   : > { %v9964_v59 = vadd.f32 %v17611_v60, %v9763_v37  ;;  %v9766_v36 = vadd.f32 %v9765_v47, %v18480_v14  ;;  %v9767_v45 = vpop.f32.mrb[107].mxu1 }
 0xbff   : > { %v9965_v6 = vadd.f32 %v17611_v60, %v9766_v36  ;;  %v10028_v1 = vmax.f32 %v9964_v59, 0.0  ;;  %v18483_v36 = vld [vmem:[#allocation56_spill] sm:$0xff] }
 0xc01   : > { %v10029_v55 = vmax.f32 %v9965_v6, 0.0 }
 0xc02   : > { %v9770_v62 = vpop.f32.mrb[108].mxu1 }
 0xc03   : > { %v9771_v48 = vadd.f32 %v18481_v4, %v9770_v62  ;;  %v9772_v24 = vpop.f32.mrb[109].mxu1  ;;  %v10082_v19 = vpack.c.bf16 %v10029_v55, %v10028_v1  ;;  %v18484_v62 = vld [vmem:[#allocation55_spill] sm:$0xff] }
 0xc04   : > { %v9773_v28 = vpop.f32.mrb[110].mxu1 }
 0xc05   : > { %v9966_v17 = vadd.f32 %v17611_v60, %v9771_v48  ;;  %v9774_v9 = vadd.f32 %v18482_v54, %v9773_v28  ;;  %v9775_v29 = vpop.f32.mrb[111].mxu1  ;;  %12154 = vmatprep.mubr.bf16.mxu0 %v10082_v19 }
 0xc07   : > { %v9967_v20 = vadd.f32 %v17611_v60, %v9774_v9  ;;  %v10030_v39 = vmax.f32 %v9966_v17, 0.0 }
 0xc09   : > { %v10031_v16 = vmax.f32 %v9967_v20, 0.0 }
 0xc0a   : > { %v9778_v10 = vpop.f32.mrb[112].mxu1 }
 0xc0b   : > { %v10083_v18 = vpack.c.bf16 %v10031_v16, %v10030_v39  ;;  %v9779_v12 = vadd.f32 %v9778_v10, %v17470_v42  ;;  %v9780_v49 = vpop.f32.mrb[113].mxu1 }
 0xc0c   : > { %v9781_v7 = vpop.f32.mrb[114].mxu1 }
 0xc0d   : > { %v9968_v34 = vadd.f32 %v17611_v60, %v9779_v12  ;;  %v9782_v5 = vadd.f32 %v9781_v7, %v17474_v46  ;;  %v9783_v37 = vpop.f32.mrb[115].mxu1  ;;  %12155 = vmatmul.mubr.bf16.gmra.mrb[20].mxu0 %v10083_v18  ;;  %v18485_v7 = vld [vmem:[#allocation54_spill] sm:$0xff] }
 0xc0f   : > { %v9969_v23 = vadd.f32 %v17611_v60, %v9782_v5  ;;  %v10032_v47 = vmax.f32 %v9968_v34, 0.0 }
 0xc11   : > { %v10033_v59 = vmax.f32 %v9969_v23, 0.0 }
 0xc12   : > { %v9786_v14 = vpop.f32.mrb[116].mxu1 }
 0xc13   : > { %v9787_v45 = vadd.f32 %v18483_v36, %v9786_v14  ;;  %v9788_v6 = vpop.f32.mrb[117].mxu1  ;;  %v10084_v1 = vpack.c.bf16 %v10033_v59, %v10032_v47  ;;  %v18486_v47 = vld [vmem:[#allocation53_spill] sm:$0xff] }
 0xc14   : > { %v9789_v55 = vpop.f32.mrb[118].mxu1 }
 0xc15   : > { %v9970_v42 = vadd.f32 %v17611_v60, %v9787_v45  ;;  %v9790_v4 = vadd.f32 %v18484_v62, %v9789_v55  ;;  %v9791_v48 = vpop.f32.mrb[119].mxu1  ;;  %12158 = vmatprep.mubr.bf16.mxu0 %v10084_v1 }
 0xc17   : > { %v9971_v46 = vadd.f32 %v17611_v60, %v9790_v4  ;;  %v10034_v24 = vmax.f32 %v9970_v42, 0.0 }
 0xc19   : > { %v10035_v19 = vmax.f32 %v9971_v46, 0.0 }
 0xc1a   : > { %v9794_v28 = vpop.f32.mrb[120].mxu1 }
 0xc1b   : > { %v10085_v17 = vpack.c.bf16 %v10035_v19, %v10034_v24  ;;  %v9795_v54 = vadd.f32 %v9794_v28, %v17484_v56  ;;  %v9796_v9 = vpop.f32.mrb[121].mxu1 }
 0xc1c   : > { %v9797_v29 = vpop.f32.mrb[122].mxu1 }
 0xc1d   : > { %v9972_v20 = vadd.f32 %v17611_v60, %v9795_v54  ;;  %v9798_v39 = vadd.f32 %v9797_v29, %v17488_v44  ;;  %v9799_v16 = vpop.f32.mrb[123].mxu1  ;;  %12159 = vmatmul.mubr.bf16.gmra.mrb[24].mxu0 %v10085_v17 }
 0xc1f   : > { %v9973_v10 = vadd.f32 %v17611_v60, %v9798_v39  ;;  %v10036_v18 = vmax.f32 %v9972_v20, 0.0 }
 0xc21   : > { %v10037_v12 = vmax.f32 %v9973_v10, 0.0 }
 0xc22   : > { %v9802_v49 = vpop.f32.mrb[124].mxu1 }
 0xc23   : > { %v9803_v34 = vadd.f32 %v18485_v7, %v9802_v49  ;;  %v9804_v5 = vpop.f32.mrb[125].mxu1  ;;  %v10086_v37 = vpack.c.bf16 %v10037_v12, %v10036_v18 }
 0xc24   : > { %v9805_v23 = vpop.f32.mrb[126].mxu1 }
 0xc25   : > { %v9974_v56 = vadd.f32 %v17611_v60, %v9803_v34  ;;  %v9806_v59 = vadd.f32 %v18486_v47, %v9805_v23  ;;  %v9807_v14 = vpop.f32.mrb[127].mxu1  ;;  %12162 = vmatprep.mubr.bf16.mxu0 %v10086_v37 }
 0xc27   : > { %v9975_v44 = vadd.f32 %v17611_v60, %v9806_v59  ;;  %v10038_v36 = vmax.f32 %v9974_v56, 0.0 }
 0xc29   : > { %v10039_v45 = vmax.f32 %v9975_v44, 0.0 }
 0xc2a   : > { %v9810_v6 = vpop.f32.mrb[128].mxu1 }
 0xc2b   : > { %v10087_v1 = vpack.c.bf16 %v10039_v45, %v10038_v36  ;;  %v9811_v55 = vadd.f32 %v9810_v6, %v17498_v13  ;;  %v9812_v42 = vpop.f32.mrb[129].mxu1 }
 0xc2c   : > { %v9813_v62 = vpop.f32.mrb[130].mxu1 }
 0xc2d   : > { %v9976_v4 = vadd.f32 %v17611_v60, %v9811_v55  ;;  %v9814_v48 = vadd.f32 %v9813_v62, %v17502_v50  ;;  %v9815_v46 = vpop.f32.mrb[131].mxu1  ;;  %12163 = vmatmul.mubr.bf16.gmra.mrb[28].mxu0 %v10087_v1 }
 0xc2f   : > { %v9977_v24 = vadd.f32 %v17611_v60, %v9814_v48  ;;  %v10040_v19 = vmax.f32 %v9976_v4, 0.0 }
 0xc31   : > { %v10041_v28 = vmax.f32 %v9977_v24, 0.0 }
 0xc32   : > { %v9818_v17 = vpop.f32.mrb[132].mxu1 }
 0xc33   : > { %v9819_v54 = vadd.f32 %v17496_v3, %v9818_v17  ;;  %v9820_v9 = vpop.f32.mrb[133].mxu1  ;;  %v10088_v29 = vpack.c.bf16 %v10041_v28, %v10040_v19 }
 0xc34   : > { %v9821_v20 = vpop.f32.mrb[134].mxu1 }
 0xc35   : > { %v9978_v13 = vadd.f32 %v17611_v60, %v9819_v54  ;;  %v9822_v39 = vadd.f32 %v17500_v21, %v9821_v20  ;;  %v9823_v16 = vpop.f32.mrb[135].mxu1  ;;  %12166 = vmatprep.mubr.bf16.mxu0 %v10088_v29 }
 0xc37   : > { %v9979_v50 = vadd.f32 %v17611_v60, %v9822_v39  ;;  %v10042_v10 = vmax.f32 %v9978_v13, 0.0 }
 0xc39   : > { %v10043_v18 = vmax.f32 %v9979_v50, 0.0 }
 0xc3a   : > { %v9826_v12 = vpop.f32.mrb[136].mxu1 }
 0xc3b   : > { %v10089_v49 = vpack.c.bf16 %v10043_v18, %v10042_v10  ;;  %v9827_v7 = vadd.f32 %v9826_v12, %v17512_v27  ;;  %v9828_v34 = vpop.f32.mrb[137].mxu1 }
 0xc3c   : > { %v9829_v5 = vpop.f32.mrb[138].mxu1 }
 0xc3d   : > { %v9980_v3 = vadd.f32 %v17611_v60, %v9827_v7  ;;  %v9830_v37 = vadd.f32 %v9829_v5, %v17516_v51  ;;  %v9831_v23 = vpop.f32.mrb[139].mxu1  ;;  %12167 = vmatmul.mubr.bf16.gmra.mrb[32].mxu0 %v10089_v49 }
 0xc3f   : > { %v9981_v21 = vadd.f32 %v17611_v60, %v9830_v37  ;;  %v10044_v56 = vmax.f32 %v9980_v3, 0.0 }
 0xc41   : > { %v10045_v47 = vmax.f32 %v9981_v21, 0.0 }
 0xc42   : > { %v9834_v59 = vpop.f32.mrb[140].mxu1 }
 0xc43   : > { %v9835_v14 = vadd.f32 %v17510_v15, %v9834_v59  ;;  %v9836_v44 = vpop.f32.mrb[141].mxu1  ;;  %v10090_v36 = vpack.c.bf16 %v10045_v47, %v10044_v56 }
 0xc44   : > { %v9837_v45 = vpop.f32.mrb[142].mxu1 }
 0xc45   : > { %v9982_v27 = vadd.f32 %v17611_v60, %v9835_v14  ;;  %v9838_v6 = vadd.f32 %v17514_v40, %v9837_v45  ;;  %v9839_v1 = vpop.f32.mrb[143].mxu1  ;;  %12170 = vmatprep.mubr.bf16.mxu0 %v10090_v36 }
 0xc47   : > { %v9983_v51 = vadd.f32 %v17611_v60, %v9838_v6  ;;  %v10046_v55 = vmax.f32 %v9982_v27, 0.0 }
 0xc49   : > { %v10047_v42 = vmax.f32 %v9983_v51, 0.0 }
 0xc4a   : > { %v9842_v62 = vpop.f32.mrb[144].mxu1 }
 0xc4b   : > { %v10091_v4 = vpack.c.bf16 %v10047_v42, %v10046_v55  ;;  %v9843_v48 = vadd.f32 %v9842_v62, %v17526_v35  ;;  %v9844_v46 = vpop.f32.mrb[145].mxu1 }
 0xc4c   : > { %v9845_v24 = vpop.f32.mrb[146].mxu1 }
 0xc4d   : > { %v9984_v15 = vadd.f32 %v17611_v60, %v9843_v48  ;;  %v9846_v19 = vadd.f32 %v9845_v24, %v17530_v26  ;;  %v9847_v28 = vpop.f32.mrb[147].mxu1  ;;  %12171 = vmatmul.mubr.bf16.gmra.mrb[36].mxu0 %v10091_v4 }
 0xc4f   : > { %v9985_v40 = vadd.f32 %v17611_v60, %v9846_v19  ;;  %v10048_v17 = vmax.f32 %v9984_v15, 0.0 }
 0xc51   : > { %v10049_v54 = vmax.f32 %v9985_v40, 0.0 }
 0xc52   : > { %v9850_v9 = vpop.f32.mrb[148].mxu1 }
 0xc53   : > { %v9851_v29 = vadd.f32 %v17524_v58, %v9850_v9  ;;  %v9852_v20 = vpop.f32.mrb[149].mxu1  ;;  %v10092_v13 = vpack.c.bf16 %v10049_v54, %v10048_v17 }
 0xc54   : > { %v9853_v39 = vpop.f32.mrb[150].mxu1 }
 0xc55   : > { %v9986_v35 = vadd.f32 %v17611_v60, %v9851_v29  ;;  %v9854_v16 = vadd.f32 %v17528_v30, %v9853_v39  ;;  %v9855_v50 = vpop.f32.mrb[151].mxu1  ;;  %12174 = vmatprep.mubr.bf16.mxu0 %v10092_v13 }
 0xc57   : > { %v9987_v26 = vadd.f32 %v17611_v60, %v9854_v16  ;;  %v10050_v10 = vmax.f32 %v9986_v35, 0.0 }
 0xc59   : > { %v10051_v18 = vmax.f32 %v9987_v26, 0.0 }
 0xc5a   : > { %v9858_v12 = vpop.f32.mrb[152].mxu1 }
 0xc5b   : > { %v10093_v49 = vpack.c.bf16 %v10051_v18, %v10050_v10  ;;  %v9859_v7 = vadd.f32 %v9858_v12, %v17540_v33  ;;  %v9860_v34 = vpop.f32.mrb[153].mxu1 }
 0xc5c   : > { %v9861_v5 = vpop.f32.mrb[154].mxu1 }
 0xc5d   : > { %v9988_v58 = vadd.f32 %v17611_v60, %v9859_v7  ;;  %v9862_v3 = vadd.f32 %v9861_v5, %v17544_v41  ;;  %v9863_v37 = vpop.f32.mrb[155].mxu1  ;;  %12175 = vmatmul.mubr.bf16.gmra.mrb[40].mxu0 %v10093_v49 }
 0xc5f   : > { %v9989_v30 = vadd.f32 %v17611_v60, %v9862_v3  ;;  %v10052_v23 = vmax.f32 %v9988_v58, 0.0 }
 0xc61   : > { %v10053_v21 = vmax.f32 %v9989_v30, 0.0 }
 0xc62   : > { %v9866_v56 = vpop.f32.mrb[156].mxu1 }
 0xc63   : > { %v9867_v47 = vadd.f32 %v17538_v0, %v9866_v56  ;;  %v9868_v59 = vpop.f32.mrb[157].mxu1  ;;  %v10094_v14 = vpack.c.bf16 %v10053_v21, %v10052_v23 }
 0xc64   : > { %v9869_v44 = vpop.f32.mrb[158].mxu1 }
 0xc65   : > { %v9990_v33 = vadd.f32 %v17611_v60, %v9867_v47  ;;  %v9870_v36 = vadd.f32 %v17542_v25, %v9869_v44  ;;  %v9871_v45 = vpop.f32.mrb[159].mxu1  ;;  %12178 = vmatprep.mubr.bf16.mxu0 %v10094_v14 }
 0xc67   : > { %v9991_v41 = vadd.f32 %v17611_v60, %v9870_v36  ;;  %v10054_v27 = vmax.f32 %v9990_v33, 0.0 }
 0xc69   : > { %v10055_v6 = vmax.f32 %v9991_v41, 0.0 }
 0xc6a   : > { %v9874_v1 = vpop.f32.mrb[160].mxu1 }
 0xc6b   : > { %v10095_v51 = vpack.c.bf16 %v10055_v6, %v10054_v27  ;;  %v9875_v55 = vadd.f32 %v9874_v1, %v17554_v22  ;;  %v9876_v42 = vpop.f32.mrb[161].mxu1 }
 0xc6c   : > { %v9877_v62 = vpop.f32.mrb[162].mxu1 }
 0xc6d   : > { %v9992_v0 = vadd.f32 %v17611_v60, %v9875_v55  ;;  %v9878_v4 = vadd.f32 %v9877_v62, %v17558_v52  ;;  %v9879_v48 = vpop.f32.mrb[163].mxu1  ;;  %12179 = vmatmul.mubr.bf16.gmra.mrb[44].mxu0 %v10095_v51 }
 0xc6f   : > { %v9993_v25 = vadd.f32 %v17611_v60, %v9878_v4  ;;  %v10056_v46 = vmax.f32 %v9992_v0, 0.0 }
 0xc71   : > { %v10057_v24 = vmax.f32 %v9993_v25, 0.0 }
 0xc72   : > { %v9882_v15 = vpop.f32.mrb[164].mxu1 }
 0xc73   : > { %v9883_v19 = vadd.f32 %v17552_v38, %v9882_v15  ;;  %v9884_v28 = vpop.f32.mrb[165].mxu1  ;;  %v10096_v40 = vpack.c.bf16 %v10057_v24, %v10056_v46 }
 0xc74   : > { %v9885_v17 = vpop.f32.mrb[166].mxu1 }
 0xc75   : > { %v9994_v22 = vadd.f32 %v17611_v60, %v9883_v19  ;;  %v9886_v54 = vadd.f32 %v17556_v32, %v9885_v17  ;;  %v9887_v9 = vpop.f32.mrb[167].mxu1  ;;  %12182 = vmatprep.mubr.bf16.mxu0 %v10096_v40 }
 0xc77   : > { %v9995_v52 = vadd.f32 %v17611_v60, %v9886_v54  ;;  %v10058_v29 = vmax.f32 %v9994_v22, 0.0 }
 0xc79   : > { %v10059_v20 = vmax.f32 %v9995_v52, 0.0 }
 0xc7a   : > { %v9890_v13 = vpop.f32.mrb[168].mxu1 }
 0xc7b   : > { %v10097_v39 = vpack.c.bf16 %v10059_v20, %v10058_v29  ;;  %v9891_v35 = vadd.f32 %v9890_v13, %v17568_v11  ;;  %v9892_v16 = vpop.f32.mrb[169].mxu1 }
 0xc7c   : > { %v9893_v50 = vpop.f32.mrb[170].mxu1 }
 0xc7d   : > { %v9996_v38 = vadd.f32 %v17611_v60, %v9891_v35  ;;  %v9894_v26 = vadd.f32 %v9893_v50, %v17572_v43  ;;  %v9895_v10 = vpop.f32.mrb[171].mxu1  ;;  %12183 = vmatmul.mubr.bf16.gmra.mrb[48].mxu0 %v10097_v39  ;;  %v18488_v39 = vld [vmem:[#allocation58_spill] sm:$0xff] }
 0xc7f   : > { %v9997_v32 = vadd.f32 %v17611_v60, %v9894_v26  ;;  %v10060_v18 = vmax.f32 %v9996_v38, 0.0 }
 0xc81   : > { %v10061_v12 = vmax.f32 %v9997_v32, 0.0 }
 0xc82   : > { %v9898_v49 = vpop.f32.mrb[172].mxu1 }
 0xc83   : > { %v9899_v7 = vadd.f32 %v17566_v61, %v9898_v49  ;;  %v9900_v34 = vpop.f32.mrb[173].mxu1  ;;  %v10098_v5 = vpack.c.bf16 %v10061_v12, %v10060_v18 }
 0xc84   : > { %v9901_v58 = vpop.f32.mrb[174].mxu1 }
 0xc85   : > { %v9998_v11 = vadd.f32 %v17611_v60, %v9899_v7  ;;  %v9902_v3 = vadd.f32 %v17570_v63, %v9901_v58  ;;  %v9903_v37 = vpop.f32.mrb[175].mxu1  ;;  %12186 = vmatprep.mubr.bf16.mxu0 %v10098_v5  ;;  %v17758_v63 = vld [vmem:[%s18487_s11] ss:$0 sm:$0xff] }
 0xc87   : > { %v9999_v43 = vadd.f32 %v17611_v60, %v9902_v3  ;;  %v10062_v30 = vmax.f32 %v9998_v11, 0.0 }
 0xc89   : > { %v10063_v23 = vmax.f32 %v9999_v43, 0.0 }
 0xc8a   : > { %v9906_v21 = vpop.f32.mrb[176].mxu1 }
 0xc8b   : > { %v10099_v56 = vpack.c.bf16 %v10063_v23, %v10062_v30  ;;  %v9907_v47 = vadd.f32 %v9906_v21, %v17582_v8  ;;  %v9908_v59 = vpop.f32.mrb[177].mxu1  ;;  %v18490_v23 = vld [vmem:[#allocation60_spill] sm:$0xff] }
 0xc8c   : > { %v9909_v14 = vpop.f32.mrb[178].mxu1 }
 0xc8d   : > { %v10000_v61 = vadd.f32 %v17611_v60, %v9907_v47  ;;  %v9910_v44 = vadd.f32 %v9909_v14, %v17586_v31  ;;  %v9911_v33 = vpop.f32.mrb[179].mxu1  ;;  %12187 = vmatmul.mubr.bf16.gmra.mrb[52].mxu0 %v10099_v56 }
 0xc8f   : > { %v10001_v36 = vadd.f32 %v17611_v60, %v9910_v44  ;;  %v12136_v45 = vpop.f32.mrb[0].mxu0  ;;  %v10064_v41 = vmax.f32 %v10000_v61, 0.0 }
 0xc90   : > { %v10218_v8 = vadd.f32 %v12136_v45, %v17758_v63  ;;  %v10209_v6 = vpop.f32.mrb[1].mxu0 }
 0xc91   : > { %v10065_v27 = vmax.f32 %v10001_v36, 0.0  ;;  %v10210_v1 = vadd.f32 %v17758_v63, %v10209_v6  ;;  %v12137_v55 = vpop.f32.mrb[2].mxu0  ;;  %v18491_v36 = vld [vmem:[#allocation59_spill] sm:$0xff] }
 0xc92   : > { %v9914_v51 = vpop.f32.mrb[180].mxu1  ;;  %v11892_v31 = vmul.f32 -1.442695, %v10218_v8  ;;  %v10221_v62 = vadd.f32 %v12137_v55, %v17758_v63  ;;  %v10212_v4 = vpop.f32.mrb[3].mxu0 }
 0xc93   : > { %v9915_v42 = vadd.f32 %v17580_v53, %v9914_v51  ;;  %v9916_v0 = vpop.f32.mrb[181].mxu1  ;;  %v10100_v48 = vpack.c.bf16 %v10065_v27, %v10064_v41  ;;  %v11890_v25 = vmul.f32 -1.442695, %v10210_v1  ;;  %v10213_v46 = vadd.f32 %v17758_v63, %v10212_v4  ;;  %v10982_v51 = vpop.permute.xlu1 %10981 }
 0xc94   : > { %v9917_v24 = vpop.f32.mrb[182].mxu1  ;;  %13055 = vpow2.f32 %v11892_v31  ;;  %v11893_v19 = vmul.f32 -1.442695, %v10221_v62 }
 0xc95   : > { %v10002_v15 = vadd.f32 %v17611_v60, %v9915_v42  ;;  %v9918_v28 = vadd.f32 %v17584_v2, %v9917_v24  ;;  %v9919_v40 = vpop.f32.mrb[183].mxu1  ;;  %12190 = vmatprep.mubr.bf16.mxu0 %v10100_v48  ;;  %13057 = vpow2.f32 %v11890_v25  ;;  %v11891_v53 = vmul.f32 -1.442695, %v10213_v46  ;;  %v10978_v42 = vpop.permute.xlu0 %10977 }
 0xc96   : > { %13059 = vpow2.f32 %v11893_v19 }
 0xc97   : > { %v10003_v17 = vadd.f32 %v17611_v60, %v9918_v28  ;;  %13061 = vpow2.f32 %v11891_v53  ;;  %v10066_v22 = vmax.f32 %v10002_v15, 0.0  ;;  %v10984_v25 = vpop.permute.xlu1 %10983 }
 0xc99   : > { %v10067_v54 = vmax.f32 %v10003_v17, 0.0  ;;  %v10980_v24 = vpop.permute.xlu0 %10979 }
 0xc9a   : > { %v9922_v9 = vpop.f32.mrb[184].mxu1 }
 0xc9b   : > { %v10101_v52 = vpack.c.bf16 %v10067_v54, %v10066_v22  ;;  %v9923_v29 = vadd.f32 %v9922_v9, %v17596_v57  ;;  %v9924_v20 = vpop.f32.mrb[185].mxu1 }
 0xc9c   : > { %v9925_v13 = vpop.f32.mrb[186].mxu1 }
 0xc9d   : > { %v9926_v35 = vadd.f32 %v9925_v13, %v18488_v39  ;;  %v9927_v2 = vpop.f32.mrb[187].mxu1  ;;  %12191 = vmatmul.mubr.bf16.gmra.mrb[56].mxu0 %v10101_v52  ;;  %v10004_v16 = vadd.f32 %v17611_v60, %v9923_v29 }
 0xc9e   : > { %v13056_v50 = vpop.eup %13055 }
 0xc9f   : > { %v10005_v38 = vadd.f32 %v17611_v60, %v9926_v35  ;;  %v13058_v26 = vpop.eup %13057  ;;  %v10658_v10 = vadd.f32 1.0, %v13056_v50  ;;  %v12140_v57 = vpop.f32.mrb[4].mxu0  ;;  %v10068_v58 = vmax.f32 %v10004_v16, 0.0 }
 0xca0   : > { %v13060_v32 = vpop.eup %13059  ;;  %v10656_v18 = vadd.f32 1.0, %v13058_v26  ;;  %v10234_v49 = vadd.f32 %v12140_v57, %v17758_v63  ;;  %v10225_v7 = vpop.f32.mrb[5].mxu0 }
 0xca1   : > { %v10069_v12 = vmax.f32 %v10005_v38, 0.0  ;;  %v13062_v34 = vpop.eup %13061  ;;  %13063 = vrcp.f32 %v10658_v10  ;;  %v10659_v5 = vadd.f32 1.0, %v13060_v32  ;;  %v10226_v11 = vadd.f32 %v17758_v63, %v10225_v7  ;;  %v12141_v37 = vpop.f32.mrb[6].mxu0 }
 0xca2   : > { %v9930_v3 = vpop.f32.mrb[188].mxu1  ;;  %13065 = vrcp.f32 %v10656_v18  ;;  %v10657_v43 = vadd.f32 1.0, %v13062_v34  ;;  %v11896_v30 = vmul.f32 -1.442695, %v10234_v49  ;;  %v10228_v47 = vpop.f32.mrb[7].mxu0  ;;  %v10237_v14 = vadd.f32 %v12141_v37, %v17758_v63 }
 0xca3   : > { %v9931_v21 = vadd.f32 %v18490_v23, %v9930_v3  ;;  %v9932_v56 = vpop.f32.mrb[189].mxu1  ;;  %13067 = vrcp.f32 %v10659_v5  ;;  %v11894_v59 = vmul.f32 -1.442695, %v10226_v11  ;;  %v10229_v61 = vadd.f32 %v17758_v63, %v10228_v47  ;;  %v10986_v26 = vpop.permute.xlu0 %10985 }
 0xca4   : > { %v9933_v44 = vpop.f32.mrb[190].mxu1  ;;  %13069 = vrcp.f32 %v10657_v43  ;;  %v10102_v27 = vpack.c.bf16 %v10069_v12, %v10068_v58  ;;  %v11897_v8 = vmul.f32 -1.442695, %v10237_v14  ;;  %v10988_v10 = vpop.permute.xlu1 %10987 }
 0xca5   : > { %v10006_v33 = vadd.f32 %v17611_v60, %v9931_v21  ;;  %v9934_v45 = vadd.f32 %v18491_v36, %v9933_v44  ;;  %v9935_v41 = vpop.f32.mrb[191].mxu1  ;;  %13071 = vpow2.f32 %v11896_v30  ;;  %v11895_v6 = vmul.f32 -1.442695, %v10229_v61 }
 0xca6   : > { %13073 = vpow2.f32 %v11894_v59  ;;  %12194 = vmatprep.mubr.bf16.mxu0 %v10102_v27 }
 0xca7   : > { %v10007_v1 = vadd.f32 %v17611_v60, %v9934_v45  ;;  %13075 = vpow2.f32 %v11897_v8  ;;  %v10070_v55 = vmax.f32 %v10006_v33, 0.0  ;;  %v10990_v18 = vpop.permute.xlu0 %10989 }
 0xca8   : > { %13077 = vpow2.f32 %v11895_v6  ;;  %v10992_v7 = vpop.permute.xlu1 %10991 }
 0xca9   : > { %v10071_v31 = vmax.f32 %v10007_v1, 0.0 }
 0xcab   : > { %v10103_v60 = vpack.c.bf16 %v10071_v31, %v10070_v55  ;;  %v13064_v62 = vpop.eup %13063  ;;  %v10994_v27 = vpop.permute.xlu0 %10993 }
 0xcac   : > { %v13066_v0 = vpop.eup %13065  ;;  %10851 = vst.msk [vmem:[%s17794_s23 + $0x10] sm:$0xff] %vm10848_vm0, %v13064_v62  ;;  %v10996_v8 = vpop.permute.xlu1 %10995 }
 0xcad   : > { %12195 = vmatmul.mubr.bf16.gmra.mrb[60].mxu0 %v10103_v60  ;;  %v13068_v4 = vpop.eup %13067  ;;  %11172 = vst.msk [vmem:[%s17794_s23 + $0x10] sm:$0xff] %vm11169_vm1, %v10982_v51 }
 0xcae   : > { %10849 = vst.msk [vmem:[%s17794_s23] sm:$0xff] %vm10848_vm0, %v13066_v0  ;;  %v13070_v48 = vpop.eup %13069  ;;  %10852 = vst.msk [vmem:[%s17794_s23 + $0x18] sm:$0xff] %vm10848_vm0, %v13068_v4 }
 0xcaf   : > { %11170 = vst.msk [vmem:[%s17794_s23] sm:$0xff] %vm11169_vm1, %v10978_v42  ;;  %v13072_v46 = vpop.eup %13071  ;;  %11173 = vst.msk [vmem:[%s17794_s23 + $0x18] sm:$0xff] %vm11169_vm1, %v10984_v25  ;;  %v12144_v15 = vpop.f32.mrb[8].mxu0 }
 0xcb0   : > { %10850 = vst.msk [vmem:[%s17794_s23 + $0x8] sm:$0xff] %vm10848_vm0, %v13070_v48  ;;  %v13074_v19 = vpop.eup %13073  ;;  %v10662_v28 = vadd.f32 1.0, %v13072_v46  ;;  %v10250_v40 = vadd.f32 %v12144_v15, %v17758_v63  ;;  %v10241_v53 = vpop.f32.mrb[9].mxu0 }
 0xcb1   : > { %11171 = vst.msk [vmem:[%s17794_s23 + $0x8] sm:$0xff] %vm11169_vm1, %v10980_v24  ;;  %v13076_v17 = vpop.eup %13075  ;;  %v10660_v22 = vadd.f32 1.0, %v13074_v19  ;;  %v10242_v54 = vadd.f32 %v17758_v63, %v10241_v53  ;;  %v12145_v9 = vpop.f32.mrb[10].mxu0 }
 0xcb2   : > { %v13078_v52 = vpop.eup %13077  ;;  %13079 = vrcp.f32 %v10662_v28  ;;  %v10663_v29 = vadd.f32 1.0, %v13076_v17  ;;  %v11900_v20 = vmul.f32 -1.442695, %v10250_v40  ;;  %v10253_v13 = vadd.f32 %v12145_v9, %v17758_v63  ;;  %v10244_v39 = vpop.f32.mrb[11].mxu0 }
 0xcb3   : > { %13081 = vrcp.f32 %v10660_v22  ;;  %v10661_v35 = vadd.f32 1.0, %v13078_v52  ;;  %v11898_v2 = vmul.f32 -1.442695, %v10242_v54  ;;  %v10245_v16 = vadd.f32 %v17758_v63, %v10244_v39  ;;  %v10998_v51 = vpop.permute.xlu0 %10997  ;;  %v11000_v60 = vpop.permute.xlu1 %10999 }
 0xcb4   : > { %13083 = vrcp.f32 %v10663_v29  ;;  %v11901_v50 = vmul.f32 -1.442695, %v10253_v13 }
 0xcb5   : > { %13085 = vrcp.f32 %v10661_v35  ;;  %v11899_v38 = vmul.f32 -1.442695, %v10245_v16 }
 0xcb6   : > { %13087 = vpow2.f32 %v11900_v20 }
 0xcb7   : > { %13089 = vpow2.f32 %v11898_v2  ;;  %v11002_v13 = vpop.permute.xlu0 %11001  ;;  %v11004_v39 = vpop.permute.xlu1 %11003 }
 0xcb8   : > { %13091 = vpow2.f32 %v11901_v50 }
 0xcb9   : > { %13093 = vpow2.f32 %v11899_v38 }
 0xcbb   : > { %v11006_v16 = vpop.permute.xlu0 %11005 }
 0xcbc   : > { %v13080_v57 = vpop.eup %13079 }
 0xcbd   : > { %v13082_v32 = vpop.eup %13081  ;;  %10855 = vst.msk [vmem:[%s17794_s23 + $0x30] sm:$0xff] %vm10848_vm0, %v13080_v57 }
 0xcbe   : > { %v13084_v12 = vpop.eup %13083  ;;  %11176 = vst.msk [vmem:[%s17794_s23 + $0x30] sm:$0xff] %vm11169_vm1, %v10990_v18 }
 0xcbf   : > { %10853 = vst.msk [vmem:[%s17794_s23 + $0x20] sm:$0xff] %vm10848_vm0, %v13082_v32  ;;  %v13086_v49 = vpop.eup %13085  ;;  %10856 = vst.msk [vmem:[%s17794_s23 + $0x38] sm:$0xff] %vm10848_vm0, %v13084_v12  ;;  %v12148_v34 = vpop.f32.mrb[12].mxu0 }
 0xcc0   : > { %11174 = vst.msk [vmem:[%s17794_s23 + $0x20] sm:$0xff] %vm11169_vm1, %v10986_v26  ;;  %v13088_v5 = vpop.eup %13087  ;;  %11177 = vst.msk [vmem:[%s17794_s23 + $0x38] sm:$0xff] %vm11169_vm1, %v10992_v7  ;;  %v10266_v58 = vadd.f32 %v12148_v34, %v17758_v63  ;;  %v10257_v11 = vpop.f32.mrb[13].mxu0 }
 0xcc1   : > { %10854 = vst.msk [vmem:[%s17794_s23 + $0x28] sm:$0xff] %vm10848_vm0, %v13086_v49  ;;  %v13090_v3 = vpop.eup %13089  ;;  %v10666_v37 = vadd.f32 1.0, %v13088_v5  ;;  %v10258_v43 = vadd.f32 %v17758_v63, %v10257_v11  ;;  %v12149_v30 = vpop.f32.mrb[14].mxu0 }
 0xcc2   : > { %11175 = vst.msk [vmem:[%s17794_s23 + $0x28] sm:$0xff] %vm11169_vm1, %v10988_v10  ;;  %v13092_v23 = vpop.eup %13091  ;;  %v10664_v21 = vadd.f32 1.0, %v13090_v3  ;;  %v10269_v56 = vadd.f32 %v12149_v30, %v17758_v63  ;;  %v10260_v47 = vpop.f32.mrb[15].mxu0  ;;  %v11904_v61 = vmul.f32 -1.442695, %v10266_v58 }
 0xcc3   : > { %v13094_v59 = vpop.eup %13093  ;;  %13095 = vrcp.f32 %v10666_v37  ;;  %v10667_v14 = vadd.f32 1.0, %v13092_v23  ;;  %v10261_v44 = vadd.f32 %v17758_v63, %v10260_v47  ;;  %v11902_v36 = vmul.f32 -1.442695, %v10258_v43  ;;  %v11008_v32 = vpop.permute.xlu1 %11007 }
 0xcc4   : > { %13097 = vrcp.f32 %v10664_v21  ;;  %v10665_v33 = vadd.f32 1.0, %v13094_v59  ;;  %v11905_v45 = vmul.f32 -1.442695, %v10269_v56 }
 0xcc5   : > { %13099 = vrcp.f32 %v10667_v14  ;;  %v11903_v41 = vmul.f32 -1.442695, %v10261_v44  ;;  %v11010_v14 = vpop.permute.xlu0 %11009 }
 0xcc6   : > { %13101 = vrcp.f32 %v10665_v33 }
 0xcc7   : > { %13103 = vpow2.f32 %v11904_v61  ;;  %v11012_v44 = vpop.permute.xlu1 %11011 }
 0xcc8   : > { %13105 = vpow2.f32 %v11902_v36 }
 0xcc9   : > { %13107 = vpow2.f32 %v11905_v45 }
 0xcca   : > { %13109 = vpow2.f32 %v11903_v41 }
 0xccd   : > { %v13096_v6 = vpop.eup %13095 }
 0xcce   : > { %v13098_v1 = vpop.eup %13097  ;;  %10859 = vst.msk [vmem:[%s17794_s23 + $0x50] sm:$0xff] %vm10848_vm0, %v13096_v6 }
 0xccf   : > { %v13100_v55 = vpop.eup %13099  ;;  %11180 = vst.msk [vmem:[%s17794_s23 + $0x50] sm:$0xff] %vm11169_vm1, %v10998_v51  ;;  %v12152_v31 = vpop.f32.mrb[16].mxu0 }
 0xcd0   : > { %10857 = vst.msk [vmem:[%s17794_s23 + $0x40] sm:$0xff] %vm10848_vm0, %v13098_v1  ;;  %v13102_v42 = vpop.eup %13101  ;;  %10860 = vst.msk [vmem:[%s17794_s23 + $0x58] sm:$0xff] %vm10848_vm0, %v13100_v55  ;;  %v10282_v62 = vadd.f32 %v12152_v31, %v17758_v63  ;;  %v10273_v0 = vpop.f32.mrb[17].mxu0 }
 0xcd1   : > { %11178 = vst.msk [vmem:[%s17794_s23 + $0x40] sm:$0xff] %vm11169_vm1, %v10994_v27  ;;  %v13104_v4 = vpop.eup %13103  ;;  %11181 = vst.msk [vmem:[%s17794_s23 + $0x58] sm:$0xff] %vm11169_vm1, %v11000_v60  ;;  %v10274_v48 = vadd.f32 %v17758_v63, %v10273_v0  ;;  %v12153_v25 = vpop.f32.mrb[18].mxu0 }
 0xcd2   : > { %10858 = vst.msk [vmem:[%s17794_s23 + $0x48] sm:$0xff] %vm10848_vm0, %v13102_v42  ;;  %v13106_v46 = vpop.eup %13105  ;;  %v10670_v24 = vadd.f32 1.0, %v13104_v4  ;;  %v10285_v15 = vadd.f32 %v12153_v25, %v17758_v63  ;;  %v10276_v19 = vpop.f32.mrb[19].mxu0  ;;  %v11908_v54 = vmul.f32 -1.442695, %v10282_v62 }
 0xcd3   : > { %11179 = vst.msk [vmem:[%s17794_s23 + $0x48] sm:$0xff] %vm11169_vm1, %v10996_v8  ;;  %v13108_v28 = vpop.eup %13107  ;;  %v10668_v40 = vadd.f32 1.0, %v13106_v46  ;;  %v10277_v53 = vadd.f32 %v17758_v63, %v10276_v19  ;;  %v11906_v52 = vmul.f32 -1.442695, %v10274_v48  ;;  %v11014_v27 = vpop.permute.xlu0 %11013 }
 0xcd4   : > { %v13110_v17 = vpop.eup %13109  ;;  %13111 = vrcp.f32 %v10670_v24  ;;  %v10671_v22 = vadd.f32 1.0, %v13108_v28  ;;  %v11909_v29 = vmul.f32 -1.442695, %v10285_v15  ;;  %v11016_v42 = vpop.permute.xlu1 %11015 }
 0xcd5   : > { %13113 = vrcp.f32 %v10668_v40  ;;  %v10669_v9 = vadd.f32 1.0, %v13110_v17  ;;  %v11907_v20 = vmul.f32 -1.442695, %v10277_v53 }
 0xcd6   : > { %13115 = vrcp.f32 %v10671_v22 }
 0xcd7   : > { %13117 = vrcp.f32 %v10669_v9  ;;  %v11018_v17 = vpop.permute.xlu0 %11017 }
 0xcd8   : > { %13119 = vpow2.f32 %v11908_v54 }
 0xcd9   : > { %13121 = vpow2.f32 %v11906_v52  ;;  %v11020_v52 = vpop.permute.xlu1 %11019 }
 0xcda   : > { %13123 = vpow2.f32 %v11909_v29 }
 0xcdb   : > { %13125 = vpow2.f32 %v11907_v20  ;;  %v11022_v54 = vpop.permute.xlu0 %11021 }
 0xcde   : > { %v13112_v35 = vpop.eup %13111 }
 0xcdf   : > { %v13114_v2 = vpop.eup %13113  ;;  %10863 = vst.msk [vmem:[%s17794_s23 + $0x70] sm:$0xff] %vm10848_vm0, %v13112_v35 }
 0xce0   : > { %v12156_v50 = vpop.f32.mrb[20].mxu0  ;;  %v13116_v38 = vpop.eup %13115  ;;  %11184 = vst.msk [vmem:[%s17794_s23 + $0x70] sm:$0xff] %vm11169_vm1, %v11006_v16 }
 0xce1   : > { %10861 = vst.msk [vmem:[%s17794_s23 + $0x60] sm:$0xff] %vm10848_vm0, %v13114_v2  ;;  %v10298_v26 = vadd.f32 %v12156_v50, %v17758_v63  ;;  %v10289_v10 = vpop.f32.mrb[21].mxu0  ;;  %v13118_v57 = vpop.eup %13117  ;;  %10864 = vst.msk [vmem:[%s17794_s23 + $0x78] sm:$0xff] %vm10848_vm0, %v13116_v38 }
 0xce2   : > { %11182 = vst.msk [vmem:[%s17794_s23 + $0x60] sm:$0xff] %vm11169_vm1, %v11002_v13  ;;  %v10290_v18 = vadd.f32 %v17758_v63, %v10289_v10  ;;  %v12157_v12 = vpop.f32.mrb[22].mxu0  ;;  %v13120_v49 = vpop.eup %13119  ;;  %11185 = vst.msk [vmem:[%s17794_s23 + $0x78] sm:$0xff] %vm11169_vm1, %v11008_v32 }
 0xce3   : > { %10862 = vst.msk [vmem:[%s17794_s23 + $0x68] sm:$0xff] %vm10848_vm0, %v13118_v57  ;;  %v11912_v7 = vmul.f32 -1.442695, %v10298_v26  ;;  %v10301_v34 = vadd.f32 %v12157_v12, %v17758_v63  ;;  %v10292_v5 = vpop.f32.mrb[23].mxu0  ;;  %v13122_v58 = vpop.eup %13121  ;;  %v10674_v11 = vadd.f32 1.0, %v13120_v49 }
 0xce4   : > { %11183 = vst.msk [vmem:[%s17794_s23 + $0x68] sm:$0xff] %vm11169_vm1, %v11004_v39  ;;  %v10293_v3 = vadd.f32 %v17758_v63, %v10292_v5  ;;  %v13124_v37 = vpop.eup %13123  ;;  %v10672_v43 = vadd.f32 1.0, %v13122_v58  ;;  %v11910_v21 = vmul.f32 -1.442695, %v10290_v18  ;;  %v11024_v57 = vpop.permute.xlu1 %11023 }
 0xce5   : > { %13127 = vpow2.f32 %v11912_v7  ;;  %v13126_v30 = vpop.eup %13125  ;;  %v10675_v23 = vadd.f32 1.0, %v13124_v37  ;;  %v11913_v47 = vmul.f32 -1.442695, %v10301_v34 }
 0xce6   : > { %13129 = vrcp.f32 %v10674_v11  ;;  %v10673_v56 = vadd.f32 1.0, %v13126_v30  ;;  %v11911_v59 = vmul.f32 -1.442695, %v10293_v3 }
 0xce7   : > { %13131 = vrcp.f32 %v10672_v43  ;;  %v11026_v43 = vpop.permute.xlu0 %11025 }
 0xce8   : > { %13133 = vrcp.f32 %v10675_v23 }
 0xce9   : > { %13135 = vrcp.f32 %v10673_v56  ;;  %v11028_v56 = vpop.permute.xlu1 %11027 }
 0xcea   : > { %13137 = vpow2.f32 %v11910_v21 }
 0xceb   : > { %13139 = vpow2.f32 %v11913_v47  ;;  %v11030_v21 = vpop.permute.xlu0 %11029 }
 0xcec   : > { %13141 = vpow2.f32 %v11911_v59 }
 0xcef   : > { %v13128_v61 = vpop.eup %13127 }
 0xcf0   : > { %v13130_v33 = vpop.eup %13129  ;;  %v10678_v36 = vadd.f32 1.0, %v13128_v61  ;;  %v12160_v45 = vpop.f32.mrb[24].mxu0 }
 0xcf1   : > { %v13132_v41 = vpop.eup %13131  ;;  %10867 = vst.msk [vmem:[%s17794_s23 + $0x90] sm:$0xff] %vm10848_vm0, %v13130_v33  ;;  %v10314_v8 = vadd.f32 %v12160_v45, %v17758_v63  ;;  %v10305_v6 = vpop.f32.mrb[25].mxu0 }
 0xcf2   : > { %v13134_v1 = vpop.eup %13133  ;;  %11188 = vst.msk [vmem:[%s17794_s23 + $0x90] sm:$0xff] %vm11169_vm1, %v11014_v27  ;;  %13143 = vrcp.f32 %v10678_v36  ;;  %v10306_v51 = vadd.f32 %v17758_v63, %v10305_v6  ;;  %v12161_v55 = vpop.f32.mrb[26].mxu0 }
 0xcf3   : > { %10865 = vst.msk [vmem:[%s17794_s23 + $0x80] sm:$0xff] %vm10848_vm0, %v13132_v41  ;;  %v13136_v31 = vpop.eup %13135  ;;  %10868 = vst.msk [vmem:[%s17794_s23 + $0x98] sm:$0xff] %vm10848_vm0, %v13134_v1  ;;  %v11916_v60 = vmul.f32 -1.442695, %v10314_v8  ;;  %v10317_v62 = vadd.f32 %v12161_v55, %v17758_v63  ;;  %v10308_v0 = vpop.f32.mrb[27].mxu0 }
 0xcf4   : > { %11186 = vst.msk [vmem:[%s17794_s23 + $0x80] sm:$0xff] %vm11169_vm1, %v11010_v14  ;;  %v13138_v4 = vpop.eup %13137  ;;  %11189 = vst.msk [vmem:[%s17794_s23 + $0x98] sm:$0xff] %vm11169_vm1, %v11016_v42  ;;  %v11914_v48 = vmul.f32 -1.442695, %v10306_v51  ;;  %v10309_v25 = vadd.f32 %v17758_v63, %v10308_v0  ;;  %v11032_v27 = vpop.permute.xlu1 %11031 }
 0xcf5   : > { %10866 = vst.msk [vmem:[%s17794_s23 + $0x88] sm:$0xff] %vm10848_vm0, %v13136_v31  ;;  %v13140_v46 = vpop.eup %13139  ;;  %v10676_v24 = vadd.f32 1.0, %v13138_v4  ;;  %13145 = vpow2.f32 %v11916_v60  ;;  %v11917_v28 = vmul.f32 -1.442695, %v10317_v62 }
 0xcf6   : > { %11187 = vst.msk [vmem:[%s17794_s23 + $0x88] sm:$0xff] %vm11169_vm1, %v11012_v44  ;;  %v13142_v15 = vpop.eup %13141  ;;  %v10679_v19 = vadd.f32 1.0, %v13140_v46  ;;  %13147 = vpow2.f32 %v11914_v48  ;;  %v11915_v53 = vmul.f32 -1.442695, %v10309_v25  ;;  %v11034_v46 = vpop.permute.xlu0 %11033 }
 0xcf7   : > { %13149 = vrcp.f32 %v10676_v24  ;;  %v10677_v40 = vadd.f32 1.0, %v13142_v15 }
 0xcf8   : > { %13151 = vrcp.f32 %v10679_v19  ;;  %v11036_v19 = vpop.permute.xlu1 %11035 }
 0xcf9   : > { %13153 = vrcp.f32 %v10677_v40 }
 0xcfa   : > { %13155 = vpow2.f32 %v11917_v28  ;;  %v11038_v28 = vpop.permute.xlu0 %11037 }
 0xcfb   : > { %13157 = vpow2.f32 %v11915_v53 }
 0xcfc   : > { %v13144_v22 = vpop.eup %13143 }
 0xcfd   : > { %10871 = vst.msk [vmem:[%s17794_s23 + $0xb0] sm:$0xff] %vm10848_vm0, %v13144_v22 }
 0xcfe   : > { %11192 = vst.msk [vmem:[%s17794_s23 + $0xb0] sm:$0xff] %vm11169_vm1, %v11022_v54 }
 0xcff   : > { %v13146_v9 = vpop.eup %13145 }
 0xd00   : > { %v13148_v29 = vpop.eup %13147  ;;  %v10682_v20 = vadd.f32 1.0, %v13146_v9  ;;  %v12164_v13 = vpop.f32.mrb[28].mxu0 }
 0xd01   : > { %v13150_v39 = vpop.eup %13149  ;;  %v10680_v35 = vadd.f32 1.0, %v13148_v29  ;;  %v10330_v2 = vadd.f32 %v12164_v13, %v17758_v63  ;;  %v10321_v16 = vpop.f32.mrb[29].mxu0 }
 0xd02   : > { %v13152_v50 = vpop.eup %13151  ;;  %10869 = vst.msk [vmem:[%s17794_s23 + $0xa0] sm:$0xff] %vm10848_vm0, %v13150_v39  ;;  %13159 = vrcp.f32 %v10682_v20  ;;  %v10322_v38 = vadd.f32 %v17758_v63, %v10321_v16  ;;  %v12165_v26 = vpop.f32.mrb[30].mxu0 }
 0xd03   : > { %v13154_v10 = vpop.eup %13153  ;;  %11190 = vst.msk [vmem:[%s17794_s23 + $0xa0] sm:$0xff] %vm11169_vm1, %v11018_v17  ;;  %13161 = vrcp.f32 %v10680_v35  ;;  %v11920_v32 = vmul.f32 -1.442695, %v10330_v2  ;;  %v10333_v18 = vadd.f32 %v12165_v26, %v17758_v63  ;;  %v10324_v12 = vpop.f32.mrb[31].mxu0 }
 0xd04   : > { %10872 = vst.msk [vmem:[%s17794_s23 + $0xb8] sm:$0xff] %vm10848_vm0, %v13152_v50  ;;  %v13156_v49 = vpop.eup %13155  ;;  %10870 = vst.msk [vmem:[%s17794_s23 + $0xa8] sm:$0xff] %vm10848_vm0, %v13154_v10  ;;  %v11918_v7 = vmul.f32 -1.442695, %v10322_v38  ;;  %v10325_v34 = vadd.f32 %v17758_v63, %v10324_v12  ;;  %v11040_v9 = vpop.permute.xlu1 %11039 }
 0xd05   : > { %11193 = vst.msk [vmem:[%s17794_s23 + $0xb8] sm:$0xff] %vm11169_vm1, %v11024_v57  ;;  %v13158_v5 = vpop.eup %13157  ;;  %11191 = vst.msk [vmem:[%s17794_s23 + $0xa8] sm:$0xff] %vm11169_vm1, %v11020_v52  ;;  %v10683_v58 = vadd.f32 1.0, %v13156_v49  ;;  %13163 = vpow2.f32 %v11920_v32  ;;  %v11921_v11 = vmul.f32 -1.442695, %v10333_v18 }
 0xd06   : > { %v10681_v3 = vadd.f32 1.0, %v13158_v5  ;;  %13165 = vpow2.f32 %v11918_v7  ;;  %v11919_v37 = vmul.f32 -1.442695, %v10325_v34  ;;  %v11042_v7 = vpop.permute.xlu0 %11041 }
 0xd07   : > { %13167 = vrcp.f32 %v10683_v58 }
 0xd08   : > { %13169 = vrcp.f32 %v10681_v3  ;;  %v11044_v5 = vpop.permute.xlu1 %11043 }
 0xd09   : > { %13171 = vpow2.f32 %v11921_v11 }
 0xd0a   : > { %13173 = vpow2.f32 %v11919_v37  ;;  %v11046_v58 = vpop.permute.xlu0 %11045 }
 0xd0c   : > { %v13160_v30 = vpop.eup %13159 }
 0xd0d   : > { %v13162_v23 = vpop.eup %13161  ;;  %10875 = vst.msk [vmem:[%s17794_s23 + $0xd0] sm:$0xff] %vm10848_vm0, %v13160_v30  ;;  %v11048_v30 = vpop.permute.xlu1 %11047 }
 0xd0e   : > { %11196 = vst.msk [vmem:[%s17794_s23 + $0xd0] sm:$0xff] %vm11169_vm1, %v11030_v21 }
 0xd0f   : > { %10873 = vst.msk [vmem:[%s17794_s23 + $0xc0] sm:$0xff] %vm10848_vm0, %v13162_v23  ;;  %v13164_v47 = vpop.eup %13163 }
 0xd10   : > { %11194 = vst.msk [vmem:[%s17794_s23 + $0xc0] sm:$0xff] %vm11169_vm1, %v11026_v43  ;;  %v13166_v59 = vpop.eup %13165  ;;  %v10686_v14 = vadd.f32 1.0, %v13164_v47  ;;  %v12168_v61 = vpop.f32.mrb[32].mxu0 }
 0xd11   : > { %v13168_v44 = vpop.eup %13167  ;;  %v10684_v33 = vadd.f32 1.0, %v13166_v59  ;;  %v10346_v36 = vadd.f32 %v12168_v61, %v17758_v63  ;;  %v10337_v45 = vpop.f32.mrb[33].mxu0 }
 0xd12   : > { %v13170_v41 = vpop.eup %13169  ;;  %10876 = vst.msk [vmem:[%s17794_s23 + $0xd8] sm:$0xff] %vm10848_vm0, %v13168_v44  ;;  %13175 = vrcp.f32 %v10686_v14  ;;  %v10338_v8 = vadd.f32 %v17758_v63, %v10337_v45  ;;  %v12169_v6 = vpop.f32.mrb[34].mxu0 }
 0xd13   : > { %v13172_v1 = vpop.eup %13171  ;;  %11197 = vst.msk [vmem:[%s17794_s23 + $0xd8] sm:$0xff] %vm11169_vm1, %v11032_v27  ;;  %13177 = vrcp.f32 %v10684_v33  ;;  %v11924_v51 = vmul.f32 -1.442695, %v10346_v36  ;;  %v10349_v55 = vadd.f32 %v12169_v6, %v17758_v63  ;;  %v10340_v31 = vpop.f32.mrb[35].mxu0 }
 0xd14   : > { %10874 = vst.msk [vmem:[%s17794_s23 + $0xc8] sm:$0xff] %vm10848_vm0, %v13170_v41  ;;  %v13174_v42 = vpop.eup %13173  ;;  %v10687_v60 = vadd.f32 1.0, %v13172_v1  ;;  %v11922_v62 = vmul.f32 -1.442695, %v10338_v8  ;;  %v10341_v0 = vadd.f32 %v17758_v63, %v10340_v31 }
 0xd15   : > { %11195 = vst.msk [vmem:[%s17794_s23 + $0xc8] sm:$0xff] %vm11169_vm1, %v11028_v56  ;;  %v10685_v4 = vadd.f32 1.0, %v13174_v42  ;;  %13179 = vpow2.f32 %v11924_v51  ;;  %v11925_v48 = vmul.f32 -1.442695, %v10349_v55  ;;  %v11050_v42 = vpop.permute.xlu0 %11049 }
 0xd16   : > { %13181 = vrcp.f32 %v10687_v60  ;;  %v11923_v25 = vmul.f32 -1.442695, %v10341_v0  ;;  %v11052_v60 = vpop.permute.xlu1 %11051 }
 0xd17   : > { %13183 = vrcp.f32 %v10685_v4 }
 0xd18   : > { %13185 = vpow2.f32 %v11922_v62 }
 0xd19   : > { %13187 = vpow2.f32 %v11925_v48  ;;  %v11054_v4 = vpop.permute.xlu0 %11053 }
 0xd1a   : > { %13189 = vpow2.f32 %v11923_v25 }
 0xd1c   : > { %v13176_v24 = vpop.eup %13175 }
 0xd1d   : > { %v13178_v15 = vpop.eup %13177  ;;  %10879 = vst.msk [vmem:[%s17794_s23 + $0xf0] sm:$0xff] %vm10848_vm0, %v13176_v24 }
 0xd1e   : > { %11200 = vst.msk [vmem:[%s17794_s23 + $0xf0] sm:$0xff] %vm11169_vm1, %v11038_v28 }
 0xd1f   : > { %10877 = vst.msk [vmem:[%s17794_s23 + $0xe0] sm:$0xff] %vm10848_vm0, %v13178_v15  ;;  %v13180_v40 = vpop.eup %13179 }
 0xd20   : > { %11198 = vst.msk [vmem:[%s17794_s23 + $0xe0] sm:$0xff] %vm11169_vm1, %v11034_v46  ;;  %v13182_v53 = vpop.eup %13181  ;;  %v10690_v17 = vadd.f32 1.0, %v13180_v40  ;;  %v12172_v22 = vpop.f32.mrb[36].mxu0 }
 0xd21   : > { %v13184_v54 = vpop.eup %13183  ;;  %10880 = vst.msk [vmem:[%s17794_s23 + $0xf8] sm:$0xff] %vm10848_vm0, %v13182_v53  ;;  %v10362_v52 = vadd.f32 %v12172_v22, %v17758_v63  ;;  %v10353_v29 = vpop.f32.mrb[37].mxu0 }
 0xd22   : > { %v13186_v20 = vpop.eup %13185  ;;  %11201 = vst.msk [vmem:[%s17794_s23 + $0xf8] sm:$0xff] %vm11169_vm1, %v11040_v9  ;;  %13191 = vrcp.f32 %v10690_v17  ;;  %v10354_v13 = vadd.f32 %v17758_v63, %v10353_v29  ;;  %v12173_v39 = vpop.f32.mrb[38].mxu0  ;;  %v17998_v29 = vld [vmem:[%s18487_s11] ss:$0 sm:$0xff] }
 0xd23   : > { %10878 = vst.msk [vmem:[%s17794_s23 + $0xe8] sm:$0xff] %vm10848_vm0, %v13184_v54  ;;  %v13188_v35 = vpop.eup %13187  ;;  %v10688_v2 = vadd.f32 1.0, %v13186_v20  ;;  %v10365_v16 = vadd.f32 %v12173_v39, %v17758_v63  ;;  %v10356_v50 = vpop.f32.mrb[39].mxu0  ;;  %v11928_v10 = vmul.f32 -1.442695, %v10362_v52 }
 0xd24   : > { %11199 = vst.msk [vmem:[%s17794_s23 + $0xe8] sm:$0xff] %vm11169_vm1, %v11036_v19  ;;  %v13190_v38 = vpop.eup %13189  ;;  %v10691_v26 = vadd.f32 1.0, %v13188_v35  ;;  %v10357_v57 = vadd.f32 %v17758_v63, %v10356_v50  ;;  %v11926_v18 = vmul.f32 -1.442695, %v10354_v13  ;;  %v11056_v19 = vpop.permute.xlu1 %11055 }
 0xd25   : > { %13193 = vrcp.f32 %v10688_v2  ;;  %v10689_v32 = vadd.f32 1.0, %v13190_v38  ;;  %v11929_v12 = vmul.f32 -1.442695, %v10365_v16 }
 0xd26   : > { %13195 = vrcp.f32 %v10691_v26  ;;  %v11927_v49 = vmul.f32 -1.442695, %v10357_v57  ;;  %v11058_v26 = vpop.permute.xlu0 %11057 }
 0xd27   : > { %13197 = vrcp.f32 %v10689_v32 }
 0xd28   : > { %13199 = vpow2.f32 %v11928_v10  ;;  %v11060_v57 = vpop.permute.xlu1 %11059 }
 0xd29   : > { %13201 = vpow2.f32 %v11926_v18 }
 0xd2a   : > { %13203 = vpow2.f32 %v11929_v12 }
 0xd2b   : > { %13205 = vpow2.f32 %v11927_v49 }
 0xd2c   : > { %v13192_v34 = vpop.eup %13191 }
 0xd2d   : > { %10883 = vst.msk [vmem:[%s17794_s23 + $0x110] sm:$0xff] %vm10848_vm0, %v13192_v34 }
 0xd2e   : > { %11204 = vst.msk [vmem:[%s17794_s23 + $0x110] sm:$0xff] %vm11169_vm1, %v11046_v58 }
 0xd2f   : > { %v13194_v11 = vpop.eup %13193 }
 0xd30   : > { %v13196_v3 = vpop.eup %13195  ;;  %10881 = vst.msk [vmem:[%s17794_s23 + $0x100] sm:$0xff] %vm10848_vm0, %v13194_v11  ;;  %v12176_v37 = vpop.f32.mrb[40].mxu0 }
 0xd31   : > { %v13198_v43 = vpop.eup %13197  ;;  %11202 = vst.msk [vmem:[%s17794_s23 + $0x100] sm:$0xff] %vm11169_vm1, %v11042_v7  ;;  %v10378_v23 = vadd.f32 %v12176_v37, %v17758_v63  ;;  %v10369_v21 = vpop.f32.mrb[41].mxu0 }
 0xd32   : > { %10884 = vst.msk [vmem:[%s17794_s23 + $0x118] sm:$0xff] %vm10848_vm0, %v13196_v3  ;;  %v13200_v56 = vpop.eup %13199  ;;  %10882 = vst.msk [vmem:[%s17794_s23 + $0x108] sm:$0xff] %vm10848_vm0, %v13198_v43  ;;  %v10370_v47 = vadd.f32 %v17758_v63, %v10369_v21  ;;  %v12177_v59 = vpop.f32.mrb[42].mxu0 }
 0xd33   : > { %11205 = vst.msk [vmem:[%s17794_s23 + $0x118] sm:$0xff] %vm11169_vm1, %v11048_v30  ;;  %v13202_v14 = vpop.eup %13201  ;;  %11203 = vst.msk [vmem:[%s17794_s23 + $0x108] sm:$0xff] %vm11169_vm1, %v11044_v5  ;;  %v10694_v61 = vadd.f32 1.0, %v13200_v56  ;;  %v10381_v44 = vadd.f32 %v12177_v59, %v17758_v63  ;;  %v10372_v33 = vpop.f32.mrb[43].mxu0  ;;  %v11932_v6 = vmul.f32 -1.442695, %v10378_v23 }
 0xd34   : > { %v13204_v36 = vpop.eup %13203  ;;  %v10692_v45 = vadd.f32 1.0, %v13202_v14  ;;  %v10373_v41 = vadd.f32 %v17758_v63, %v10372_v33  ;;  %v11930_v51 = vmul.f32 -1.442695, %v10370_v47  ;;  %v11062_v7 = vpop.permute.xlu0 %11061 }
 0xd35   : > { %v13206_v27 = vpop.eup %13205  ;;  %13207 = vrcp.f32 %v10694_v61  ;;  %v10695_v8 = vadd.f32 1.0, %v13204_v36  ;;  %v11933_v55 = vmul.f32 -1.442695, %v10381_v44  ;;  %v11064_v43 = vpop.permute.xlu1 %11063 }
 0xd36   : > { %13209 = vrcp.f32 %v10692_v45  ;;  %v10693_v1 = vadd.f32 1.0, %v13206_v27  ;;  %v11931_v31 = vmul.f32 -1.442695, %v10373_v41 }
 0xd37   : > { %13211 = vrcp.f32 %v10695_v8 }
 0xd38   : > { %13213 = vrcp.f32 %v10693_v1  ;;  %v11066_v27 = vpop.permute.xlu0 %11065 }
 0xd39   : > { %13215 = vpow2.f32 %v11932_v6 }
 0xd3a   : > { %13217 = vpow2.f32 %v11930_v51  ;;  %v11068_v51 = vpop.permute.xlu1 %11067 }
 0xd3b   : > { %13219 = vpow2.f32 %v11933_v55 }
 0xd3c   : > { %13221 = vpow2.f32 %v11931_v31  ;;  %v11070_v6 = vpop.permute.xlu0 %11069 }
 0xd3f   : > { %v13208_v62 = vpop.eup %13207 }
 0xd40   : > { %v13210_v0 = vpop.eup %13209  ;;  %10887 = vst.msk [vmem:[%s17794_s23 + $0x130] sm:$0xff] %vm10848_vm0, %v13208_v62  ;;  %v12180_v48 = vpop.f32.mrb[44].mxu0 }
 0xd41   : > { %v13212_v25 = vpop.eup %13211  ;;  %11208 = vst.msk [vmem:[%s17794_s23 + $0x130] sm:$0xff] %vm11169_vm1, %v11054_v4  ;;  %v10394_v46 = vadd.f32 %v12180_v48, %v17758_v63  ;;  %v10385_v24 = vpop.f32.mrb[45].mxu0 }
 0xd42   : > { %10885 = vst.msk [vmem:[%s17794_s23 + $0x120] sm:$0xff] %vm10848_vm0, %v13210_v0  ;;  %v13214_v15 = vpop.eup %13213  ;;  %10888 = vst.msk [vmem:[%s17794_s23 + $0x138] sm:$0xff] %vm10848_vm0, %v13212_v25  ;;  %v10386_v28 = vadd.f32 %v17758_v63, %v10385_v24  ;;  %v12181_v40 = vpop.f32.mrb[46].mxu0 }
 0xd43   : > { %11206 = vst.msk [vmem:[%s17794_s23 + $0x120] sm:$0xff] %vm11169_vm1, %v11050_v42  ;;  %v13216_v53 = vpop.eup %13215  ;;  %11209 = vst.msk [vmem:[%s17794_s23 + $0x138] sm:$0xff] %vm11169_vm1, %v11056_v19  ;;  %v11936_v17 = vmul.f32 -1.442695, %v10394_v46  ;;  %v10397_v22 = vadd.f32 %v12181_v40, %v17758_v63  ;;  %v10388_v54 = vpop.f32.mrb[47].mxu0 }
 0xd44   : > { %10886 = vst.msk [vmem:[%s17794_s23 + $0x128] sm:$0xff] %vm10848_vm0, %v13214_v15  ;;  %v13218_v9 = vpop.eup %13217  ;;  %v10698_v52 = vadd.f32 1.0, %v13216_v53  ;;  %v10389_v20 = vadd.f32 %v17998_v29, %v10388_v54  ;;  %v11934_v16 = vmul.f32 -1.442695, %v10386_v28  ;;  %v11072_v15 = vpop.permute.xlu1 %11071 }
 0xd45   : > { %11207 = vst.msk [vmem:[%s17794_s23 + $0x128] sm:$0xff] %vm11169_vm1, %v11052_v60  ;;  %v13220_v13 = vpop.eup %13219  ;;  %v10696_v39 = vadd.f32 1.0, %v13218_v9  ;;  %13223 = vpow2.f32 %v11936_v17  ;;  %v11937_v50 = vmul.f32 -1.442695, %v10397_v22 }
 0xd46   : > { %v13222_v35 = vpop.eup %13221  ;;  %13225 = vrcp.f32 %v10698_v52  ;;  %v10699_v2 = vadd.f32 1.0, %v13220_v13  ;;  %v11935_v38 = vmul.f32 -1.442695, %v10389_v20 }
 0xd47   : > { %13227 = vrcp.f32 %v10696_v39  ;;  %v10697_v63 = vadd.f32 1.0, %v13222_v35  ;;  %v11074_v39 = vpop.permute.xlu0 %11073 }
 0xd48   : > { %13229 = vrcp.f32 %v10699_v2 }
 0xd49   : > { %13231 = vrcp.f32 %v10697_v63  ;;  %v11076_v63 = vpop.permute.xlu1 %11075 }
 0xd4a   : > { %13233 = vpow2.f32 %v11934_v16 }
 0xd4b   : > { %13235 = vpow2.f32 %v11937_v50  ;;  %v11078_v16 = vpop.permute.xlu0 %11077 }
 0xd4c   : > { %13237 = vpow2.f32 %v11935_v38 }
 0xd4f   : > { %v13224_v10 = vpop.eup %13223 }
 0xd50   : > { %v13226_v32 = vpop.eup %13225  ;;  %v10702_v18 = vadd.f32 1.0, %v13224_v10  ;;  %v12184_v12 = vpop.f32.mrb[48].mxu0 }
 0xd51   : > { %v13228_v49 = vpop.eup %13227  ;;  %10891 = vst.msk [vmem:[%s17794_s23 + $0x150] sm:$0xff] %vm10848_vm0, %v13226_v32  ;;  %v10410_v34 = vadd.f32 %v17998_v29, %v12184_v12  ;;  %v10401_v5 = vpop.f32.mrb[49].mxu0 }
 0xd52   : > { %v13230_v58 = vpop.eup %13229  ;;  %11212 = vst.msk [vmem:[%s17794_s23 + $0x150] sm:$0xff] %vm11169_vm1, %v11062_v7  ;;  %13239 = vrcp.f32 %v10702_v18  ;;  %v10402_v11 = vadd.f32 %v17998_v29, %v10401_v5  ;;  %v12185_v3 = vpop.f32.mrb[50].mxu0 }
 0xd53   : > { %10889 = vst.msk [vmem:[%s17794_s23 + $0x140] sm:$0xff] %vm10848_vm0, %v13228_v49  ;;  %v13232_v37 = vpop.eup %13231  ;;  %10892 = vst.msk [vmem:[%s17794_s23 + $0x158] sm:$0xff] %vm10848_vm0, %v13230_v58  ;;  %v11940_v30 = vmul.f32 -1.442695, %v10410_v34  ;;  %v10413_v23 = vadd.f32 %v17998_v29, %v12185_v3  ;;  %v10404_v21 = vpop.f32.mrb[51].mxu0 }
 0xd54   : > { %11210 = vst.msk [vmem:[%s17794_s23 + $0x140] sm:$0xff] %vm11169_vm1, %v11058_v26  ;;  %v13234_v56 = vpop.eup %13233  ;;  %11213 = vst.msk [vmem:[%s17794_s23 + $0x158] sm:$0xff] %vm11169_vm1, %v11064_v43  ;;  %v11938_v47 = vmul.f32 -1.442695, %v10402_v11  ;;  %v10405_v59 = vadd.f32 %v17998_v29, %v10404_v21  ;;  %v11080_v7 = vpop.permute.xlu1 %11079 }
 0xd55   : > { %10890 = vst.msk [vmem:[%s17794_s23 + $0x148] sm:$0xff] %vm10848_vm0, %v13232_v37  ;;  %v13236_v14 = vpop.eup %13235  ;;  %v10700_v61 = vadd.f32 1.0, %v13234_v56  ;;  %13241 = vpow2.f32 %v11940_v30  ;;  %v11941_v36 = vmul.f32 -1.442695, %v10413_v23 }
 0xd56   : > { %11211 = vst.msk [vmem:[%s17794_s23 + $0x148] sm:$0xff] %vm11169_vm1, %v11060_v57  ;;  %v13238_v44 = vpop.eup %13237  ;;  %v10703_v33 = vadd.f32 1.0, %v13236_v14  ;;  %13243 = vpow2.f32 %v11938_v47  ;;  %v11939_v41 = vmul.f32 -1.442695, %v10405_v59  ;;  %v11082_v14 = vpop.permute.xlu0 %11081 }
 0xd57   : > { %13245 = vrcp.f32 %v10700_v61  ;;  %v10701_v45 = vadd.f32 1.0, %v13238_v44 }
 0xd58   : > { %13247 = vrcp.f32 %v10703_v33  ;;  %v11084_v33 = vpop.permute.xlu1 %11083 }
 0xd59   : > { %13249 = vrcp.f32 %v10701_v45 }
 0xd5a   : > { %13251 = vpow2.f32 %v11941_v36  ;;  %v11086_v36 = vpop.permute.xlu0 %11085 }
 0xd5b   : > { %13253 = vpow2.f32 %v11939_v41 }
 0xd5c   : > { %v13240_v8 = vpop.eup %13239 }
 0xd5d   : > { %10895 = vst.msk [vmem:[%s17794_s23 + $0x170] sm:$0xff] %vm10848_vm0, %v13240_v8 }
 0xd5e   : > { %11216 = vst.msk [vmem:[%s17794_s23 + $0x170] sm:$0xff] %vm11169_vm1, %v11070_v6 }
 0xd5f   : > { %v13242_v1 = vpop.eup %13241 }
 0xd60   : > { %v13244_v55 = vpop.eup %13243  ;;  %v10706_v31 = vadd.f32 1.0, %v13242_v1  ;;  %v12188_v42 = vpop.f32.mrb[52].mxu0 }
 0xd61   : > { %v13246_v60 = vpop.eup %13245  ;;  %v10704_v62 = vadd.f32 1.0, %v13244_v55  ;;  %v10426_v0 = vadd.f32 %v17998_v29, %v12188_v42  ;;  %v10417_v4 = vpop.f32.mrb[53].mxu0 }
 0xd62   : > { %v13248_v48 = vpop.eup %13247  ;;  %10893 = vst.msk [vmem:[%s17794_s23 + $0x160] sm:$0xff] %vm10848_vm0, %v13246_v60  ;;  %13255 = vrcp.f32 %v10706_v31  ;;  %v10418_v25 = vadd.f32 %v17998_v29, %v10417_v4  ;;  %v12189_v46 = vpop.f32.mrb[54].mxu0 }
 0xd63   : > { %v13250_v24 = vpop.eup %13249  ;;  %11214 = vst.msk [vmem:[%s17794_s23 + $0x160] sm:$0xff] %vm11169_vm1, %v11066_v27  ;;  %13257 = vrcp.f32 %v10704_v62  ;;  %v11944_v19 = vmul.f32 -1.442695, %v10426_v0  ;;  %v10429_v28 = vadd.f32 %v17998_v29, %v12189_v46  ;;  %v10420_v40 = vpop.f32.mrb[55].mxu0 }
 0xd64   : > { %10896 = vst.msk [vmem:[%s17794_s23 + $0x178] sm:$0xff] %vm10848_vm0, %v13248_v48  ;;  %v13252_v53 = vpop.eup %13251  ;;  %10894 = vst.msk [vmem:[%s17794_s23 + $0x168] sm:$0xff] %vm10848_vm0, %v13250_v24  ;;  %v11942_v17 = vmul.f32 -1.442695, %v10418_v25  ;;  %v10421_v22 = vadd.f32 %v17998_v29, %v10420_v40  ;;  %v11088_v1 = vpop.permute.xlu1 %11087 }
 0xd65   : > { %11217 = vst.msk [vmem:[%s17794_s23 + $0x178] sm:$0xff] %vm11169_vm1, %v11072_v15  ;;  %v13254_v54 = vpop.eup %13253  ;;  %11215 = vst.msk [vmem:[%s17794_s23 + $0x168] sm:$0xff] %vm11169_vm1, %v11068_v51  ;;  %v10707_v9 = vadd.f32 1.0, %v13252_v53  ;;  %13259 = vpow2.f32 %v11944_v19  ;;  %v11945_v52 = vmul.f32 -1.442695, %v10429_v28 }
 0xd66   : > { %v10705_v20 = vadd.f32 1.0, %v13254_v54  ;;  %13261 = vpow2.f32 %v11942_v17  ;;  %v11943_v13 = vmul.f32 -1.442695, %v10421_v22  ;;  %v11090_v17 = vpop.permute.xlu0 %11089 }
 0xd67   : > { %13263 = vrcp.f32 %v10707_v9 }
 0xd68   : > { %13265 = vrcp.f32 %v10705_v20  ;;  %v11092_v22 = vpop.permute.xlu1 %11091 }
 0xd69   : > { %13267 = vpow2.f32 %v11945_v52 }
 0xd6a   : > { %13269 = vpow2.f32 %v11943_v13  ;;  %v11094_v54 = vpop.permute.xlu0 %11093 }
 0xd6c   : > { %v13256_v35 = vpop.eup %13255  ;;  %v11096_v13 = vpop.permute.xlu1 %11095 }
 0xd6d   : > { %v13258_v2 = vpop.eup %13257  ;;  %10899 = vst.msk [vmem:[%s17794_s23 + $0x190] sm:$0xff] %vm10848_vm0, %v13256_v35 }
 0xd6e   : > { %11220 = vst.msk [vmem:[%s17794_s23 + $0x190] sm:$0xff] %vm11169_vm1, %v11078_v16 }
 0xd6f   : > { %10897 = vst.msk [vmem:[%s17794_s23 + $0x180] sm:$0xff] %vm10848_vm0, %v13258_v2  ;;  %v13260_v50 = vpop.eup %13259 }
 0xd70   : > { %11218 = vst.msk [vmem:[%s17794_s23 + $0x180] sm:$0xff] %vm11169_vm1, %v11074_v39  ;;  %v13262_v38 = vpop.eup %13261  ;;  %v10710_v26 = vadd.f32 1.0, %v13260_v50  ;;  %v12192_v10 = vpop.f32.mrb[56].mxu0 }
 0xd71   : > { %v13264_v57 = vpop.eup %13263  ;;  %v10708_v32 = vadd.f32 1.0, %v13262_v38  ;;  %v10442_v18 = vadd.f32 %v17998_v29, %v12192_v10  ;;  %v10433_v12 = vpop.f32.mrb[57].mxu0 }
 0xd72   : > { %v13266_v49 = vpop.eup %13265  ;;  %10900 = vst.msk [vmem:[%s17794_s23 + $0x198] sm:$0xff] %vm10848_vm0, %v13264_v57  ;;  %13271 = vrcp.f32 %v10710_v26  ;;  %v10434_v34 = vadd.f32 %v17998_v29, %v10433_v12  ;;  %v12193_v5 = vpop.f32.mrb[58].mxu0 }
 0xd73   : > { %v13268_v58 = vpop.eup %13267  ;;  %11221 = vst.msk [vmem:[%s17794_s23 + $0x198] sm:$0xff] %vm11169_vm1, %v11080_v7  ;;  %13273 = vrcp.f32 %v10708_v32  ;;  %v11948_v11 = vmul.f32 -1.442695, %v10442_v18  ;;  %v10445_v3 = vadd.f32 %v17998_v29, %v12193_v5  ;;  %v10436_v37 = vpop.f32.mrb[59].mxu0 }
 0xd74   : > { %10898 = vst.msk [vmem:[%s17794_s23 + $0x188] sm:$0xff] %vm10848_vm0, %v13266_v49  ;;  %v13270_v43 = vpop.eup %13269  ;;  %v10711_v30 = vadd.f32 1.0, %v13268_v58  ;;  %v11946_v23 = vmul.f32 -1.442695, %v10434_v34  ;;  %v10437_v21 = vadd.f32 %v17998_v29, %v10436_v37  ;;  %v11098_v10 = vpop.permute.xlu0 %11097 }
 0xd75   : > { %11219 = vst.msk [vmem:[%s17794_s23 + $0x188] sm:$0xff] %vm11169_vm1, %v11076_v63  ;;  %v10709_v56 = vadd.f32 1.0, %v13270_v43  ;;  %13275 = vpow2.f32 %v11948_v11  ;;  %v11949_v47 = vmul.f32 -1.442695, %v10445_v3  ;;  %v11100_v57 = vpop.permute.xlu1 %11099 }
 0xd76   : > { %13277 = vrcp.f32 %v10711_v30  ;;  %v11947_v59 = vmul.f32 -1.442695, %v10437_v21 }
 0xd77   : > { %13279 = vrcp.f32 %v10709_v56 }
 0xd78   : > { %13281 = vpow2.f32 %v11946_v23  ;;  %v11102_v12 = vpop.permute.xlu0 %11101 }
 0xd79   : > { %13283 = vpow2.f32 %v11949_v47  ;;  %v11104_v34 = vpop.permute.xlu1 %11103 }
 0xd7a   : > { %13285 = vpow2.f32 %v11947_v59 }
 0xd7c   : > { %v13272_v61 = vpop.eup %13271 }
 0xd7d   : > { %v13274_v44 = vpop.eup %13273  ;;  %10903 = vst.msk [vmem:[%s17794_s23 + $0x1b0] sm:$0xff] %vm10848_vm0, %v13272_v61 }
 0xd7e   : > { %11224 = vst.msk [vmem:[%s17794_s23 + $0x1b0] sm:$0xff] %vm11169_vm1, %v11086_v36 }
 0xd7f   : > { %10901 = vst.msk [vmem:[%s17794_s23 + $0x1a0] sm:$0xff] %vm10848_vm0, %v13274_v44  ;;  %v13276_v45 = vpop.eup %13275 }
 0xd80   : > { %11222 = vst.msk [vmem:[%s17794_s23 + $0x1a0] sm:$0xff] %vm11169_vm1, %v11082_v14  ;;  %v13278_v41 = vpop.eup %13277  ;;  %v10714_v27 = vadd.f32 1.0, %v13276_v45  ;;  %v12196_v8 = vpop.f32.mrb[60].mxu0 }
 0xd81   : > { %v13280_v6 = vpop.eup %13279  ;;  %10904 = vst.msk [vmem:[%s17794_s23 + $0x1b8] sm:$0xff] %vm10848_vm0, %v13278_v41  ;;  %v10458_v51 = vadd.f32 %v17998_v29, %v12196_v8  ;;  %v10449_v55 = vpop.f32.mrb[61].mxu0 }
 0xd82   : > { %v13282_v31 = vpop.eup %13281  ;;  %11225 = vst.msk [vmem:[%s17794_s23 + $0x1b8] sm:$0xff] %vm11169_vm1, %v11088_v1  ;;  %13287 = vrcp.f32 %v10714_v27  ;;  %v10450_v42 = vadd.f32 %v17998_v29, %v10449_v55  ;;  %v12197_v60 = vpop.f32.mrb[62].mxu0 }
 0xd83   : > { %10902 = vst.msk [vmem:[%s17794_s23 + $0x1a8] sm:$0xff] %vm10848_vm0, %v13280_v6  ;;  %v13284_v62 = vpop.eup %13283  ;;  %v10712_v0 = vadd.f32 1.0, %v13282_v31  ;;  %v10461_v4 = vadd.f32 %v17998_v29, %v12197_v60  ;;  %v10452_v48 = vpop.f32.mrb[63].mxu0  ;;  %v11952_v24 = vmul.f32 -1.442695, %v10458_v51 }
 0xd84   : > { %11223 = vst.msk [vmem:[%s17794_s23 + $0x1a8] sm:$0xff] %vm11169_vm1, %v11084_v33  ;;  %v13286_v25 = vpop.eup %13285  ;;  %v10715_v46 = vadd.f32 1.0, %v13284_v62  ;;  %v10453_v15 = vadd.f32 %v17998_v29, %v10452_v48  ;;  %v11950_v28 = vmul.f32 -1.442695, %v10450_v42 }
 0xd85   : > { %13289 = vrcp.f32 %v10712_v0  ;;  %v10713_v19 = vadd.f32 1.0, %v13286_v25  ;;  %v11953_v40 = vmul.f32 -1.442695, %v10461_v4 }
 0xd86   : > { %13291 = vrcp.f32 %v10715_v46  ;;  %v11951_v53 = vmul.f32 -1.442695, %v10453_v15 }
 0xd87   : > { %13293 = vrcp.f32 %v10713_v19 }
 0xd88   : > { %13295 = vpow2.f32 %v11952_v24 }
 0xd89   : > { %13297 = vpow2.f32 %v11950_v28 }
 0xd8a   : > { %13299 = vpow2.f32 %v11953_v40 }
 0xd8b   : > { %13301 = vpow2.f32 %v11951_v53 }
 0xd8c   : > { %v13288_v29 = vpop.eup %13287 }
 0xd8d   : > { %10907 = vst.msk [vmem:[%s17794_s23 + $0x1d0] sm:$0xff] %vm10848_vm0, %v13288_v29 }
 0xd8e   : > { %11228 = vst.msk [vmem:[%s17794_s23 + $0x1d0] sm:$0xff] %vm11169_vm1, %v11094_v54 }
 0xd8f   : > { %v13290_v9 = vpop.eup %13289 }
 0xd90   : > { %v13292_v52 = vpop.eup %13291  ;;  %10905 = vst.msk [vmem:[%s17794_s23 + $0x1c0] sm:$0xff] %vm10848_vm0, %v13290_v9 }
 0xd91   : > { %v13294_v20 = vpop.eup %13293  ;;  %11226 = vst.msk [vmem:[%s17794_s23 + $0x1c0] sm:$0xff] %vm11169_vm1, %v11090_v17 }
 0xd92   : > { %10908 = vst.msk [vmem:[%s17794_s23 + $0x1d8] sm:$0xff] %vm10848_vm0, %v13292_v52  ;;  %v13296_v39 = vpop.eup %13295  ;;  %10906 = vst.msk [vmem:[%s17794_s23 + $0x1c8] sm:$0xff] %vm10848_vm0, %v13294_v20 }
 0xd93   : > { %11229 = vst.msk [vmem:[%s17794_s23 + $0x1d8] sm:$0xff] %vm11169_vm1, %v11096_v13  ;;  %v13298_v35 = vpop.eup %13297  ;;  %11227 = vst.msk [vmem:[%s17794_s23 + $0x1c8] sm:$0xff] %vm11169_vm1, %v11092_v22  ;;  %v10718_v2 = vadd.f32 1.0, %v13296_v39 }
 0xd94   : > { %v13300_v16 = vpop.eup %13299  ;;  %v10716_v63 = vadd.f32 1.0, %v13298_v35 }
 0xd95   : > { %v13302_v50 = vpop.eup %13301  ;;  %13303 = vrcp.f32 %v10718_v2  ;;  %v10719_v38 = vadd.f32 1.0, %v13300_v16 }
 0xd96   : > { %13305 = vrcp.f32 %v10716_v63  ;;  %v10717_v26 = vadd.f32 1.0, %v13302_v50 }
 0xd97   : > { %13307 = vrcp.f32 %v10719_v38 }
 0xd98   : > { %13309 = vrcp.f32 %v10717_v26 }
 0xd9f   : > { %v13304_v32 = vpop.eup %13303 }
 0xda0   : > { %v13306_v18 = vpop.eup %13305  ;;  %10911 = vst.msk [vmem:[%s17794_s23 + $0x1f0] sm:$0xff] %vm10848_vm0, %v13304_v32 }
 0xda1   : > { %v13308_v49 = vpop.eup %13307  ;;  %11232 = vst.msk [vmem:[%s17794_s23 + $0x1f0] sm:$0xff] %vm11169_vm1, %v11102_v12 }
 0xda2   : > { %10909 = vst.msk [vmem:[%s17794_s23 + $0x1e0] sm:$0xff] %vm10848_vm0, %v13306_v18  ;;  %v13310_v7 = vpop.eup %13309  ;;  %10912 = vst.msk [vmem:[%s17794_s23 + $0x1f8] sm:$0xff] %vm10848_vm0, %v13308_v49 }
 0xda3   : > { %11230 = vst.msk [vmem:[%s17794_s23 + $0x1e0] sm:$0xff] %vm11169_vm1, %v11098_v10  ;;  %11233 = vst.msk [vmem:[%s17794_s23 + $0x1f8] sm:$0xff] %vm11169_vm1, %v11104_v34 }
 0xda4   : > { %10910 = vst.msk [vmem:[%s17794_s23 + $0x1e8] sm:$0xff] %vm10848_vm0, %v13310_v7 }
 0xda5   : > { %11231 = vst.msk [vmem:[%s17794_s23 + $0x1e8] sm:$0xff] %vm11169_vm1, %v11100_v57 }
 0xda6 PF: > { %p44_p11 = scmp.ge.s32.totalorder %s14279_s7, 4   ;;  %s18493_s29 = smov %s13794_s2 }
 0xda7   : > { %s18494_s2 = smov %s13798_s6  ;;  %s18495_s6 = smov %s14290_s12 }
 0xda8   : > { %s18496_s30 = smov %s14279_s7  ;;  %46 = sbr.rel (!%p44_p11) target bundleno = 32 (0x20), region = 225 }
 0xdaf   :  { %11256 = vsyncpa [#allocation3], 1 }
 0xdb0   :  { %11258 = vsyncpa [#allocation3 + $0x1], 1 }
 0xdb1   :  { %11259 = vsyncpa [#allocation5], 1 }
 0xdb2   :  { %11261 = vsyncpa [#allocation5 + $0x1], 1 }
 0xdb3   :  { %11262 = vsyncpa [#allocation8], 1 }
 0xdb4   :  { %11263 = vsyncpa [#allocation11], 1 }
 0xdb5   :  { %11264 = vsyncpa [#allocation14], 1 }
 0xdb6   :  { %11265 = vsyncpa [#allocation17], 1 }
 0xdb7   :  { %11266 = vsyncpa [#allocation20], 1 }
 0xdb8   :  { %11267 = vsyncpa [#allocation23], 1 }

</bundles_post_ra>
